<compile_context>
chip_gen: v7x
topology: tpu7x:2x2x1
jax: 0.10.0
libtpu: 0.0.40
codegen_flags: <defaults>
</compile_context>

<pallas_src>
import jax
import jax.numpy as jnp
import numpy as np
from jax import lax
from jax.experimental import pallas as pl
from jax.experimental.pallas import tpu as pltpu

_K = 5  # conv kernel size fixed by the module spec (kernel_size=(5, 5))


# ----------------------------------------------------------------------------
# Wrapper-side weight repacking (runs once in XLA, outside the kernel)
# ----------------------------------------------------------------------------
def _banded_conv_weight(w, w_pad, w_out):
  """(Cout, Cin, K, K) conv weight -> (K, w_pad*Cin, w_out*Cout) banded matrix.

  Block ky multiplies padded input row (i + ky); within a block the row index
  is (jj, cin) over padded columns and the column index is (j, cout) over
  output columns, with entry w[cout, cin, ky, jj - j] when 0 <= jj - j < K.
  """
  c_out, c_in, k, _ = w.shape
  w_l = jnp.transpose(w, (2, 3, 1, 0))  # (ky, kx, cin, cout)
  sel = (jnp.arange(w_pad)[:, None, None]
         == jnp.arange(w_out)[None, :, None] + jnp.arange(k)[None, None, :])
  sel = sel.astype(w_l.dtype)  # (w_pad, w_out, K) -> [jj, j, kx]
  big = jnp.einsum('PJX,YXCO->YPCJO', sel, w_l)  # (K, w_pad, Cin, w_out, Cout)
  return big.reshape(k, w_pad * c_in, w_out * c_out)


def _pool_width_select(w_in, c, w_pad_next):
  """0/1 matrices folding the maxpool width pass + conv2 zero padding.

  xpad2_row = h @ S_h + m @ S_m, where h is a (w_in*c)-lane row of the
  row-pooled map (lane = col*c + channel) and m[l] = max(h[l], h[l + c]).
  Output lanes are (jj, channel) over the next conv's zero-padded width.
  """
  w_q = w_in // 2 + 1
  assert w_pad_next == w_q + 2
  s_h = np.zeros((w_in * c, w_pad_next * c), np.float32)
  s_m = np.zeros(((w_in - 1) * c, w_pad_next * c), np.float32)
  for cc in range(c):
    s_h[cc, 1 * c + cc] = 1.0                        # pool col 0    <- col 0
    s_h[(w_in - 1) * c + cc, w_q * c + cc] = 1.0     # last pool col <- last col
  for jo in range(1, w_q - 1):
    for cc in range(c):
      s_m[(2 * jo - 1) * c + cc, (jo + 1) * c + cc] = 1.0
  return s_h, s_m


def _fold_fc1(fc1_w, c2, h_q, w_q, w_out2):
  """Fold pool2 width pass + PyTorch NCHW flatten into per-row fc1 weights.

  fc1(flatten(pool2)) == sum_i h2[:, i, :] @ Gh[i] + m2[:, i, :] @ Gm[i],
  where h2 is the row-pooled conv2 output (lane = col*c2 + channel) and
  m2[l] = max(h2[l], h2[l + c2]).
  """
  nh = fc1_w.shape[0]
  w_r = fc1_w.reshape(nh, c2, h_q, w_q)
  w_perm = jnp.transpose(w_r, (2, 3, 1, 0))  # (i, jo, c, nh)
  gh = jnp.zeros((h_q, w_out2 * c2, nh), fc1_w.dtype)
  gh = gh.at[:, 0:c2, :].set(w_perm[:, 0])
  gh = gh.at[:, (w_out2 - 1) * c2:w_out2 * c2, :].set(w_perm[:, w_q - 1])
  gm = jnp.zeros((h_q, (w_out2 - 1) * c2, nh), fc1_w.dtype)
  for jo in range(1, w_q - 1):
    gm = gm.at[:, (2 * jo - 1) * c2:2 * jo * c2, :].set(w_perm[:, jo])
  return gh, gm


def _pick_batch_block(n):
  for bb in (16, 8, 4, 2):
    if n % bb == 0 and n // bb >= 2:
      return bb
  return 1


# ----------------------------------------------------------------------------
# Fused forward pass
# ----------------------------------------------------------------------------
@jax.jit
def cnn_forward_pallas(x_nchw, conv1_w, conv2_w, fc1_w, fc2_w):
  n, c_in, h, w = x_nchw.shape
  c1 = conv1_w.shape[0]
  c2 = conv2_w.shape[0]
  nh = fc1_w.shape[0]
  ncls = fc2_w.shape[0]

  # Spatial sizes: conv (k=5, pad=1) then pool (k=2, s=2, pad=1), twice.
  hp1, wp1 = h + 2, w + 2
  ho1, wo1 = h - 2, w - 2
  assert ho1 % 2 == 0 and wo1 % 2 == 0
  hq1, wq1 = ho1 // 2 + 1, wo1 // 2 + 1
  hp2, wp2 = hq1 + 2, wq1 + 2
  ho2, wo2 = hq1 - 2, wq1 - 2
  assert ho2 % 2 == 0 and wo2 % 2 == 0
  hq2, wq2 = ho2 // 2 + 1, wo2 // 2 + 1
  assert fc1_w.shape[1] == c2 * hq2 * wq2, "input size inconsistent with fc1"

  l1 = wo1 * c1           # conv1 output lanes (col, cout)
  l1m = (wo1 - 1) * c1
  lx2 = wp2 * c1          # conv2 padded-input lanes (col, cin)
  l2 = wo2 * c2           # conv2 output lanes
  l2m = (wo2 - 1) * c2
  lout = ((ncls + 127) // 128) * 128   # lane-dense output width

  bb = _pick_batch_block(n)            # batch block per grid step
  g = n // bb

  bf16 = jnp.bfloat16

  # --- input: NCHW -> zero-padded, lane-flattened (N, H+2, (W+2)*Cin) bf16
  x_l = jnp.transpose(x_nchw, (0, 2, 3, 1))
  x_l = jnp.pad(x_l, ((0, 0), (1, 1), (1, 1), (0, 0)))
  x_l = x_l.reshape(n, hp1, wp1 * c_in).astype(bf16)

  # --- weights repacked once
  w1b = _banded_conv_weight(conv1_w, wp1, wo1).astype(bf16)   # (5, wp1*cin, l1)
  w2b = _banded_conv_weight(conv2_w, wp2, wo2).astype(bf16)   # (5, lx2, l2)
  s_h_np, s_m_np = _pool_width_select(wo1, c1, wp2)
  s_h = jnp.asarray(s_h_np, bf16)                             # (l1,  lx2)
  s_m = jnp.asarray(s_m_np, bf16)                             # (l1m, lx2)
  gh, gm = _fold_fc1(fc1_w, c2, hq2, wq2, wo2)
  gh = gh.astype(bf16)                                        # (hq2, l2,  nh)
  gm = gm.astype(bf16)                                        # (hq2, l2m, nh)
  wfc2p = jnp.zeros((nh, lout), fc2_w.dtype).at[:, :ncls].set(fc2_w.T)
  wfc2p = wfc2p.astype(bf16)

  def kernel(x_ref, w1_ref, sh_ref, sm_ref, w2_ref, gh_ref, gm_ref, wf2_ref,
             out_ref, h1_ref, xp2_ref, h2_ref):
    f32 = jnp.float32

    # ---- conv1: 5 wide MXU matmuls (one per kernel row) + ReLU --------------
    acc1 = jnp.dot(x_ref[:, 0:ho1, :].reshape(bb * ho1, wp1 * c_in),
                   w1_ref[0], preferred_element_type=f32)
    for ky in range(1, _K):
      acc1 = acc1 + jnp.dot(
          x_ref[:, ky:ky + ho1, :].reshape(bb * ho1, wp1 * c_in),
          w1_ref[ky], preferred_element_type=f32)
    y1 = jnp.maximum(acc1, 0.0).reshape(bb, ho1, l1)

    # ---- maxpool1 row pass: in-register pair max ----------------------------
    pair1 = y1[:, 1:ho1 - 1, :].reshape(bb, hq1 - 2, 2, l1)
    h1_ref[:, 0:1, :] = y1[:, 0:1, :]
    h1_ref[:, 1:hq1 - 1, :] = jnp.max(pair1, axis=2)
    h1_ref[:, hq1 - 1:hq1, :] = y1[:, ho1 - 1:ho1, :]
    h1 = h1_ref[...]

    # ---- maxpool1 column pass + conv2 zero padding via selection matmuls ----
    m1 = jnp.maximum(h1[:, :, :l1m], h1[:, :, c1:])
    xi = (jnp.dot(h1.astype(bf16).reshape(bb * hq1, l1), sh_ref[...],
                  preferred_element_type=f32)
          + jnp.dot(m1.astype(bf16).reshape(bb * hq1, l1m), sm_ref[...],
                    preferred_element_type=f32))
    xp2_ref[:, 0:1, :] = jnp.zeros((bb, 1, lx2), bf16)          # top pad row
    xp2_ref[:, hp2 - 1:hp2, :] = jnp.zeros((bb, 1, lx2), bf16)  # bottom pad row
    xp2_ref[:, 1:hp2 - 1, :] = xi.reshape(bb, hq1, lx2).astype(bf16)

    # ---- conv2: 5 wide MXU matmuls + ReLU -----------------------------------
    acc2 = jnp.dot(xp2_ref[:, 0:ho2, :].reshape(bb * ho2, lx2),
                   w2_ref[0], preferred_element_type=f32)
    for ky in range(1, _K):
      acc2 = acc2 + jnp.dot(
          xp2_ref[:, ky:ky + ho2, :].reshape(bb * ho2, lx2),
          w2_ref[ky], preferred_element_type=f32)
    y2 = jnp.maximum(acc2, 0.0).reshape(bb, ho2, l2)

    # ---- maxpool2 row pass ---------------------------------------------------
    pair2 = y2[:, 1:ho2 - 1, :].reshape(bb, hq2 - 2, 2, l2)
    h2_ref[:, 0:1, :] = y2[:, 0:1, :]
    h2_ref[:, 1:hq2 - 1, :] = jnp.max(pair2, axis=2)
    h2_ref[:, hq2 - 1:hq2, :] = y2[:, ho2 - 1:ho2, :]
    h2 = h2_ref[...]

    # ---- maxpool2 column pass + NCHW flatten + fc1 (folded into Gh/Gm) ------
    m2 = jnp.maximum(h2[:, :, :l2m], h2[:, :, c2:])
    h2b = h2.astype(bf16)
    m2b = m2.astype(bf16)
    accf = jnp.dot(h2b[:, 0, :], gh_ref[0], preferred_element_type=f32)
    accf = accf + jnp.dot(m2b[:, 0, :], gm_ref[0], preferred_element_type=f32)
    for i in range(1, hq2):
      accf = accf + jnp.dot(h2b[:, i, :], gh_ref[i], preferred_element_type=f32)
      accf = accf + jnp.dot(m2b[:, i, :], gm_ref[i], preferred_element_type=f32)
    hfc = jnp.maximum(accf, 0.0).astype(bf16)

    # ---- fc2 (lane-padded -> dense store) ------------------------------------
    out_ref[0] = jnp.dot(hfc, wf2_ref[...], preferred_element_type=f32)

  flops = 2 * n * (ho1 * wo1 * _K * _K * c_in * c1
                   + ho2 * wo2 * _K * _K * c1 * c2
                   + hq2 * wq2 * c2 * nh + nh * ncls)
  bytes_accessed = (2 * x_l.size + 4 * n * lout
                    + 2 * (w1b.size + w2b.size + s_h.size + s_m.size
                           + gh.size + gm.size + wfc2p.size))

  out3 = pl.pallas_call(
      kernel,
      out_shape=jax.ShapeDtypeStruct((g, bb, lout), jnp.float32),
      grid=(g,),
      in_specs=[
          pl.BlockSpec((bb, hp1, wp1 * c_in), lambda i: (i, 0, 0)),
          pl.BlockSpec(w1b.shape, lambda i: (0, 0, 0)),
          pl.BlockSpec(s_h.shape, lambda i: (0, 0)),
          pl.BlockSpec(s_m.shape, lambda i: (0, 0)),
          pl.BlockSpec(w2b.shape, lambda i: (0, 0, 0)),
          pl.BlockSpec(gh.shape, lambda i: (0, 0, 0)),
          pl.BlockSpec(gm.shape, lambda i: (0, 0, 0)),
          pl.BlockSpec(wfc2p.shape, lambda i: (0, 0)),
      ],
      out_specs=pl.BlockSpec((1, bb, lout), lambda i: (i, 0, 0)),
      scratch_shapes=[
          pltpu.VMEM((bb, hq1, l1), jnp.float32),   # h1: row-pooled conv1 map
          pltpu.VMEM((bb, hp2, lx2), bf16),         # xp2: zero-padded conv2 in
          pltpu.VMEM((bb, hq2, l2), jnp.float32),   # h2: row-pooled conv2 map
      ],
      compiler_params=pltpu.CompilerParams(
          dimension_semantics=("parallel",),
          vmem_limit_bytes=32 * 1024 * 1024),
      cost_estimate=pl.CostEstimate(flops=flops, transcendentals=0,
                                    bytes_accessed=bytes_accessed),
  )(x_l, w1b, s_h, s_m, w2b, gh, gm, wfc2p)

  return out3.reshape(n, lout)[:, :ncls]


# ----------------------------------------------------------------------------
# Pure-JAX f32 reference (mirrors the PyTorch forward) for the self-check
# ----------------------------------------------------------------------------
def cnn_forward_ref(x, conv1_w, conv2_w, fc1_w, fc2_w):
  dn = ('NCHW', 'OIHW', 'NCHW')
  hi = lax.Precision.HIGHEST
  y = lax.conv_general_dilated(x, conv1_w, (1, 1), [(1, 1), (1, 1)],
                               dimension_numbers=dn, precision=hi)
  y = jnp.maximum(y, 0.0)
  y = lax.reduce_window(y, -jnp.inf, lax.max, (1, 1, 2, 2), (1, 1, 2, 2),
                        ((0, 0), (0, 0), (1, 1), (1, 1)))
  y = lax.conv_general_dilated(y, conv2_w, (1, 1), [(1, 1), (1, 1)],
                               dimension_numbers=dn, precision=hi)
  y = jnp.maximum(y, 0.0)
  y = lax.reduce_window(y, -jnp.inf, lax.max, (1, 1, 2, 2), (1, 1, 2, 2),
                        ((0, 0), (0, 0), (1, 1), (1, 1)))
  y = y.reshape(y.shape[0], -1)
  y = jnp.maximum(jnp.dot(y, fc1_w.T, precision=hi), 0.0)
  return jnp.dot(y, fc2_w.T, precision=hi)


# ----------------------------------------------------------------------------
if __name__ == "__main__":
  # fc1 expects hidden_channels*2*(7*7) features, which with 5x5/pad-1 convs and
  # 2x2/stride-2/pad-1 pools implies 28x28 spatial inputs.
  in_channels, hidden_channels = 4, 8
  num_hiddens, num_classes = 32, 10
  N, H, W = 8, 28, 28

  key = jax.random.PRNGKey(0)
  ks = jax.random.split(key, 5)

  def _uniform(k, shape, fan_in):
    b = 1.0 / float(fan_in) ** 0.5
    return jax.random.uniform(k, shape, jnp.float32, -b, b)

  x = jax.random.normal(ks[0], (N, in_channels, H, W), jnp.float32)
  conv1_w = _uniform(ks[1], (hidden_channels, in_channels, 5, 5),
                     in_channels * 25)
  conv2_w = _uniform(ks[2], (hidden_channels * 2, hidden_channels, 5, 5),
                     hidden_channels * 25)
  fc1_w = _uniform(ks[3], (num_hiddens, hidden_channels * 2 * 7 * 7),
                   hidden_channels * 2 * 7 * 7)
  fc2_w = _uniform(ks[4], (num_classes, num_hiddens), num_hiddens)

  out = jax.block_until_ready(
      cnn_forward_pallas(x, conv1_w, conv2_w, fc1_w, fc2_w))
  assert out.shape == (N, num_classes)

  ref = jax.block_until_ready(
      cnn_forward_ref(x, conv1_w, conv2_w, fc1_w, fc2_w))
  max_diff = float(jnp.max(jnp.abs(out - ref)))
  # bf16 MXU operands with f32 accumulation: allow modest tolerance vs f32 ref.
  tol = 3e-2 * (float(jnp.max(jnp.abs(ref))) + 1.0)
  assert max_diff < tol, f"mismatch vs reference: max_diff={max_diff} tol={tol}"

  print("KERNEL_OK")
</pallas_src>

<mosaic_0001>
module attributes {stable_mosaic.version = 11 : i64} {
  func.func @kernel(%arg0: i32, %arg1: memref<4x30x120xbf16, #tpu.memory_space<vmem>>, %arg2: memref<5x120x208xbf16, #tpu.memory_space<vmem>>, %arg3: memref<208x128xbf16, #tpu.memory_space<vmem>>, %arg4: memref<200x128xbf16, #tpu.memory_space<vmem>>, %arg5: memref<5x128x192xbf16, #tpu.memory_space<vmem>>, %arg6: memref<7x192x32xbf16, #tpu.memory_space<vmem>>, %arg7: memref<7x176x32xbf16, #tpu.memory_space<vmem>>, %arg8: memref<32x128xbf16, #tpu.memory_space<vmem>>, %arg9: memref<1x4x128xf32, #tpu.memory_space<vmem>>, %arg10: memref<4x14x208xf32, #tpu.memory_space<vmem>>, %arg11: memref<4x16x128xbf16, #tpu.memory_space<vmem>>, %arg12: memref<4x7x192xf32, #tpu.memory_space<vmem>>) attributes {dimension_semantics = [#tpu.dimension_semantics<parallel>], iteration_bounds = array<i64: 2>, scalar_prefetch = 0 : i64, scratch_operands = 3 : i64, tpu.core_type = #tpu.core_type<tc>, window_params = [{transform_indices = @transform_0, window_bounds = array<i64: 4, 30, 120>}, {pipeline_mode = #tpu.pipeline_mode<synchronous>, transform_indices = @transform_1, window_bounds = array<i64: 5, 120, 208>}, {pipeline_mode = #tpu.pipeline_mode<synchronous>, transform_indices = @transform_2, window_bounds = array<i64: 208, 128>}, {pipeline_mode = #tpu.pipeline_mode<synchronous>, transform_indices = @transform_3, window_bounds = array<i64: 200, 128>}, {pipeline_mode = #tpu.pipeline_mode<synchronous>, transform_indices = @transform_4, window_bounds = array<i64: 5, 128, 192>}, {pipeline_mode = #tpu.pipeline_mode<synchronous>, transform_indices = @transform_5, window_bounds = array<i64: 7, 192, 32>}, {pipeline_mode = #tpu.pipeline_mode<synchronous>, transform_indices = @transform_6, window_bounds = array<i64: 7, 176, 32>}, {pipeline_mode = #tpu.pipeline_mode<synchronous>, transform_indices = @transform_7, window_bounds = array<i64: 32, 128>}, {transform_indices = @transform_8, window_bounds = array<i64: 1, 4, 128>}]} {
    %c0 = arith.constant 0 : index
    %c0_0 = arith.constant 0 : index
    %c0_1 = arith.constant 0 : index
    %0 = vector.load %arg1[%c0, %c0_0, %c0_1] : memref<4x30x120xbf16, #tpu.memory_space<vmem>>, vector<4x26x120xbf16>
    %1 = vector.shape_cast %0 : vector<4x26x120xbf16> to vector<104x120xbf16>
    %c0_2 = arith.constant 0 : index
    %c0_3 = arith.constant 0 : index
    %c0_4 = arith.constant 0 : index
    %2 = vector.load %arg2[%c0_2, %c0_3, %c0_4] : memref<5x120x208xbf16, #tpu.memory_space<vmem>>, vector<1x120x208xbf16>
    %3 = vector.shape_cast %2 : vector<1x120x208xbf16> to vector<120x208xbf16>
    %cst = arith.constant dense<0.000000e+00> : vector<104x208xf32>
    %4 = tpu.matmul %1, %3, %cst {dimension_numbers = #tpu.dot_dimension_numbers<[1], [0], [0], [1], [0, 0, 1, 1], [], []>} : vector<104x120xbf16>, vector<120x208xbf16>, vector<104x208xf32> -> vector<104x208xf32>
    %c0_5 = arith.constant 0 : index
    %c1 = arith.constant 1 : index
    %c0_6 = arith.constant 0 : index
    %5 = vector.load %arg1[%c0_5, %c1, %c0_6] : memref<4x30x120xbf16, #tpu.memory_space<vmem>>, vector<4x26x120xbf16>
    %6 = vector.shape_cast %5 : vector<4x26x120xbf16> to vector<104x120xbf16>
    %c1_7 = arith.constant 1 : index
    %c0_8 = arith.constant 0 : index
    %c0_9 = arith.constant 0 : index
    %7 = vector.load %arg2[%c1_7, %c0_8, %c0_9] : memref<5x120x208xbf16, #tpu.memory_space<vmem>>, vector<1x120x208xbf16>
    %8 = vector.shape_cast %7 : vector<1x120x208xbf16> to vector<120x208xbf16>
    %cst_10 = arith.constant dense<0.000000e+00> : vector<104x208xf32>
    %9 = tpu.matmul %6, %8, %cst_10 {dimension_numbers = #tpu.dot_dimension_numbers<[1], [0], [0], [1], [0, 0, 1, 1], [], []>} : vector<104x120xbf16>, vector<120x208xbf16>, vector<104x208xf32> -> vector<104x208xf32>
    %10 = arith.addf %4, %9 : vector<104x208xf32>
    %c0_11 = arith.constant 0 : index
    %c2 = arith.constant 2 : index
    %c0_12 = arith.constant 0 : index
    %11 = vector.load %arg1[%c0_11, %c2, %c0_12] : memref<4x30x120xbf16, #tpu.memory_space<vmem>>, vector<4x26x120xbf16>
    %12 = vector.shape_cast %11 : vector<4x26x120xbf16> to vector<104x120xbf16>
    %c2_13 = arith.constant 2 : index
    %c0_14 = arith.constant 0 : index
    %c0_15 = arith.constant 0 : index
    %13 = vector.load %arg2[%c2_13, %c0_14, %c0_15] : memref<5x120x208xbf16, #tpu.memory_space<vmem>>, vector<1x120x208xbf16>
    %14 = vector.shape_cast %13 : vector<1x120x208xbf16> to vector<120x208xbf16>
    %cst_16 = arith.constant dense<0.000000e+00> : vector<104x208xf32>
    %15 = tpu.matmul %12, %14, %cst_16 {dimension_numbers = #tpu.dot_dimension_numbers<[1], [0], [0], [1], [0, 0, 1, 1], [], []>} : vector<104x120xbf16>, vector<120x208xbf16>, vector<104x208xf32> -> vector<104x208xf32>
    %16 = arith.addf %10, %15 : vector<104x208xf32>
    %c0_17 = arith.constant 0 : index
    %c3 = arith.constant 3 : index
    %c0_18 = arith.constant 0 : index
    %17 = vector.load %arg1[%c0_17, %c3, %c0_18] : memref<4x30x120xbf16, #tpu.memory_space<vmem>>, vector<4x26x120xbf16>
    %18 = vector.shape_cast %17 : vector<4x26x120xbf16> to vector<104x120xbf16>
    %c3_19 = arith.constant 3 : index
    %c0_20 = arith.constant 0 : index
    %c0_21 = arith.constant 0 : index
    %19 = vector.load %arg2[%c3_19, %c0_20, %c0_21] : memref<5x120x208xbf16, #tpu.memory_space<vmem>>, vector<1x120x208xbf16>
    %20 = vector.shape_cast %19 : vector<1x120x208xbf16> to vector<120x208xbf16>
    %cst_22 = arith.constant dense<0.000000e+00> : vector<104x208xf32>
    %21 = tpu.matmul %18, %20, %cst_22 {dimension_numbers = #tpu.dot_dimension_numbers<[1], [0], [0], [1], [0, 0, 1, 1], [], []>} : vector<104x120xbf16>, vector<120x208xbf16>, vector<104x208xf32> -> vector<104x208xf32>
    %22 = arith.addf %16, %21 : vector<104x208xf32>
    %c0_23 = arith.constant 0 : index
    %c4 = arith.constant 4 : index
    %c0_24 = arith.constant 0 : index
    %23 = vector.load %arg1[%c0_23, %c4, %c0_24] : memref<4x30x120xbf16, #tpu.memory_space<vmem>>, vector<4x26x120xbf16>
    %24 = vector.shape_cast %23 : vector<4x26x120xbf16> to vector<104x120xbf16>
    %c4_25 = arith.constant 4 : index
    %c0_26 = arith.constant 0 : index
    %c0_27 = arith.constant 0 : index
    %25 = vector.load %arg2[%c4_25, %c0_26, %c0_27] : memref<5x120x208xbf16, #tpu.memory_space<vmem>>, vector<1x120x208xbf16>
    %26 = vector.shape_cast %25 : vector<1x120x208xbf16> to vector<120x208xbf16>
    %cst_28 = arith.constant dense<0.000000e+00> : vector<104x208xf32>
    %27 = tpu.matmul %24, %26, %cst_28 {dimension_numbers = #tpu.dot_dimension_numbers<[1], [0], [0], [1], [0, 0, 1, 1], [], []>} : vector<104x120xbf16>, vector<120x208xbf16>, vector<104x208xf32> -> vector<104x208xf32>
    %28 = arith.addf %22, %27 : vector<104x208xf32>
    %cst_29 = arith.constant 0.000000e+00 : f32
    %29 = vector.broadcast %cst_29 : f32 to vector<104x208xf32>
    %30 = arith.maximumf %28, %29 : vector<104x208xf32>
    %31 = vector.shape_cast %30 : vector<104x208xf32> to vector<4x26x208xf32>
    %32 = vector.extract_strided_slice %31 {offsets = [0, 1, 0], sizes = [4, 24, 208], strides = [1, 1, 1]} : vector<4x26x208xf32> to vector<4x24x208xf32>
    %33 = vector.shape_cast %32 : vector<4x24x208xf32> to vector<4x12x2x208xf32>
    %34 = vector.extract_strided_slice %31 {offsets = [0, 0, 0], sizes = [4, 1, 208], strides = [1, 1, 1]} : vector<4x26x208xf32> to vector<4x1x208xf32>
    %c0_30 = arith.constant 0 : index
    %c0_31 = arith.constant 0 : index
    %c0_32 = arith.constant 0 : index
    %35 = vector.load %arg10[%c0_30, %c0_31, %c0_32] : memref<4x14x208xf32, #tpu.memory_space<vmem>>, vector<4x1x208xf32>
    tpu.vector_store %arg10[%c0_30, %c0_31, %c0_32], %34 {strides = array<i32>} : memref<4x14x208xf32, #tpu.memory_space<vmem>>, vector<4x1x208xf32>,
    %cst_33 = arith.constant dense<0xFF800000> : vector<4x12x208xf32>
    %36 = vector.multi_reduction <maximumf>, %33, %cst_33 [2] : vector<4x12x2x208xf32> to vector<4x12x208xf32>
    %c0_34 = arith.constant 0 : index
    %c1_35 = arith.constant 1 : index
    %c0_36 = arith.constant 0 : index
    %37 = vector.load %arg10[%c0_34, %c1_35, %c0_36] : memref<4x14x208xf32, #tpu.memory_space<vmem>>, vector<4x12x208xf32>
    tpu.vector_store %arg10[%c0_34, %c1_35, %c0_36], %36 {strides = array<i32>} : memref<4x14x208xf32, #tpu.memory_space<vmem>>, vector<4x12x208xf32>,
    %38 = vector.extract_strided_slice %31 {offsets = [0, 25, 0], sizes = [4, 1, 208], strides = [1, 1, 1]} : vector<4x26x208xf32> to vector<4x1x208xf32>
    %c0_37 = arith.constant 0 : index
    %c13 = arith.constant 13 : index
    %c0_38 = arith.constant 0 : index
    %39 = vector.load %arg10[%c0_37, %c13, %c0_38] : memref<4x14x208xf32, #tpu.memory_space<vmem>>, vector<4x1x208xf32>
    tpu.vector_store %arg10[%c0_37, %c13, %c0_38], %38 {strides = array<i32>} : memref<4x14x208xf32, #tpu.memory_space<vmem>>, vector<4x1x208xf32>,
    %c0_39 = arith.constant 0 : index
    %c0_40 = arith.constant 0 : index
    %c0_41 = arith.constant 0 : index
    %40 = vector.load %arg10[%c0_39, %c0_40, %c0_41] : memref<4x14x208xf32, #tpu.memory_space<vmem>>, vector<4x14x208xf32>
    %41 = vector.extract_strided_slice %40 {offsets = [0, 0, 0], sizes = [4, 14, 200], strides = [1, 1, 1]} : vector<4x14x208xf32> to vector<4x14x200xf32>
    %42 = vector.extract_strided_slice %40 {offsets = [0, 0, 8], sizes = [4, 14, 200], strides = [1, 1, 1]} : vector<4x14x208xf32> to vector<4x14x200xf32>
    %43 = arith.maximumf %41, %42 : vector<4x14x200xf32>
    %44 = arith.truncf %40 : vector<4x14x208xf32> to vector<4x14x208xbf16>
    %45 = vector.shape_cast %44 : vector<4x14x208xbf16> to vector<56x208xbf16>
    %c0_42 = arith.constant 0 : index
    %c0_43 = arith.constant 0 : index
    %46 = vector.load %arg3[%c0_42, %c0_43] : memref<208x128xbf16, #tpu.memory_space<vmem>>, vector<208x128xbf16>
    %cst_44 = arith.constant dense<0.000000e+00> : vector<56x128xf32>
    %47 = tpu.matmul %45, %46, %cst_44 {dimension_numbers = #tpu.dot_dimension_numbers<[1], [0], [0], [1], [0, 0, 1, 1], [], []>} : vector<56x208xbf16>, vector<208x128xbf16>, vector<56x128xf32> -> vector<56x128xf32>
    %48 = arith.truncf %43 : vector<4x14x200xf32> to vector<4x14x200xbf16>
    %49 = vector.shape_cast %48 : vector<4x14x200xbf16> to vector<56x200xbf16>
    %c0_45 = arith.constant 0 : index
    %c0_46 = arith.constant 0 : index
    %50 = vector.load %arg4[%c0_45, %c0_46] : memref<200x128xbf16, #tpu.memory_space<vmem>>, vector<200x128xbf16>
    %cst_47 = arith.constant dense<0.000000e+00> : vector<56x128xf32>
    %51 = tpu.matmul %49, %50, %cst_47 {dimension_numbers = #tpu.dot_dimension_numbers<[1], [0], [0], [1], [0, 0, 1, 1], [], []>} : vector<56x200xbf16>, vector<200x128xbf16>, vector<56x128xf32> -> vector<56x128xf32>
    %52 = arith.addf %47, %51 : vector<56x128xf32>
    %cst_48 = arith.constant 0.000000e+00 : bf16
    %53 = vector.broadcast %cst_48 : bf16 to vector<4x1x128xbf16>
    %c0_49 = arith.constant 0 : index
    %c0_50 = arith.constant 0 : index
    %c0_51 = arith.constant 0 : index
    %54 = vector.load %arg11[%c0_49, %c0_50, %c0_51] : memref<4x16x128xbf16, #tpu.memory_space<vmem>>, vector<4x1x128xbf16>
    tpu.vector_store %arg11[%c0_49, %c0_50, %c0_51], %53 {strides = array<i32>} : memref<4x16x128xbf16, #tpu.memory_space<vmem>>, vector<4x1x128xbf16>,
    %cst_52 = arith.constant 0.000000e+00 : bf16
    %55 = vector.broadcast %cst_52 : bf16 to vector<4x1x128xbf16>
    %c0_53 = arith.constant 0 : index
    %c15 = arith.constant 15 : index
    %c0_54 = arith.constant 0 : index
    %56 = vector.load %arg11[%c0_53, %c15, %c0_54] : memref<4x16x128xbf16, #tpu.memory_space<vmem>>, vector<4x1x128xbf16>
    tpu.vector_store %arg11[%c0_53, %c15, %c0_54], %55 {strides = array<i32>} : memref<4x16x128xbf16, #tpu.memory_space<vmem>>, vector<4x1x128xbf16>,
    %57 = vector.shape_cast %52 : vector<56x128xf32> to vector<4x14x128xf32>
    %58 = arith.truncf %57 : vector<4x14x128xf32> to vector<4x14x128xbf16>
    %c0_55 = arith.constant 0 : index
    %c1_56 = arith.constant 1 : index
    %c0_57 = arith.constant 0 : index
    %59 = vector.load %arg11[%c0_55, %c1_56, %c0_57] : memref<4x16x128xbf16, #tpu.memory_space<vmem>>, vector<4x14x128xbf16>
    tpu.vector_store %arg11[%c0_55, %c1_56, %c0_57], %58 {strides = array<i32>} : memref<4x16x128xbf16, #tpu.memory_space<vmem>>, vector<4x14x128xbf16>,
    %c0_58 = arith.constant 0 : index
    %c0_59 = arith.constant 0 : index
    %c0_60 = arith.constant 0 : index
    %60 = vector.load %arg11[%c0_58, %c0_59, %c0_60] : memref<4x16x128xbf16, #tpu.memory_space<vmem>>, vector<4x12x128xbf16>
    %61 = vector.shape_cast %60 : vector<4x12x128xbf16> to vector<48x128xbf16>
    %c0_61 = arith.constant 0 : index
    %c0_62 = arith.constant 0 : index
    %c0_63 = arith.constant 0 : index
    %62 = vector.load %arg5[%c0_61, %c0_62, %c0_63] : memref<5x128x192xbf16, #tpu.memory_space<vmem>>, vector<1x128x192xbf16>
    %63 = vector.shape_cast %62 : vector<1x128x192xbf16> to vector<128x192xbf16>
    %cst_64 = arith.constant dense<0.000000e+00> : vector<48x192xf32>
    %64 = tpu.matmul %61, %63, %cst_64 {dimension_numbers = #tpu.dot_dimension_numbers<[1], [0], [0], [1], [0, 0, 1, 1], [], []>} : vector<48x128xbf16>, vector<128x192xbf16>, vector<48x192xf32> -> vector<48x192xf32>
    %c0_65 = arith.constant 0 : index
    %c1_66 = arith.constant 1 : index
    %c0_67 = arith.constant 0 : index
    %65 = vector.load %arg11[%c0_65, %c1_66, %c0_67] : memref<4x16x128xbf16, #tpu.memory_space<vmem>>, vector<4x12x128xbf16>
    %66 = vector.shape_cast %65 : vector<4x12x128xbf16> to vector<48x128xbf16>
    %c1_68 = arith.constant 1 : index
    %c0_69 = arith.constant 0 : index
    %c0_70 = arith.constant 0 : index
    %67 = vector.load %arg5[%c1_68, %c0_69, %c0_70] : memref<5x128x192xbf16, #tpu.memory_space<vmem>>, vector<1x128x192xbf16>
    %68 = vector.shape_cast %67 : vector<1x128x192xbf16> to vector<128x192xbf16>
    %cst_71 = arith.constant dense<0.000000e+00> : vector<48x192xf32>
    %69 = tpu.matmul %66, %68, %cst_71 {dimension_numbers = #tpu.dot_dimension_numbers<[1], [0], [0], [1], [0, 0, 1, 1], [], []>} : vector<48x128xbf16>, vector<128x192xbf16>, vector<48x192xf32> -> vector<48x192xf32>
    %70 = arith.addf %64, %69 : vector<48x192xf32>
    %c0_72 = arith.constant 0 : index
    %c2_73 = arith.constant 2 : index
    %c0_74 = arith.constant 0 : index
    %71 = vector.load %arg11[%c0_72, %c2_73, %c0_74] : memref<4x16x128xbf16, #tpu.memory_space<vmem>>, vector<4x12x128xbf16>
    %72 = vector.shape_cast %71 : vector<4x12x128xbf16> to vector<48x128xbf16>
    %c2_75 = arith.constant 2 : index
    %c0_76 = arith.constant 0 : index
    %c0_77 = arith.constant 0 : index
    %73 = vector.load %arg5[%c2_75, %c0_76, %c0_77] : memref<5x128x192xbf16, #tpu.memory_space<vmem>>, vector<1x128x192xbf16>
    %74 = vector.shape_cast %73 : vector<1x128x192xbf16> to vector<128x192xbf16>
    %cst_78 = arith.constant dense<0.000000e+00> : vector<48x192xf32>
    %75 = tpu.matmul %72, %74, %cst_78 {dimension_numbers = #tpu.dot_dimension_numbers<[1], [0], [0], [1], [0, 0, 1, 1], [], []>} : vector<48x128xbf16>, vector<128x192xbf16>, vector<48x192xf32> -> vector<48x192xf32>
    %76 = arith.addf %70, %75 : vector<48x192xf32>
    %c0_79 = arith.constant 0 : index
    %c3_80 = arith.constant 3 : index
    %c0_81 = arith.constant 0 : index
    %77 = vector.load %arg11[%c0_79, %c3_80, %c0_81] : memref<4x16x128xbf16, #tpu.memory_space<vmem>>, vector<4x12x128xbf16>
    %78 = vector.shape_cast %77 : vector<4x12x128xbf16> to vector<48x128xbf16>
    %c3_82 = arith.constant 3 : index
    %c0_83 = arith.constant 0 : index
    %c0_84 = arith.constant 0 : index
    %79 = vector.load %arg5[%c3_82, %c0_83, %c0_84] : memref<5x128x192xbf16, #tpu.memory_space<vmem>>, vector<1x128x192xbf16>
    %80 = vector.shape_cast %79 : vector<1x128x192xbf16> to vector<128x192xbf16>
    %cst_85 = arith.constant dense<0.000000e+00> : vector<48x192xf32>
    %81 = tpu.matmul %78, %80, %cst_85 {dimension_numbers = #tpu.dot_dimension_numbers<[1], [0], [0], [1], [0, 0, 1, 1], [], []>} : vector<48x128xbf16>, vector<128x192xbf16>, vector<48x192xf32> -> vector<48x192xf32>
    %82 = arith.addf %76, %81 : vector<48x192xf32>
    %c0_86 = arith.constant 0 : index
    %c4_87 = arith.constant 4 : index
    %c0_88 = arith.constant 0 : index
    %83 = vector.load %arg11[%c0_86, %c4_87, %c0_88] : memref<4x16x128xbf16, #tpu.memory_space<vmem>>, vector<4x12x128xbf16>
    %84 = vector.shape_cast %83 : vector<4x12x128xbf16> to vector<48x128xbf16>
    %c4_89 = arith.constant 4 : index
    %c0_90 = arith.constant 0 : index
    %c0_91 = arith.constant 0 : index
    %85 = vector.load %arg5[%c4_89, %c0_90, %c0_91] : memref<5x128x192xbf16, #tpu.memory_space<vmem>>, vector<1x128x192xbf16>
    %86 = vector.shape_cast %85 : vector<1x128x192xbf16> to vector<128x192xbf16>
    %cst_92 = arith.constant dense<0.000000e+00> : vector<48x192xf32>
    %87 = tpu.matmul %84, %86, %cst_92 {dimension_numbers = #tpu.dot_dimension_numbers<[1], [0], [0], [1], [0, 0, 1, 1], [], []>} : vector<48x128xbf16>, vector<128x192xbf16>, vector<48x192xf32> -> vector<48x192xf32>
    %88 = arith.addf %82, %87 : vector<48x192xf32>
    %cst_93 = arith.constant 0.000000e+00 : f32
    %89 = vector.broadcast %cst_93 : f32 to vector<48x192xf32>
    %90 = arith.maximumf %88, %89 : vector<48x192xf32>
    %91 = vector.shape_cast %90 : vector<48x192xf32> to vector<4x12x192xf32>
    %92 = vector.extract_strided_slice %91 {offsets = [0, 1, 0], sizes = [4, 10, 192], strides = [1, 1, 1]} : vector<4x12x192xf32> to vector<4x10x192xf32>
    %93 = vector.shape_cast %92 : vector<4x10x192xf32> to vector<4x5x2x192xf32>
    %94 = vector.extract_strided_slice %91 {offsets = [0, 0, 0], sizes = [4, 1, 192], strides = [1, 1, 1]} : vector<4x12x192xf32> to vector<4x1x192xf32>
    %c0_94 = arith.constant 0 : index
    %c0_95 = arith.constant 0 : index
    %c0_96 = arith.constant 0 : index
    %95 = vector.load %arg12[%c0_94, %c0_95, %c0_96] : memref<4x7x192xf32, #tpu.memory_space<vmem>>, vector<4x1x192xf32>
    tpu.vector_store %arg12[%c0_94, %c0_95, %c0_96], %94 {strides = array<i32>} : memref<4x7x192xf32, #tpu.memory_space<vmem>>, vector<4x1x192xf32>,
    %cst_97 = arith.constant dense<0xFF800000> : vector<4x5x192xf32>
    %96 = vector.multi_reduction <maximumf>, %93, %cst_97 [2] : vector<4x5x2x192xf32> to vector<4x5x192xf32>
    %c0_98 = arith.constant 0 : index
    %c1_99 = arith.constant 1 : index
    %c0_100 = arith.constant 0 : index
    %97 = vector.load %arg12[%c0_98, %c1_99, %c0_100] : memref<4x7x192xf32, #tpu.memory_space<vmem>>, vector<4x5x192xf32>
    tpu.vector_store %arg12[%c0_98, %c1_99, %c0_100], %96 {strides = array<i32>} : memref<4x7x192xf32, #tpu.memory_space<vmem>>, vector<4x5x192xf32>,
    %98 = vector.extract_strided_slice %91 {offsets = [0, 11, 0], sizes = [4, 1, 192], strides = [1, 1, 1]} : vector<4x12x192xf32> to vector<4x1x192xf32>
    %c0_101 = arith.constant 0 : index
    %c6 = arith.constant 6 : index
    %c0_102 = arith.constant 0 : index
    %99 = vector.load %arg12[%c0_101, %c6, %c0_102] : memref<4x7x192xf32, #tpu.memory_space<vmem>>, vector<4x1x192xf32>
    tpu.vector_store %arg12[%c0_101, %c6, %c0_102], %98 {strides = array<i32>} : memref<4x7x192xf32, #tpu.memory_space<vmem>>, vector<4x1x192xf32>,
    %c0_103 = arith.constant 0 : index
    %c0_104 = arith.constant 0 : index
    %c0_105 = arith.constant 0 : index
    %100 = vector.load %arg12[%c0_103, %c0_104, %c0_105] : memref<4x7x192xf32, #tpu.memory_space<vmem>>, vector<4x7x192xf32>
    %101 = vector.extract_strided_slice %100 {offsets = [0, 0, 0], sizes = [4, 7, 176], strides = [1, 1, 1]} : vector<4x7x192xf32> to vector<4x7x176xf32>
    %102 = vector.extract_strided_slice %100 {offsets = [0, 0, 16], sizes = [4, 7, 176], strides = [1, 1, 1]} : vector<4x7x192xf32> to vector<4x7x176xf32>
    %103 = arith.maximumf %101, %102 : vector<4x7x176xf32>
    %104 = arith.truncf %100 : vector<4x7x192xf32> to vector<4x7x192xbf16>
    %105 = arith.truncf %103 : vector<4x7x176xf32> to vector<4x7x176xbf16>
    %106 = vector.extract_strided_slice %104 {offsets = [0, 0, 0], sizes = [4, 1, 192], strides = [1, 1, 1]} : vector<4x7x192xbf16> to vector<4x1x192xbf16>
    %107 = vector.shape_cast %106 : vector<4x1x192xbf16> to vector<4x192xbf16>
    %c0_106 = arith.constant 0 : index
    %c0_107 = arith.constant 0 : index
    %c0_108 = arith.constant 0 : index
    %108 = vector.load %arg6[%c0_106, %c0_107, %c0_108] : memref<7x192x32xbf16, #tpu.memory_space<vmem>>, vector<1x192x32xbf16>
    %109 = vector.shape_cast %108 : vector<1x192x32xbf16> to vector<192x32xbf16>
    %cst_109 = arith.constant dense<0.000000e+00> : vector<4x32xf32>
    %110 = tpu.matmul %107, %109, %cst_109 {dimension_numbers = #tpu.dot_dimension_numbers<[1], [0], [0], [1], [0, 0, 1, 1], [], []>} : vector<4x192xbf16>, vector<192x32xbf16>, vector<4x32xf32> -> vector<4x32xf32>
    %111 = vector.extract_strided_slice %105 {offsets = [0, 0, 0], sizes = [4, 1, 176], strides = [1, 1, 1]} : vector<4x7x176xbf16> to vector<4x1x176xbf16>
    %112 = vector.shape_cast %111 : vector<4x1x176xbf16> to vector<4x176xbf16>
    %c0_110 = arith.constant 0 : index
    %c0_111 = arith.constant 0 : index
    %c0_112 = arith.constant 0 : index
    %113 = vector.load %arg7[%c0_110, %c0_111, %c0_112] : memref<7x176x32xbf16, #tpu.memory_space<vmem>>, vector<1x176x32xbf16>
    %114 = vector.shape_cast %113 : vector<1x176x32xbf16> to vector<176x32xbf16>
    %cst_113 = arith.constant dense<0.000000e+00> : vector<4x32xf32>
    %115 = tpu.matmul %112, %114, %cst_113 {dimension_numbers = #tpu.dot_dimension_numbers<[1], [0], [0], [1], [0, 0, 1, 1], [], []>} : vector<4x176xbf16>, vector<176x32xbf16>, vector<4x32xf32> -> vector<4x32xf32>
    %116 = arith.addf %110, %115 : vector<4x32xf32>
    %117 = vector.extract_strided_slice %104 {offsets = [0, 1, 0], sizes = [4, 1, 192], strides = [1, 1, 1]} : vector<4x7x192xbf16> to vector<4x1x192xbf16>
    %118 = vector.shape_cast %117 : vector<4x1x192xbf16> to vector<4x192xbf16>
    %c1_114 = arith.constant 1 : index
    %c0_115 = arith.constant 0 : index
    %c0_116 = arith.constant 0 : index
    %119 = vector.load %arg6[%c1_114, %c0_115, %c0_116] : memref<7x192x32xbf16, #tpu.memory_space<vmem>>, vector<1x192x32xbf16>
    %120 = vector.shape_cast %119 : vector<1x192x32xbf16> to vector<192x32xbf16>
    %cst_117 = arith.constant dense<0.000000e+00> : vector<4x32xf32>
    %121 = tpu.matmul %118, %120, %cst_117 {dimension_numbers = #tpu.dot_dimension_numbers<[1], [0], [0], [1], [0, 0, 1, 1], [], []>} : vector<4x192xbf16>, vector<192x32xbf16>, vector<4x32xf32> -> vector<4x32xf32>
    %122 = arith.addf %116, %121 : vector<4x32xf32>
    %123 = vector.extract_strided_slice %105 {offsets = [0, 1, 0], sizes = [4, 1, 176], strides = [1, 1, 1]} : vector<4x7x176xbf16> to vector<4x1x176xbf16>
    %124 = vector.shape_cast %123 : vector<4x1x176xbf16> to vector<4x176xbf16>
    %c1_118 = arith.constant 1 : index
    %c0_119 = arith.constant 0 : index
    %c0_120 = arith.constant 0 : index
    %125 = vector.load %arg7[%c1_118, %c0_119, %c0_120] : memref<7x176x32xbf16, #tpu.memory_space<vmem>>, vector<1x176x32xbf16>
    %126 = vector.shape_cast %125 : vector<1x176x32xbf16> to vector<176x32xbf16>
    %cst_121 = arith.constant dense<0.000000e+00> : vector<4x32xf32>
    %127 = tpu.matmul %124, %126, %cst_121 {dimension_numbers = #tpu.dot_dimension_numbers<[1], [0], [0], [1], [0, 0, 1, 1], [], []>} : vector<4x176xbf16>, vector<176x32xbf16>, vector<4x32xf32> -> vector<4x32xf32>
    %128 = arith.addf %122, %127 : vector<4x32xf32>
    %129 = vector.extract_strided_slice %104 {offsets = [0, 2, 0], sizes = [4, 1, 192], strides = [1, 1, 1]} : vector<4x7x192xbf16> to vector<4x1x192xbf16>
    %130 = vector.shape_cast %129 : vector<4x1x192xbf16> to vector<4x192xbf16>
    %c2_122 = arith.constant 2 : index
    %c0_123 = arith.constant 0 : index
    %c0_124 = arith.constant 0 : index
    %131 = vector.load %arg6[%c2_122, %c0_123, %c0_124] : memref<7x192x32xbf16, #tpu.memory_space<vmem>>, vector<1x192x32xbf16>
    %132 = vector.shape_cast %131 : vector<1x192x32xbf16> to vector<192x32xbf16>
    %cst_125 = arith.constant dense<0.000000e+00> : vector<4x32xf32>
    %133 = tpu.matmul %130, %132, %cst_125 {dimension_numbers = #tpu.dot_dimension_numbers<[1], [0], [0], [1], [0, 0, 1, 1], [], []>} : vector<4x192xbf16>, vector<192x32xbf16>, vector<4x32xf32> -> vector<4x32xf32>
    %134 = arith.addf %128, %133 : vector<4x32xf32>
    %135 = vector.extract_strided_slice %105 {offsets = [0, 2, 0], sizes = [4, 1, 176], strides = [1, 1, 1]} : vector<4x7x176xbf16> to vector<4x1x176xbf16>
    %136 = vector.shape_cast %135 : vector<4x1x176xbf16> to vector<4x176xbf16>
    %c2_126 = arith.constant 2 : index
    %c0_127 = arith.constant 0 : index
    %c0_128 = arith.constant 0 : index
    %137 = vector.load %arg7[%c2_126, %c0_127, %c0_128] : memref<7x176x32xbf16, #tpu.memory_space<vmem>>, vector<1x176x32xbf16>
    %138 = vector.shape_cast %137 : vector<1x176x32xbf16> to vector<176x32xbf16>
    %cst_129 = arith.constant dense<0.000000e+00> : vector<4x32xf32>
    %139 = tpu.matmul %136, %138, %cst_129 {dimension_numbers = #tpu.dot_dimension_numbers<[1], [0], [0], [1], [0, 0, 1, 1], [], []>} : vector<4x176xbf16>, vector<176x32xbf16>, vector<4x32xf32> -> vector<4x32xf32>
    %140 = arith.addf %134, %139 : vector<4x32xf32>
    %141 = vector.extract_strided_slice %104 {offsets = [0, 3, 0], sizes = [4, 1, 192], strides = [1, 1, 1]} : vector<4x7x192xbf16> to vector<4x1x192xbf16>
    %142 = vector.shape_cast %141 : vector<4x1x192xbf16> to vector<4x192xbf16>
    %c3_130 = arith.constant 3 : index
    %c0_131 = arith.constant 0 : index
    %c0_132 = arith.constant 0 : index
    %143 = vector.load %arg6[%c3_130, %c0_131, %c0_132] : memref<7x192x32xbf16, #tpu.memory_space<vmem>>, vector<1x192x32xbf16>
    %144 = vector.shape_cast %143 : vector<1x192x32xbf16> to vector<192x32xbf16>
    %cst_133 = arith.constant dense<0.000000e+00> : vector<4x32xf32>
    %145 = tpu.matmul %142, %144, %cst_133 {dimension_numbers = #tpu.dot_dimension_numbers<[1], [0], [0], [1], [0, 0, 1, 1], [], []>} : vector<4x192xbf16>, vector<192x32xbf16>, vector<4x32xf32> -> vector<4x32xf32>
    %146 = arith.addf %140, %145 : vector<4x32xf32>
    %147 = vector.extract_strided_slice %105 {offsets = [0, 3, 0], sizes = [4, 1, 176], strides = [1, 1, 1]} : vector<4x7x176xbf16> to vector<4x1x176xbf16>
    %148 = vector.shape_cast %147 : vector<4x1x176xbf16> to vector<4x176xbf16>
    %c3_134 = arith.constant 3 : index
    %c0_135 = arith.constant 0 : index
    %c0_136 = arith.constant 0 : index
    %149 = vector.load %arg7[%c3_134, %c0_135, %c0_136] : memref<7x176x32xbf16, #tpu.memory_space<vmem>>, vector<1x176x32xbf16>
    %150 = vector.shape_cast %149 : vector<1x176x32xbf16> to vector<176x32xbf16>
    %cst_137 = arith.constant dense<0.000000e+00> : vector<4x32xf32>
    %151 = tpu.matmul %148, %150, %cst_137 {dimension_numbers = #tpu.dot_dimension_numbers<[1], [0], [0], [1], [0, 0, 1, 1], [], []>} : vector<4x176xbf16>, vector<176x32xbf16>, vector<4x32xf32> -> vector<4x32xf32>
    %152 = arith.addf %146, %151 : vector<4x32xf32>
    %153 = vector.extract_strided_slice %104 {offsets = [0, 4, 0], sizes = [4, 1, 192], strides = [1, 1, 1]} : vector<4x7x192xbf16> to vector<4x1x192xbf16>
    %154 = vector.shape_cast %153 : vector<4x1x192xbf16> to vector<4x192xbf16>
    %c4_138 = arith.constant 4 : index
    %c0_139 = arith.constant 0 : index
    %c0_140 = arith.constant 0 : index
    %155 = vector.load %arg6[%c4_138, %c0_139, %c0_140] : memref<7x192x32xbf16, #tpu.memory_space<vmem>>, vector<1x192x32xbf16>
    %156 = vector.shape_cast %155 : vector<1x192x32xbf16> to vector<192x32xbf16>
    %cst_141 = arith.constant dense<0.000000e+00> : vector<4x32xf32>
    %157 = tpu.matmul %154, %156, %cst_141 {dimension_numbers = #tpu.dot_dimension_numbers<[1], [0], [0], [1], [0, 0, 1, 1], [], []>} : vector<4x192xbf16>, vector<192x32xbf16>, vector<4x32xf32> -> vector<4x32xf32>
    %158 = arith.addf %152, %157 : vector<4x32xf32>
    %159 = vector.extract_strided_slice %105 {offsets = [0, 4, 0], sizes = [4, 1, 176], strides = [1, 1, 1]} : vector<4x7x176xbf16> to vector<4x1x176xbf16>
    %160 = vector.shape_cast %159 : vector<4x1x176xbf16> to vector<4x176xbf16>
    %c4_142 = arith.constant 4 : index
    %c0_143 = arith.constant 0 : index
    %c0_144 = arith.constant 0 : index
    %161 = vector.load %arg7[%c4_142, %c0_143, %c0_144] : memref<7x176x32xbf16, #tpu.memory_space<vmem>>, vector<1x176x32xbf16>
    %162 = vector.shape_cast %161 : vector<1x176x32xbf16> to vector<176x32xbf16>
    %cst_145 = arith.constant dense<0.000000e+00> : vector<4x32xf32>
    %163 = tpu.matmul %160, %162, %cst_145 {dimension_numbers = #tpu.dot_dimension_numbers<[1], [0], [0], [1], [0, 0, 1, 1], [], []>} : vector<4x176xbf16>, vector<176x32xbf16>, vector<4x32xf32> -> vector<4x32xf32>
    %164 = arith.addf %158, %163 : vector<4x32xf32>
    %165 = vector.extract_strided_slice %104 {offsets = [0, 5, 0], sizes = [4, 1, 192], strides = [1, 1, 1]} : vector<4x7x192xbf16> to vector<4x1x192xbf16>
    %166 = vector.shape_cast %165 : vector<4x1x192xbf16> to vector<4x192xbf16>
    %c5 = arith.constant 5 : index
    %c0_146 = arith.constant 0 : index
    %c0_147 = arith.constant 0 : index
    %167 = vector.load %arg6[%c5, %c0_146, %c0_147] : memref<7x192x32xbf16, #tpu.memory_space<vmem>>, vector<1x192x32xbf16>
    %168 = vector.shape_cast %167 : vector<1x192x32xbf16> to vector<192x32xbf16>
    %cst_148 = arith.constant dense<0.000000e+00> : vector<4x32xf32>
    %169 = tpu.matmul %166, %168, %cst_148 {dimension_numbers = #tpu.dot_dimension_numbers<[1], [0], [0], [1], [0, 0, 1, 1], [], []>} : vector<4x192xbf16>, vector<192x32xbf16>, vector<4x32xf32> -> vector<4x32xf32>
    %170 = arith.addf %164, %169 : vector<4x32xf32>
    %171 = vector.extract_strided_slice %105 {offsets = [0, 5, 0], sizes = [4, 1, 176], strides = [1, 1, 1]} : vector<4x7x176xbf16> to vector<4x1x176xbf16>
    %172 = vector.shape_cast %171 : vector<4x1x176xbf16> to vector<4x176xbf16>
    %c5_149 = arith.constant 5 : index
    %c0_150 = arith.constant 0 : index
    %c0_151 = arith.constant 0 : index
    %173 = vector.load %arg7[%c5_149, %c0_150, %c0_151] : memref<7x176x32xbf16, #tpu.memory_space<vmem>>, vector<1x176x32xbf16>
    %174 = vector.shape_cast %173 : vector<1x176x32xbf16> to vector<176x32xbf16>
    %cst_152 = arith.constant dense<0.000000e+00> : vector<4x32xf32>
    %175 = tpu.matmul %172, %174, %cst_152 {dimension_numbers = #tpu.dot_dimension_numbers<[1], [0], [0], [1], [0, 0, 1, 1], [], []>} : vector<4x176xbf16>, vector<176x32xbf16>, vector<4x32xf32> -> vector<4x32xf32>
    %176 = arith.addf %170, %175 : vector<4x32xf32>
    %177 = vector.extract_strided_slice %104 {offsets = [0, 6, 0], sizes = [4, 1, 192], strides = [1, 1, 1]} : vector<4x7x192xbf16> to vector<4x1x192xbf16>
    %178 = vector.shape_cast %177 : vector<4x1x192xbf16> to vector<4x192xbf16>
    %c6_153 = arith.constant 6 : index
    %c0_154 = arith.constant 0 : index
    %c0_155 = arith.constant 0 : index
    %179 = vector.load %arg6[%c6_153, %c0_154, %c0_155] : memref<7x192x32xbf16, #tpu.memory_space<vmem>>, vector<1x192x32xbf16>
    %180 = vector.shape_cast %179 : vector<1x192x32xbf16> to vector<192x32xbf16>
    %cst_156 = arith.constant dense<0.000000e+00> : vector<4x32xf32>
    %181 = tpu.matmul %178, %180, %cst_156 {dimension_numbers = #tpu.dot_dimension_numbers<[1], [0], [0], [1], [0, 0, 1, 1], [], []>} : vector<4x192xbf16>, vector<192x32xbf16>, vector<4x32xf32> -> vector<4x32xf32>
    %182 = arith.addf %176, %181 : vector<4x32xf32>
    %183 = vector.extract_strided_slice %105 {offsets = [0, 6, 0], sizes = [4, 1, 176], strides = [1, 1, 1]} : vector<4x7x176xbf16> to vector<4x1x176xbf16>
    %184 = vector.shape_cast %183 : vector<4x1x176xbf16> to vector<4x176xbf16>
    %c6_157 = arith.constant 6 : index
    %c0_158 = arith.constant 0 : index
    %c0_159 = arith.constant 0 : index
    %185 = vector.load %arg7[%c6_157, %c0_158, %c0_159] : memref<7x176x32xbf16, #tpu.memory_space<vmem>>, vector<1x176x32xbf16>
    %186 = vector.shape_cast %185 : vector<1x176x32xbf16> to vector<176x32xbf16>
    %cst_160 = arith.constant dense<0.000000e+00> : vector<4x32xf32>
    %187 = tpu.matmul %184, %186, %cst_160 {dimension_numbers = #tpu.dot_dimension_numbers<[1], [0], [0], [1], [0, 0, 1, 1], [], []>} : vector<4x176xbf16>, vector<176x32xbf16>, vector<4x32xf32> -> vector<4x32xf32>
    %188 = arith.addf %182, %187 : vector<4x32xf32>
    %cst_161 = arith.constant 0.000000e+00 : f32
    %189 = vector.broadcast %cst_161 : f32 to vector<4x32xf32>
    %190 = arith.maximumf %188, %189 : vector<4x32xf32>
    %191 = arith.truncf %190 : vector<4x32xf32> to vector<4x32xbf16>
    %c0_162 = arith.constant 0 : index
    %c0_163 = arith.constant 0 : index
    %192 = vector.load %arg8[%c0_162, %c0_163] : memref<32x128xbf16, #tpu.memory_space<vmem>>, vector<32x128xbf16>
    %cst_164 = arith.constant dense<0.000000e+00> : vector<4x128xf32>
    %193 = tpu.matmul %191, %192, %cst_164 {dimension_numbers = #tpu.dot_dimension_numbers<[1], [0], [0], [1], [0, 0, 1, 1], [], []>} : vector<4x32xbf16>, vector<32x128xbf16>, vector<4x128xf32> -> vector<4x128xf32>
    %c0_165 = arith.constant 0 : index
    %c0_166 = arith.constant 0 : index
    %c0_167 = arith.constant 0 : index
    %194 = vector.load %arg9[%c0_165, %c0_166, %c0_167] : memref<1x4x128xf32, #tpu.memory_space<vmem>>, vector<1x4x128xf32>
    %195 = vector.shape_cast %194 : vector<1x4x128xf32> to vector<4x128xf32>
    %196 = vector.shape_cast %193 : vector<4x128xf32> to vector<1x4x128xf32>
    tpu.vector_store %arg9[%c0_165, %c0_166, %c0_167], %196 {strides = array<i32>} : memref<1x4x128xf32, #tpu.memory_space<vmem>>, vector<1x4x128xf32>,
    return
  }
  func.func @transform_0(%arg0: i32) -> (i32, i32, i32) {
    %c0_i32 = arith.constant 0 : i32
    %c0_i32_0 = arith.constant 0 : i32
    %c0_i32_1 = arith.constant 0 : i32
    return %arg0, %c0_i32, %c0_i32_0 : i32, i32, i32
  }
  func.func @transform_1(%arg0: i32) -> (i32, i32, i32) {
    %c0_i32 = arith.constant 0 : i32
    %c0_i32_0 = arith.constant 0 : i32
    %c0_i32_1 = arith.constant 0 : i32
    %c0_i32_2 = arith.constant 0 : i32
    return %c0_i32, %c0_i32_0, %c0_i32_1 : i32, i32, i32
  }
  func.func @transform_2(%arg0: i32) -> (i32, i32) {
    %c0_i32 = arith.constant 0 : i32
    %c0_i32_0 = arith.constant 0 : i32
    %c0_i32_1 = arith.constant 0 : i32
    return %c0_i32, %c0_i32_0 : i32, i32
  }
  func.func @transform_3(%arg0: i32) -> (i32, i32) {
    %c0_i32 = arith.constant 0 : i32
    %c0_i32_0 = arith.constant 0 : i32
    %c0_i32_1 = arith.constant 0 : i32
    return %c0_i32, %c0_i32_0 : i32, i32
  }
  func.func @transform_4(%arg0: i32) -> (i32, i32, i32) {
    %c0_i32 = arith.constant 0 : i32
    %c0_i32_0 = arith.constant 0 : i32
    %c0_i32_1 = arith.constant 0 : i32
    %c0_i32_2 = arith.constant 0 : i32
    return %c0_i32, %c0_i32_0, %c0_i32_1 : i32, i32, i32
  }
  func.func @transform_5(%arg0: i32) -> (i32, i32, i32) {
    %c0_i32 = arith.constant 0 : i32
    %c0_i32_0 = arith.constant 0 : i32
    %c0_i32_1 = arith.constant 0 : i32
    %c0_i32_2 = arith.constant 0 : i32
    return %c0_i32, %c0_i32_0, %c0_i32_1 : i32, i32, i32
  }
  func.func @transform_6(%arg0: i32) -> (i32, i32, i32) {
    %c0_i32 = arith.constant 0 : i32
    %c0_i32_0 = arith.constant 0 : i32
    %c0_i32_1 = arith.constant 0 : i32
    %c0_i32_2 = arith.constant 0 : i32
    return %c0_i32, %c0_i32_0, %c0_i32_1 : i32, i32, i32
  }
  func.func @transform_7(%arg0: i32) -> (i32, i32) {
    %c0_i32 = arith.constant 0 : i32
    %c0_i32_0 = arith.constant 0 : i32
    %c0_i32_1 = arith.constant 0 : i32
    return %c0_i32, %c0_i32_0 : i32, i32
  }
  func.func @transform_8(%arg0: i32) -> (i32, i32, i32) {
    %c0_i32 = arith.constant 0 : i32
    %c0_i32_0 = arith.constant 0 : i32
    %c0_i32_1 = arith.constant 0 : i32
    return %arg0, %c0_i32, %c0_i32_0 : i32, i32, i32
  }
}

</mosaic_0001>

<bundles_post_ra>
// kernel: cnn_forward_pallas.1
= control target key start
LH: loop header
LB: loop body
LE: loop exit
PB: predicated region body
PF: predicated region fallthrough
CT: control target
= control target key end

     0   :  { %13 = vsyncpa [#allocation6], 0  ;;  %s21046_s0 = inlined_call_operand.vmem [shape: bf16[8,30,120], index: 0, kind: input, shape index: {}]   ;;  %s21047_s1 = inlined_call_operand.vmem [shape: bf16[5,120,208], index: 1, kind: input, shape index: {}]   ;;  %s21048_s2 = inlined_call_operand.vmem [shape: bf16[208,128], index: 2, kind: input, shape index: {}]   ;;  %s21049_s3 = inlined_call_operand.vmem [shape: bf16[200,128], index: 3, kind: input, shape index: {}]   ;;  %s21050_s4 = inlined_call_operand.vmem [shape: bf16[5,128,192], index: 4, kind: input, shape index: {}]   ;;  %s21051_s5 = inlined_call_operand.vmem [shape: bf16[7,192,32], index: 5, kind: input, shape index: {}]   ;;  %s21052_s6 = inlined_call_operand.vmem [shape: bf16[7,176,32], index: 6, kind: input, shape index: {}]   ;;  %s21053_s7 = inlined_call_operand.vmem [shape: bf16[32,128], index: 7, kind: input, shape index: {}]   ;;  %s21054_s8 = inlined_call_operand.hbm [shape: f32[2,4,128], index: 8, kind: output, shape index: {}]  }
   0x1   :  { %15 = vsyncpa [#allocation6 + $0x1], 0  ;;  %s16275_s27 = smov 0   ;;  %s16277_s28 = smov 0  }
   0x2   :  { %s16279_s29 = smov 0   ;;  %s16281_s30 = smov 0  }
   0x3 LB: > { %s16296_s9 = sadd.s32 4294967295, %s16220_s30   ;;  %s14331_s10 = sadd.s32 4294967294, %s16220_s30   ;;  %s16220_s30 = sphi %s16281_s30, %s21252_s30   ;;  %s16216_s29 = sphi %s16279_s29, %s21251_s29   ;;  %s16212_s28 = sphi %s16277_s28, %s21250_s28   ;;  %s16208_s27 = sphi %s16275_s27, %s21249_s27  }
   0x4   : > { %s16300_s11 = sadd.s32 1, %s16220_s30   ;;  %s201_s12 = sadd.s32 1, %s16216_s29 }
   0x5   : > { %s198_s13 = ssub.s32 %s16220_s30, %s16300_s11  ;;  %p211_p0 = scmp.ne.s32.totalorder %s16216_s29, %s16212_s28 }
   0x6   : > { %p199_p1 = scmp.eq.s32.totalorder %s198_s13, 0  ;;  %p212_p2 = scmp.eq.s32.totalorder %s16296_s9, 1 }
   0x7   : > { %p217_p3 = scmp.ne.s32.totalorder %s16212_s28, %s16208_s27  ;;  %p218_p4 = scmp.eq.s32.totalorder %s14331_s10, 1 }
   0x8   : > { %s16311_s14 = scalar_select %p199_p1, %s16216_s29, %s201_s12  }
   0x9   : > { %p16313_p5 = por %p212_p2, %p211_p0  ;;  %p16317_p6 = por %p218_p4, %p217_p3 }
   0xa   : > { %p14334_p7 = scmp.ge.s32.totalorder %s16220_s30, 1  ;;  %p267_p8 = scmp.lt.s32.totalorder %s16220_s30, 3 }
   0xc   : > { %p268_p9 = pnand %p14334_p7, %p267_p8 }
   0xe   : > { %271 = sbr.rel (%p268_p9) target bundleno = 2655 (0xa5f), region = 52 }
  0x15   : > { %v15713_v0 = vld [vmem:[%s21047_s1 + $0x7c] ss:$8 sps:$4 sm:$0xff]   ;;  %v15715_v1 = vld [vmem:[%s21047_s1 + $0x78] ss:$8 sps:$4 sm:$0xff]   ;;  %v21057_v2 = vmov 0   ;;  %s14336_s21 = sshll.u32 %s16296_s9, 2  ;;  %v21055_v4 = vlaneseq }
  0x16   : > { %1702 = vmatprep.mubr.bf16.mxu0 %v21057_v2  ;;  %9927 = vmatprep.mubr.bf16.mxu1 %v21057_v2  ;;  %v15716_v3 = vld [vmem:[%s21047_s1 + $0x8c] ss:$8 sps:$4 sm:$0xff]   ;;  %p303_p10 = scmp.lt.s32.totalorder %s14336_s21, 7  ;;  %v15718_v5 = vld [vmem:[%s21047_s1 + $0x88] ss:$8 sps:$4 sm:$0xff]   ;;  %vm1663_vm0 = vcmask 1043456  }
  0x17   : > { %1670 = vmatprep.subr.bf16.mxu0 %v15713_v0  ;;  %v15719_v6 = vld [vmem:[%s21047_s1 + $0x9c] ss:$8 sps:$4 sm:$0xff]   ;;  %v16223_v7 = vmov 1966171168   ;;  %v16342_v9 = vshrl.u32 %v21055_v4, 7  ;;  %v16361_v14 = vld [vmem:[%s21047_s1 + $0xe8] sm:$0xff] }
  0x18   : > { %1671 = vmatpush1.bf16.msra.mxu0 %v15715_v1  ;;  %s21254_s21 = smov (!%p303_p10, %s14336_s21), 7  ;;  %v351_v8 = vunpack.c.l.s4 %v16223_v7  ;;  %v15721_v10 = vld [vmem:[%s21047_s1 + $0x98] ss:$8 sps:$4 sm:$0xff]   ;;  %v15722_v11 = vld [vmem:[%s21047_s1 + $0xac] ss:$8 sps:$4 sm:$0xff]   ;;  %v14440_v16 = vcombine.low %v16361_v14, %v16361_v14  ;;  %v14441_v19 = vcombine.high %v16361_v14, %v16361_v14  ;;  %s16225_s24 = smov 120  }
  0x19   : > { %1672 = vmatprep.subr.bf16.mxu0 %v15716_v3  ;;  %s15385_s12 = sshll.u32 %s21254_s21, 4  ;;  %21083 = vst [vmem:[#allocation8_spill] sm:$0xff] %v16342_v9  ;;  %vm797_vm1 = vsmask.f32 256  ;;  %v15724_v13 = vld [vmem:[%s21047_s1 + $0xa8] ss:$8 sps:$4 sm:$0xff]  }
  0x1a   : > { %s16350_s20 = scalar_lea.vmem %s21046_s0, %s15385_s12  ;;  %v352_v12 = vunpack.c.0.s8 %v351_v8  ;;  %vm798_vm2 = vsmask.f32 1284  ;;  %v15725_v15 = vld [vmem:[%s21047_s1 + $0xbc] ss:$8 sps:$4 sm:$0xff]   ;;  %vm21079_vm4 = vsmask.f32 2312 }
  0x1b   : > { %v14339_v17 = vld.sshfl [vmem:[%s16350_s20] sm:$0x33 pattern:$0x75316420]  ;;  %vm799_vm3 = vmor %vm797_vm1, %vm798_vm2  ;;  %vm802_vm6 = vsmask.f32 3340 }
  0x1c   : > { %1673 = vmatpush1.bf16.msra.mxu0 %v15718_v5  ;;  %v16370_v18 = vsub.s32 %v352_v12, %v16342_v9  ;;  %v14340_v20 = vld.sshfl [vmem:[%s16350_s20 + $0x4] sm:$0x33 pattern:$0x75316420]  ;;  %v349_v21 = vcombine.high %v14339_v17, %v14339_v17  ;;  %vm801_vm5 = vmor %vm799_vm3, %vm21079_vm4  ;;  %v16378_v22 = vsel %vm1663_vm0, %v14440_v16, 0  ;;  %vm1641_vm2 = vcmask 982016  }
  0x1d   : > { %1674 = vmatprep.subr.bf16.mxu0 %v15719_v6  ;;  %v16381_v23 = vld.sshfl [vmem:[%s16350_s20 + $0x8] sm:$0x33 pattern:$0x75316420]  ;;  %v373_v25 = vcombine.high %v14340_v20, %v14340_v20  ;;  %vm803_vm7 = vmor %vm801_vm5, %vm802_vm6  ;;  %vm21078_vm8 = vsmask.f32 4368 }
  0x1e   : > { %v16384_v24 = vrot.slane %v14339_v17, %v16370_v18  ;;  %v16387_v26 = vrot.slane %v14340_v20, %v16370_v18  ;;  %v16390_v27 = vrot.slane %v349_v21, %v16370_v18  ;;  %v16394_v28 = vrot.slane %v16381_v23, %v16370_v18  ;;  %v15727_v29 = vld [vmem:[%s21047_s1 + $0xb8] ss:$8 sps:$4 sm:$0xff]   ;;  %vm805_vm10 = vmor %vm803_vm7, %vm21078_vm8  ;;  %v15728_v36 = vld [vmem:[%s21047_s1 + $0xcc] ss:$8 sps:$4 sm:$0xff]   ;;  %s16226_s23 = smov 112   ;;  %s299_s21 = sand.u32 1, %s16212_s28  }
  0x1f   : > { %vm806_vm9 = vsmask.f32 5396  ;;  %v16402_v31 = vrot.slane %v373_v25, %v16370_v18  ;;  %vm21077_vm11 = vsmask.f32 6424  ;;  %vm810_vm13 = vsmask.f32 7452 }
  0x20   : > { %1675 = vmatpush1.bf16.msra.mxu0 %v15721_v10  ;;  %v364_v30 = vcombine.high %v16384_v24, %v16384_v24  ;;  %v388_v32 = vcombine.high %v16387_v26, %v16387_v26  ;;  %v365_v33 = vcombine.high %v16390_v27, %v16390_v27  ;;  %vm807_vm12 = vmor %vm805_vm10, %vm806_vm9  ;;  %v813_v34 = vshrl.u32 %v16384_v24, 16  ;;  %v15730_v46 = vld [vmem:[%s21047_s1 + $0xc8] ss:$8 sps:$4 sm:$0xff]   ;;  %v15731_v56 = vld [vmem:[%s21047_s1 + $0xdc] ss:$8 sps:$4 sm:$0xff]   ;;  %s14335_s22 = sshll.u32 %s299_s21, 2 }
  0x21   : > { %1676 = vmatprep.subr.bf16.mxu0 %v15722_v11  ;;  %v818_v35 = vshll.u32 %v16390_v27, 16  ;;  %v389_v37 = vcombine.high %v16402_v31, %v16402_v31  ;;  %vm809_vm14 = vmor %vm807_vm12, %vm21077_vm11  ;;  %v821_v38 = vshrl.u32 %v16390_v27, 16  ;;  %v842_v44 = vshll.u32 %v16387_v26, 16  ;;  %v15733_v8 = vld [vmem:[%s21047_s1 + $0xd8] ss:$8 sps:$4 sm:$0xff]   ;;  %s301_s25 = scalar_lea.vmem [#allocation5], %s14335_s22 }
  0x22   : > { %v826_v39 = vshll.u32 %v364_v30, 16  ;;  %v829_v40 = vshrl.u32 %v364_v30, 16  ;;  %vm16418_vm15 = vmor %vm809_vm14, %vm810_vm13  ;;  %v834_v42 = vshll.u32 %v365_v33, 16  ;;  %v837_v43 = vshrl.u32 %v365_v33, 16  ;;  %s14272_s26 = sshll.u32 %s301_s25, 4  ;;  %s14259_s12 = scalar_lea.sflag [#allocation6], %s299_s21  ;;  %s21001_s26 = int_to_ptr.vmem [resolvable:$true] %s14272_s26 }
  0x23   : > { %v845_v45 = vshrl.u32 %v16387_v26, 16  ;;  %v820_v47 = vsel %vm16418_vm15, %v813_v34, %v818_v35  ;;  %v850_v49 = vshll.u32 %v16402_v31, 16  ;;  %v853_v50 = vshrl.u32 %v16402_v31, 16  ;;  %s16158_s13 = scalar_lea.vmem %s21001_s26, 64 }
  0x24   : > { %1677 = vmatpush1.bf16.msra.mxu0 %v15724_v13  ;;  %v828_v48 = vsel %vm16418_vm15, %v821_v38, %v826_v39  ;;  %v836_v51 = vsel %vm16418_vm15, %v829_v40, %v834_v42  ;;  %v844_v52 = vsel %vm16418_vm15, %v837_v43, %v842_v44  ;;  %v858_v53 = vshll.u32 %v388_v32, 16  ;;  %v14343_v55 = vld.sshfl [vmem:[%s16350_s20 + $0x10] sm:$0x33 pattern:$0x75316420]  ;;  %p16159_p11 = scmp.ne.s32.totalorder %s21001_s26, %s16158_s13 }
  0x25   : > { %1678 = vmatprep.subr.bf16.mxu0 %v15725_v15  ;;  %v861_v54 = vshrl.u32 %v388_v32, 16  ;;  %v852_v57 = vsel %vm16418_vm15, %v845_v45, %v850_v49  ;;  %v866_v58 = vshll.u32 %v389_v37, 16  ;;  %v869_v59 = vshrl.u32 %v389_v37, 16  ;;  %v15738_v39 = vld [vmem:[%s21047_s1 + $0x4] ss:$8 sps:$4 sm:$0xff]  }
  0x26   : > { %v874_v60 = vshll.u32 %v16394_v28, 16  ;;  %v860_v61 = vsel %vm16418_vm15, %v853_v50, %v858_v53  ;;  %v1248_v62 = vcombine.low %v820_v47, %v828_v48  ;;  %v1249_v63 = vcombine.low %v836_v51, %v844_v52  ;;  %v14355_v1 = vld.sshfl [vmem:[%s16350_s20 + $0xc] sm:$0x11 pattern:$0x75316420]  ;;  %p16160_p12 = pnand %p16159_p11, %p16313_p5 }
  0x27   : > { %v397_v0 = vcombine.high %v16381_v23, %v16381_v23  ;;  %v868_v3 = vsel %vm16418_vm15, %v861_v54, %v866_v58  ;;  %v1250_v6 = vcombine.low %v852_v57, %v860_v61  ;;  %v412_v7 = vcombine.high %v16394_v28, %v16394_v28  ;;  %v14344_v51 = vld.sshfl [vmem:[%s16350_s20 + $0x14] sm:$0x33 pattern:$0x75316420]  ;;  %v15736_v53 = vld [vmem:[%s21047_s1] ss:$8 sps:$4 sm:$0xff]  }
  0x28   : > { %1679 = vmatpush1.bf16.msra.mxu0 %v15727_v29  ;;  %v876_v5 = vsel %vm16418_vm15, %v869_v59, %v874_v60  ;;  %v1258_v11 = vrot.slane %v1248_v62, %v16370_v18  ;;  %v1265_v12 = vrot.slane %v1249_v63, %v16370_v18  ;;  %v435_v16 = vcombine.high %v14343_v55, %v14343_v55  ;;  %v15741_v57 = vld [vmem:[%s21047_s1 + $0x14] ss:$8 sps:$4 sm:$0xff]   ;;  %p16161_p13 = pneg %p16160_p12 }
  0x29   : > { %1680 = vmatprep.subr.bf16.mxu0 %v15728_v36  ;;  %v1251_v10 = vcombine.low %v868_v3, %v876_v5  ;;  %v16461_v13 = vrot.slane %v397_v0, %v16370_v18  ;;  %v1272_v15 = vrot.slane %v1250_v6, %v16370_v18  ;;  %v16465_v17 = vrot.slane %v14343_v55, %v16370_v18  ;;  %v14345_v5 = vld.sshfl [vmem:[%s16350_s20 + $0x18] sm:$0x33 pattern:$0x75316420] }
  0x2a   : > { %v716_v20 = vcombine.high %v14355_v1, %v14355_v1  ;;  %v1280_v23 = vcombine.low %v1258_v11, %v1265_v12  ;;  %v723_v29 = vrot.slane %v14355_v1, %v16370_v18  ;;  %v16472_v30 = vrot.slane %v435_v16, %v16370_v18 }
  0x2b   : > { %v1279_v21 = vrot.slane %v1251_v10, %v16370_v18  ;;  %v413_v25 = vcombine.high %v16461_v13, %v16461_v13  ;;  %v16476_v32 = vcombine.high %v16465_v17, %v16465_v17  ;;  %v877_v34 = vshrl.u32 %v16394_v28, 16 }
  0x2c   : > { %1681 = vmatpush1.bf16.msra.mxu0 %v15730_v46  ;;  %v730_v33 = vrot.slane %v716_v20, %v16370_v18  ;;  %v1288_v36 = vrot.slane %v1280_v23, %v16370_v18  ;;  %v882_v37 = vshll.u32 %v16461_v13, 16  ;;  %v885_v38 = vshrl.u32 %v16461_v13, 16 }
  0x2d   : > { %1682 = vmatprep.subr.bf16.mxu0 %v15731_v56  ;;  %v1281_v35 = vcombine.low %v1272_v15, %v1279_v21  ;;  %v16492_v40 = vcombine.high %v16472_v30, %v16472_v30  ;;  %v890_v42 = vshll.u32 %v412_v7, 16  ;;  %v893_v43 = vshrl.u32 %v412_v7, 16  ;;  %v15744_v21 = vld [vmem:[%s21047_s1 + $0x24] ss:$8 sps:$4 sm:$0xff]  }
  0x2e   : > { %v898_v44 = vshll.u32 %v413_v25, 16  ;;  %v884_v46 = vsel %vm16418_vm15, %v877_v34, %v882_v37  ;;  %v901_v47 = vshrl.u32 %v413_v25, 16  ;;  %v906_v14 = vshll.u32 %v723_v29, 16 }
  0x2f   : > { %v1295_v45 = vrot.slane %v1281_v35, %v16370_v18  ;;  %v909_v49 = vshrl.u32 %v723_v29, 16  ;;  %v914_v50 = vshll.u32 %v730_v33, 16  ;;  %v918_v55 = vshrl.u32 %v16465_v17, 16 }
  0x30   : > { %1683 = vmatpush1.bf16.msra.mxu0 %v15733_v8  ;;  %v900_v48 = vsel %vm16418_vm15, %v893_v43, %v898_v44  ;;  %v908_v54 = vsel %vm16418_vm15, %v901_v47, %v906_v14  ;;  %v923_v56 = vshll.u32 %v16472_v30, 16  ;;  %v926_v58 = vshrl.u32 %v16472_v30, 16  ;;  %v15739_v8 = vld [vmem:[%s21047_s1 + $0x10] ss:$8 sps:$4 sm:$0xff]   ;;  %v15742_v43 = vld [vmem:[%s21047_s1 + $0x20] ss:$8 sps:$4 sm:$0xff]  }
  0x31   : > { %14442 = vmatprep.subr.msk.bf16.mxu0 %vm1663_vm0, %v14441_v19  ;;  %v892_v19 = vsel %vm16418_vm15, %v885_v38, %v890_v42  ;;  %v1296_v52 = vcombine.low %v1288_v36, %v1295_v45  ;;  %v931_v59 = vshll.u32 %v16476_v32, 16  ;;  %v934_v60 = vshrl.u32 %v16476_v32, 16 }
  0x32   : > { %v925_v61 = vsel %vm16418_vm15, %v918_v55, %v923_v56  ;;  %v939_v62 = vshll.u32 %v16492_v40, 16  ;;  %v1297_v63 = vcombine.low %v884_v46, %v892_v19  ;;  %v1298_v0 = vcombine.low %v900_v48, %v908_v54  ;;  %v14347_v54 = vld.sshfl [vmem:[%s16350_s20 + $0x20] sm:$0x33 pattern:$0x75316420] }
  0x33   : > { %v933_v1 = vsel %vm16418_vm15, %v926_v58, %v931_v59  ;;  %v459_v6 = vcombine.high %v14344_v51, %v14344_v51  ;;  %v16526_v7 = vrot.slane %v14344_v51, %v16370_v18  ;;  %v942_v15 = vshrl.u32 %v16492_v40, 16 }
  0x34   : > { %1685 = vmatpush1.bf16.msra.mxu0 %v16378_v22  ;;  %v916_v22 = vsel %vm16418_vm15, %v909_v49, %v914_v50  ;;  %v941_v10 = vsel %vm16418_vm15, %v934_v60, %v939_v62  ;;  %v1307_v11 = vrot.slane %v1297_v63, %v16370_v18  ;;  %v1314_v12 = vrot.slane %v1298_v0, %v16370_v18  ;;  %v15747_v49 = vld [vmem:[%s21047_s1 + $0x34] ss:$8 sps:$4 sm:$0xff]   ;;  %v15745_v62 = vld [vmem:[%s21047_s1 + $0x30] ss:$8 sps:$4 sm:$0xff]  }
  0x35   : > { %2191 = vmatprep.subr.bf16.mxu0 %v15738_v39  ;;  %v1299_v3 = vcombine.low %v916_v22, %v925_v61  ;;  %v1300_v16 = vcombine.low %v933_v1, %v941_v10  ;;  %v16542_v23 = vrot.slane %v459_v6, %v16370_v18  ;;  %v16546_v25 = vcombine.high %v16526_v7, %v16526_v7 }
  0x36   : > { %v1329_v29 = vcombine.low %v1307_v11, %v1314_v12  ;;  %v483_v33 = vcombine.high %v14345_v5, %v14345_v5  ;;  %v16549_v34 = vrot.slane %v14345_v5, %v16370_v18  ;;  %v947_v35 = vshll.u32 %v16526_v7, 16  ;;  %v15750_v5 = vld [vmem:[%s21047_s1 + $0x44] ss:$8 sps:$4 sm:$0xff]  }
  0x37   : > { %14443 = vmatmul.mubr.msk.bf16.vlgmr.msra.gmra.mrb[0].mxu0 %vm1641_vm2, %v1296_v52  ;;  %v1321_v20 = vrot.slane %v1299_v3, %v16370_v18  ;;  %v1328_v36 = vrot.slane %v1300_v16, %v16370_v18  ;;  %v16555_v37 = vcombine.high %v16542_v23, %v16542_v23  ;;  %v950_v38 = vshrl.u32 %v16526_v7, 16  ;;  %v14348_v12 = vld.sshfl [vmem:[%s16350_s20 + $0x24] sm:$0x33 pattern:$0x75316420] }
  0x38   : > { %2192 = vmatpush1.bf16.msra.mxu0 %v15736_v53  ;;  %1712 = vmatprep.mubr.bf16.mxu0 %v21057_v2  ;;  %v955_v39 = vshll.u32 %v16542_v23, 16  ;;  %v1337_v42 = vrot.slane %v1329_v29, %v16370_v18  ;;  %v16564_v44 = vrot.slane %v483_v33, %v16370_v18  ;;  %v16568_v45 = vcombine.high %v16549_v34, %v16549_v34  ;;  %v14356_v29 = vld.sshfl [vmem:[%s16350_s20 + $0x1c] sm:$0x11 pattern:$0x75316420] }
  0x39   : > { %2193 = vmatprep.subr.bf16.mxu0 %v15741_v57  ;;  %v949_v46 = vsel %vm16418_vm15, %v942_v15, %v947_v35  ;;  %v1330_v47 = vcombine.low %v1321_v20, %v1328_v36  ;;  %v958_v19 = vshrl.u32 %v16542_v23, 16  ;;  %v963_v48 = vshll.u32 %v16546_v25, 16 }
  0x3a   : > { %v957_v14 = vsel %vm16418_vm15, %v950_v38, %v955_v39  ;;  %v16581_v50 = vcombine.high %v16564_v44, %v16564_v44  ;;  %v966_v51 = vshrl.u32 %v16546_v25, 16  ;;  %v971_v52 = vshll.u32 %v16555_v37, 16  ;;  %v15748_v39 = vld [vmem:[%s21047_s1 + $0x40] ss:$8 sps:$4 sm:$0xff]  }
  0x3b   : > { %v974_v53 = vshrl.u32 %v16555_v37, 16  ;;  %v1344_v55 = vrot.slane %v1330_v47, %v16370_v18  ;;  %v965_v56 = vsel %vm16418_vm15, %v958_v19, %v963_v48  ;;  %v979_v57 = vshll.u32 %v16549_v34, 16 }
  0x3c   : > { %2194 = vmatpush1.bf16.msra.mxu0 %v15739_v8  ;;  %v982_v22 = vshrl.u32 %v16549_v34, 16  ;;  %v973_v58 = vsel %vm16418_vm15, %v966_v51, %v971_v52  ;;  %v987_v59 = vshll.u32 %v16564_v44, 16  ;;  %v990_v60 = vshrl.u32 %v16564_v44, 16 }
  0x3d   : > { %2195 = vmatprep.subr.bf16.mxu0 %v15744_v21  ;;  %v995_v61 = vshll.u32 %v16568_v45, 16  ;;  %v1345_v63 = vcombine.low %v1337_v42, %v1344_v55  ;;  %v981_v0 = vsel %vm16418_vm15, %v974_v53, %v979_v57  ;;  %v998_v1 = vshrl.u32 %v16568_v45, 16 }
  0x3e   : > { %v1003_v3 = vshll.u32 %v16581_v50, 16  ;;  %v989_v6 = vsel %vm16418_vm15, %v982_v22, %v987_v59  ;;  %v1346_v10 = vcombine.low %v949_v46, %v957_v14  ;;  %v1347_v11 = vcombine.low %v965_v56, %v973_v58  ;;  %v15753_v14 = vld [vmem:[%s21047_s1 + $0x54] ss:$8 sps:$4 sm:$0xff]   ;;  %v15751_v59 = vld [vmem:[%s21047_s1 + $0x50] ss:$8 sps:$4 sm:$0xff]  }
  0x3f   : > { %v997_v8 = vsel %vm16418_vm15, %v990_v60, %v995_v61  ;;  %14444 = vmatmul.mubr.msk.bf16.gmra.mrb[4].mxu0 %vm1641_vm2, %v1345_v63  ;;  %v1348_v16 = vcombine.low %v981_v0, %v989_v6  ;;  %v521_v20 = vcombine.high %v14347_v54, %v14347_v54  ;;  %v16616_v21 = vrot.slane %v14347_v54, %v16370_v18  ;;  %v15756_v0 = vld [vmem:[%s21047_s1 + $0x64] ss:$8 sps:$4 sm:$0xff]  }
  0x40   : > { %2196 = vmatpush1.bf16.msra.mxu0 %v15742_v43  ;;  %v1005_v15 = vsel %vm16418_vm15, %v998_v1, %v1003_v3  ;;  %1722 = vmatprep.mubr.bf16.mxu0 %v21057_v2  ;;  %v1356_v35 = vrot.slane %v1346_v10, %v16370_v18  ;;  %v1363_v36 = vrot.slane %v1347_v11, %v16370_v18  ;;  %v1006_v38 = vshrl.u32 %v16581_v50, 16 }
  0x41   : > { %2197 = vmatprep.subr.bf16.mxu0 %v15747_v49  ;;  %v1349_v33 = vcombine.low %v997_v8, %v1005_v15  ;;  %v1370_v42 = vrot.slane %v1348_v16, %v16370_v18  ;;  %v16628_v43 = vrot.slane %v521_v20, %v16370_v18  ;;  %v536_v46 = vcombine.high %v16616_v21, %v16616_v21  ;;  %v14349_v8 = vld.sshfl [vmem:[%s16350_s20 + $0x28] sm:$0x33 pattern:$0x75316420] }
  0x42   : > { %v545_v47 = vcombine.high %v14348_v12, %v14348_v12  ;;  %v1378_v48 = vcombine.low %v1356_v35, %v1363_v36  ;;  %v16637_v49 = vrot.slane %v14348_v12, %v16370_v18  ;;  %v738_v51 = vcombine.high %v14356_v29, %v14356_v29  ;;  %v15754_v35 = vld [vmem:[%s21047_s1 + $0x60] ss:$8 sps:$4 sm:$0xff]  }
  0x43   : > { %v1377_v19 = vrot.slane %v1349_v33, %v16370_v18  ;;  %v537_v52 = vcombine.high %v16628_v43, %v16628_v43  ;;  %v16645_v54 = vrot.slane %v14356_v29, %v16370_v18  ;;  %v1023_v55 = vshrl.u32 %v16616_v21, 16 }
  0x44   : > { %2198 = vmatpush1.bf16.msra.mxu0 %v15745_v62  ;;  %v16642_v53 = vrot.slane %v545_v47, %v16370_v18  ;;  %v1386_v57 = vrot.slane %v1378_v48, %v16370_v18  ;;  %v16651_v22 = vcombine.high %v16637_v49, %v16637_v49  ;;  %v16654_v58 = vrot.slane %v738_v51, %v16370_v18  ;;  %v14351_v48 = vld.sshfl [vmem:[%s16350_s20 + $0x30] sm:$0x33 pattern:$0x75316420] }
  0x45   : > { %2199 = vmatprep.subr.bf16.mxu0 %v15750_v5  ;;  %21086 = vst [vmem:[#allocation9_spill] sm:$0xff] %v16645_v54  ;;  %v1379_v56 = vcombine.low %v1370_v42, %v1377_v19  ;;  %v1011_v60 = vshll.u32 %v16645_v54, 16  ;;  %v1014_v61 = vshrl.u32 %v16645_v54, 16  ;;  %v1028_v62 = vshll.u32 %v16628_v43, 16 }
  0x46   : > { %21087 = vst [vmem:[#allocation10_spill] sm:$0xff] %v16651_v22  ;;  %v1031_v63 = vshrl.u32 %v16628_v43, 16  ;;  %v1019_v3 = vshll.u32 %v16654_v58, 16  ;;  %v1036_v5 = vshll.u32 %v536_v46, 16  ;;  %v1039_v6 = vshrl.u32 %v536_v46, 16 }
  0x47   : > { %v1393_v1 = vrot.slane %v1379_v56, %v16370_v18  ;;  %v1013_v10 = vsel %vm16418_vm15, %v1006_v38, %v1011_v60  ;;  %v1030_v11 = vsel %vm16418_vm15, %v1023_v55, %v1028_v62  ;;  %v1044_v12 = vshll.u32 %v537_v52, 16 }
  0x48   : > { %2200 = vmatpush1.bf16.msra.mxu0 %v15748_v39  ;;  %v1047_v15 = vshrl.u32 %v537_v52, 16  ;;  %v1021_v20 = vsel %vm16418_vm15, %v1014_v61, %v1019_v3  ;;  %v1038_v29 = vsel %vm16418_vm15, %v1031_v63, %v1036_v5  ;;  %v1052_v33 = vshll.u32 %v16637_v49, 16 }
  0x49   : > { %2201 = vmatprep.subr.bf16.mxu0 %v15753_v14  ;;  %v1394_v16 = vcombine.low %v1386_v57, %v1393_v1  ;;  %v1046_v36 = vsel %vm16418_vm15, %v1039_v6, %v1044_v12  ;;  %v1055_v38 = vshrl.u32 %v16637_v49, 16  ;;  %v1060_v39 = vshll.u32 %v16642_v53, 16  ;;  %v14357_v57 = vld.sshfl [vmem:[%s16350_s20 + $0x2c] sm:$0x11 pattern:$0x75316420] }
  0x4a   : > { %v1063_v42 = vshrl.u32 %v16642_v53, 16  ;;  %v1054_v46 = vsel %vm16418_vm15, %v1047_v15, %v1052_v33  ;;  %v1068_v47 = vshll.u32 %v16651_v22, 16  ;;  %v1395_v14 = vcombine.low %v1013_v10, %v1021_v20 }
  0x4b   : > { %14445 = vmatmul.mubr.msk.bf16.gmra.mrb[8].mxu0 %vm1641_vm2, %v1394_v16  ;;  %v1396_v19 = vcombine.low %v1030_v11, %v1038_v29  ;;  %v1062_v51 = vsel %vm16418_vm15, %v1055_v38, %v1060_v39  ;;  %v1397_v52 = vcombine.low %v1046_v36, %v1054_v46  ;;  %v16696_v55 = vcombine.high %v16642_v53, %v16642_v53 }
  0x4c   : > { %2202 = vmatpush1.bf16.msra.mxu0 %v15751_v59  ;;  %1732 = vmatprep.mubr.bf16.mxu0 %v21057_v2  ;;  %v569_v56 = vcombine.high %v14349_v8, %v14349_v8  ;;  %v1070_v59 = vsel %vm16418_vm15, %v1063_v42, %v1068_v47  ;;  %v1405_v60 = vrot.slane %v1395_v14, %v16370_v18  ;;  %v1071_v33 = vshrl.u32 %v16651_v22, 16 }
  0x4d   : > { %2203 = vmatprep.subr.bf16.mxu0 %v15756_v0  ;;  %21088 = vst [vmem:[#allocation11_spill] sm:$0xff] %v16696_v55  ;;  %v1412_v61 = vrot.slane %v1396_v19, %v16370_v18  ;;  %v16704_v62 = vrot.slane %v14349_v8, %v16370_v18  ;;  %v1398_v63 = vcombine.low %v1062_v51, %v1070_v59  ;;  %v1079_v38 = vshrl.u32 %v16696_v55, 16 }
  0x4e   : > { %v1419_v0 = vrot.slane %v1397_v52, %v16370_v18  ;;  %v16708_v1 = vrot.slane %v569_v56, %v16370_v18  ;;  %v607_v3 = vcombine.high %v14351_v48, %v14351_v48  ;;  %v16715_v10 = vrot.slane %v14351_v48, %v16370_v18 }
  0x4f   : > { %v1427_v5 = vcombine.low %v1405_v60, %v1412_v61  ;;  %v16712_v6 = vcombine.high %v16704_v62, %v16704_v62  ;;  %v760_v11 = vcombine.high %v14357_v57, %v14357_v57  ;;  %v1426_v8 = vrot.slane %v1398_v63, %v16370_v18 }
  0x50   : > { %2204 = vmatpush1.bf16.msra.mxu0 %v15754_v35  ;;  %v16720_v12 = vcombine.high %v16708_v1, %v16708_v1  ;;  %v16723_v15 = vrot.slane %v607_v3, %v16370_v18  ;;  %v16726_v16 = vrot.slane %v14357_v57, %v16370_v18  ;;  %v1076_v35 = vshll.u32 %v16696_v55, 16  ;;  %v14352_v57 = vld.sshfl [vmem:[%s16350_s20 + $0x34] sm:$0x33 pattern:$0x75316420] }
  0x51   : > { %21089 = vst [vmem:[#allocation12_spill] sm:$0xff] %v16712_v6  ;;  %v1435_v20 = vrot.slane %v1427_v5, %v16370_v18  ;;  %v16730_v29 = vrot.slane %v760_v11, %v16370_v18  ;;  %v1428_v36 = vcombine.low %v1419_v0, %v1426_v8  ;;  %v1084_v39 = vshll.u32 %v16704_v62, 16 }
  0x52   : > { %21090 = vst [vmem:[#allocation13_spill] sm:$0xff] %v16720_v12  ;;  %21091 = vst [vmem:[#allocation14_spill] sm:$0xff] %v16726_v16  ;;  %v1087_v42 = vshrl.u32 %v16704_v62, 16  ;;  %v1078_v46 = vsel %vm16418_vm15, %v1071_v33, %v1076_v35  ;;  %v1092_v47 = vshll.u32 %v16708_v1, 16  ;;  %v1095_v14 = vshrl.u32 %v16708_v1, 16 }
  0x53   : > { %21092 = vst [vmem:[#allocation15_spill] sm:$0xff] %v16730_v29  ;;  %v1100_v19 = vshll.u32 %v16712_v6, 16  ;;  %v1442_v48 = vrot.slane %v1428_v36, %v16370_v18  ;;  %v1086_v51 = vsel %vm16418_vm15, %v1079_v38, %v1084_v39  ;;  %v1103_v52 = vshrl.u32 %v16712_v6, 16 }
  0x54   : > { %v1108_v56 = vshll.u32 %v16720_v12, 16  ;;  %v1094_v59 = vsel %vm16418_vm15, %v1087_v42, %v1092_v47  ;;  %v1111_v61 = vshrl.u32 %v16720_v12, 16  ;;  %v1116_v63 = vshll.u32 %v16726_v16, 16 }
  0x55   : > { %v1102_v60 = vsel %vm16418_vm15, %v1095_v14, %v1100_v19  ;;  %v1443_v0 = vcombine.low %v1435_v20, %v1442_v48  ;;  %v1119_v5 = vshrl.u32 %v16726_v16, 16  ;;  %v1124_v11 = vshll.u32 %v16730_v29, 16  ;;  %v14353_v42 = vld.sshfl [vmem:[%s16350_s20 + $0x38] sm:$0x33 pattern:$0x75316420] }
  0x56   : > { %v1110_v3 = vsel %vm16418_vm15, %v1103_v52, %v1108_v56  ;;  %v1118_v8 = vsel %vm16418_vm15, %v1111_v61, %v1116_v63  ;;  %v1128_v33 = vshrl.u32 %v16715_v10, 16  ;;  %v1133_v35 = vshll.u32 %v16723_v15, 16 }
  0x57   : > { %v1444_v36 = vcombine.low %v1078_v46, %v1086_v51  ;;  %14446 = vmatmul.mubr.msk.bf16.gmra.mrb[12].mxu0 %vm1641_vm2, %v1443_v0  ;;  %v1126_v20 = vsel %vm16418_vm15, %v1119_v5, %v1124_v11  ;;  %v1445_v38 = vcombine.low %v1094_v59, %v1102_v60  ;;  %v1446_v39 = vcombine.low %v1110_v3, %v1118_v8 }
  0x58   : > { %v16768_v47 = vcombine.high %v16715_v10, %v16715_v10  ;;  %1742 = vmatprep.mubr.bf16.mxu0 %v21057_v2  ;;  %v1135_v14 = vsel %vm16418_vm15, %v1128_v33, %v1133_v35  ;;  %v16776_v46 = vcombine.high %v16723_v15, %v16723_v15  ;;  %v631_v48 = vcombine.high %v14352_v57, %v14352_v57 }
  0x59   : > { %v1454_v19 = vrot.slane %v1444_v36, %v16370_v18  ;;  %v1447_v51 = vcombine.low %v1126_v20, %v1135_v14  ;;  %v1461_v52 = vrot.slane %v1445_v38, %v16370_v18  ;;  %v1468_v56 = vrot.slane %v1446_v39, %v16370_v18 }
  0x5a   : > { %v16781_v59 = vrot.slane %v14352_v57, %v16370_v18  ;;  %v16784_v60 = vrot.slane %v631_v48, %v16370_v18  ;;  %v655_v61 = vcombine.high %v14353_v42, %v14353_v42  ;;  %v16787_v63 = vrot.slane %v14353_v42, %v16370_v18 }
  0x5b   : > { %v1136_v0 = vshrl.u32 %v16723_v15, 16  ;;  %v1475_v3 = vrot.slane %v1447_v51, %v16370_v18  ;;  %v1476_v5 = vcombine.low %v1454_v19, %v1461_v52  ;;  %v1141_v8 = vshll.u32 %v16768_v47, 16 }
  0x5c   : > { %v16793_v11 = vcombine.high %v16781_v59, %v16781_v59  ;;  %v16798_v57 = vcombine.high %v16784_v60, %v16784_v60  ;;  %v16801_v33 = vrot.slane %v655_v61, %v16370_v18  ;;  %v1144_v35 = vshrl.u32 %v16768_v47, 16 }
  0x5d   : > { %v1149_v36 = vshll.u32 %v16776_v46, 16  ;;  %v1477_v20 = vcombine.low %v1468_v56, %v1475_v3  ;;  %v1484_v38 = vrot.slane %v1476_v5, %v16370_v18  ;;  %v1143_v39 = vsel %vm16418_vm15, %v1136_v0, %v1141_v8  ;;  %v14358_v0 = vld.sshfl [vmem:[%s16350_s20 + $0x3c] sm:$0x11 pattern:$0x75316420] }
  0x5e   : > { %v1152_v42 = vshrl.u32 %v16776_v46, 16  ;;  %v1157_v19 = vshll.u32 %v16781_v59, 16  ;;  %v1160_v48 = vshrl.u32 %v16781_v59, 16  ;;  %v1165_v51 = vshll.u32 %v16784_v60, 16 }
  0x5f   : > { %v1151_v14 = vsel %vm16418_vm15, %v1144_v35, %v1149_v36  ;;  %v1491_v52 = vrot.slane %v1477_v20, %v16370_v18  ;;  %v1168_v56 = vshrl.u32 %v16784_v60, 16  ;;  %v1173_v61 = vshll.u32 %v16793_v11, 16 }
  0x60   : > { %v1176_v3 = vshrl.u32 %v16793_v11, 16  ;;  %v1159_v5 = vsel %vm16418_vm15, %v1152_v42, %v1157_v19  ;;  %v1167_v8 = vsel %vm16418_vm15, %v1160_v48, %v1165_v51  ;;  %v1181_v35 = vshll.u32 %v16798_v57, 16 }
  0x61   : > { %v1184_v36 = vshrl.u32 %v16798_v57, 16  ;;  %v1492_v4 = vcombine.low %v1484_v38, %v1491_v52  ;;  %v1175_v20 = vsel %vm16418_vm15, %v1168_v56, %v1173_v61  ;;  %v1189_v2 = vshll.u32 %v16787_v63, 16 }
  0x62   : > { %v1192_v9 = vshrl.u32 %v16787_v63, 16  ;;  %v1183_v29 = vsel %vm16418_vm15, %v1176_v3, %v1181_v35  ;;  %v1197_v42 = vshll.u32 %v16801_v33, 16  ;;  %v1493_v19 = vcombine.low %v1143_v39, %v1151_v14 }
  0x63   : > { %v1494_v12 = vcombine.low %v1159_v5, %v1167_v8  ;;  %14447 = vmatmul.mubr.msk.bf16.gmra.mrb[16].mxu0 %vm1641_vm2, %v1492_v4  ;;  %v1191_v48 = vsel %vm16418_vm15, %v1184_v36, %v1189_v2  ;;  %v1495_v38 = vcombine.low %v1175_v20, %v1183_v29  ;;  %v16837_v51 = vcombine.high %v16787_v63, %v16787_v63  ;;  %v700_v8 = vld [vmem:[%s21047_s1 + $0x70] sm:$0xff] }
  0x64   : > { %v16841_v52 = vcombine.high %v16801_v33, %v16801_v33  ;;  %v21093_v56 = vmov 0   ;;  %v1199_v39 = vsel %vm16418_vm15, %v1192_v9, %v1197_v42  ;;  %v1503_v14 = vrot.slane %v1493_v19, %v16370_v18 }
  0x65   : > { %1752 = vmatprep.mubr.bf16.mxu0 %v21093_v56  ;;  %v1510_v4 = vrot.slane %v1494_v12, %v16370_v18  ;;  %v782_v61 = vcombine.high %v14358_v0, %v14358_v0  ;;  %v1496_v2 = vcombine.low %v1191_v48, %v1199_v39  ;;  %v1517_v29 = vrot.slane %v1495_v38, %v16370_v18 }
  0x66   : > { %v16850_v3 = vrot.slane %v14358_v0, %v16370_v18  ;;  %v1200_v5 = vshrl.u32 %v16801_v33, 16  ;;  %v1205_v36 = vshll.u32 %v16837_v51, 16  ;;  %v1208_v12 = vshrl.u32 %v16837_v51, 16 }
  0x67   : > { %v1525_v35 = vcombine.low %v1503_v14, %v1510_v4  ;;  %v16857_v9 = vrot.slane %v782_v61, %v16370_v18  ;;  %v1524_v20 = vrot.slane %v1496_v2, %v16370_v18  ;;  %v1213_v42 = vshll.u32 %v16841_v52, 16  ;;  %v15761_v4 = vld [vmem:[%s21047_s1 + $0xf4] ss:$8 sps:$4 sm:$0xff]  }
  0x68   : > { %v1216_v0 = vshrl.u32 %v16841_v52, 16  ;;  %v1221_v19 = vshll.u32 %v16850_v3, 16  ;;  %v1207_v38 = vsel %vm16418_vm15, %v1200_v5, %v1205_v36  ;;  %v1224_v39 = vshrl.u32 %v16850_v3, 16 }
  0x69   : > { %v1533_v48 = vrot.slane %v1525_v35, %v16370_v18  ;;  %v1229_v14 = vshll.u32 %v16857_v9, 16  ;;  %v1526_v61 = vcombine.low %v1517_v29, %v1524_v20  ;;  %v1215_v2 = vsel %vm16418_vm15, %v1208_v12, %v1213_v42  ;;  %v14342_v20 = vld.sshfl [vmem:[%s16350_s20 + $0xc] sm:$0x1 pattern:$0x75316420] }
  0x6a   : > { %v1223_v16 = vsel %vm16418_vm15, %v1216_v0, %v1221_v19  ;;  %v14471_v35 = vcombine.high %v700_v8, %v700_v8  ;;  %v1542_v36 = vcombine.low %v1207_v38, %v1215_v2  ;;  %v14470_v6 = vcombine.low %v700_v8, %v700_v8 }
  0x6b   : > { %v1231_v5 = vsel %vm16418_vm15, %v1224_v39, %v1229_v14  ;;  %v1771_v55 = vcombine.low %v16384_v24, %v16390_v27  ;;  %v1540_v22 = vrot.slane %v1526_v61, %v16370_v18  ;;  %v14450_v29 = vcombine.high %v16384_v24, %v16390_v27 }
  0x6c   : > { %v1543_v54 = vcombine.low %v1223_v16, %v1231_v5  ;;  %14472 = vmatprep.subr.msk.bf16.mxu0 %vm1663_vm0, %v14471_v35  ;;  %v1773_v12 = vcombine.low %v16387_v26, %v16402_v31  ;;  %v1550_v42 = vrot.slane %v1542_v36, %v16370_v18  ;;  %v2186_v0 = vsel %vm1663_vm0, %v14470_v6, 0 }
  0x6d   : > { %v14451_v8 = vcombine.high %v16387_v26, %v16402_v31  ;;  %v1781_v19 = vrot.slane %v1771_v55, %v16370_v18  ;;  %v1541_v38 = vcombine.low %v1533_v48, %v1540_v22  ;;  %2206 = vmatpush1.bf16.msra.mxu0 %v2186_v0  ;;  %v1788_v24 = vrot.slane %v14450_v29, %v16370_v18  ;;  %v14346_v48 = vld.sshfl [vmem:[%s16350_s20 + $0x1c] sm:$0x1 pattern:$0x75316420] }
  0x6e   : > { %v1557_v16 = vrot.slane %v1543_v54, %v16370_v18  ;;  %v1795_v27 = vrot.slane %v1773_v12, %v16370_v18  ;;  %3136 = vmatprep.subr.bf16.mxu0 %v15761_v4  ;;  %v427_v14 = vrot.slane %v14342_v20, %v16370_v18  ;;  %v1820_v6 = vcombine.low %v16394_v28, %v16461_v13 }
  0x6f   : > { %v1802_v39 = vrot.slane %v14451_v8, %v16370_v18  ;;  %14448 = vmatmul.mubr.msk.bf16.gmra.mrb[20].mxu0 %vm1641_vm2, %v1541_v38  ;;  %v1869_v31 = vcombine.low %v16492_v40, %v16526_v7  ;;  %v1803_v54 = vcombine.low %v1781_v19, %v1788_v24  ;;  %v14452_v22 = vcombine.high %v16394_v28, %v16461_v13 }
  0x70   : > { %v1558_v26 = vcombine.low %v1550_v42, %v1557_v16  ;;  %1762 = vmatprep.mubr.bf16.mxu0 %v21093_v56  ;;  %v1823_v55 = vcombine.low %v16472_v30, %v16476_v32  ;;  %v1870_v61 = vcombine.low %v16542_v23, %v16546_v25  ;;  %v1822_v35 = vcombine.low %v427_v14, %v16465_v17  ;;  %v15759_v14 = vld [vmem:[%s21047_s1 + $0xf0] ss:$8 sps:$4 sm:$0xff]  }
  0x71   : > { %v1804_v4 = vcombine.low %v1795_v27, %v1802_v39  ;;  %v1830_v40 = vrot.slane %v1820_v6, %v16370_v18  ;;  %v1871_v5 = vcombine.low %v16555_v37, %v16549_v34  ;;  %v1872_v28 = vcombine.low %v16564_v44, %v16568_v45 }
  0x72   : > { %v1565_v2 = vrot.slane %v1558_v26, %v16370_v18  ;;  %v1879_v13 = vrot.slane %v1869_v31, %v16370_v18  ;;  %v1886_v30 = vrot.slane %v1870_v61, %v16370_v18  ;;  %v513_v32 = vrot.slane %v14346_v48, %v16370_v18  ;;  %v14350_v61 = vld.sshfl [vmem:[%s16350_s20 + $0x2c] sm:$0x1 pattern:$0x75316420] }
  0x73   : > { %v1811_v25 = vrot.slane %v1803_v54, %v16370_v18  ;;  %v1837_v36 = vrot.slane %v14452_v22, %v16370_v18  ;;  %v1851_v17 = vrot.slane %v1823_v55, %v16370_v18  ;;  %v1893_v29 = vrot.slane %v1871_v5, %v16370_v18  ;;  %v15764_v54 = vld [vmem:[%s21047_s1 + $0x104] ss:$8 sps:$4 sm:$0xff]  }
  0x74   : > { %v1900_v12 = vrot.slane %v1872_v28, %v16370_v18  ;;  %v1901_v37 = vcombine.low %v1879_v13, %v1886_v30  ;;  %v1918_v20 = vcombine.low %v16581_v50, %v513_v32  ;;  %v1919_v45 = vcombine.low %v16616_v21, %v16628_v43  ;;  %v15767_v28 = vld [vmem:[%s21047_s1 + $0x114] ss:$8 sps:$4 sm:$0xff]   ;;  %v15765_v32 = vld [vmem:[%s21047_s1 + $0x110] ss:$8 sps:$4 sm:$0xff]  }
  0x75   : > { %v1818_v42 = vrot.slane %v1804_v4, %v16370_v18  ;;  %v1844_v0 = vrot.slane %v1822_v35, %v16370_v18  ;;  %v14453_v8 = vcombine.high %v16616_v21, %v16628_v43  ;;  %v1921_v19 = vcombine.low %v16637_v49, %v16642_v53  ;;  %v15762_v35 = vld [vmem:[%s21047_s1 + $0x100] ss:$8 sps:$4 sm:$0xff]  }
  0x76   : > { %v1902_v38 = vcombine.low %v1893_v29, %v1900_v12  ;;  %v16937_v16 = vrot.slane %v1901_v37, %v16370_v18  ;;  %v1928_v50 = vrot.slane %v1918_v20, %v16370_v18  ;;  %v1935_v24 = vrot.slane %v1919_v45, %v16370_v18  ;;  %v15768_v37 = vld [vmem:[%s21047_s1 + $0x120] ss:$8 sps:$4 sm:$0xff]   ;;  %v15773_v20 = vld [vmem:[%s21047_s1 + $0x134] ss:$8 sps:$4 sm:$0xff]  }
  0x77   : > { %14449 = vmatmul.mubr.msk.bf16.gmra.mrb[24].mxu0 %vm1641_vm2, %v1565_v2  ;;  %v1942_v27 = vrot.slane %v14453_v8, %v16370_v18  ;;  %v1949_v21 = vrot.slane %v1921_v19, %v16370_v18  ;;  %v1852_v6 = vcombine.low %v1830_v40, %v1837_v36  ;;  %v1819_v31 = vcombine.low %v1811_v25, %v1818_v42 }
  0x78   : > { %2223 = vmatprep.mubr.bf16.mxu0 %v21093_v56  ;;  %v1916_v43 = vrot.slane %v1902_v38, %v16370_v18  ;;  %v1950_v39 = vcombine.low %v1928_v50, %v1935_v24  ;;  %v1853_v22 = vcombine.low %v1844_v0, %v1851_v17  ;;  %v599_v13 = vrot.slane %v14350_v61, %v16370_v18  ;;  %v15770_v17 = vld [vmem:[%s21047_s1 + $0x124] ss:$8 sps:$4 sm:$0xff]   ;;  %v14354_v0 = vld.sshfl [vmem:[%s16350_s20 + $0x3c] sm:$0x1 pattern:$0x75316420] }
  0x79   : > { %v1951_v26 = vcombine.low %v1942_v27, %v1949_v21  ;;  %v1860_v40 = vrot.slane %v1852_v6, %v16370_v18  ;;  %v14454_v25 = vcombine.high %v16637_v49, %v16642_v53  ;;  %v1968_v36 = vcombine.low %v16704_v62, %v16708_v1  ;;  %v15771_v50 = vld [vmem:[%s21047_s1 + $0x130] ss:$8 sps:$4 sm:$0xff]   ;;  %v14481_v21 = vld.sshfl [vmem:[%s16350_s20 + $0x4] sm:$0x33 pattern:$0x75316420] }
  0x7a   : > { %v1917_v55 = vcombine.low %v16937_v16, %v1916_v43  ;;  %v1958_v48 = vrot.slane %v1950_v39, %v16370_v18  ;;  %v1867_v5 = vrot.slane %v1853_v22, %v16370_v18  ;;  %v14455_v29 = vcombine.high %v16704_v62, %v16708_v1  ;;  %v14480_v16 = vld.sshfl [vmem:[%s16350_s20] sm:$0x32 pattern:$0x75316420]  ;;  %v15776_v43 = vld [vmem:[%s21047_s1 + $0x144] ss:$8 sps:$4 sm:$0xff]  }
  0x7b   : > { %v1965_v4 = vrot.slane %v1951_v26, %v16370_v18  ;;  %v1970_v12 = vcombine.low %v599_v13, %v16715_v10  ;;  %v1977_v45 = vrot.slane %v14454_v25, %v16370_v18  ;;  %v1984_v42 = vrot.slane %v1968_v36, %v16370_v18  ;;  %v15774_v26 = vld [vmem:[%s21047_s1 + $0x140] ss:$8 sps:$4 sm:$0xff]  }
  0x7c   : > { %v1868_v30 = vcombine.low %v1860_v40, %v1867_v5  ;;  %v1991_v10 = vrot.slane %v14455_v29, %v16370_v18  ;;  %v2016_v19 = vcombine.low %v16723_v15, %v16768_v47  ;;  %v2017_v38 = vcombine.low %v16776_v46, %v16781_v59 }
  0x7d   : > { %v16955_v2 = vcombine.low %v1958_v48, %v1965_v4  ;;  %v1998_v8 = vrot.slane %v1970_v12, %v16370_v18  ;;  %v2018_v24 = vcombine.low %v16784_v60, %v16793_v11  ;;  %v2019_v27 = vcombine.low %v16798_v57, %v16787_v63  ;;  %v14492_v4 = vld.sshfl [vmem:[%s16350_s20 + $0x30] sm:$0x32 pattern:$0x75316420] }
  0x7e   : > { %v1999_v15 = vcombine.low %v1977_v45, %v1984_v42  ;;  %v2026_v46 = vrot.slane %v2016_v19, %v16370_v18  ;;  %v2033_v39 = vrot.slane %v2017_v38, %v16370_v18  ;;  %v2331_v6 = vcombine.high %v14480_v16, %v14480_v16  ;;  %v14484_v12 = vld.sshfl [vmem:[%s16350_s20 + $0x10] sm:$0x32 pattern:$0x75316420] }
  0x7f   : > { %14473 = vmatmul.mubr.msk.bf16.vlgmr.msra.gmra.mrb[0].mxu0 %vm1641_vm2, %v1819_v31  ;;  %v2000_v47 = vcombine.low %v1991_v10, %v1998_v8  ;;  %v2040_v11 = vrot.slane %v2018_v24, %v16370_v18  ;;  %v2047_v57 = vrot.slane %v2019_v27, %v16370_v18  ;;  %v15779_v31 = vld [vmem:[%s21047_s1 + $0x154] ss:$8 sps:$4 sm:$0xff]   ;;  %v2355_v22 = vcombine.high %v14481_v21, %v14481_v21 }
  0x80   : > { %3137 = vmatpush1.bf16.msra.mxu0 %v15759_v14  ;;  %2233 = vmatprep.mubr.bf16.mxu0 %v21093_v56  ;;  %v685_v14 = vrot.slane %v14354_v0, %v16370_v18  ;;  %v2007_v48 = vrot.slane %v1999_v15, %v16370_v18  ;;  %v2065_v40 = vcombine.low %v16801_v33, %v16837_v51  ;;  %v16157_v15 = vld.sshfl [vmem:[%s16350_s20 + $0xc] sm:$0x11 pattern:$0x75316420]  ;;  %vm21080_vm3 = vcmask 1040384  }
  0x81   : > { %3138 = vmatprep.subr.bf16.mxu0 %v15764_v54  ;;  %v2338_v54 = vrot.slane %v14480_v16, %v16370_v18  ;;  %v2014_v61 = vrot.slane %v2000_v47, %v16370_v18  ;;  %v2049_v13 = vcombine.low %v2040_v11, %v2047_v57  ;;  %v17043_v25 = vrot.slane %v14481_v21, %v16370_v18 }
  0x82   : > { %v17033_v5 = vcombine.low %v16841_v52, %v685_v14  ;;  %v2613_v51 = vcombine.high %v14492_v4, %v14492_v4  ;;  %v2073_v42 = vrot.slane %v2065_v40, %v16370_v18  ;;  %v17083_v27 = vrot.slane %v14492_v4, %v16370_v18 }
  0x83   : > { %v17045_v36 = vcombine.high %v2338_v54, %v2338_v54  ;;  %v17058_v10 = vrot.slane %v2049_v13, %v16370_v18  ;;  %v17066_v19 = vcombine.high %v17043_v25, %v17043_v25  ;;  %v2403_v47 = vcombine.high %v16157_v15, %v16157_v15 }
  0x84   : > { %3139 = vmatpush1.bf16.msra.mxu0 %v15762_v35  ;;  %v2048_v35 = vcombine.low %v2026_v46, %v2033_v39  ;;  %v2080_v0 = vrot.slane %v17033_v5, %v16370_v18  ;;  %v17080_v24 = vrot.slane %v2613_v51, %v16370_v18  ;;  %v15784_v46 = vld [vmem:[%s21047_s1 + $0x16c] ss:$8 sps:$4 sm:$0xff]   ;;  %v2410_v39 = vrot.slane %v16157_v15, %v16370_v18 }
  0x85   : > { %3140 = vmatprep.subr.bf16.mxu0 %v15767_v28  ;;  %v14482_v28 = vld.sshfl [vmem:[%s16350_s20 + $0x8] sm:$0x33 pattern:$0x75316420]  ;;  %v2425_v14 = vcombine.high %v14484_v12, %v14484_v12  ;;  %v2962_v57 = vcombine.low %v16781_v59, %v16784_v60  ;;  %v2964_v54 = vcombine.low %v16787_v63, %v16801_v33  ;;  %v17125_v40 = vrot.slane %v14484_v12, %v16370_v18 }
  0x86   : > { %v17052_v45 = vrot.slane %v2048_v35, %v16370_v18  ;;  %v17069_v38 = vrot.slane %v14482_v28, %v16370_v18  ;;  %v14514_v11 = vcombine.high %v17083_v27, %v17080_v24  ;;  %v2417_v35 = vrot.slane %v2403_v47, %v16370_v18 }
  0x87   : > { %14474 = vmatmul.mubr.msk.bf16.gmra.mrb[4].mxu0 %vm1641_vm2, %v1868_v30  ;;  %v15777_v30 = vld [vmem:[%s21047_s1 + $0x150] ss:$8 sps:$4 sm:$0xff]   ;;  %v2978_v4 = vrot.slane %v2962_v57, %v16370_v18  ;;  %v17128_v5 = vrot.slane %v2425_v14, %v16370_v18  ;;  %v14516_v13 = vcombine.high %v16787_v63, %v16801_v33  ;;  %v14512_v47 = vcombine.high %v16526_v7, %v16542_v23 }
  0x88   : > { %2243 = vmatprep.mubr.bf16.mxu0 %v21093_v56  ;;  %3141 = vmatpush1.bf16.msra.mxu0 %v15765_v32  ;;  %v17040_v32 = vrot.slane %v2331_v6, %v16370_v18  ;;  %v2081_v14 = vcombine.low %v2073_v42, %v2080_v0  ;;  %v14513_v0 = vcombine.high %v16549_v34, %v16564_v44  ;;  %vm5920_vm5 = vcmask 1042434  }
  0x89   : > { %3142 = vmatprep.subr.bf16.mxu0 %v15770_v17  ;;  %v17048_v17 = vrot.slane %v2355_v22, %v16370_v18  ;;  %v17144_v63 = vrot.slane %v14516_v13, %v16370_v18  ;;  %v14511_v15 = vcombine.high %v17125_v40, %v17128_v5  ;;  %vm5921_vm6 = vmor %vm21080_vm3, %vm5920_vm5  ;;  %vm5922_vm7 = vcmask 1044484  }
  0x8a   : > { %v17062_v8 = vcombine.high %v17040_v32, %v17040_v32  ;;  %vm5924_vm9 = vcmask 1046534   ;;  %vm5923_vm10 = vmor %vm5921_vm6, %vm5922_vm7  ;;  %vm6601_vm13 = vcmask 1041408   ;;  %vm6609_vm14 = vcmask 648192  }
  0x8b   : > { %v17075_v16 = vcombine.high %v17048_v17, %v17048_v17  ;;  %vm7372_vm6 = vcmask 1043459   ;;  %vm7378_vm11 = vcmask 1047559   ;;  %vm7472_vm8 = vcmask 654337  }
  0x8c   : > { %3143 = vmatpush1.bf16.msra.mxu0 %v15768_v37  ;;  %v2379_v37 = vcombine.high %v14482_v28, %v14482_v28  ;;  %v2717_v6 = vcombine.low %v17062_v8, %v17043_v25  ;;  %vm7386_vm4 = vcmask 1041409   ;;  %vm7475_vm3 = vcmask 651264  }
  0x8d   : > { %3144 = vmatprep.subr.bf16.mxu0 %v15773_v20  ;;  %v2015_v20 = vcombine.low %v2007_v48, %v2014_v61  ;;  %v2719_v22 = vcombine.low %v17075_v16, %v17069_v38 }
  0x8f   : > { %14475 = vmatmul.mubr.msk.bf16.gmra.mrb[8].mxu0 %vm1641_vm2, %v1917_v55  ;;  %v14510_v55 = vld [vmem:[%s21047_s1 + $0x160] sm:$0xff]  ;;  %v2747_v12 = vrot.slane %v2719_v22, %v16370_v18  ;;  %v2796_v22 = vrot.slane %v14511_v15, %v16370_v18 }
  0x90   : > { %2253 = vmatprep.mubr.bf16.mxu0 %v21093_v56  ;;  %3145 = vmatpush1.bf16.msra.mxu0 %v15771_v50  ;;  %v14532_v52 = vcombine.high %v14510_v55, %v14510_v55  ;;  %v14531_v29 = vcombine.low %v14510_v55, %v14510_v55  ;;  %v2716_v50 = vcombine.low %v17040_v32, %v17045_v36 }
  0x91   : > { %3146 = vmatprep.subr.bf16.mxu0 %v15776_v43  ;;  %v17092_v43 = vcombine.high %v17069_v38, %v17069_v38  ;;  %v2971_v55 = vrot.slane %v14514_v11, %v16370_v18 }
  0x92   : > { %v3131_v21 = vsel %vm1663_vm0, %v14531_v29, 0  ;;  %v2726_v48 = vrot.slane %v2716_v50, %v16370_v18  ;;  %v3011_v29 = vcombine.low %v16850_v3, %v16857_v9  ;;  %v2814_v3 = vcombine.low %v16526_v7, %v16542_v23  ;;  %v17174_v7 = vld [vmem:[%s21047_s1 + $0x1d8] sm:$0xff] }
  0x93   : > { %v2993_v28 = vcombine.low %v2971_v55, %v2978_v4  ;;  %v3676_v23 = vshrl.u32 %v17040_v32, 16  ;;  %v3681_v55 = vshll.u32 %v17045_v36, 16  ;;  %v15797_v32 = vld [vmem:[%s21047_s1 + $0x1b8] ss:$8 sps:$4 sm:$0xff]  }
  0x94   : > { %3147 = vmatpush1.bf16.msra.mxu0 %v15774_v26  ;;  %v2718_v26 = vcombine.low %v17048_v17, %v17066_v19 }
  0x95   : > { %3148 = vmatprep.subr.bf16.mxu0 %v15779_v31  ;;  %v14515_v31 = vcombine.high %v16781_v59, %v16784_v60  ;;  %v2992_v60 = vrot.slane %v2964_v54, %v16370_v18  ;;  %v17141_v50 = vrot.slane %v2993_v28, %v16370_v18 }
  0x96   : > { %v2740_v51 = vrot.slane %v2718_v26, %v16370_v18 }
  0x97   : > { %14476 = vmatmul.mubr.msk.bf16.gmra.mrb[12].mxu0 %vm1641_vm2, %v16955_v2  ;;  %v17088_v2 = vrot.slane %v2379_v37, %v16370_v18  ;;  %v2985_v59 = vrot.slane %v14515_v31, %v16370_v18  ;;  %v2816_v31 = vcombine.low %v16549_v34, %v16564_v44  ;;  %v2088_v34 = vrot.slane %v2081_v14, %v16370_v18  ;;  %v15791_v14 = vld [vmem:[%s21047_s1 + $0x198] ss:$8 sps:$4 sm:$0xff]  }
  0x98   : > { %2263 = vmatprep.mubr.bf16.mxu0 %v21093_v56  ;;  %3149 = vmatpush1.bf16.msra.mxu0 %v15777_v30  ;;  %v2733_v30 = vrot.slane %v2717_v6, %v16370_v18 }
  0x99   : > { %14533 = vmatprep.subr.msk.bf16.mxu0 %vm1663_vm0, %v14532_v52  ;;  %v17119_v61 = vcombine.high %v17088_v2, %v17088_v2  ;;  %v2994_v52 = vcombine.low %v2985_v59, %v2992_v60  ;;  %v2765_v37 = vcombine.low %v17088_v2, %v17092_v43  ;;  %v2838_v59 = vrot.slane %v2816_v31, %v16370_v18  ;;  %v21095_v31 = vld [vmem:[#allocation9_spill] sm:$0xff] }
  0x9a   : > { %v2748_v6 = vcombine.low %v2726_v48, %v2733_v30  ;;  %v2831_v48 = vrot.slane %v14512_v47, %v16370_v18  ;;  %v2845_v60 = vrot.slane %v14513_v0, %v16370_v18  ;;  %v21101_v0 = vld [vmem:[#allocation13_spill] sm:$0xff] }
  0x9b   : > { %v2766_v33 = vcombine.low %v17119_v61, %v2410_v39  ;;  %v17151_v9 = vrot.slane %v2994_v52, %v16370_v18  ;;  %v2064_v39 = vcombine.low %v17052_v45, %v17058_v10  ;;  %v2775_v26 = vrot.slane %v2765_v37, %v16370_v18 }
  0x9c   : > { %3151 = vmatpush1.bf16.msra.mxu0 %v3131_v21  ;;  %v2767_v21 = vcombine.low %v2417_v35, %v17128_v5  ;;  %v2749_v45 = vcombine.low %v2740_v51, %v2747_v12  ;;  %v2824_v10 = vrot.slane %v2814_v3, %v16370_v18  ;;  %v14638_v35 = vcombine.low %v17174_v7, %v17174_v7  ;;  %v14550_v3 = vld.sshfl [vmem:[%s16350_s20 + $0x24] sm:$0x33 pattern:$0x75316420] }
  0x9d   : > { %4531 = vmatprep.subr.bf16.mxu0 %v15784_v46  ;;  %v14488_v46 = vld.sshfl [vmem:[%s16350_s20 + $0x20] sm:$0x32 pattern:$0x75316420]  ;;  %v2782_v42 = vrot.slane %v2766_v33, %v16370_v18  ;;  %v17193_v28 = vrot.slane %v2748_v6, %v16370_v18 }
  0x9e   : > { %v2789_v54 = vrot.slane %v2767_v21, %v16370_v18  ;;  %v2519_v4 = vcombine.high %v14488_v46, %v14488_v46  ;;  %v17196_v13 = vrot.slane %v2749_v45, %v16370_v18  ;;  %v2846_v51 = vcombine.low %v2824_v10, %v2831_v48  ;;  %v14544_v33 = vld.sshfl [vmem:[%s16350_s20 + $0xc] sm:$0x13 pattern:$0x75316420] }
  0x9f   : > { %14477 = vmatmul.mubr.msk.bf16.gmra.mrb[16].mxu0 %vm1641_vm2, %v2015_v20  ;;  %v17154_v20 = vrot.slane %v3011_v29, %v16370_v18  ;;  %v2797_v44 = vcombine.low %v2775_v26, %v2782_v42  ;;  %v2526_v52 = vrot.slane %v14488_v46, %v16370_v18  ;;  %v17203_v12 = vsel %vm1663_vm0, %v14638_v35, 0  ;;  %v14548_v21 = vld.sshfl [vmem:[%s16350_s20 + $0x1c] sm:$0x13 pattern:$0x75316420] }
  0xa0   : > { %2273 = vmatprep.mubr.bf16.mxu0 %v21093_v56  ;;  %v2798_v30 = vcombine.low %v2789_v54, %v2796_v22  ;;  %v17200_v29 = vrot.slane %v2519_v4, %v16370_v18  ;;  %v2847_v46 = vcombine.low %v2838_v59, %v2845_v60  ;;  %v2863_v45 = vcombine.low %v21095_v31, %v16654_v58  ;;  %v21097_v58 = vld [vmem:[#allocation10_spill] sm:$0xff] }
  0xa1   : > { %v17219_v10 = vcombine.high %v2526_v52, %v2526_v52  ;;  %v3374_v59 = vcombine.high %v14544_v33, %v14544_v33  ;;  %v17234_v60 = vrot.slane %v14544_v33, %v16370_v18  ;;  %v17242_v57 = vrot.slane %v2846_v51, %v16370_v18  ;;  %v14547_v33 = vld.sshfl [vmem:[%s16350_s20 + $0x18] sm:$0x33 pattern:$0x75316420] }
  0xa2   : > { %21094 = vst [vmem:[#allocation16_spill] sm:$0xff] %v17200_v29  ;;  %v2812_v26 = vrot.slane %v2798_v30, %v16370_v18  ;;  %v17223_v54 = vcombine.high %v17200_v29, %v17200_v29  ;;  %v17245_v11 = vrot.slane %v2847_v46, %v16370_v18  ;;  %v2866_v35 = vcombine.low %v16642_v53, %v21097_v58  ;;  %v15782_v30 = vld [vmem:[%s21047_s1 + $0x168] ss:$8 sps:$4 sm:$0xff]   ;;  %v15787_v46 = vld [vmem:[%s21047_s1 + $0x17c] ss:$8 sps:$4 sm:$0xff]  }
  0xa3   : > { %v17254_v31 = vrot.slane %v2863_v45, %v16370_v18  ;;  %v2864_v53 = vcombine.low %v17200_v29, %v17219_v10  ;;  %v21099_v58 = vld [vmem:[#allocation12_spill] sm:$0xff]  ;;  %v21100_v4 = vld [vmem:[#allocation14_spill] sm:$0xff]  ;;  %v3389_v45 = vcombine.high %v17234_v60, %v17234_v60  ;;  %v3445_v42 = vcombine.high %v14547_v33, %v14547_v33 }
  0xa4   : > { %21096 = vst [vmem:[#allocation9_spill] sm:$0xff] %v17223_v54  ;;  %v2913_v48 = vcombine.low %v16708_v1, %v21099_v58  ;;  %v17283_v1 = vcombine.high %v17128_v5, %v17128_v5 }
  0xa5   : > { %v17309_v6 = vshll.u32 %v3389_v45, 16  ;;  %v2880_v47 = vrot.slane %v2864_v53, %v16370_v18  ;;  %v15788_v45 = vld [vmem:[%s21047_s1 + $0x188] ss:$8 sps:$4 sm:$0xff]   ;;  %v17331_v53 = vrot.slane %v3445_v42, %v16370_v18 }
  0xa7   : > { %14478 = vmatmul.mubr.msk.bf16.gmra.mrb[20].mxu0 %vm1641_vm2, %v2064_v39  ;;  %v2805_v39 = vrot.slane %v2797_v44, %v16370_v18  ;;  %v14546_v44 = vld.sshfl [vmem:[%s16350_s20 + $0x14] sm:$0x33 pattern:$0x75316420]  ;;  %21105 = vst [vmem:[#allocation12_spill] sm:$0xff] %v17331_v53 }
  0xa8   : > { %2283 = vmatprep.mubr.bf16.mxu0 %v21093_v56  ;;  %v3421_v51 = vcombine.high %v14546_v44, %v14546_v44 }
  0xa9   : > { %v2813_v52 = vcombine.low %v2805_v39, %v2812_v26  ;;  %v2914_v39 = vcombine.low %v21101_v0, %v21100_v4  ;;  %v17268_v26 = vrot.slane %v3374_v59, %v16370_v18  ;;  %v17286_v0 = vrot.slane %v14546_v44, %v16370_v18  ;;  %v15785_v59 = vld [vmem:[%s21047_s1 + $0x178] ss:$8 sps:$4 sm:$0xff]   ;;  %v15790_v44 = vld [vmem:[%s21047_s1 + $0x18c] ss:$8 sps:$4 sm:$0xff]  }
  0xaa   : > { %v17279_v22 = vrot.slane %v3421_v51, %v16370_v18  ;;  %v2929_v4 = vrot.slane %v2913_v48, %v16370_v18  ;;  %v15793_v48 = vld [vmem:[%s21047_s1 + $0x19c] ss:$8 sps:$4 sm:$0xff]  }
  0xaf   : > { %14479 = vmatmul.mubr.msk.bf16.gmra.mrb[24].mxu0 %vm1641_vm2, %v2088_v34  ;;  %v2764_v34 = vcombine.low %v17193_v28, %v17196_v13  ;;  %v21098_v28 = vld [vmem:[#allocation11_spill] sm:$0xff] }
  0xb0   : > { %3168 = vmatprep.mubr.bf16.mxu0 %v21093_v56  ;;  %v2912_v13 = vcombine.low %v21098_v28, %v16704_v62  ;;  %v2865_v62 = vcombine.low %v17223_v54, %v16637_v49  ;;  %v17276_v28 = vcombine.high %v17125_v40, %v17125_v40  ;;  %v21102_v40 = vld [vmem:[#allocation15_spill] sm:$0xff] }
  0xb1   : > { %v2915_v58 = vcombine.low %v21102_v40, %v17080_v24  ;;  %v17306_v40 = vcombine.high %v17286_v0, %v17286_v0 }
  0xb2   : > { %v2922_v49 = vrot.slane %v2912_v13, %v16370_v18  ;;  %v17315_v13 = vcombine.high %v17279_v22, %v17279_v22  ;;  %v2887_v51 = vrot.slane %v2865_v62, %v16370_v18 }
  0xb3   : > { %v17352_v15 = vrot.slane %v2915_v58, %v16370_v18  ;;  %v17368_v58 = vrot.slane %v14548_v21, %v16370_v18 }
  0xb4   : > { %21103 = vst [vmem:[#allocation10_spill] sm:$0xff] %v17315_v13  ;;  %v2944_v42 = vcombine.low %v2922_v49, %v2929_v4  ;;  %v15799_v49 = vld [vmem:[%s21047_s1 + $0x1bc] ss:$8 sps:$4 sm:$0xff]  }
  0xb6   : > { %v17395_v4 = vrot.slane %v2944_v42, %v16370_v18  ;;  %v3683_v42 = vsel %vm16418_vm15, %v3676_v23, %v3681_v55  ;;  %v21112_v55 = vshll.u32 %v17043_v25, 16 }
  0xb7   : > { %14534 = vmatmul.mubr.msk.bf16.vlgmr.msra.gmra.mrb[0].mxu0 %vm1641_vm2, %v2764_v34  ;;  %v3516_v34 = vcombine.high %v14550_v3, %v14550_v3 }
  0xb8   : > { %4532 = vmatpush1.bf16.msra.mxu0 %v15782_v30  ;;  %3178 = vmatprep.mubr.bf16.mxu0 %v21093_v56  ;;  %v17349_v30 = vrot.slane %v2914_v39, %v16370_v18  ;;  %v17365_v39 = vcombine.high %v17331_v53, %v17331_v53 }
  0xb9   : > { %4533 = vmatprep.subr.bf16.mxu0 %v15787_v46  ;;  %v17328_v46 = vrot.slane %v14547_v33, %v16370_v18  ;;  %v2894_v33 = vrot.slane %v2866_v35, %v16370_v18  ;;  %v3469_v35 = vcombine.high %v14548_v21, %v14548_v21  ;;  %v17379_v21 = vcombine.high %v17368_v58, %v17368_v58 }
  0xba   : > { %21107 = vst [vmem:[#allocation13_spill] sm:$0xff] %v17365_v39  ;;  %v21153_v29 = vshll.u32 %v17365_v39, 16 }
  0xbb   : > { %21104 = vst [vmem:[#allocation11_spill] sm:$0xff] %v17328_v46  ;;  %v17356_v62 = vcombine.high %v17328_v46, %v17328_v46  ;;  %v2896_v37 = vcombine.low %v2887_v51, %v2894_v33  ;;  %21108 = vst [vmem:[#allocation15_spill] sm:$0xff] %v17379_v21  ;;  %v14551_v51 = vld.sshfl [vmem:[%s16350_s20 + $0x28] sm:$0x33 pattern:$0x75316420] }
  0xbc   : > { %4534 = vmatpush1.bf16.msra.mxu0 %v15785_v59  ;;  %v2895_v59 = vcombine.low %v17254_v31, %v2880_v47  ;;  %v17413_v47 = vrot.slane %v14550_v3, %v16370_v18 }
  0xbd   : > { %4535 = vmatprep.subr.bf16.mxu0 %v15790_v44  ;;  %21106 = vst [vmem:[#allocation14_spill] sm:$0xff] %v17356_v62  ;;  %v15796_v44 = vld [vmem:[%s21047_s1 + $0x1ac] ss:$8 sps:$4 sm:$0xff]  }
  0xbe   : > { %v17392_v33 = vrot.slane %v2895_v59, %v16370_v18  ;;  %v21119_v59 = vshrl.u32 %v17066_v19, 16 }
  0xbf   : > { %14535 = vmatmul.mubr.msk.bf16.gmra.mrb[4].mxu0 %vm1641_vm2, %v2813_v52  ;;  %v2862_v52 = vcombine.low %v17242_v57, %v17245_v11  ;;  %v15794_v11 = vld [vmem:[%s21047_s1 + $0x1a8] ss:$8 sps:$4 sm:$0xff]   ;;  %v2945_v57 = vcombine.low %v17349_v30, %v17352_v15  ;;  %v2910_v30 = vrot.slane %v2896_v37, %v16370_v18  ;;  %v21110_v15 = vshll.u32 %v17062_v8, 16 }
  0xc0   : > { %3188 = vmatprep.mubr.bf16.mxu0 %v21093_v56  ;;  %4536 = vmatpush1.bf16.msra.mxu0 %v15788_v45  ;;  %v21111_v37 = vshrl.u32 %v17045_v36, 16  ;;  %v21114_v45 = vshll.u32 %v17048_v17, 16  ;;  %v21115_v36 = vshrl.u32 %v17043_v25, 16 }
  0xc1   : > { %4537 = vmatprep.subr.bf16.mxu0 %v15793_v48  ;;  %v17389_v48 = vrot.slane %v3469_v35, %v16370_v18  ;;  %v14552_v35 = vld.sshfl [vmem:[%s16350_s20 + $0x2c] sm:$0x13 pattern:$0x75316420] }
  0xc2   : > { %v3691_v23 = vsel %vm16418_vm15, %v21111_v37, %v21110_v15  ;;  %v3707_v15 = vsel %vm16418_vm15, %v21115_v36, %v21114_v45  ;;  %v21116_v37 = vshll.u32 %v17066_v19, 16  ;;  %v21120_v45 = vshll.u32 %v17069_v38, 16 }
  0xc3   : > { %21109 = vst [vmem:[#allocation17_spill] sm:$0xff] %v17389_v48  ;;  %v21121_v36 = vshrl.u32 %v17075_v16, 16  ;;  %v2959_v19 = vrot.slane %v2945_v57, %v16370_v18 }
  0xc4   : > { %4538 = vmatpush1.bf16.msra.mxu0 %v15791_v14  ;;  %v17416_v14 = vrot.slane %v3516_v34, %v16370_v18  ;;  %v15802_v34 = vld [vmem:[%s21047_s1 + $0x1cc] ss:$8 sps:$4 sm:$0xff]  }
  0xc5   : > { %4539 = vmatprep.subr.bf16.mxu0 %v15796_v44  ;;  %v21113_v44 = vshrl.u32 %v17062_v8, 16  ;;  %v21117_v8 = vshrl.u32 %v17048_v17, 16  ;;  %v3731_v17 = vsel %vm16418_vm15, %v21121_v36, %v21120_v45  ;;  %v2911_v45 = vcombine.low %v17392_v33, %v2910_v30 }
  0xc6   : > { %v4111_v36 = vcombine.low %v3683_v42, %v3691_v23  ;;  %v21138_v42 = vshrl.u32 %v17283_v1, 16 }
  0xc7   : > { %14536 = vmatmul.mubr.msk.bf16.gmra.mrb[8].mxu0 %vm1641_vm2, %v2862_v52  ;;  %v3699_v3 = vsel %vm16418_vm15, %v21113_v44, %v21112_v55  ;;  %v3715_v55 = vsel %vm16418_vm15, %v21117_v8, %v21116_v37  ;;  %v21122_v37 = vshll.u32 %v17088_v2, 16  ;;  %v21123_v8 = vshrl.u32 %v17069_v38, 16 }
  0xc8   : > { %3198 = vmatprep.mubr.bf16.mxu0 %v21093_v56  ;;  %4540 = vmatpush1.bf16.msra.mxu0 %v15794_v11  ;;  %v21118_v11 = vshll.u32 %v17075_v16, 16  ;;  %v3540_v44 = vcombine.high %v14551_v51, %v14551_v51  ;;  %v17485_v16 = vcombine.high %v17413_v47, %v17413_v47  ;;  %v17492_v38 = vrot.slane %v14551_v51, %v16370_v18 }
  0xc9   : > { %4541 = vmatprep.subr.bf16.mxu0 %v15799_v49  ;;  %v3739_v49 = vsel %vm16418_vm15, %v21123_v8, %v21122_v37  ;;  %v3564_v37 = vcombine.high %v14552_v35, %v14552_v35  ;;  %v14639_v8 = vcombine.high %v17174_v7, %v17174_v7  ;;  %v4112_v52 = vcombine.low %v3699_v3, %v3707_v15 }
  0xca   : > { %v3723_v25 = vsel %vm16418_vm15, %v21119_v59, %v21118_v11  ;;  %v15800_v59 = vld [vmem:[%s21047_s1 + $0x1c8] ss:$8 sps:$4 sm:$0xff]   ;;  %v17489_v11 = vcombine.high %v17416_v14, %v17416_v14  ;;  %v17496_v57 = vrot.slane %v3540_v44, %v16370_v18  ;;  %v4114_v54 = vcombine.low %v3731_v17, %v3739_v49 }
  0xcb   : > { %v4113_v31 = vcombine.low %v3715_v55, %v3723_v25  ;;  %v17504_v33 = vcombine.high %v17492_v38, %v17492_v38  ;;  %v17516_v3 = vrot.slane %v4111_v36, %v16370_v18  ;;  %v17522_v15 = vrot.slane %v3564_v37, %v16370_v18  ;;  %v14554_v36 = vld.sshfl [vmem:[%s16350_s20 + $0x34] sm:$0x33 pattern:$0x75316420] }
  0xcc   : > { %4542 = vmatpush1.bf16.msra.mxu0 %v15797_v32  ;;  %v17508_v30 = vcombine.high %v17496_v57, %v17496_v57  ;;  %v17528_v25 = vrot.slane %v4112_v52, %v16370_v18  ;;  %v17531_v17 = vrot.slane %v14552_v35, %v16370_v18  ;;  %v4142_v35 = vrot.slane %v4114_v54, %v16370_v18  ;;  %v14555_v54 = vld.sshfl [vmem:[%s16350_s20 + $0x38] sm:$0x33 pattern:$0x75316420] }
  0xcd   : > { %4543 = vmatprep.subr.bf16.mxu0 %v15802_v34  ;;  %v15807_v34 = vld [vmem:[%s21047_s1 + $0x1e4] ss:$8 sps:$4 sm:$0xff]   ;;  %v4135_v44 = vrot.slane %v4113_v31, %v16370_v18  ;;  %v2960_v32 = vcombine.low %v17395_v4, %v2959_v19  ;;  %v17553_v31 = vcombine.high %v17083_v27, %v17083_v27  ;;  %v3611_v49 = vcombine.high %v14554_v36, %v14554_v36 }
  0xce   : > { %v4143_v4 = vcombine.low %v17516_v3, %v17528_v25  ;;  %v21126_v27 = vshll.u32 %v17119_v61, 16  ;;  %v21127_v37 = vshrl.u32 %v17092_v43, 16  ;;  %v21128_v52 = vshll.u32 %v17234_v60, 16 }
  0xcf   : > { %14537 = vmatmul.mubr.msk.bf16.gmra.mrb[12].mxu0 %vm1641_vm2, %v2911_v45  ;;  %v17557_v45 = vrot.slane %v14554_v36, %v16370_v18  ;;  %v4144_v19 = vcombine.low %v4135_v44, %v4142_v35  ;;  %v21129_v3 = vshrl.u32 %v17119_v61, 16  ;;  %v21131_v25 = vshrl.u32 %v17234_v60, 16 }
  0xd0   : > { %3208 = vmatprep.mubr.bf16.mxu0 %v21093_v56  ;;  %4544 = vmatpush1.bf16.msra.mxu0 %v15800_v59  ;;  %v3579_v59 = vcombine.high %v17531_v17, %v17531_v17  ;;  %v3755_v36 = vsel %vm16418_vm15, %v21127_v37, %v21126_v27  ;;  %v21132_v61 = vshrl.u32 %v17268_v26, 16  ;;  %v21135_v35 = vshll.u32 %v17283_v1, 16 }
  0xd1   : > { %14640 = vmatprep.subr.msk.bf16.mxu0 %vm1663_vm0, %v14639_v8  ;;  %v21124_v8 = vshll.u32 %v17092_v43, 16  ;;  %v3763_v44 = vsel %vm16418_vm15, %v21129_v3, %v21128_v52  ;;  %v21130_v43 = vshll.u32 %v17268_v26, 16  ;;  %v21136_v55 = vshrl.u32 %v17276_v28, 16 }
  0xd2   : > { %v3779_v52 = vsel %vm16418_vm15, %v21132_v61, %v17309_v6  ;;  %v17619_v61 = vrot.slane %v14555_v54, %v16370_v18  ;;  %v21145_v1 = vshll.u32 %v17315_v13, 16  ;;  %v21150_v3 = vshrl.u32 %v17328_v46, 16 }
  0xd3   : > { %v3771_v37 = vsel %vm16418_vm15, %v21131_v25, %v21130_v43  ;;  %v17612_v25 = vcombine.high %v17557_v45, %v17557_v45  ;;  %v3796_v23 = vsel %vm16418_vm15, %v21136_v55, %v21135_v35  ;;  %v21147_v35 = vshll.u32 %v17328_v46, 16  ;;  %v15810_v46 = vld [vmem:[%s21047_s1 + $0x1f4] ss:$8 sps:$4 sm:$0xff]  }
  0xd4   : > { %4546 = vmatpush1.bf16.msra.mxu0 %v17203_v12  ;;  %v21125_v12 = vshrl.u32 %v17088_v2, 16  ;;  %v17582_v2 = vcombine.high %v17080_v24, %v17080_v24  ;;  %v4161_v7 = vcombine.low %v3763_v44, %v3771_v37  ;;  %v21140_v37 = vcombine.low %v17144_v63, %v17154_v20 }
  0xd5   : > { %5506 = vmatprep.subr.bf16.mxu0 %v15807_v34 }
  0xd6   : > { %v3747_v34 = vsel %vm16418_vm15, %v21125_v12, %v21124_v8  ;;  %v17600_v8 = vshll.u32 %v3579_v59, 16  ;;  %v21134_v12 = vshrl.u32 %v17128_v5, 16  ;;  %v3635_v59 = vcombine.high %v14555_v54, %v14555_v54 }
  0xd7   : > { %14538 = vmatmul.mubr.msk.bf16.gmra.mrb[16].mxu0 %vm1641_vm2, %v2960_v32  ;;  %v17585_v32 = vrot.slane %v3611_v49, %v16370_v18  ;;  %v21133_v49 = vshll.u32 %v17276_v28, 16  ;;  %v21137_v54 = vshll.u32 %v17286_v0, 16  ;;  %v4160_v43 = vcombine.low %v3747_v34, %v3755_v36 }
  0xd8   : > { %3218 = vmatprep.mubr.bf16.mxu0 %v21093_v56  ;;  %v17644_v55 = vrot.slane %v3635_v59, %v16370_v18  ;;  %v17654_v34 = vcombine.high %v17619_v61, %v17619_v61  ;;  %v21143_v28 = vshll.u32 %v17306_v40, 16 }
  0xd9   : > { %v3788_v27 = vsel %vm16418_vm15, %v21134_v12, %v21133_v49  ;;  %v17616_v6 = vcombine.high %v17585_v32, %v17585_v32  ;;  %v3804_v5 = vsel %vm16418_vm15, %v21138_v42, %v21137_v54  ;;  %v14556_v49 = vld.sshfl [vmem:[%s16350_s20 + $0x3c] sm:$0x13 pattern:$0x75316420]  ;;  %v21139_v42 = vcombine.low %v17141_v50, %v17151_v9 }
  0xda   : > { %v4162_v51 = vcombine.low %v3779_v52, %v3788_v27  ;;  %v4163_v54 = vcombine.low %v3796_v23, %v3804_v5  ;;  %v3033_v52 = vrot.slane %v21140_v37, %v16370_v18  ;;  %v4151_v50 = vrot.slane %v4143_v4, %v16370_v18  ;;  %v17680_v4 = vld [vmem:[%s21047_s1 + $0x250] sm:$0xff] }
  0xdb   : > { %v17666_v9 = vcombine.high %v17644_v55, %v17644_v55  ;;  %v4158_v23 = vrot.slane %v4144_v19, %v16370_v18  ;;  %v4170_v27 = vrot.slane %v4160_v43, %v16370_v18  ;;  %v3659_v59 = vcombine.high %v14556_v49, %v14556_v49 }
  0xdc   : > { %v17671_v5 = vrot.slane %v14556_v49, %v16370_v18  ;;  %v4184_v44 = vrot.slane %v4162_v51, %v16370_v18  ;;  %v4191_v19 = vrot.slane %v4163_v54, %v16370_v18  ;;  %v21141_v51 = vshll.u32 %v17279_v22, 16 }
  0xdd   : > { %v17685_v49 = vrot.slane %v3659_v59, %v16370_v18  ;;  %v21142_v37 = vshrl.u32 %v17286_v0, 16  ;;  %v21146_v54 = vshrl.u32 %v17306_v40, 16  ;;  %v21149_v59 = vshll.u32 %v17331_v53, 16 }
  0xde   : > { %v17696_v63 = vcombine.high %v17671_v5, %v17671_v5  ;;  %v21155_v12 = vshll.u32 %v17368_v58, 16 }
  0xdf   : > { %14539 = vmatmul.mubr.msk.bf16.gmra.mrb[20].mxu0 %vm1641_vm2, %v21139_v42  ;;  %v4177_v42 = vrot.slane %v4161_v7, %v16370_v18  ;;  %v3812_v20 = vsel %vm16418_vm15, %v21142_v37, %v21141_v51  ;;  %v21144_v51 = vshrl.u32 %v17279_v22, 16  ;;  %v3828_v43 = vsel %vm16418_vm15, %v21146_v54, %v21145_v1 }
  0xe0   : > { %3228 = vmatprep.mubr.bf16.mxu0 %v21093_v56  ;;  %v21148_v7 = vshrl.u32 %v17315_v13, 16  ;;  %v21152_v1 = vshrl.u32 %v17331_v53, 16 }
  0xe1   : > { %v3820_v37 = vsel %vm16418_vm15, %v21144_v51, %v21143_v28  ;;  %v3844_v28 = vsel %vm16418_vm15, %v21150_v3, %v21149_v59  ;;  %v21151_v51 = vshll.u32 %v17356_v62, 16  ;;  %v21156_v3 = vshrl.u32 %v17365_v39, 16 }
  0xe2   : > { %v3836_v36 = vsel %vm16418_vm15, %v21148_v7, %v21147_v35  ;;  %v21154_v35 = vshrl.u32 %v17356_v62, 16  ;;  %v14701_v59 = vcombine.low %v17680_v4, %v17680_v4  ;;  %v4209_v53 = vcombine.low %v3812_v20, %v3820_v37  ;;  %v15808_v20 = vld [vmem:[%s21047_s1 + $0x1f0] ss:$8 sps:$4 sm:$0xff]  }
  0xe3   : > { %v3852_v54 = vsel %vm16418_vm15, %v21152_v1, %v21151_v51  ;;  %v4192_v51 = vcombine.low %v4170_v27, %v4177_v42  ;;  %v4193_v1 = vcombine.low %v4184_v44, %v4191_v19 }
  0xe4   : > { %v3860_v7 = vsel %vm16418_vm15, %v21154_v35, %v21153_v29  ;;  %v17752_v13 = vsel %vm1663_vm0, %v14701_v59, 0  ;;  %v15805_v29 = vld [vmem:[%s21047_s1 + $0x1e0] ss:$8 sps:$4 sm:$0xff]   ;;  %v4210_v35 = vcombine.low %v3828_v43, %v3836_v36  ;;  %v4211_v39 = vcombine.low %v3844_v28, %v3852_v54 }
  0xe5   : > { %v4200_v44 = vrot.slane %v4192_v51, %v16370_v18  ;;  %v4207_v27 = vrot.slane %v4193_v1, %v16370_v18  ;;  %v4219_v42 = vrot.slane %v4209_v53, %v16370_v18  ;;  %v21158_v43 = vshrl.u32 %v17368_v58, 16  ;;  %v15813_v53 = vld [vmem:[%s21047_s1 + $0x204] ss:$8 sps:$4 sm:$0xff]   ;;  %v21164_v1 = vld [vmem:[#allocation9_spill] sm:$0xff] }
  0xe6   : > { %v4226_v19 = vrot.slane %v4210_v35, %v16370_v18  ;;  %v4233_v36 = vrot.slane %v4211_v39, %v16370_v18  ;;  %v21159_v28 = vshll.u32 %v17379_v21, 16  ;;  %v21160_v54 = vshrl.u32 %v17389_v48, 16 }
  0xe7   : > { %14540 = vmatmul.mubr.msk.bf16.gmra.mrb[24].mxu0 %vm1641_vm2, %v3033_v52  ;;  %v3868_v52 = vsel %vm16418_vm15, %v21156_v3, %v21155_v12  ;;  %v4159_v3 = vcombine.low %v4151_v50, %v4158_v23  ;;  %v21157_v23 = vshll.u32 %v17389_v48, 16  ;;  %v21165_v35 = vshll.u32 %v21164_v1, 16 }
  0xe8   : > { %4563 = vmatprep.mubr.bf16.mxu0 %v21093_v56  ;;  %v4212_v12 = vcombine.low %v3860_v7, %v3868_v52  ;;  %v3884_v39 = vsel %vm16418_vm15, %v21160_v54, %v21159_v28  ;;  %v21161_v7 = vshll.u32 %v17219_v10, 16  ;;  %v21162_v52 = vld [vmem:[#allocation16_spill] sm:$0xff]  ;;  %v21169_v54 = vshll.u32 %v17416_v14, 16 }
  0xe9   : > { %v3876_v37 = vsel %vm16418_vm15, %v21158_v43, %v21157_v23  ;;  %v21163_v59 = vshrl.u32 %v21162_v52, 16  ;;  %v21167_v23 = vshll.u32 %v17413_v47, 16  ;;  %v21168_v43 = vshrl.u32 %v21164_v1, 16 }
  0xea   : > { %v4240_v50 = vrot.slane %v4212_v12, %v16370_v18  ;;  %v21166_v12 = vshrl.u32 %v17219_v10, 16  ;;  %v21171_v52 = vshll.u32 %v17485_v16, 16  ;;  %v4208_v62 = vcombine.low %v4200_v44, %v4207_v27 }
  0xeb   : > { %v3893_v51 = vsel %vm16418_vm15, %v21163_v59, %v21161_v7  ;;  %v3909_v28 = vsel %vm16418_vm15, %v21168_v43, %v21167_v23  ;;  %v21170_v7 = vshrl.u32 %v17413_v47, 16  ;;  %v21172_v59 = vshrl.u32 %v17416_v14, 16  ;;  %v15811_v23 = vld [vmem:[%s21047_s1 + $0x200] ss:$8 sps:$4 sm:$0xff]  }
  0xec   : > { %v4241_v43 = vcombine.low %v4219_v42, %v4226_v19  ;;  %v21177_v42 = vshll.u32 %v17496_v57, 16  ;;  %v21178_v19 = vshrl.u32 %v17492_v38, 16  ;;  %v21179_v27 = vshll.u32 %v17504_v33, 16 }
  0xed   : > { %v3917_v10 = vsel %vm16418_vm15, %v21170_v7, %v21169_v54  ;;  %v3925_v1 = vsel %vm16418_vm15, %v21172_v59, %v21171_v52  ;;  %v4242_v54 = vcombine.low %v4233_v36, %v4240_v50  ;;  %v4258_v7 = vcombine.low %v3876_v37, %v3884_v39  ;;  %v15816_v52 = vld [vmem:[%s21047_s1 + $0x214] ss:$8 sps:$4 sm:$0xff]  }
  0xee   : > { %v4260_v48 = vcombine.low %v3909_v28, %v3917_v10  ;;  %v3949_v44 = vsel %vm16418_vm15, %v21178_v19, %v21177_v42  ;;  %v21180_v36 = vshrl.u32 %v17496_v57, 16  ;;  %v21181_v50 = vshll.u32 %v17508_v30, 16  ;;  %v15814_v42 = vld [vmem:[%s21047_s1 + $0x210] ss:$8 sps:$4 sm:$0xff]  }
  0xef   : > { %14641 = vmatmul.mubr.msk.bf16.vlgmr.msra.gmra.mrb[0].mxu0 %vm1641_vm2, %v4159_v3  ;;  %v3901_v3 = vsel %vm16418_vm15, %v21166_v12, %v21165_v35  ;;  %v21173_v35 = vshll.u32 %v17489_v11, 16  ;;  %v21183_v39 = vshll.u32 %v17531_v17, 16  ;;  %v21185_v28 = vshll.u32 %v17522_v15, 16 }
  0xf0   : > { %5507 = vmatpush1.bf16.msra.mxu0 %v15805_v29  ;;  %4573 = vmatprep.mubr.bf16.mxu0 %v21093_v56  ;;  %v21174_v29 = vshrl.u32 %v17485_v16, 16  ;;  %v4259_v59 = vcombine.low %v3893_v51, %v3901_v3  ;;  %v21175_v16 = vshll.u32 %v17492_v38, 16  ;;  %v21184_v51 = vshrl.u32 %v17508_v30, 16 }
  0xf1   : > { %5508 = vmatprep.subr.bf16.mxu0 %v15810_v46  ;;  %v21176_v46 = vshrl.u32 %v17489_v11, 16  ;;  %v21182_v11 = vshrl.u32 %v17504_v33, 16  ;;  %v21186_v10 = vshrl.u32 %v17531_v17, 16  ;;  %v21187_v33 = vshrl.u32 %v17522_v15, 16 }
  0xf2   : > { %v3933_v12 = vsel %vm16418_vm15, %v21174_v29, %v21173_v35  ;;  %v3973_v3 = vsel %vm16418_vm15, %v21184_v51, %v21183_v39  ;;  %v21188_v29 = vshll.u32 %v17553_v31, 16  ;;  %v21189_v30 = vshrl.u32 %v17080_v24, 16 }
  0xf3   : > { %v4261_v21 = vcombine.low %v3925_v1, %v3933_v12  ;;  %v3941_v35 = vsel %vm16418_vm15, %v21176_v46, %v21175_v16  ;;  %v3965_v37 = vsel %vm16418_vm15, %v21182_v11, %v21181_v50  ;;  %v3981_v1 = vsel %vm16418_vm15, %v21186_v10, %v21185_v28 }
  0xf4   : > { %5509 = vmatpush1.bf16.msra.mxu0 %v15808_v20  ;;  %v3957_v20 = vsel %vm16418_vm15, %v21180_v36, %v21179_v27  ;;  %v3998_v12 = vsel %vm16418_vm15, %v21189_v30, %v21188_v29  ;;  %v4249_v16 = vrot.slane %v4241_v43, %v16370_v18  ;;  %v4256_v46 = vrot.slane %v4242_v54, %v16370_v18  ;;  %v15819_v43 = vld [vmem:[%s21047_s1 + $0x224] ss:$8 sps:$4 sm:$0xff]  }
  0xf5   : > { %5510 = vmatprep.subr.bf16.mxu0 %v15813_v53  ;;  %v3989_v53 = vsel %vm16418_vm15, %v21187_v33, %v17600_v8  ;;  %v4268_v19 = vrot.slane %v4258_v7, %v16370_v18  ;;  %v4275_v8 = vrot.slane %v4259_v59, %v16370_v18  ;;  %v4282_v27 = vrot.slane %v4260_v48, %v16370_v18 }
  0xf6   : > { %v4289_v24 = vrot.slane %v4261_v21, %v16370_v18  ;;  %v4307_v36 = vcombine.low %v3941_v35, %v3949_v44  ;;  %v4308_v54 = vcombine.low %v3957_v20, %v3965_v37  ;;  %v4309_v50 = vcombine.low %v3973_v3, %v3981_v1  ;;  %v15822_v21 = vld [vmem:[%s21047_s1 + $0x234] ss:$8 sps:$4 sm:$0xff]  }
  0xf7   : > { %14642 = vmatmul.mubr.msk.bf16.gmra.mrb[4].mxu0 %vm1641_vm2, %v4208_v62  ;;  %v4310_v11 = vcombine.low %v3989_v53, %v3998_v12  ;;  %v15817_v62 = vld [vmem:[%s21047_s1 + $0x220] ss:$8 sps:$4 sm:$0xff]   ;;  %v4257_v7 = vcombine.low %v4249_v16, %v4256_v46  ;;  %v4290_v48 = vcombine.low %v4268_v19, %v4275_v8  ;;  %v21190_v20 = vshll.u32 %v17582_v2, 16 }
  0xf8   : > { %4583 = vmatprep.mubr.bf16.mxu0 %v21093_v56  ;;  %5511 = vmatpush1.bf16.msra.mxu0 %v15811_v23  ;;  %v4291_v59 = vcombine.low %v4282_v27, %v4289_v24  ;;  %v4317_v35 = vrot.slane %v4307_v36, %v16370_v18  ;;  %v4324_v23 = vrot.slane %v4308_v54, %v16370_v18  ;;  %v21191_v37 = vshrl.u32 %v17553_v31, 16 }
  0xf9   : > { %5512 = vmatprep.subr.bf16.mxu0 %v15816_v52  ;;  %v4331_v44 = vrot.slane %v4309_v50, %v16370_v18  ;;  %v4338_v52 = vrot.slane %v4310_v11, %v16370_v18  ;;  %v21192_v51 = vshll.u32 %v17557_v45, 16  ;;  %v21193_v3 = vshrl.u32 %v17582_v2, 16  ;;  %v15820_v2 = vld [vmem:[%s21047_s1 + $0x230] ss:$8 sps:$4 sm:$0xff]  }
  0xfa   : > { %v4006_v39 = vsel %vm16418_vm15, %v21191_v37, %v21190_v20  ;;  %v21194_v10 = vshll.u32 %v17585_v32, 16  ;;  %v21195_v1 = vshrl.u32 %v17557_v45, 16  ;;  %v21196_v53 = vshll.u32 %v17612_v25, 16  ;;  %v15825_v20 = vld [vmem:[%s21047_s1 + $0x244] ss:$8 sps:$4 sm:$0xff]  }
  0xfb   : > { %v4014_v28 = vsel %vm16418_vm15, %v21193_v3, %v21192_v51  ;;  %v21197_v31 = vshrl.u32 %v17585_v32, 16  ;;  %v21198_v30 = vshll.u32 %v17616_v6, 16  ;;  %v21199_v12 = vshrl.u32 %v17612_v25, 16 }
  0xfc   : > { %5513 = vmatpush1.bf16.msra.mxu0 %v15814_v42  ;;  %v4022_v33 = vsel %vm16418_vm15, %v21195_v1, %v21194_v10  ;;  %v21200_v46 = vshll.u32 %v17619_v61, 16  ;;  %v21201_v42 = vshrl.u32 %v17616_v6, 16  ;;  %v21202_v8 = vshll.u32 %v17644_v55, 16 }
  0xfd   : > { %5514 = vmatprep.subr.bf16.mxu0 %v15819_v43  ;;  %v4030_v29 = vsel %vm16418_vm15, %v21197_v31, %v21196_v53  ;;  %v4038_v16 = vsel %vm16418_vm15, %v21199_v12, %v21198_v30  ;;  %v21203_v27 = vshrl.u32 %v17619_v61, 16  ;;  %v21204_v43 = vshll.u32 %v17654_v34, 16 }
  0xfe   : > { %v4046_v19 = vsel %vm16418_vm15, %v21201_v42, %v21200_v46  ;;  %v21205_v36 = vshrl.u32 %v17644_v55, 16  ;;  %v4298_v50 = vrot.slane %v4290_v48, %v16370_v18  ;;  %v4305_v11 = vrot.slane %v4291_v59, %v16370_v18  ;;  %v15823_v48 = vld [vmem:[%s21047_s1 + $0x240] ss:$8 sps:$4 sm:$0xff]  }
  0xff   : > { %v4054_v24 = vsel %vm16418_vm15, %v21203_v27, %v21202_v8  ;;  %14643 = vmatmul.mubr.msk.bf16.gmra.mrb[8].mxu0 %vm1641_vm2, %v4257_v7  ;;  %v4356_v37 = vcombine.low %v4006_v39, %v4014_v28  ;;  %v4357_v51 = vcombine.low %v4022_v33, %v4030_v29  ;;  %v4358_v3 = vcombine.low %v4038_v16, %v4046_v19  ;;  %v14650_v33 = vld.sshfl [vmem:[%s16350_s20 + $0x8] sm:$0x33 pattern:$0x75316420] }
 0x100   : > { %v4062_v54 = vsel %vm16418_vm15, %v21205_v36, %v21204_v43  ;;  %4593 = vmatprep.mubr.bf16.mxu0 %v21093_v56  ;;  %5515 = vmatpush1.bf16.msra.mxu0 %v15817_v62  ;;  %v4339_v7 = vcombine.low %v4317_v35, %v4324_v23  ;;  %v4340_v1 = vcombine.low %v4331_v44, %v4338_v52  ;;  %v14648_v35 = vld.sshfl [vmem:[%s16350_s20] sm:$0x22 pattern:$0x75316420]  ;;  %v21207_v30 = vshrl.u32 %v17654_v34, 16 }
 0x101   : > { %5516 = vmatprep.subr.bf16.mxu0 %v15822_v21  ;;  %v4359_v10 = vcombine.low %v4054_v24, %v4062_v54  ;;  %v4306_v59 = vcombine.low %v4298_v50, %v4305_v11  ;;  %v4366_v53 = vrot.slane %v4356_v37, %v16370_v18  ;;  %v4373_v62 = vrot.slane %v4357_v51, %v16370_v18  ;;  %v14649_v52 = vld.sshfl [vmem:[%s16350_s20 + $0x4] sm:$0x33 pattern:$0x75316420] }
 0x102   : > { %v4380_v39 = vrot.slane %v4358_v3, %v16370_v18  ;;  %v14702_v28 = vcombine.high %v17680_v4, %v17680_v4  ;;  %v4347_v23 = vrot.slane %v4339_v7, %v16370_v18  ;;  %v4354_v44 = vrot.slane %v4340_v1, %v16370_v18  ;;  %v14652_v8 = vld.sshfl [vmem:[%s16350_s20 + $0x10] sm:$0x22 pattern:$0x75316420] }
 0x103   : > { %v4387_v21 = vrot.slane %v4359_v10, %v16370_v18  ;;  %v4388_v31 = vcombine.low %v4366_v53, %v4373_v62  ;;  %v21206_v4 = vshll.u32 %v17666_v9, 16  ;;  %v21208_v16 = vshll.u32 %v17671_v5, 16 }
 0x104   : > { %5517 = vmatpush1.bf16.msra.mxu0 %v15820_v2  ;;  %v4355_v2 = vcombine.low %v4347_v23, %v4354_v44  ;;  %v21209_v46 = vshrl.u32 %v17666_v9, 16  ;;  %v4697_v19 = vcombine.high %v14648_v35, %v14648_v35  ;;  %v21210_v27 = vshll.u32 %v17685_v49, 16 }
 0x105   : > { %5518 = vmatprep.subr.bf16.mxu0 %v15825_v20  ;;  %v4389_v29 = vcombine.low %v4380_v39, %v4387_v21  ;;  %v4070_v12 = vsel %vm16418_vm15, %v21207_v30, %v21206_v4  ;;  %v21211_v24 = vshrl.u32 %v17671_v5, 16  ;;  %v21212_v36 = vshll.u32 %v17696_v63, 16 }
 0x106   : > { %v4078_v42 = vsel %vm16418_vm15, %v21209_v46, %v21208_v16  ;;  %v21213_v54 = vshrl.u32 %v17685_v49, 16  ;;  %v4721_v11 = vcombine.high %v14649_v52, %v14649_v52  ;;  %v4745_v20 = vcombine.high %v14650_v33, %v14650_v33 }
 0x107   : > { %14644 = vmatmul.mubr.msk.bf16.gmra.mrb[12].mxu0 %vm1641_vm2, %v4306_v59  ;;  %v4086_v43 = vsel %vm16418_vm15, %v21211_v24, %v21210_v27  ;;  %v4396_v37 = vrot.slane %v4388_v31, %v16370_v18  ;;  %v4403_v51 = vrot.slane %v4389_v29, %v16370_v18  ;;  %v4405_v3 = vcombine.low %v4070_v12, %v4078_v42 }
 0x108   : > { %4603 = vmatprep.mubr.bf16.mxu0 %v21093_v56  ;;  %5519 = vmatpush1.bf16.msra.mxu0 %v15823_v48  ;;  %v4094_v50 = vsel %vm16418_vm15, %v21213_v54, %v21212_v36  ;;  %v4704_v7 = vrot.slane %v14648_v35, %v16370_v18  ;;  %v4711_v1 = vrot.slane %v4697_v19, %v16370_v18  ;;  %vm18130_vm15 = vmor %vm5923_vm10, %vm5924_vm9  ;;  %vm7375_vm10 = vcmask 1045509  }
 0x109   : > { %14703 = vmatprep.subr.msk.bf16.mxu0 %vm1663_vm0, %v14702_v28  ;;  %v4406_v10 = vcombine.low %v4086_v43, %v4094_v50  ;;  %v4728_v48 = vrot.slane %v14649_v52, %v16370_v18  ;;  %v4735_v41 = vrot.slane %v4721_v11, %v16370_v18  ;;  %v4759_v59 = vrot.slane %v4745_v20, %v16370_v18  ;;  %v14656_v11 = vld.sshfl [vmem:[%s16350_s20 + $0x20] sm:$0x22 pattern:$0x75316420] }
 0x10a   : > { %v4792_v53 = vcombine.high %v14652_v8, %v14652_v8  ;;  %v4404_v62 = vcombine.low %v4396_v37, %v4403_v51  ;;  %v4413_v39 = vrot.slane %v4405_v3, %v16370_v18  ;;  %v14679_v28 = vcombine.high %v4704_v7, %v4711_v1  ;;  %v21214_v20 = vld [vmem:[#allocation11_spill] sm:$0xff]  ;;  %v21215_v37 = vld [vmem:[#allocation10_spill] sm:$0xff]  ;;  %v21218_v1 = vld [vmem:[#allocation13_spill] sm:$0xff] }
 0x10b   : > { %v4420_v21 = vrot.slane %v4406_v10, %v16370_v18  ;;  %v5087_v35 = vcombine.low %v4728_v48, %v4735_v41  ;;  %v14680_v23 = vcombine.high %v4728_v48, %v4735_v41  ;;  %v5136_v46 = vcombine.low %v17234_v60, %v17268_v26  ;;  %v21216_v3 = vld [vmem:[#allocation14_spill] sm:$0xff]  ;;  %v21217_v10 = vld [vmem:[#allocation12_spill] sm:$0xff] }
 0x10c   : > { %5521 = vmatpush1.bf16.msra.mxu0 %v17752_v13  ;;  %v4752_v13 = vrot.slane %v14650_v33, %v16370_v18  ;;  %v4806_v52 = vrot.slane %v4792_v53, %v16370_v18  ;;  %v5096_v29 = vrot.slane %v14679_v28, %v16370_v18  ;;  %v4799_v33 = vrot.slane %v14652_v8, %v16370_v18 }
 0x10d   : > { %8441 = vmatprep.subr.bf16.mxu0 %v21093_v56  ;;  %v4421_v31 = vcombine.low %v4413_v39, %v4420_v21  ;;  %v5110_v4 = vrot.slane %v14680_v23, %v16370_v18  ;;  %v5152_v36 = vrot.slane %v5136_v46, %v16370_v18  ;;  %v5185_v51 = vcombine.low %v21215_v37, %v21214_v20 }
 0x10e   : > { %v5089_v44 = vcombine.low %v4752_v13, %v4759_v59  ;;  %v4808_v12 = vcombine.high %v4806_v52, %v4806_v52  ;;  %v14681_v16 = vcombine.high %v4752_v13, %v4759_v59  ;;  %v14682_v42 = vcombine.high %v17234_v60, %v4799_v33  ;;  %v21219_v33 = vld [vmem:[#allocation15_spill] sm:$0xff] }
 0x10f   : > { %14645 = vmatmul.mubr.msk.bf16.gmra.mrb[16].mxu0 %vm1641_vm2, %v4355_v2  ;;  %v5103_v2 = vrot.slane %v5087_v35, %v16370_v18  ;;  %v4428_v19 = vrot.slane %v4421_v31, %v16370_v18  ;;  %v5186_v7 = vcombine.low %v21217_v10, %v21216_v3  ;;  %v5187_v48 = vcombine.low %v21218_v1, %v17368_v58 }
 0x110   : > { %4613 = vmatprep.mubr.bf16.mxu0 %v21093_v56  ;;  %v5117_v30 = vrot.slane %v5089_v44, %v16370_v18  ;;  %v5138_v24 = vcombine.low %v4808_v12, %v17286_v0  ;;  %v5145_v43 = vrot.slane %v14681_v16, %v16370_v18  ;;  %v5159_v26 = vrot.slane %v14682_v42, %v16370_v18  ;;  %v14660_v12 = vld.sshfl [vmem:[%s16350_s20 + $0x30] sm:$0x22 pattern:$0x75316420]  ;;  %s15382_s20 = sshll.u32 %s16296_s9, 6  ;;  %s16229_s9 = smov [#allocation5]  }
 0x111   : > { %v5118_v8 = vcombine.low %v5096_v29, %v5103_v2  ;;  %v5184_v0 = vcombine.low %v17279_v22, %v17306_v40  ;;  %v4887_v53 = vcombine.high %v14656_v11, %v14656_v11  ;;  %v5201_v39 = vrot.slane %v5185_v51, %v16370_v18  ;;  %v21220_v2 = vld [vmem:[#allocation17_spill] sm:$0xff]  ;;  %s16162_s17 = sshll.u32 %s16229_s9, 4  ;;  %s16163_s17 = int_to_ptr.vmem [resolvable:$false] %s16162_s17 }
 0x112   : > { %v5119_v27 = vcombine.low %v5110_v4, %v5117_v30  ;;  %v5166_v60 = vrot.slane %v5138_v24, %v16370_v18  ;;  %v5167_v13 = vcombine.low %v5145_v43, %v5152_v36  ;;  %v5208_v22 = vrot.slane %v5186_v7, %v16370_v18  ;;  %s16164_s18 = scalar_lea.vmem %s16163_s17, 128  ;;  %p16165_p0 = scmp.lt.s32.totalorder %s21001_s26, %s16163_s17 }
 0x113   : > { %v5126_v54 = vrot.slane %v5118_v8, %v16370_v18  ;;  %v5215_v40 = vrot.slane %v5187_v48, %v16370_v18  ;;  %v4894_v58 = vrot.slane %v14656_v11, %v16370_v18  ;;  %v4901_v35 = vrot.slane %v4887_v53, %v16370_v18  ;;  %p16166_p1 = scmp.lt.s32.totalorder %s16164_s18, %s16158_s13 }
 0x114   : > { %v5133_v50 = vrot.slane %v5119_v27, %v16370_v18  ;;  %v5168_v59 = vcombine.low %v5159_v26, %v5166_v60  ;;  %v5175_v21 = vrot.slane %v5167_v13, %v16370_v18  ;;  %v5235_v52 = vcombine.low %v17413_v47, %v17416_v14 }
 0x115   : > { %v5217_v44 = vcombine.low %v5208_v22, %v5215_v40  ;;  %v14684_v31 = vcombine.high %v17413_v47, %v17416_v14  ;;  %v5233_v4 = vcombine.low %v21220_v2, %v21219_v33  ;;  %v14683_v30 = vcombine.high %v4894_v58, %v4901_v35  ;;  %p16167_p2 = por %p16166_p1, %p16165_p0 }
 0x116   : > { %v5134_v41 = vcombine.low %v5126_v54, %v5133_v50  ;;  %v5182_v28 = vrot.slane %v5168_v59, %v16370_v18  ;;  %v5257_v42 = vrot.slane %v5235_v52, %v16370_v18  ;;  %v4982_v14 = vcombine.high %v14660_v12, %v14660_v12 }
 0x117   : > { %14646 = vmatmul.mubr.msk.bf16.gmra.mrb[20].mxu0 %vm1641_vm2, %v4404_v62  ;;  %v5194_v62 = vrot.slane %v5184_v0, %v16370_v18  ;;  %v5231_v46 = vrot.slane %v5217_v44, %v16370_v18  ;;  %v5243_v8 = vrot.slane %v5233_v4, %v16370_v18  ;;  %v5250_v47 = vrot.slane %v14683_v30, %v16370_v18  ;;  %p16168_p3 = pnand %p16167_p2, %p16161_p13 }
 0x118   : > { %4623 = vmatprep.mubr.bf16.mxu0 %v21093_v56  ;;  %v5183_v29 = vcombine.low %v5175_v21, %v5182_v28  ;;  %v4989_v27 = vrot.slane %v14660_v12, %v16370_v18  ;;  %v5282_v36 = vcombine.low %v17492_v38, %v17496_v57  ;;  %v14685_v54 = vcombine.high %v17492_v38, %v17496_v57 }
 0x119   : > { %v5216_v23 = vcombine.low %v5194_v62, %v5201_v39  ;;  %v5265_v50 = vcombine.low %v5243_v8, %v5250_v47  ;;  %v5284_v26 = vcombine.low %v17531_v17, %v17522_v15  ;;  %v4996_v11 = vrot.slane %v4982_v14, %v16370_v18 }
 0x11a   : > { %v14686_v60 = vcombine.high %v17531_v17, %v4989_v27  ;;  %v5292_v20 = vrot.slane %v5282_v36, %v16370_v18  ;;  %v5299_v37 = vrot.slane %v14685_v54, %v16370_v18  ;;  %v5332_v17 = vcombine.low %v17585_v32, %v17612_v25 }
 0x11b   : > { %v5224_v16 = vrot.slane %v5216_v23, %v16370_v18  ;;  %v5273_v51 = vrot.slane %v5265_v50, %v16370_v18  ;;  %v5306_v38 = vrot.slane %v5284_v26, %v16370_v18  ;;  %v4998_v3 = vcombine.high %v4996_v11, %v4996_v11 }
 0x11c   : > { %v5313_v57 = vrot.slane %v14686_v60, %v16370_v18  ;;  %v5314_v15 = vcombine.low %v5292_v20, %v5299_v37  ;;  %v5333_v10 = vcombine.low %v17616_v6, %v17619_v61  ;;  %v5348_v59 = vrot.slane %v5332_v17, %v16370_v18 }
 0x11d   : > { %v5232_v24 = vcombine.low %v5224_v16, %v5231_v46  ;;  %v5331_v48 = vcombine.low %v4998_v3, %v17557_v45  ;;  %v5380_v39 = vcombine.low %v17666_v9, %v17671_v5  ;;  %v5381_v22 = vcombine.low %v17685_v49, %v17696_v63 }
 0x11e   : > { %v5315_v1 = vcombine.low %v5306_v38, %v5313_v57  ;;  %v5322_v13 = vrot.slane %v5314_v15, %v16370_v18  ;;  %v5355_v25 = vrot.slane %v5333_v10, %v16370_v18  ;;  %v16224_v9 = vmov 1983009808  }
 0x11f   : > { %14647 = vmatmul.mubr.msk.bf16.gmra.mrb[24].mxu0 %vm1641_vm2, %v4428_v19  ;;  %v5264_v19 = vrot.slane %v14684_v31, %v16370_v18  ;;  %v5341_v32 = vrot.slane %v5331_v48, %v16370_v18  ;;  %v5388_v21 = vrot.slane %v5380_v39, %v16370_v18  ;;  %v5395_v28 = vrot.slane %v5381_v22, %v16370_v18  ;;  %v21221_v31 = vld [vmem:[#allocation8_spill] sm:$0xff] }
 0x120   : > { %5538 = vmatprep.mubr.bf16.mxu0 %v21093_v56  ;;  %v5329_v53 = vrot.slane %v5315_v1, %v16370_v18  ;;  %v5688_v5 = vunpack.c.l.s4 %v16224_v9  ;;  %v21222_v47 = vlaneseq }
 0x121   : > { %v5266_v43 = vcombine.low %v5257_v42, %v5264_v19  ;;  %v5363_v61 = vcombine.low %v5341_v32, %v5348_v59  ;;  %v5396_v58 = vcombine.low %v5388_v21, %v5395_v28 }
 0x122   : > { %v5330_v45 = vcombine.low %v5322_v13, %v5329_v53  ;;  %v5689_v23 = vunpack.c.0.s8 %v5688_v5  ;;  %vm18123_vm12 = vcmp.lt.s32.totalorder %v21222_v47, 208 }
 0x123   : > { %v5280_v0 = vrot.slane %v5266_v43, %v16370_v18  ;;  %v5403_v35 = vrot.slane %v5396_v58, %v16370_v18 }
 0x125   : > { %v5281_v7 = vcombine.low %v5273_v51, %v5280_v0 }
 0x127   : > { %14704 = vmatmul.mubr.msk.bf16.vlgmr.msra.gmra.mrb[0].mxu0 %vm1641_vm2, %v5134_v41  ;;  %v5334_v41 = vcombine.low %v17644_v55, %v17654_v34  ;;  %v5371_v55 = vrot.slane %v5363_v61, %v16370_v18 }
 0x128   : > { %5548 = vmatprep.mubr.bf16.mxu0 %v21093_v56 }
 0x129   : > { %v5362_v6 = vrot.slane %v5334_v41, %v16370_v18 }
 0x12b   : > { %v5364_v62 = vcombine.low %v5355_v25, %v5362_v6 }
 0x12d   : > { %v5378_v34 = vrot.slane %v5364_v62, %v16370_v18 }
 0x12f   : > { %14705 = vmatmul.mubr.msk.bf16.gmra.mrb[4].mxu0 %vm1641_vm2, %v5183_v29  ;;  %v5379_v40 = vcombine.low %v5371_v55, %v5378_v34  ;;  %v18115_v29 = vsub.s32 %v5689_v23, %v21221_v31 }
 0x130   : > { %5558 = vmatprep.mubr.bf16.mxu0 %v21093_v56 }
 0x137   : > { %14706 = vmatmul.mubr.msk.bf16.gmra.mrb[8].mxu0 %vm1641_vm2, %v5232_v24 }
 0x138   : > { %5568 = vmatprep.mubr.bf16.mxu0 %v21093_v56 }
 0x13f   : > { %14707 = vmatmul.mubr.msk.bf16.gmra.mrb[12].mxu0 %vm1641_vm2, %v5281_v7 }
 0x140   : > { %5578 = vmatprep.mubr.bf16.mxu0 %v21093_v56 }
 0x147   : > { %14708 = vmatmul.mubr.msk.bf16.gmra.mrb[16].mxu0 %vm1641_vm2, %v5330_v45 }
 0x148   : > { %5588 = vmatprep.mubr.bf16.mxu0 %v21093_v56 }
 0x14f   : > { %14709 = vmatmul.mubr.msk.bf16.gmra.mrb[20].mxu0 %vm1641_vm2, %v5379_v40 }
 0x150   : > { %5598 = vmatprep.mubr.bf16.mxu0 %v21093_v56 }
 0x157   : > { %14710 = vmatmul.mubr.msk.bf16.gmra.mrb[24].mxu0 %vm1641_vm2, %v5403_v35 }
 0x1fa   : > { %v5540_v63 = vpop.f32.mrb[0].mxu0 }
 0x1fb   : > { %v5633_v49 = vmax.f32 %v5540_v63, 0.0  ;;  %v5542_v44 = vpop.f32.mrb[1].mxu0 }
 0x1fc   : > { %v5634_v52 = vmax.f32 %v5542_v44, 0.0  ;;  %v5544_v33 = vpop.f32.mrb[2].mxu0 }
 0x1fd   : > { %v5635_v2 = vmax.f32 %v5544_v33, 0.0  ;;  %v5546_v4 = vpop.f32.mrb[3].mxu0 }
 0x1fe   : > { %v5685_v30 = vcombine.low %v5633_v49, %v5634_v52  ;;  %v5686_v12 = vcombine.high %v5633_v49, %v5634_v52  ;;  %v5636_v16 = vmax.f32 %v5546_v4, 0.0 }
 0x200   : > { %v5693_v46 = vrot.slane %v5685_v30, %v18115_v29  ;;  %v5700_v42 = vrot.slane %v5686_v12, %v18115_v29  ;;  %v5703_v19 = vcombine.low %v5635_v2, %v5636_v16  ;;  %v5704_v8 = vcombine.high %v5635_v2, %v5636_v16 }
 0x202   : > { %v5701_v27 = vcombine.high %v5693_v46, %v5693_v46  ;;  %v5702_v24 = vcombine.high %v5700_v42, %v5700_v42  ;;  %v14711_v43 = vrot.slane %v5693_v46, 9  ;;  %v5931_v36 = vrot.slane %v5700_v42, 7  ;;  %v18127_v54 = vpop.f32.mrb[4].mxu0 }
 0x203   : > { %v6080_v26 = vrot.slane %v5693_v46, %v16370_v18  ;;  %v5711_v60 = vrot.slane %v5703_v19, %v18115_v29  ;;  %v5718_v11 = vrot.slane %v5704_v8, %v18115_v29  ;;  %v5637_v0 = vmax.f32 %v18127_v54, 0.0  ;;  %v18138_v20 = vpop.f32.mrb[5].mxu0 }
 0x204   : > { %v5928_v37 = vrot.slane %v5701_v27, 7  ;;  %v5933_v51 = vrot.slane %v5931_v36, 2  ;;  %v5934_v38 = vrot.slane %v5702_v24, 7  ;;  %v5638_v57 = vmax.f32 %v18138_v20, 0.0  ;;  %v18141_v3 = vpop.f32.mrb[6].mxu0 }
 0x205   : > { %6110 = vst.msk [vmem:[#allocation2] ss:$8 sm:$0x3] %vm18123_vm12, %v6080_v26  ;;  %v5719_v15 = vcombine.high %v5711_v60, %v5711_v60  ;;  %v5720_v17 = vcombine.high %v5718_v11, %v5718_v11  ;;  %v5937_v10 = vrot.slane %v5711_v60, 7  ;;  %v5943_v7 = vrot.slane %v5718_v11, 7  ;;  %v18145_v1 = vpop.f32.mrb[7].mxu0 }
 0x206   : > { %v5929_v48 = vsel %vm18130_vm15, %v14711_v43, %v5928_v37  ;;  %v5930_v41 = vrot.slane %v5928_v37, 2  ;;  %v5935_v13 = vsel %vm18130_vm15, %v5933_v51, %v5934_v38  ;;  %v5936_v59 = vrot.slane %v5934_v38, 2 }
 0x207   : > { %v6127_v53 = vrot.slane %v5929_v48, %v18115_v29  ;;  %v6143_v32 = vrot.slane %v5935_v13, %v18115_v29  ;;  %v5939_v25 = vrot.slane %v5937_v10, 2  ;;  %v5940_v6 = vrot.slane %v5719_v15, 7 }
 0x208   : > { %v5932_v45 = vsel %vm18130_vm15, %v5930_v41, %v5931_v36  ;;  %v5938_v61 = vsel %vm18130_vm15, %v5936_v59, %v5937_v10  ;;  %v5945_v62 = vrot.slane %v5943_v7, 2  ;;  %v18157_v55 = vrot.slane %v5720_v17, 7 }
 0x209   : > { %v6128_v34 = vcombine.high %v6127_v53, %v6127_v53  ;;  %v6135_v39 = vrot.slane %v5932_v45, %v18115_v29  ;;  %v6144_v22 = vcombine.high %v6143_v32, %v6143_v32  ;;  %v6602_v40 = vsel %vm6601_vm13, %v6127_v53, -inf }
 0x20a   : > { %v6603_v21 = vrot.slane %v6602_v40, 4  ;;  %v6631_v28 = vsel %vm6601_vm13, %v6143_v32, -inf  ;;  %v5941_v58 = vsel %vm18130_vm15, %v5939_v25, %v5940_v6  ;;  %v5942_v35 = vrot.slane %v5940_v6, 2  ;;  %v18164_v9 = vpop.f32.mrb[8].mxu0 }
 0x20b   : > { %v6136_v5 = vcombine.high %v6135_v39, %v6135_v39  ;;  %v6610_v23 = vsel %vm6609_vm14, %v6128_v34, -inf  ;;  %v6617_v63 = vsel %vm6601_vm13, %v6135_v39, -inf  ;;  %v6632_v49 = vrot.slane %v6631_v28, 4  ;;  %v18168_v44 = vpop.f32.mrb[9].mxu0 }
 0x20c   : > { %v6604_v52 = vmax.f32 %v6602_v40, %v6603_v21  ;;  %v6611_v31 = vrot.slane %v6610_v23, 4  ;;  %v6618_v33 = vrot.slane %v6617_v63, 4  ;;  %v6638_v2 = vsel %vm6609_vm14, %v6144_v22, -inf  ;;  %v18171_v4 = vpop.f32.mrb[10].mxu0 }
 0x20d   : > { %v6624_v30 = vsel %vm6609_vm14, %v6136_v5, -inf  ;;  %v6633_v12 = vmax.f32 %v6631_v28, %v6632_v49  ;;  %v6639_v16 = vrot.slane %v6638_v2, 4  ;;  %v5944_v46 = vsel %vm18130_vm15, %v5942_v35, %v5943_v7  ;;  %v18176_v42 = vpop.f32.mrb[11].mxu0 }
 0x20e   : > { %v6605_v19 = vrot.slane %v6604_v52, 2  ;;  %v6612_v8 = vmax.f32 %v6610_v23, %v6611_v31  ;;  %v6619_v27 = vmax.f32 %v6617_v63, %v6618_v33  ;;  %v6625_v24 = vrot.slane %v6624_v30, 4 }
 0x20f   : > { %v6634_v43 = vrot.slane %v6633_v12, 2  ;;  %v6640_v36 = vmax.f32 %v6638_v2, %v6639_v16  ;;  %v5947_v26 = vsel %vm18130_vm15, %v5945_v62, %v18157_v55  ;;  %v5948_v60 = vrot.slane %v18157_v55, 2 }
 0x210   : > { %v6606_v11 = vmax.f32 %v6604_v52, %v6605_v19  ;;  %v6613_v37 = vrot.slane %v6612_v8, 2  ;;  %v6620_v51 = vrot.slane %v6619_v27, 2  ;;  %v6626_v38 = vmax.f32 %v6624_v30, %v6625_v24 }
 0x211   : > { %v6635_v15 = vmax.f32 %v6633_v12, %v6634_v43  ;;  %v6641_v17 = vrot.slane %v6640_v36, 2  ;;  %v6151_v10 = vrot.slane %v5938_v61, %v18115_v29  ;;  %v6159_v7 = vrot.slane %v5941_v58, %v18115_v29 }
 0x212   : > { %v6607_v48 = vrot.slane %v6606_v11, 1  ;;  %v6614_v41 = vmax.f32 %v6612_v8, %v6613_v37  ;;  %v6621_v13 = vmax.f32 %v6619_v27, %v6620_v51  ;;  %v6627_v59 = vrot.slane %v6626_v38, 2  ;;  %v18184_v53 = vpop.f32.mrb[12].mxu0 }
 0x213   : > { %v6636_v32 = vrot.slane %v6635_v15, 1  ;;  %v6642_v25 = vmax.f32 %v6640_v36, %v6641_v17  ;;  %v6152_v6 = vcombine.high %v6151_v10, %v6151_v10  ;;  %v6160_v45 = vcombine.high %v6159_v7, %v6159_v7  ;;  %v18186_v62 = vpop.f32.mrb[13].mxu0 }
 0x214   : > { %v6608_v34 = vmax.f32 %v6606_v11, %v6607_v48  ;;  %v6615_v39 = vrot.slane %v6614_v41, 1  ;;  %v6622_v22 = vrot.slane %v6621_v13, 1  ;;  %v6628_v40 = vmax.f32 %v6626_v38, %v6627_v59  ;;  %v18188_v21 = vpop.f32.mrb[14].mxu0 }
 0x215   : > { %v6637_v61 = vmax.f32 %v6635_v15, %v6636_v32  ;;  %v6643_v28 = vrot.slane %v6642_v25, 1  ;;  %v6167_v58 = vrot.slane %v5944_v46, %v18115_v29  ;;  %v6175_v35 = vrot.slane %v5947_v26, %v18115_v29  ;;  %v18192_v5 = vpop.f32.mrb[15].mxu0 }
 0x216   : > { %v6616_v23 = vmax.f32 %v6614_v41, %v6615_v39  ;;  %v6623_v63 = vmax.f32 %v6621_v13, %v6622_v22  ;;  %v6629_v49 = vrot.slane %v6628_v40, 1  ;;  %v6645_v52 = vsel %vm6601_vm13, %v6151_v10, -inf }
 0x217   : > { %v6644_v31 = vmax.f32 %v6642_v25, %v6643_v28  ;;  %v6168_v33 = vcombine.high %v6167_v58, %v6167_v58  ;;  %v6176_v2 = vcombine.high %v6175_v35, %v6175_v35  ;;  %v6646_v30 = vrot.slane %v6645_v52, 4 }
 0x218   : > { %v6630_v12 = vmax.f32 %v6628_v40, %v6629_v49  ;;  %v7371_v16 = vsel %vm5920_vm5, %v6623_v63, %v6608_v34  ;;  %v6652_v19 = vsel %vm6609_vm14, %v6152_v6, -inf  ;;  %v6659_v46 = vsel %vm6601_vm13, %v6159_v7, -inf }
 0x219   : > { %v7373_v8 = vsel %vm7372_vm6, %v6637_v61, %v7371_v16  ;;  %v6647_v27 = vmax.f32 %v6645_v52, %v6646_v30  ;;  %v6653_v24 = vrot.slane %v6652_v19, 4  ;;  %v6660_v43 = vrot.slane %v6659_v46, 4 }
 0x21a   : > { %v7380_v36 = vsel %vm5920_vm5, %v6630_v12, %v6616_v23  ;;  %v6666_v26 = vsel %vm6609_vm14, %v6160_v45, -inf  ;;  %v6673_v11 = vsel %vm6601_vm13, %v6167_v58, -inf  ;;  %v6680_v37 = vsel %vm6609_vm14, %v6168_v33, -inf  ;;  %v18203_v51 = vpop.f32.mrb[16].mxu0 }
 0x21b   : > { %v7381_v38 = vsel %vm7372_vm6, %v6644_v31, %v7380_v36  ;;  %v6648_v15 = vrot.slane %v6647_v27, 2  ;;  %v6654_v17 = vmax.f32 %v6652_v19, %v6653_v24  ;;  %v6661_v10 = vmax.f32 %v6659_v46, %v6660_v43  ;;  %v18206_v7 = vpop.f32.mrb[17].mxu0 }
 0x21c   : > { %v6667_v48 = vrot.slane %v6666_v26, 4  ;;  %v6674_v41 = vrot.slane %v6673_v11, 4  ;;  %v6681_v13 = vrot.slane %v6680_v37, 4  ;;  %v6687_v59 = vsel %vm6601_vm13, %v6175_v35, -inf }
 0x21d   : > { %v6649_v32 = vmax.f32 %v6647_v27, %v6648_v15  ;;  %v6655_v25 = vrot.slane %v6654_v17, 2  ;;  %v6662_v6 = vrot.slane %v6661_v10, 2  ;;  %v6688_v45 = vrot.slane %v6687_v59, 4 }
 0x21e   : > { %v6668_v34 = vmax.f32 %v6666_v26, %v6667_v48  ;;  %v6675_v39 = vmax.f32 %v6673_v11, %v6674_v41  ;;  %v6682_v22 = vmax.f32 %v6680_v37, %v6681_v13  ;;  %v6694_v40 = vsel %vm6609_vm14, %v6176_v2, -inf }
 0x21f   : > { %v6650_v61 = vrot.slane %v6649_v32, 1  ;;  %v6656_v28 = vmax.f32 %v6654_v17, %v6655_v25  ;;  %v6663_v58 = vmax.f32 %v6661_v10, %v6662_v6  ;;  %v6689_v23 = vmax.f32 %v6687_v59, %v6688_v45 }
 0x220   : > { %v6669_v63 = vrot.slane %v6668_v34, 2  ;;  %v6676_v49 = vrot.slane %v6675_v39, 2  ;;  %v6683_v52 = vrot.slane %v6682_v22, 2  ;;  %v6695_v31 = vrot.slane %v6694_v40, 4 }
 0x221   : > { %v6651_v33 = vmax.f32 %v6649_v32, %v6650_v61  ;;  %v6657_v35 = vrot.slane %v6656_v28, 1  ;;  %v6664_v30 = vrot.slane %v6663_v58, 1  ;;  %v6690_v12 = vrot.slane %v6689_v23, 2  ;;  %v18226_v61 = vpop.f32.mrb[18].mxu0 }
 0x222   : > { %v6670_v16 = vmax.f32 %v6668_v34, %v6669_v63  ;;  %v6677_v19 = vmax.f32 %v6675_v39, %v6676_v49  ;;  %v6684_v46 = vmax.f32 %v6682_v22, %v6683_v52  ;;  %v6696_v27 = vmax.f32 %v6694_v40, %v6695_v31 }
 0x223   : > { %v6658_v24 = vmax.f32 %v6656_v28, %v6657_v35  ;;  %v6665_v2 = vmax.f32 %v6663_v58, %v6664_v30  ;;  %v6691_v43 = vmax.f32 %v6689_v23, %v6690_v12  ;;  %v7374_v36 = vsel %vm5922_vm7, %v6651_v33, %v7373_v8 }
 0x224   : > { %v6671_v26 = vrot.slane %v6670_v16, 1  ;;  %v6678_v11 = vrot.slane %v6677_v19, 1  ;;  %v6685_v37 = vrot.slane %v6684_v46, 1  ;;  %v6697_v15 = vrot.slane %v6696_v27, 2 }
 0x225   : > { %v6692_v17 = vrot.slane %v6691_v43, 1  ;;  %v7376_v10 = vsel %vm7375_vm10, %v6665_v2, %v7374_v36  ;;  %v7382_v48 = vsel %vm5922_vm7, %v6658_v24, %v7381_v38  ;;  %v5721_v41 = vcombine.low %v5637_v0, %v5638_v57 }
 0x226   : > { %v6672_v13 = vmax.f32 %v6670_v16, %v6671_v26  ;;  %v6679_v59 = vmax.f32 %v6677_v19, %v6678_v11  ;;  %v6686_v32 = vmax.f32 %v6684_v46, %v6685_v37  ;;  %v6698_v25 = vmax.f32 %v6696_v27, %v6697_v15 }
 0x227   : > { %v6693_v6 = vmax.f32 %v6691_v43, %v6692_v17  ;;  %v5722_v8 = vcombine.high %v5637_v0, %v5638_v57  ;;  %v5729_v45 = vrot.slane %v5721_v41, %v18115_v29  ;;  %v5639_v34 = vmax.f32 %v18141_v3, 0.0  ;;  %v18231_v57 = vpop.f32.mrb[19].mxu0 }
 0x228   : > { %v6699_v38 = vrot.slane %v6698_v25, 1  ;;  %v7377_v39 = vsel %vm5924_vm9, %v6679_v59, %v7376_v10  ;;  %v7383_v22 = vsel %vm7375_vm10, %v6672_v13, %v7382_v48  ;;  %v5640_v40 = vmax.f32 %v18145_v1, 0.0 }
 0x229   : > { %v7379_v28 = vsel %vm7378_vm11, %v6693_v6, %v7377_v39  ;;  %v7384_v20 = vsel %vm5924_vm9, %v6686_v32, %v7383_v22  ;;  %v5736_v54 = vrot.slane %v5722_v8, %v18115_v29  ;;  %v5737_v0 = vcombine.high %v5729_v45, %v5729_v45 }
 0x22a   : > { %v6700_v58 = vmax.f32 %v6698_v25, %v6699_v38  ;;  %7471 = vst [vmem:[#allocation2] sm:$0xfe] %v7379_v28  ;;  %v5949_v3 = vrot.slane %v5729_v45, 7  ;;  %v5739_v23 = vcombine.low %v5639_v34, %v5640_v40  ;;  %v5740_v63 = vcombine.high %v5639_v34, %v5640_v40 }
 0x22b   : > { %v5738_v49 = vcombine.high %v5736_v54, %v5736_v54  ;;  %v5952_v52 = vrot.slane %v5737_v0, 7  ;;  %v5955_v31 = vrot.slane %v5736_v54, 7  ;;  %v5641_v1 = vmax.f32 %v18164_v9, 0.0 }
 0x22c   : > { %v7385_v33 = vsel %vm7378_vm11, %v6700_v58, %v7384_v20  ;;  %v5950_v35 = vsel %vm18130_vm15, %v5948_v60, %v5949_v3  ;;  %v5951_v30 = vrot.slane %v5949_v3, 2  ;;  %v18240_v12 = vrot.slane %v5739_v23, %v18115_v29 }
 0x22d   : > { %7473 = vst.msk [vmem:[#allocation2 + $0x8] sm:$0xfe] %vm7472_vm8, %v7385_v33  ;;  %v5954_v16 = vrot.slane %v5952_v52, 2  ;;  %v5957_v19 = vrot.slane %v5955_v31, 2  ;;  %v5958_v46 = vrot.slane %v5738_v49, 7  ;;  %v6183_v27 = vrot.slane %v5950_v35, %v18115_v29 }
 0x22e   : > { %v5953_v24 = vsel %vm18130_vm15, %v5951_v30, %v5952_v52  ;;  %v18247_v2 = vrot.slane %v5740_v63, %v18115_v29  ;;  %v18251_v55 = vcombine.high %v18240_v12, %v18240_v12  ;;  %v5961_v60 = vrot.slane %v18240_v12, 7 }
 0x22f   : > { %v5956_v43 = vsel %vm18130_vm15, %v5954_v16, %v5955_v31  ;;  %v5959_v36 = vsel %vm18130_vm15, %v5957_v19, %v5958_v46  ;;  %v5960_v26 = vrot.slane %v5958_v46, 2  ;;  %v6184_v11 = vcombine.high %v6183_v27, %v6183_v27 }
 0x230   : > { %v6191_v37 = vrot.slane %v5953_v24, %v18115_v29  ;;  %v6199_v15 = vrot.slane %v5956_v43, %v18115_v29  ;;  %v6207_v17 = vrot.slane %v5959_v36, %v18115_v29  ;;  %v6701_v10 = vsel %vm6601_vm13, %v6183_v27, -inf }
 0x231   : > { %v6702_v48 = vrot.slane %v6701_v10, 4  ;;  %v6708_v41 = vsel %vm6609_vm14, %v6184_v11, -inf  ;;  %v5756_v13 = vcombine.high %v18247_v2, %v18247_v2  ;;  %v18267_v59 = vsel %vm18130_vm15, %v5960_v26, %v5961_v60 }
 0x232   : > { %v6192_v32 = vcombine.high %v6191_v37, %v6191_v37  ;;  %v6200_v25 = vcombine.high %v6199_v15, %v6199_v15  ;;  %v6208_v6 = vcombine.high %v6207_v17, %v6207_v17  ;;  %v6709_v8 = vrot.slane %v6708_v41, 4 }
 0x233   : > { %v6703_v45 = vmax.f32 %v6701_v10, %v6702_v48  ;;  %v6715_v34 = vsel %vm6601_vm13, %v6191_v37, -inf  ;;  %v6729_v38 = vsel %vm6601_vm13, %v6199_v15, -inf  ;;  %v6743_v39 = vsel %vm6601_vm13, %v6207_v17, -inf }
 0x234   : > { %v6710_v22 = vmax.f32 %v6708_v41, %v6709_v8  ;;  %v6716_v40 = vrot.slane %v6715_v34, 4  ;;  %v6722_v28 = vsel %vm6609_vm14, %v6192_v32, -inf  ;;  %v6730_v20 = vrot.slane %v6729_v38, 4 }
 0x235   : > { %v6704_v54 = vrot.slane %v6703_v45, 2  ;;  %v6723_v0 = vrot.slane %v6722_v28, 4  ;;  %v6736_v58 = vsel %vm6609_vm14, %v6200_v25, -inf  ;;  %v6744_v3 = vrot.slane %v6743_v39, 4 }
 0x236   : > { %v6711_v23 = vrot.slane %v6710_v22, 2  ;;  %v6717_v63 = vmax.f32 %v6715_v34, %v6716_v40  ;;  %v6731_v49 = vmax.f32 %v6729_v38, %v6730_v20  ;;  %v6737_v52 = vrot.slane %v6736_v58, 4 }
 0x237   : > { %v6705_v31 = vmax.f32 %v6703_v45, %v6704_v54  ;;  %v6724_v33 = vmax.f32 %v6722_v28, %v6723_v0  ;;  %v6745_v35 = vmax.f32 %v6743_v39, %v6744_v3  ;;  %v6750_v30 = vsel %vm6609_vm14, %v6208_v6, -inf }
 0x238   : > { %v6712_v16 = vmax.f32 %v6710_v22, %v6711_v23  ;;  %v6718_v19 = vrot.slane %v6717_v63, 2  ;;  %v6732_v46 = vrot.slane %v6731_v49, 2  ;;  %v6738_v27 = vmax.f32 %v6736_v58, %v6737_v52 }
 0x239   : > { %v6706_v24 = vrot.slane %v6705_v31, 1  ;;  %v6725_v60 = vrot.slane %v6724_v33, 2  ;;  %v6746_v43 = vrot.slane %v6745_v35, 2  ;;  %v6751_v36 = vrot.slane %v6750_v30, 4 }
 0x23a   : > { %v6713_v26 = vrot.slane %v6712_v16, 1  ;;  %v6719_v11 = vmax.f32 %v6717_v63, %v6718_v19  ;;  %v6733_v37 = vmax.f32 %v6731_v49, %v6732_v46  ;;  %v6739_v15 = vrot.slane %v6738_v27, 2 }
 0x23b   : > { %v6707_v17 = vmax.f32 %v6705_v31, %v6706_v24  ;;  %v6726_v10 = vmax.f32 %v6724_v33, %v6725_v60  ;;  %v6747_v48 = vmax.f32 %v6745_v35, %v6746_v43  ;;  %v6752_v41 = vmax.f32 %v6750_v30, %v6751_v36 }
 0x23c   : > { %v6714_v32 = vmax.f32 %v6712_v16, %v6713_v26  ;;  %v6720_v25 = vrot.slane %v6719_v11, 1  ;;  %v6734_v8 = vrot.slane %v6733_v37, 1  ;;  %v6740_v6 = vmax.f32 %v6738_v27, %v6739_v15 }
 0x23d   : > { %v6727_v45 = vrot.slane %v6726_v10, 1  ;;  %v6748_v34 = vrot.slane %v6747_v48, 1  ;;  %v6753_v38 = vrot.slane %v6752_v41, 2  ;;  %v14712_v39 = vrot.slane %v18251_v55, 9 }
 0x23e   : > { %v6721_v22 = vmax.f32 %v6719_v11, %v6720_v25  ;;  %v6735_v40 = vmax.f32 %v6733_v37, %v6734_v8  ;;  %v6741_v28 = vrot.slane %v6740_v6, 1  ;;  %v5965_v20 = vrot.slane %v18247_v2, 7  ;;  %v18285_v2 = vpop.f32.mrb[20].mxu0 }
 0x23f   : > { %v6728_v54 = vmax.f32 %v6726_v10, %v6727_v45  ;;  %v6749_v0 = vmax.f32 %v6747_v48, %v6748_v34  ;;  %v6754_v58 = vmax.f32 %v6752_v41, %v6753_v38  ;;  %v18277_v3 = vrot.slane %v5756_v13, 7  ;;  %v18296_v27 = vpop.f32.mrb[21].mxu0 }
 0x240   : > { %v6742_v23 = vmax.f32 %v6740_v6, %v6741_v28  ;;  %v7387_v63 = vsel %vm7386_vm4, %v6721_v22, %v6707_v17  ;;  %v5966_v49 = vsel %vm18130_vm15, %v14712_v39, %v5965_v20  ;;  %v5967_v52 = vrot.slane %v5965_v20, 2 }
 0x241   : > { %v6755_v31 = vrot.slane %v6754_v58, 1  ;;  %v7388_v33 = vsel %vm5920_vm5, %v6735_v40, %v7387_v63  ;;  %v7391_v35 = vsel %vm7386_vm4, %v6728_v54, %v6714_v32  ;;  %v5970_v30 = vrot.slane %v18277_v3, 2 }
 0x242   : > { %v18288_v16 = vsel %vm7372_vm6, %v6749_v0, %v7388_v33  ;;  %v7392_v13 = vsel %vm5920_vm5, %v6742_v23, %v7391_v35  ;;  %v5969_v19 = vsel %vm18130_vm15, %v5967_v52, %v18277_v3  ;;  %v6087_v46 = vrot.slane %v18251_v55, %v16370_v18 }
 0x243   : > { %v6756_v24 = vmax.f32 %v6754_v58, %v6755_v31  ;;  %v6215_v60 = vrot.slane %v18267_v59, %v18115_v29  ;;  %v6223_v43 = vrot.slane %v5966_v49, %v18115_v29  ;;  %v6231_v36 = vrot.slane %v5969_v19, %v18115_v29 }
 0x244   : > { %6113 = vst.msk [vmem:[#allocation2 + $0x20] ss:$8 sm:$0x3] %vm18123_vm12, %v6087_v46  ;;  %v7495_v26 = vrot.slane %v18240_v12, %v16370_v18  ;;  %v5642_v11 = vmax.f32 %v18168_v44, 0.0  ;;  %v5643_v55 = vmax.f32 %v18171_v4, 0.0  ;;  %v5644_v37 = vmax.f32 %v18176_v42, 0.0 }
 0x245   : > { %v18310_v15 = vsel %vm7372_vm6, %v6756_v24, %v7392_v13  ;;  %v6216_v59 = vcombine.high %v6215_v60, %v6215_v60  ;;  %v6224_v17 = vcombine.high %v6223_v43, %v6223_v43  ;;  %v6232_v10 = vcombine.high %v6231_v36, %v6231_v36 }
 0x246   : > { %v6757_v48 = vsel %vm6601_vm13, %v6215_v60, -inf  ;;  %v6771_v41 = vsel %vm6601_vm13, %v6223_v43, -inf  ;;  %v6785_v32 = vsel %vm6601_vm13, %v6231_v36, -inf  ;;  %v7496_v25 = vcombine.high %v7495_v26, %v7495_v26 }
 0x247   : > { %v6758_v12 = vrot.slane %v6757_v48, 4  ;;  %v6764_v44 = vsel %vm6609_vm14, %v6216_v59, -inf  ;;  %v6772_v8 = vrot.slane %v6771_v41, 4  ;;  %v6778_v6 = vsel %vm6609_vm14, %v6224_v17, -inf }
 0x248   : > { %v6765_v45 = vrot.slane %v6764_v44, 4  ;;  %v6779_v34 = vrot.slane %v6778_v6, 4  ;;  %v6786_v38 = vrot.slane %v6785_v32, 4  ;;  %v6792_v39 = vsel %vm6609_vm14, %v6232_v10, -inf }
 0x249   : > { %7526 = vst.msk [vmem:[#allocation2 + $0x15] ss:$8 sm:$0x3] %vm18123_vm12, %v7496_v25  ;;  %v6759_v22 = vmax.f32 %v6757_v48, %v6758_v12  ;;  %v6773_v40 = vmax.f32 %v6771_v41, %v6772_v8  ;;  %v6793_v28 = vrot.slane %v6792_v39, 4  ;;  %v5757_v20 = vcombine.low %v5641_v1, %v5642_v11  ;;  %v18326_v48 = vpop.f32.mrb[22].mxu0 }
 0x24a   : > { %v6766_v54 = vmax.f32 %v6764_v44, %v6765_v45  ;;  %v6780_v0 = vmax.f32 %v6778_v6, %v6779_v34  ;;  %v6787_v58 = vmax.f32 %v6785_v32, %v6786_v38  ;;  %v5758_v23 = vcombine.high %v5641_v1, %v5642_v11  ;;  %v18328_v44 = vpop.f32.mrb[23].mxu0 }
 0x24b   : > { %v6760_v63 = vrot.slane %v6759_v22, 2  ;;  %v6774_v49 = vrot.slane %v6773_v40, 2  ;;  %v6794_v52 = vmax.f32 %v6792_v39, %v6793_v28  ;;  %v5765_v31 = vrot.slane %v5757_v20, %v18115_v29 }
 0x24c   : > { %v6767_v33 = vrot.slane %v6766_v54, 2  ;;  %v6781_v35 = vrot.slane %v6780_v0, 2  ;;  %v6788_v13 = vrot.slane %v6787_v58, 2  ;;  %v5772_v19 = vrot.slane %v5758_v23, %v18115_v29 }
 0x24d   : > { %v6761_v46 = vmax.f32 %v6759_v22, %v6760_v63  ;;  %v6775_v24 = vmax.f32 %v6773_v40, %v6774_v49  ;;  %v6795_v60 = vrot.slane %v6794_v52, 2  ;;  %v5773_v43 = vcombine.high %v5765_v31, %v5765_v31 }
 0x24e   : > { %v6768_v36 = vmax.f32 %v6766_v54, %v6767_v33  ;;  %v6782_v26 = vmax.f32 %v6780_v0, %v6781_v35  ;;  %v6789_v59 = vmax.f32 %v6787_v58, %v6788_v13  ;;  %v5774_v17 = vcombine.high %v5772_v19, %v5772_v19 }
 0x24f   : > { %v6762_v9 = vrot.slane %v6761_v46, 1  ;;  %v6776_v1 = vrot.slane %v6775_v24, 1  ;;  %v6796_v11 = vmax.f32 %v6794_v52, %v6795_v60  ;;  %v5971_v10 = vrot.slane %v5765_v31, 7 }
 0x250   : > { %v6769_v41 = vrot.slane %v6768_v36, 1  ;;  %v6783_v32 = vrot.slane %v6782_v26, 1  ;;  %v6790_v25 = vrot.slane %v6789_v59, 1  ;;  %v5974_v12 = vrot.slane %v5773_v43, 7 }
 0x251   : > { %v6763_v8 = vmax.f32 %v6761_v46, %v6762_v9  ;;  %v6777_v6 = vmax.f32 %v6775_v24, %v6776_v1  ;;  %v6797_v45 = vrot.slane %v6796_v11, 1  ;;  %v5972_v34 = vsel %vm18130_vm15, %v5970_v30, %v5971_v10 }
 0x252   : > { %v6770_v38 = vmax.f32 %v6768_v36, %v6769_v41  ;;  %v6784_v39 = vmax.f32 %v6782_v26, %v6783_v32  ;;  %v6791_v22 = vmax.f32 %v6789_v59, %v6790_v25  ;;  %v5973_v40 = vrot.slane %v5971_v10, 2 }
 0x253   : > { %v6798_v28 = vmax.f32 %v6796_v11, %v6797_v45  ;;  %v7390_v20 = vsel %vm5922_vm7, %v6763_v8, %v18288_v16  ;;  %v5976_v54 = vrot.slane %v5974_v12, 2  ;;  %v5977_v0 = vrot.slane %v5772_v19, 7 }
 0x254   : > { %v7394_v58 = vsel %vm5922_vm7, %v6770_v38, %v18310_v15  ;;  %v18339_v23 = vsel %vm5920_vm5, %v6791_v22, %v6777_v6  ;;  %7474 = vst [vmem:[#allocation2 + $0x10] sm:$0x1f] %v7390_v20  ;;  %v5975_v3 = vsel %vm18130_vm15, %v5973_v40, %v5974_v12  ;;  %v18343_v30 = vrot.slane %v5774_v17, 7 }
 0x255   : > { %v18346_v63 = vsel %vm5920_vm5, %v6798_v28, %v6784_v39  ;;  %7476 = vst.msk [vmem:[#allocation2 + $0x18] sm:$0x1f] %vm7475_vm3, %v7394_v58  ;;  %v5978_v16 = vsel %vm18130_vm15, %v5976_v54, %v5977_v0  ;;  %v5979_v49 = vrot.slane %v5977_v0, 2  ;;  %v6239_v15 = vrot.slane %v5972_v34, %v18115_v29 }
 0x256   : > { %v5982_v52 = vrot.slane %v18343_v30, 2  ;;  %v6247_v31 = vrot.slane %v5975_v3, %v18115_v29  ;;  %v6255_v33 = vrot.slane %v5978_v16, %v18115_v29  ;;  %v5775_v35 = vcombine.low %v5643_v55, %v5644_v37 }
 0x257   : > { %v5981_v13 = vsel %vm18130_vm15, %v5979_v49, %v18343_v30  ;;  %v6240_v19 = vcombine.high %v6239_v15, %v6239_v15  ;;  %v6799_v46 = vsel %vm6601_vm13, %v6239_v15, -inf  ;;  %v5776_v24 = vcombine.high %v5643_v55, %v5644_v37 }
 0x258   : > { %v6248_v60 = vcombine.high %v6247_v31, %v6247_v31  ;;  %v6256_v43 = vcombine.high %v6255_v33, %v6255_v33  ;;  %v6263_v36 = vrot.slane %v5981_v13, %v18115_v29  ;;  %v6800_v26 = vrot.slane %v6799_v46, 4 }
 0x259   : > { %v6806_v59 = vsel %vm6609_vm14, %v6240_v19, -inf  ;;  %v6813_v17 = vsel %vm6601_vm13, %v6247_v31, -inf  ;;  %v6827_v9 = vsel %vm6601_vm13, %v6255_v33, -inf  ;;  %v18372_v1 = vrot.slane %v5775_v35, %v18115_v29 }
 0x25a   : > { %v6264_v11 = vcombine.high %v6263_v36, %v6263_v36  ;;  %v6801_v10 = vmax.f32 %v6799_v46, %v6800_v26  ;;  %v6807_v42 = vrot.slane %v6806_v59, 4  ;;  %v6814_v41 = vrot.slane %v6813_v17, 4 }
 0x25b   : > { %v6820_v4 = vsel %vm6609_vm14, %v6248_v60, -inf  ;;  %v6828_v55 = vrot.slane %v6827_v9, 4  ;;  %v6834_v37 = vsel %vm6609_vm14, %v6256_v43, -inf  ;;  %v6841_v32 = vsel %vm6601_vm13, %v6263_v36, -inf }
 0x25c   : > { %v6802_v25 = vrot.slane %v6801_v10, 2  ;;  %v6808_v12 = vmax.f32 %v6806_v59, %v6807_v42  ;;  %v6815_v8 = vmax.f32 %v6813_v17, %v6814_v41  ;;  %v6821_v6 = vrot.slane %v6820_v4, 4 }
 0x25d   : > { %v6829_v45 = vmax.f32 %v6827_v9, %v6828_v55  ;;  %v6835_v34 = vrot.slane %v6834_v37, 4  ;;  %v6842_v38 = vrot.slane %v6841_v32, 4  ;;  %v6848_v39 = vsel %vm6609_vm14, %v6264_v11, -inf }
 0x25e   : > { %v6803_v22 = vmax.f32 %v6801_v10, %v6802_v25  ;;  %v6809_v40 = vrot.slane %v6808_v12, 2  ;;  %v6816_v28 = vrot.slane %v6815_v8, 2  ;;  %v6822_v20 = vmax.f32 %v6820_v4, %v6821_v6 }
 0x25f   : > { %v6830_v54 = vrot.slane %v6829_v45, 2  ;;  %v6836_v0 = vmax.f32 %v6834_v37, %v6835_v34  ;;  %v6843_v58 = vmax.f32 %v6841_v32, %v6842_v38  ;;  %v6849_v3 = vrot.slane %v6848_v39, 4 }
 0x260   : > { %v6804_v16 = vrot.slane %v6803_v22, 1  ;;  %v6810_v49 = vmax.f32 %v6808_v12, %v6809_v40  ;;  %v6817_v15 = vmax.f32 %v6815_v8, %v6816_v28  ;;  %v6823_v31 = vrot.slane %v6822_v20, 2 }
 0x261   : > { %v6831_v33 = vmax.f32 %v6829_v45, %v6830_v54  ;;  %v6837_v35 = vrot.slane %v6836_v0, 2  ;;  %v6844_v13 = vrot.slane %v6843_v58, 2  ;;  %v6850_v19 = vmax.f32 %v6848_v39, %v6849_v3 }
 0x262   : > { %v6805_v46 = vmax.f32 %v6803_v22, %v6804_v16  ;;  %v6811_v60 = vrot.slane %v6810_v49, 1  ;;  %v6818_v43 = vrot.slane %v6817_v15, 1  ;;  %v6824_v36 = vmax.f32 %v6822_v20, %v6823_v31 }
 0x263   : > { %v6832_v26 = vrot.slane %v6831_v33, 1  ;;  %v6838_v59 = vmax.f32 %v6836_v0, %v6837_v35  ;;  %v6845_v17 = vmax.f32 %v6843_v58, %v6844_v13  ;;  %v6851_v9 = vrot.slane %v6850_v19, 2 }
 0x264   : > { %v6812_v11 = vmax.f32 %v6810_v49, %v6811_v60  ;;  %v6819_v10 = vmax.f32 %v6817_v15, %v6818_v43  ;;  %v6825_v42 = vrot.slane %v6824_v36, 1  ;;  %v7396_v41 = vsel %vm7372_vm6, %v6805_v46, %v18339_v23 }
 0x265   : > { %v6833_v4 = vmax.f32 %v6831_v33, %v6832_v26  ;;  %v6839_v55 = vrot.slane %v6838_v59, 1  ;;  %v6846_v37 = vrot.slane %v6845_v17, 1  ;;  %v6852_v32 = vmax.f32 %v6850_v19, %v6851_v9 }
 0x266   : > { %v6826_v25 = vmax.f32 %v6824_v36, %v6825_v42  ;;  %v7397_v12 = vsel %vm5922_vm7, %v6819_v10, %v7396_v41  ;;  %v7402_v8 = vsel %vm7372_vm6, %v6812_v11, %v18346_v63  ;;  %v5790_v6 = vrot.slane %v5776_v24, %v18115_v29 }
 0x267   : > { %v6840_v45 = vmax.f32 %v6838_v59, %v6839_v55  ;;  %v6847_v34 = vmax.f32 %v6845_v17, %v6846_v37  ;;  %v6853_v38 = vrot.slane %v6852_v32, 1  ;;  %v7398_v39 = vsel %vm7375_vm10, %v6833_v4, %v7397_v12 }
 0x268   : > { %v7403_v22 = vsel %vm5922_vm7, %v6826_v25, %v7402_v8  ;;  %v5791_v23 = vcombine.high %v18372_v1, %v18372_v1  ;;  %v5792_v40 = vcombine.high %v5790_v6, %v5790_v6  ;;  %v5983_v28 = vrot.slane %v18372_v1, 7 }
 0x269   : > { %v6854_v20 = vmax.f32 %v6852_v32, %v6853_v38  ;;  %v18390_v54 = vsel %vm5924_vm9, %v6847_v34, %v7398_v39  ;;  %v7404_v63 = vsel %vm7375_vm10, %v6840_v45, %v7403_v22  ;;  %v5989_v24 = vrot.slane %v5790_v6, 7 }
 0x26a   : > { %v5984_v0 = vsel %vm18130_vm15, %v5982_v52, %v5983_v28  ;;  %v5985_v58 = vrot.slane %v5983_v28, 2  ;;  %v5986_v3 = vrot.slane %v5791_v23, 7  ;;  %v18397_v16 = vrot.slane %v5792_v40, 7 }
 0x26b   : > { %v18400_v49 = vsel %vm5924_vm9, %v6854_v20, %v7404_v63  ;;  %v5991_v1 = vrot.slane %v5989_v24, 2  ;;  %v6271_v15 = vrot.slane %v5984_v0, %v18115_v29  ;;  %v5645_v31 = vmax.f32 %v18184_v53, 0.0 }
 0x26c   : > { %v5987_v33 = vsel %vm18130_vm15, %v5985_v58, %v5986_v3  ;;  %v5988_v35 = vrot.slane %v5986_v3, 2  ;;  %v5994_v30 = vrot.slane %v18397_v16, 2  ;;  %v5646_v52 = vmax.f32 %v18186_v62, 0.0 }
 0x26d   : > { %v5993_v13 = vsel %vm18130_vm15, %v5991_v1, %v18397_v16  ;;  %v6272_v19 = vcombine.high %v6271_v15, %v6271_v15  ;;  %v6279_v46 = vrot.slane %v5987_v33, %v18115_v29  ;;  %v6855_v60 = vsel %vm6601_vm13, %v6271_v15, -inf }
 0x26e   : > { %v5990_v43 = vsel %vm18130_vm15, %v5988_v35, %v5989_v24  ;;  %v6295_v36 = vrot.slane %v5993_v13, %v18115_v29  ;;  %v6856_v26 = vrot.slane %v6855_v60, 4  ;;  %v5793_v59 = vcombine.low %v5645_v31, %v5646_v52 }
 0x26f   : > { %v6280_v17 = vcombine.high %v6279_v46, %v6279_v46  ;;  %v6287_v9 = vrot.slane %v5990_v43, %v18115_v29  ;;  %v6862_v11 = vsel %vm6609_vm14, %v6272_v19, -inf  ;;  %v6869_v10 = vsel %vm6601_vm13, %v6279_v46, -inf }
 0x270   : > { %v6296_v42 = vcombine.high %v6295_v36, %v6295_v36  ;;  %v6857_v41 = vmax.f32 %v6855_v60, %v6856_v26  ;;  %v6863_v4 = vrot.slane %v6862_v11, 4  ;;  %v6870_v55 = vrot.slane %v6869_v10, 4 }
 0x271   : > { %v6288_v37 = vcombine.high %v6287_v9, %v6287_v9  ;;  %v6876_v32 = vsel %vm6609_vm14, %v6280_v17, -inf  ;;  %v6883_v25 = vsel %vm6601_vm13, %v6287_v9, -inf  ;;  %v6897_v12 = vsel %vm6601_vm13, %v6295_v36, -inf }
 0x272   : > { %v6858_v8 = vrot.slane %v6857_v41, 2  ;;  %v6864_v6 = vmax.f32 %v6862_v11, %v6863_v4  ;;  %v6871_v45 = vmax.f32 %v6869_v10, %v6870_v55  ;;  %v6877_v34 = vrot.slane %v6876_v32, 4 }
 0x273   : > { %v6884_v38 = vrot.slane %v6883_v25, 4  ;;  %v6890_v39 = vsel %vm6609_vm14, %v6288_v37, -inf  ;;  %v6898_v22 = vrot.slane %v6897_v12, 4  ;;  %v6904_v23 = vsel %vm6609_vm14, %v6296_v42, -inf }
 0x274   : > { %v6859_v40 = vmax.f32 %v6857_v41, %v6858_v8  ;;  %v6865_v28 = vrot.slane %v6864_v6, 2  ;;  %v6872_v20 = vrot.slane %v6871_v45, 2  ;;  %v6878_v63 = vmax.f32 %v6876_v32, %v6877_v34 }
 0x275   : > { %v6885_v24 = vmax.f32 %v6883_v25, %v6884_v38  ;;  %v6891_v0 = vrot.slane %v6890_v39, 4  ;;  %v6899_v58 = vmax.f32 %v6897_v12, %v6898_v22  ;;  %v6905_v3 = vrot.slane %v6904_v23, 4 }
 0x276   : > { %v6860_v1 = vrot.slane %v6859_v40, 1  ;;  %v6866_v15 = vmax.f32 %v6864_v6, %v6865_v28  ;;  %v6873_v33 = vmax.f32 %v6871_v45, %v6872_v20  ;;  %v6879_v35 = vrot.slane %v6878_v63, 2  ;;  %v18430_v6 = vpop.f32.mrb[24].mxu0 }
 0x277   : > { %v6886_v13 = vrot.slane %v6885_v24, 2  ;;  %v6892_v19 = vmax.f32 %v6890_v39, %v6891_v0  ;;  %v6900_v46 = vrot.slane %v6899_v58, 2  ;;  %v6906_v60 = vmax.f32 %v6904_v23, %v6905_v3  ;;  %v18439_v22 = vpop.f32.mrb[25].mxu0 }
 0x278   : > { %v6861_v43 = vmax.f32 %v6859_v40, %v6860_v1  ;;  %v6867_v36 = vrot.slane %v6866_v15, 1  ;;  %v6874_v26 = vrot.slane %v6873_v33, 1  ;;  %v6880_v17 = vmax.f32 %v6878_v63, %v6879_v35  ;;  %v5604_v20 = vpop.f32.mrb[26].mxu0 }
 0x279   : > { %v6887_v9 = vmax.f32 %v6885_v24, %v6886_v13  ;;  %v6893_v11 = vrot.slane %v6892_v19, 2  ;;  %v6901_v10 = vmax.f32 %v6899_v58, %v6900_v46  ;;  %v6907_v42 = vrot.slane %v6906_v60, 2  ;;  %v5605_v0 = vpop.f32.mrb[27].mxu0 }
 0x27a   : > { %v6868_v41 = vmax.f32 %v6866_v15, %v6867_v36  ;;  %v6875_v4 = vmax.f32 %v6873_v33, %v6874_v26  ;;  %v6881_v55 = vrot.slane %v6880_v17, 1  ;;  %v7400_v37 = vsel %vm7378_vm11, %v6861_v43, %v18390_v54 }
 0x27b   : > { %v6888_v32 = vrot.slane %v6887_v9, 1  ;;  %v6894_v25 = vmax.f32 %v6892_v19, %v6893_v11  ;;  %v6902_v12 = vrot.slane %v6901_v10, 1  ;;  %v6908_v8 = vmax.f32 %v6906_v60, %v6907_v42  ;;  %7477 = vst [vmem:[#allocation2 + $0x20] sm:$0xfe] %v7400_v37 }
 0x27c   : > { %v6882_v45 = vmax.f32 %v6880_v17, %v6881_v55  ;;  %v7406_v34 = vsel %vm7378_vm11, %v6868_v41, %v18400_v49  ;;  %v5794_v38 = vcombine.high %v5645_v31, %v5646_v52  ;;  %v5801_v39 = vrot.slane %v5793_v59, %v18115_v29 }
 0x27d   : > { %v6889_v54 = vmax.f32 %v6887_v9, %v6888_v32  ;;  %v6895_v23 = vrot.slane %v6894_v25, 1  ;;  %v6903_v40 = vmax.f32 %v6901_v10, %v6902_v12  ;;  %v6909_v28 = vrot.slane %v6908_v8, 1  ;;  %7478 = vst.msk [vmem:[#allocation2 + $0x28] sm:$0xfe] %vm7472_vm8, %v7406_v34 }
 0x27e   : > { %v5808_v63 = vrot.slane %v5794_v38, %v18115_v29  ;;  %v5809_v24 = vcombine.high %v5801_v39, %v5801_v39  ;;  %v5995_v49 = vrot.slane %v5801_v39, 7  ;;  %v5647_v62 = vmax.f32 %v18188_v21, 0.0 }
 0x27f   : > { %v6896_v53 = vmax.f32 %v6894_v25, %v6895_v23  ;;  %v6910_v31 = vmax.f32 %v6908_v8, %v6909_v28  ;;  %v7407_v52 = vsel %vm7386_vm4, %v6889_v54, %v6875_v4  ;;  %v5648_v59 = vmax.f32 %v18192_v5, 0.0 }
 0x280   : > { %v18447_v58 = vsel %vm5920_vm5, %v6903_v40, %v7407_v52  ;;  %v5810_v3 = vcombine.high %v5808_v63, %v5808_v63  ;;  %v5996_v1 = vsel %vm18130_vm15, %v5994_v30, %v5995_v49  ;;  %v5997_v15 = vrot.slane %v5995_v49, 2 }
 0x281   : > { %v7411_v33 = vsel %vm7386_vm4, %v6896_v53, %v6882_v45  ;;  %v5998_v21 = vrot.slane %v5809_v24, 7  ;;  %v14713_v35 = vrot.slane %v5808_v63, 9  ;;  %v6094_v13 = vrot.slane %v5808_v63, %v16370_v18 }
 0x282   : > { %v18456_v19 = vsel %vm5920_vm5, %v6910_v31, %v7411_v33  ;;  %v6002_v5 = vrot.slane %v5810_v3, 7  ;;  %v6303_v46 = vrot.slane %v5996_v1, %v18115_v29  ;;  %v7503_v60 = vrot.slane %v5809_v24, %v16370_v18 }
 0x283   : > { %v5999_v16 = vsel %vm18130_vm15, %v5997_v15, %v5998_v21  ;;  %6116 = vst.msk [vmem:[#allocation2 + $0x40] ss:$8 sm:$0x3] %vm18123_vm12, %v6094_v13  ;;  %v5811_v30 = vcombine.low %v5647_v62, %v5648_v59  ;;  %v5812_v43 = vcombine.high %v5647_v62, %v5648_v59  ;;  %v5649_v36 = vmax.f32 %v18203_v51, 0.0 }
 0x284   : > { %v6003_v26 = vsel %vm18130_vm15, %v14713_v35, %v6002_v5  ;;  %v6004_v17 = vrot.slane %v6002_v5, 2  ;;  %v6304_v9 = vcombine.high %v6303_v46, %v6303_v46  ;;  %v6311_v11 = vrot.slane %v5999_v16, %v18115_v29 }
 0x285   : > { %v6319_v10 = vrot.slane %v6003_v26, %v18115_v29  ;;  %v6911_v42 = vsel %vm6601_vm13, %v6303_v46, -inf  ;;  %v7504_v41 = vcombine.high %v7503_v60, %v7503_v60  ;;  %v5819_v4 = vrot.slane %v5811_v30, %v18115_v29 }
 0x286   : > { %v6312_v55 = vcombine.high %v6311_v11, %v6311_v11  ;;  %v6912_v37 = vrot.slane %v6911_v42, 4  ;;  %v6918_v32 = vsel %vm6609_vm14, %v6304_v9, -inf  ;;  %v6925_v25 = vsel %vm6601_vm13, %v6311_v11, -inf }
 0x287   : > { %v6320_v12 = vcombine.high %v6319_v10, %v6319_v10  ;;  %v6919_v8 = vrot.slane %v6918_v32, 4  ;;  %v6926_v45 = vrot.slane %v6925_v25, 4  ;;  %v6939_v34 = vsel %vm6601_vm13, %v6319_v10, -inf  ;;  %7529 = vst.msk [vmem:[#allocation2 + $0x35] ss:$8 sm:$0x3] %vm18123_vm12, %v7504_v41 }
 0x288   : > { %v6913_v38 = vmax.f32 %v6911_v42, %v6912_v37  ;;  %v6932_v39 = vsel %vm6609_vm14, %v6312_v55, -inf  ;;  %v6940_v54 = vrot.slane %v6939_v34, 4  ;;  %v5826_v23 = vrot.slane %v5812_v43, %v18115_v29 }
 0x289   : > { %v6920_v40 = vmax.f32 %v6918_v32, %v6919_v8  ;;  %v6927_v28 = vmax.f32 %v6925_v25, %v6926_v45  ;;  %v6933_v20 = vrot.slane %v6932_v39, 4  ;;  %v6946_v63 = vsel %vm6609_vm14, %v6320_v12, -inf }
 0x28a   : > { %v6914_v24 = vrot.slane %v6913_v38, 2  ;;  %v6941_v49 = vmax.f32 %v6939_v34, %v6940_v54  ;;  %v6947_v62 = vrot.slane %v6946_v63, 4  ;;  %v5827_v0 = vcombine.high %v5819_v4, %v5819_v4 }
 0x28b   : > { %v6921_v53 = vrot.slane %v6920_v40, 2  ;;  %v6928_v31 = vrot.slane %v6927_v28, 2  ;;  %v6934_v52 = vmax.f32 %v6932_v39, %v6933_v20  ;;  %v5828_v59 = vcombine.high %v5826_v23, %v5826_v23 }
 0x28c   : > { %v6915_v3 = vmax.f32 %v6913_v38, %v6914_v24  ;;  %v6942_v1 = vrot.slane %v6941_v49, 2  ;;  %v6948_v15 = vmax.f32 %v6946_v63, %v6947_v62  ;;  %v6005_v33 = vrot.slane %v5819_v4, 7 }
 0x28d   : > { %v6922_v21 = vmax.f32 %v6920_v40, %v6921_v53  ;;  %v6929_v35 = vmax.f32 %v6927_v28, %v6928_v31  ;;  %v6935_v13 = vrot.slane %v6934_v52, 2  ;;  %v6008_v5 = vrot.slane %v5827_v0, 7 }
 0x28e   : > { %v6916_v46 = vrot.slane %v6915_v3, 1  ;;  %v6943_v60 = vmax.f32 %v6941_v49, %v6942_v1  ;;  %v6949_v16 = vrot.slane %v6948_v15, 2  ;;  %v6006_v30 = vsel %vm18130_vm15, %v6004_v17, %v6005_v33 }
 0x28f   : > { %v6923_v43 = vrot.slane %v6922_v21, 1  ;;  %v6930_v26 = vrot.slane %v6929_v35, 1  ;;  %v6936_v9 = vmax.f32 %v6934_v52, %v6935_v13  ;;  %v6007_v11 = vrot.slane %v6005_v33, 2 }
 0x290   : > { %v6917_v10 = vmax.f32 %v6915_v3, %v6916_v46  ;;  %v6944_v42 = vrot.slane %v6943_v60, 1  ;;  %v6950_v41 = vmax.f32 %v6948_v15, %v6949_v16  ;;  %v6010_v55 = vrot.slane %v6008_v5, 2 }
 0x291   : > { %v6924_v37 = vmax.f32 %v6922_v21, %v6923_v43  ;;  %v6931_v4 = vmax.f32 %v6929_v35, %v6930_v26  ;;  %v6937_v32 = vrot.slane %v6936_v9, 1  ;;  %v6009_v25 = vsel %vm18130_vm15, %v6007_v11, %v6008_v5 }
 0x292   : > { %v18483_v12 = vmax.f32 %v6943_v60, %v6944_v42  ;;  %v6951_v8 = vrot.slane %v6950_v41, 1  ;;  %v7409_v17 = vsel %vm7372_vm6, %v6917_v10, %v18447_v58  ;;  %v6011_v45 = vrot.slane %v5826_v23, 7 }
 0x293   : > { %v6938_v34 = vmax.f32 %v6936_v9, %v6937_v32  ;;  %v7410_v38 = vsel %vm5922_vm7, %v6931_v4, %v7409_v17  ;;  %v7413_v39 = vsel %vm7372_vm6, %v6924_v37, %v18456_v19  ;;  %v18490_v54 = vrot.slane %v5828_v59, 7 }
 0x294   : > { %v18492_v40 = vmax.f32 %v6950_v41, %v6951_v8  ;;  %7479 = vst [vmem:[#allocation2 + $0x30] sm:$0x1f] %v7410_v38  ;;  %v6012_v28 = vsel %vm18130_vm15, %v6010_v55, %v6011_v45  ;;  %v6013_v20 = vrot.slane %v6011_v45, 2  ;;  %v6327_v63 = vrot.slane %v6006_v30, %v18115_v29 }
 0x295   : > { %v7414_v58 = vsel %vm5922_vm7, %v6938_v34, %v7413_v39  ;;  %v6016_v23 = vrot.slane %v18490_v54, 2  ;;  %v6335_v24 = vrot.slane %v6009_v25, %v18115_v29  ;;  %v6343_v49 = vrot.slane %v6012_v28, %v18115_v29 }
 0x296   : > { %7480 = vst.msk [vmem:[#allocation2 + $0x38] sm:$0x1f] %vm7475_vm3, %v7414_v58  ;;  %v6015_v19 = vsel %vm18130_vm15, %v6013_v20, %v18490_v54  ;;  %v6328_v62 = vcombine.high %v6327_v63, %v6327_v63  ;;  %v6953_v0 = vsel %vm6601_vm13, %v6327_v63, -inf  ;;  %v5650_v53 = vmax.f32 %v18206_v7, 0.0  ;;  %v15828_v54 = vld [vmem:[%s21049_s3] sm:$0xff]  }
 0x297   : > { %v6336_v31 = vcombine.high %v6335_v24, %v6335_v24  ;;  %v6344_v52 = vcombine.high %v6343_v49, %v6343_v49  ;;  %v6351_v59 = vrot.slane %v6015_v19, %v18115_v29  ;;  %v6954_v3 = vrot.slane %v6953_v0, 4  ;;  %8442 = vmatpush1.bf16.msra.mxu0 %v15828_v54 }
 0x298   : > { %v6960_v1 = vsel %vm6609_vm14, %v6328_v62, -inf  ;;  %v6967_v15 = vsel %vm6601_vm13, %v6335_v24, -inf  ;;  %v6981_v33 = vsel %vm6601_vm13, %v6343_v49, -inf  ;;  %v5829_v21 = vcombine.low %v5649_v36, %v5650_v53  ;;  %8443 = vmatprep.subr.bf16.mxu0 %v21093_v56 }
 0x299   : > { %v6352_v35 = vcombine.high %v6351_v59, %v6351_v59  ;;  %v6955_v13 = vmax.f32 %v6953_v0, %v6954_v3  ;;  %v6961_v5 = vrot.slane %v6960_v1, 4  ;;  %v6968_v46 = vrot.slane %v6967_v15, 4 }
 0x29a   : > { %v6974_v7 = vsel %vm6609_vm14, %v6336_v31, -inf  ;;  %v6982_v60 = vrot.slane %v6981_v33, 4  ;;  %v6988_v16 = vsel %vm6609_vm14, %v6344_v52, -inf  ;;  %v6995_v30 = vsel %vm6601_vm13, %v6351_v59, -inf }
 0x29b   : > { %v6956_v43 = vrot.slane %v6955_v13, 2  ;;  %v6962_v26 = vmax.f32 %v6960_v1, %v6961_v5  ;;  %v6969_v9 = vmax.f32 %v6967_v15, %v6968_v46  ;;  %v6975_v11 = vrot.slane %v6974_v7, 4 }
 0x29c   : > { %v6983_v10 = vmax.f32 %v6981_v33, %v6982_v60  ;;  %v6989_v42 = vrot.slane %v6988_v16, 4  ;;  %v6996_v41 = vrot.slane %v6995_v30, 4  ;;  %v7002_v55 = vsel %vm6609_vm14, %v6352_v35, -inf }
 0x29d   : > { %v6957_v37 = vmax.f32 %v6955_v13, %v6956_v43  ;;  %v6963_v4 = vrot.slane %v6962_v26, 2  ;;  %v6970_v32 = vrot.slane %v6969_v9, 2  ;;  %v6976_v25 = vmax.f32 %v6974_v7, %v6975_v11 }
 0x29e   : > { %v6984_v8 = vrot.slane %v6983_v10, 2  ;;  %v6990_v17 = vmax.f32 %v6988_v16, %v6989_v42  ;;  %v6997_v45 = vmax.f32 %v6995_v30, %v6996_v41  ;;  %v7003_v34 = vrot.slane %v7002_v55, 4 }
 0x29f   : > { %v6958_v38 = vrot.slane %v6957_v37, 1  ;;  %v6964_v39 = vmax.f32 %v6962_v26, %v6963_v4  ;;  %v6971_v28 = vmax.f32 %v6969_v9, %v6970_v32  ;;  %v6977_v20 = vrot.slane %v6976_v25, 2 }
 0x2a0   : > { %v6985_v63 = vmax.f32 %v6983_v10, %v6984_v8  ;;  %v6991_v58 = vrot.slane %v6990_v17, 2  ;;  %v6998_v24 = vrot.slane %v6997_v45, 2  ;;  %v7004_v49 = vmax.f32 %v7002_v55, %v7003_v34 }
 0x2a1   : > { %v6959_v19 = vmax.f32 %v6957_v37, %v6958_v38  ;;  %v6965_v62 = vrot.slane %v6964_v39, 1  ;;  %v6972_v0 = vrot.slane %v6971_v28, 1  ;;  %v6978_v31 = vmax.f32 %v6976_v25, %v6977_v20 }
 0x2a2   : > { %v6986_v52 = vrot.slane %v6985_v63, 1  ;;  %v6992_v59 = vmax.f32 %v6990_v17, %v6991_v58  ;;  %v6999_v3 = vmax.f32 %v6997_v45, %v6998_v24  ;;  %v7005_v1 = vrot.slane %v7004_v49, 2 }
 0x2a3   : > { %v6966_v15 = vmax.f32 %v6964_v39, %v6965_v62  ;;  %v6973_v33 = vmax.f32 %v6971_v28, %v6972_v0  ;;  %v6979_v35 = vrot.slane %v6978_v31, 1  ;;  %v7415_v13 = vsel %vm5920_vm5, %v6959_v19, %v18483_v12 }
 0x2a4   : > { %v6987_v5 = vmax.f32 %v6985_v63, %v6986_v52  ;;  %v6993_v46 = vrot.slane %v6992_v59, 1  ;;  %v7000_v7 = vrot.slane %v6999_v3, 1  ;;  %v7006_v60 = vmax.f32 %v7004_v49, %v7005_v1 }
 0x2a5   : > { %v6980_v16 = vmax.f32 %v6978_v31, %v6979_v35  ;;  %v7416_v30 = vsel %vm7372_vm6, %v6973_v33, %v7415_v13  ;;  %v7421_v43 = vsel %vm5920_vm5, %v6966_v15, %v18492_v40  ;;  %v5830_v26 = vcombine.high %v5649_v36, %v5650_v53 }
 0x2a6   : > { %v6994_v9 = vmax.f32 %v6992_v59, %v6993_v46  ;;  %v7001_v11 = vmax.f32 %v6999_v3, %v7000_v7  ;;  %v7007_v10 = vrot.slane %v7006_v60, 1  ;;  %v7417_v42 = vsel %vm5922_vm7, %v6987_v5, %v7416_v30  ;;  %v15829_v59 = vld [vmem:[%s21049_s3 + $0x8] sm:$0xff]  }
 0x2a7   : > { %v7422_v12 = vsel %vm7372_vm6, %v6980_v16, %v7421_v43  ;;  %v5837_v41 = vrot.slane %v5829_v21, %v18115_v29  ;;  %v5844_v55 = vrot.slane %v5830_v26, %v18115_v29  ;;  %v5651_v37 = vmax.f32 %v18226_v61, 0.0  ;;  %8444 = vmatpush1.bf16.msra.mxu0 %v15829_v59 }
 0x2a8   : > { %v7008_v4 = vmax.f32 %v7006_v60, %v7007_v10  ;;  %v18530_v32 = vsel %vm7375_vm10, %v7001_v11, %v7417_v42  ;;  %v7423_v51 = vsel %vm5922_vm7, %v6994_v9, %v7422_v12  ;;  %v5652_v36 = vmax.f32 %v18231_v57, 0.0  ;;  %v15830_v10 = vld [vmem:[%s21049_s3 + $0x10] sm:$0xff]   ;;  %8445 = vmatprep.subr.bf16.mxu0 %v21093_v56 }
 0x2a9   : > { %v5845_v40 = vcombine.high %v5837_v41, %v5837_v41  ;;  %v5846_v53 = vcombine.high %v5844_v55, %v5844_v55  ;;  %v6017_v25 = vrot.slane %v5837_v41, 7  ;;  %v6023_v8 = vrot.slane %v5844_v55, 7 }
 0x2aa   : > { %v18535_v17 = vsel %vm7375_vm10, %v7008_v4, %v7423_v51  ;;  %v5847_v21 = vcombine.low %v5651_v37, %v5652_v36  ;;  %v5848_v45 = vcombine.high %v5651_v37, %v5652_v36  ;;  %v5653_v34 = vmax.f32 %v18285_v2, 0.0 }
 0x2ab   : > { %v6018_v61 = vsel %vm18130_vm15, %v6016_v23, %v6017_v25  ;;  %v6019_v38 = vrot.slane %v6017_v25, 2  ;;  %v6020_v39 = vrot.slane %v5845_v40, 7  ;;  %v6025_v28 = vrot.slane %v6023_v8, 2  ;;  %8446 = vmatpush1.bf16.msra.mxu0 %v15830_v10 }
 0x2ac   : > { %v18542_v57 = vrot.slane %v5846_v53, 7  ;;  %v6359_v20 = vrot.slane %v6018_v61, %v18115_v29  ;;  %v18546_v63 = vrot.slane %v5847_v21, %v18115_v29  ;;  %v18549_v58 = vrot.slane %v5848_v45, %v18115_v29  ;;  %8447 = vmatprep.subr.bf16.mxu0 %v21093_v56 }
 0x2ad   : > { %v6021_v23 = vsel %vm18130_vm15, %v6019_v38, %v6020_v39  ;;  %v6022_v24 = vrot.slane %v6020_v39, 2  ;;  %v5654_v49 = vmax.f32 %v18296_v27, 0.0  ;;  %v5655_v19 = vmax.f32 %v18326_v48, 0.0  ;;  %v15831_v39 = vld [vmem:[%s21049_s3 + $0x18] sm:$0xff]  }
 0x2ae   : > { %v6027_v62 = vsel %vm18130_vm15, %v6025_v28, %v18542_v57  ;;  %v6028_v0 = vrot.slane %v18542_v57, 2  ;;  %v6360_v31 = vcombine.high %v6359_v20, %v6359_v20  ;;  %v6367_v52 = vrot.slane %v6021_v23, %v18115_v29 }
 0x2af   : > { %v6024_v3 = vsel %vm18130_vm15, %v6022_v24, %v6023_v8  ;;  %v6383_v1 = vrot.slane %v6027_v62, %v18115_v29  ;;  %v7009_v15 = vsel %vm6601_vm13, %v6359_v20, -inf  ;;  %v5863_v33 = vcombine.high %v18546_v63, %v18546_v63  ;;  %8448 = vmatpush1.bf16.msra.mxu0 %v15831_v39 }
 0x2b0   : > { %v6368_v35 = vcombine.high %v6367_v52, %v6367_v52  ;;  %v6375_v13 = vrot.slane %v6024_v3, %v18115_v29  ;;  %v7010_v5 = vrot.slane %v7009_v15, 4  ;;  %v7016_v46 = vsel %vm6609_vm14, %v6360_v31, -inf  ;;  %8449 = vmatprep.subr.bf16.mxu0 %v21093_v56 }
 0x2b1   : > { %v6384_v7 = vcombine.high %v6383_v1, %v6383_v1  ;;  %v7017_v60 = vrot.slane %v7016_v46, 4  ;;  %v7023_v16 = vsel %vm6601_vm13, %v6367_v52, -inf  ;;  %v7051_v30 = vsel %vm6601_vm13, %v6383_v1, -inf }
 0x2b2   : > { %v6376_v43 = vcombine.high %v6375_v13, %v6375_v13  ;;  %v7011_v26 = vmax.f32 %v7009_v15, %v7010_v5  ;;  %v7024_v9 = vrot.slane %v7023_v16, 4  ;;  %v7030_v11 = vsel %vm6609_vm14, %v6368_v35, -inf }
 0x2b3   : > { %v7018_v42 = vmax.f32 %v7016_v46, %v7017_v60  ;;  %v7031_v12 = vrot.slane %v7030_v11, 4  ;;  %v7037_v41 = vsel %vm6601_vm13, %v6375_v13, -inf  ;;  %v7052_v55 = vrot.slane %v7051_v30, 4 }
 0x2b4   : > { %v7012_v37 = vrot.slane %v7011_v26, 2  ;;  %v7025_v4 = vmax.f32 %v7023_v16, %v7024_v9  ;;  %v7038_v51 = vrot.slane %v7037_v41, 4  ;;  %v7044_v36 = vsel %vm6609_vm14, %v6376_v43, -inf }
 0x2b5   : > { %v7019_v40 = vrot.slane %v7018_v42, 2  ;;  %v7032_v53 = vmax.f32 %v7030_v11, %v7031_v12  ;;  %v7045_v25 = vrot.slane %v7044_v36, 4  ;;  %v7053_v8 = vmax.f32 %v7051_v30, %v7052_v55 }
 0x2b6   : > { %v7013_v21 = vmax.f32 %v7011_v26, %v7012_v37  ;;  %v7026_v45 = vrot.slane %v7025_v4, 2  ;;  %v7039_v61 = vmax.f32 %v7037_v41, %v7038_v51  ;;  %v7058_v38 = vsel %vm6609_vm14, %v6384_v7, -inf  ;;  %v15832_v7 = vld [vmem:[%s21049_s3 + $0x20] sm:$0xff]  }
 0x2b7   : > { %v7020_v28 = vmax.f32 %v7018_v42, %v7019_v40  ;;  %v7033_v20 = vrot.slane %v7032_v53, 2  ;;  %v7046_v54 = vmax.f32 %v7044_v36, %v7045_v25  ;;  %v7054_v23 = vrot.slane %v7053_v8, 2  ;;  %8450 = vmatpush1.bf16.msra.mxu0 %v15832_v7 }
 0x2b8   : > { %v7014_v24 = vrot.slane %v7013_v21, 1  ;;  %v7027_v62 = vmax.f32 %v7025_v4, %v7026_v45  ;;  %v7040_v31 = vrot.slane %v7039_v61, 2  ;;  %v7059_v52 = vrot.slane %v7058_v38, 4  ;;  %8451 = vmatprep.subr.bf16.mxu0 %v21093_v56 }
 0x2b9   : > { %v7021_v59 = vrot.slane %v7020_v28, 1  ;;  %v7034_v3 = vmax.f32 %v7032_v53, %v7033_v20  ;;  %v7047_v1 = vrot.slane %v7046_v54, 2  ;;  %v7055_v15 = vmax.f32 %v7053_v8, %v7054_v23 }
 0x2ba   : > { %v7015_v35 = vmax.f32 %v7013_v21, %v7014_v24  ;;  %v7028_v13 = vrot.slane %v7027_v62, 1  ;;  %v7041_v5 = vmax.f32 %v7039_v61, %v7040_v31  ;;  %v7060_v46 = vmax.f32 %v7058_v38, %v7059_v52 }
 0x2bb   : > { %v7022_v60 = vmax.f32 %v7020_v28, %v7021_v59  ;;  %v7035_v16 = vrot.slane %v7034_v3, 1  ;;  %v7048_v30 = vmax.f32 %v7046_v54, %v7047_v1  ;;  %v7056_v43 = vrot.slane %v7055_v15, 1 }
 0x2bc   : > { %v7029_v26 = vmax.f32 %v7027_v62, %v7028_v13  ;;  %v7042_v9 = vrot.slane %v7041_v5, 1  ;;  %v7061_v11 = vrot.slane %v7060_v46, 2  ;;  %v7419_v10 = vsel %vm5924_vm9, %v7015_v35, %v18530_v32 }
 0x2bd   : > { %v7036_v42 = vmax.f32 %v7034_v3, %v7035_v16  ;;  %v7049_v12 = vrot.slane %v7048_v30, 1  ;;  %v7057_v41 = vmax.f32 %v7055_v15, %v7056_v43  ;;  %v7425_v55 = vsel %vm5924_vm9, %v7022_v60, %v18535_v17 }
 0x2be   : > { %v7043_v37 = vmax.f32 %v7041_v5, %v7042_v9  ;;  %v7062_v4 = vmax.f32 %v7060_v46, %v7061_v11  ;;  %v7420_v51 = vsel %vm7378_vm11, %v7029_v26, %v7419_v10  ;;  %v18600_v36 = vcombine.high %v18549_v58, %v18549_v58 }
 0x2bf   : > { %v7050_v40 = vmax.f32 %v7048_v30, %v7049_v12  ;;  %v7426_v53 = vsel %vm7378_vm11, %v7036_v42, %v7425_v55  ;;  %7481 = vst [vmem:[#allocation2 + $0x40] sm:$0xfe] %v7420_v51  ;;  %v6029_v32 = vrot.slane %v18546_v63, 7  ;;  %v6032_v25 = vrot.slane %v5863_v33, 7 }
 0x2c0   : > { %v7063_v17 = vrot.slane %v7062_v4, 1  ;;  %v18609_v8 = vsel %vm7386_vm4, %v7057_v41, %v7043_v37  ;;  %7482 = vst.msk [vmem:[#allocation2 + $0x48] sm:$0xfe] %vm7472_vm8, %v7426_v53  ;;  %v6035_v21 = vrot.slane %v18549_v58, 7  ;;  %v14714_v45 = vrot.slane %v18600_v36, 9 }
 0x2c1   : > { %v6030_v61 = vsel %vm18130_vm15, %v6028_v0, %v6029_v32  ;;  %v6031_v38 = vrot.slane %v6029_v32, 2  ;;  %v6034_v63 = vrot.slane %v6032_v25, 2  ;;  %v6101_v33 = vrot.slane %v18600_v36, %v16370_v18 }
 0x2c2   : > { %v7064_v39 = vmax.f32 %v7062_v4, %v7063_v17  ;;  %v6391_v28 = vrot.slane %v6030_v61, %v18115_v29  ;;  %v7511_v20 = vrot.slane %v18549_v58, %v16370_v18  ;;  %v5865_v54 = vcombine.low %v5653_v34, %v5654_v49 }
 0x2c3   : > { %v6033_v57 = vsel %vm18130_vm15, %v6031_v38, %v6032_v25  ;;  %v6036_v0 = vsel %vm18130_vm15, %v6034_v63, %v6035_v21  ;;  %6119 = vst.msk [vmem:[#allocation2 + $0x60] ss:$8 sm:$0x3] %vm18123_vm12, %v6101_v33  ;;  %v5866_v23 = vcombine.high %v5653_v34, %v5654_v49  ;;  %v5656_v58 = vmax.f32 %v18328_v44, 0.0 }
 0x2c4   : > { %v18639_v24 = vsel %vm7386_vm4, %v7064_v39, %v7050_v40  ;;  %v6392_v62 = vcombine.high %v6391_v28, %v6391_v28  ;;  %v6399_v31 = vrot.slane %v6033_v57, %v18115_v29  ;;  %v6407_v52 = vrot.slane %v6036_v0, %v18115_v29 }
 0x2c5   : > { %v7065_v59 = vsel %vm6601_vm13, %v6391_v28, -inf  ;;  %v7512_v3 = vcombine.high %v7511_v20, %v7511_v20  ;;  %v5873_v1 = vrot.slane %v5865_v54, %v18115_v29  ;;  %v5880_v27 = vrot.slane %v5866_v23, %v18115_v29 }
 0x2c6   : > { %v6400_v15 = vcombine.high %v6399_v31, %v6399_v31  ;;  %v6408_v2 = vcombine.high %v6407_v52, %v6407_v52  ;;  %v7066_v34 = vrot.slane %v7065_v59, 4  ;;  %v7072_v49 = vsel %vm6609_vm14, %v6392_v62, -inf }
 0x2c7   : > { %v7073_v35 = vrot.slane %v7072_v49, 4  ;;  %v7079_v13 = vsel %vm6601_vm13, %v6399_v31, -inf  ;;  %v7093_v5 = vsel %vm6601_vm13, %v6407_v52, -inf  ;;  %7532 = vst.msk [vmem:[#allocation2 + $0x55] ss:$8 sm:$0x3] %vm18123_vm12, %v7512_v3  ;;  %v5881_v46 = vcombine.high %v5873_v1, %v5873_v1 }
 0x2c8   : > { %v7067_v7 = vmax.f32 %v7065_v59, %v7066_v34  ;;  %v7080_v60 = vrot.slane %v7079_v13, 4  ;;  %v7086_v16 = vsel %vm6609_vm14, %v6400_v15, -inf  ;;  %v7094_v30 = vrot.slane %v7093_v5, 4 }
 0x2c9   : > { %v7074_v43 = vmax.f32 %v7072_v49, %v7073_v35  ;;  %v7087_v26 = vrot.slane %v7086_v16, 4  ;;  %v7100_v9 = vsel %vm6609_vm14, %v6408_v2, -inf  ;;  %v5882_v11 = vcombine.high %v5880_v27, %v5880_v27 }
 0x2ca   : > { %v7068_v10 = vrot.slane %v7067_v7, 2  ;;  %v7081_v42 = vmax.f32 %v7079_v13, %v7080_v60  ;;  %v7095_v12 = vmax.f32 %v7093_v5, %v7094_v30  ;;  %v7101_v41 = vrot.slane %v7100_v9, 4 }
 0x2cb   : > { %v7075_v55 = vrot.slane %v7074_v43, 2  ;;  %v7088_v37 = vmax.f32 %v7086_v16, %v7087_v26  ;;  %v6039_v4 = vrot.slane %v5873_v1, 7  ;;  %v6042_v51 = vrot.slane %v5881_v46, 7 }
 0x2cc   : > { %v7069_v36 = vmax.f32 %v7067_v7, %v7068_v10  ;;  %v7082_v40 = vrot.slane %v7081_v42, 2  ;;  %v7096_v53 = vrot.slane %v7095_v12, 2  ;;  %v7102_v32 = vmax.f32 %v7100_v9, %v7101_v41 }
 0x2cd   : > { %v7076_v25 = vmax.f32 %v7074_v43, %v7075_v55  ;;  %v7089_v17 = vrot.slane %v7088_v37, 2  ;;  %v6040_v21 = vsel %vm18130_vm15, %v14714_v45, %v6039_v4  ;;  %v6041_v61 = vrot.slane %v6039_v4, 2 }
 0x2ce   : > { %v7070_v38 = vrot.slane %v7069_v36, 1  ;;  %v7083_v63 = vmax.f32 %v7081_v42, %v7082_v40  ;;  %v7097_v33 = vmax.f32 %v7095_v12, %v7096_v53  ;;  %v7103_v39 = vrot.slane %v7102_v32, 2 }
 0x2cf   : > { %v7077_v28 = vrot.slane %v7076_v25, 1  ;;  %v7090_v20 = vmax.f32 %v7088_v37, %v7089_v17  ;;  %v6043_v54 = vsel %vm18130_vm15, %v6041_v61, %v6042_v51  ;;  %v6044_v57 = vrot.slane %v6042_v51, 2 }
 0x2d0   : > { %v7071_v0 = vmax.f32 %v7069_v36, %v7070_v38  ;;  %v7084_v23 = vrot.slane %v7083_v63, 1  ;;  %v7098_v62 = vrot.slane %v7097_v33, 1  ;;  %v7104_v31 = vmax.f32 %v7102_v32, %v7103_v39 }
 0x2d1   : > { %v7078_v52 = vmax.f32 %v7076_v25, %v7077_v28  ;;  %v7091_v59 = vrot.slane %v7090_v20, 1  ;;  %v6045_v3 = vrot.slane %v5880_v27, 7  ;;  %v18657_v1 = vrot.slane %v5882_v11, 7 }
 0x2d2   : > { %v7085_v45 = vmax.f32 %v7083_v63, %v7084_v23  ;;  %v7099_v15 = vmax.f32 %v7097_v33, %v7098_v62  ;;  %v7105_v2 = vrot.slane %v7104_v31, 1  ;;  %v7428_v34 = vsel %vm5920_vm5, %v7071_v0, %v18609_v8 }
 0x2d3   : > { %v7092_v49 = vmax.f32 %v7090_v20, %v7091_v59  ;;  %v7432_v35 = vsel %vm5920_vm5, %v7078_v52, %v18639_v24  ;;  %v6046_v13 = vsel %vm18130_vm15, %v6044_v57, %v6045_v3  ;;  %v6047_v5 = vrot.slane %v6045_v3, 2 }
 0x2d4   : > { %v7106_v46 = vmax.f32 %v7104_v31, %v7105_v2  ;;  %v7429_v7 = vsel %vm7372_vm6, %v7085_v45, %v7428_v34  ;;  %v6050_v27 = vrot.slane %v18657_v1, 2  ;;  %v6415_v60 = vrot.slane %v6040_v21, %v18115_v29 }
 0x2d5   : > { %v7430_v16 = vsel %vm5922_vm7, %v7099_v15, %v7429_v7  ;;  %v7433_v30 = vsel %vm7372_vm6, %v7092_v49, %v7432_v35  ;;  %v6049_v8 = vsel %vm18130_vm15, %v6047_v5, %v18657_v1  ;;  %v6423_v24 = vrot.slane %v6043_v54, %v18115_v29 }
 0x2d6   : > { %v7434_v43 = vsel %vm5922_vm7, %v7106_v46, %v7433_v30  ;;  %7483 = vst [vmem:[#allocation2 + $0x50] sm:$0x1f] %v7430_v16  ;;  %v6416_v26 = vcombine.high %v6415_v60, %v6415_v60  ;;  %v6431_v9 = vrot.slane %v6046_v13, %v18115_v29  ;;  %v6439_v11 = vrot.slane %v6049_v8, %v18115_v29 }
 0x2d7   : > { %7484 = vst.msk [vmem:[#allocation2 + $0x58] sm:$0x1f] %vm7475_vm3, %v7434_v43  ;;  %v6424_v10 = vcombine.high %v6423_v24, %v6423_v24  ;;  %v7107_v42 = vsel %vm6601_vm13, %v6415_v60, -inf  ;;  %v7121_v12 = vsel %vm6601_vm13, %v6423_v24, -inf  ;;  %v5883_v41 = vcombine.low %v5655_v19, %v5656_v58 }
 0x2d8   : > { %v6432_v55 = vcombine.high %v6431_v9, %v6431_v9  ;;  %v6440_v37 = vcombine.high %v6439_v11, %v6439_v11  ;;  %v7108_v4 = vrot.slane %v7107_v42, 4  ;;  %v7114_v51 = vsel %vm6609_vm14, %v6416_v26, -inf }
 0x2d9   : > { %v7115_v36 = vrot.slane %v7114_v51, 4  ;;  %v7122_v40 = vrot.slane %v7121_v12, 4  ;;  %v7128_v53 = vsel %vm6609_vm14, %v6424_v10, -inf  ;;  %v7135_v32 = vsel %vm6601_vm13, %v6431_v9, -inf }
 0x2da   : > { %v7109_v25 = vmax.f32 %v7107_v42, %v7108_v4  ;;  %v7129_v17 = vrot.slane %v7128_v53, 4  ;;  %v7136_v21 = vrot.slane %v7135_v32, 4  ;;  %v7142_v61 = vsel %vm6609_vm14, %v6432_v55, -inf }
 0x2db   : > { %v7116_v38 = vmax.f32 %v7114_v51, %v7115_v36  ;;  %v7123_v63 = vmax.f32 %v7121_v12, %v7122_v40  ;;  %v7143_v33 = vrot.slane %v7142_v61, 4  ;;  %v7149_v39 = vsel %vm6601_vm13, %v6439_v11, -inf }
 0x2dc   : > { %v7110_v28 = vrot.slane %v7109_v25, 2  ;;  %v7130_v20 = vmax.f32 %v7128_v53, %v7129_v17  ;;  %v7137_v54 = vmax.f32 %v7135_v32, %v7136_v21  ;;  %v7150_v57 = vrot.slane %v7149_v39, 4  ;;  %v18696_v32 = vld [vmem:[#allocation2 + $0x8] sm:$0xff] }
 0x2dd   : > { %v7117_v0 = vrot.slane %v7116_v38, 2  ;;  %v7124_v23 = vrot.slane %v7123_v63, 2  ;;  %v7144_v62 = vmax.f32 %v7142_v61, %v7143_v33  ;;  %v7156_v31 = vsel %vm6609_vm14, %v6440_v37, -inf }
 0x2de   : > { %v7111_v52 = vmax.f32 %v7109_v25, %v7110_v28  ;;  %v7131_v59 = vrot.slane %v7130_v20, 2  ;;  %v7138_v3 = vrot.slane %v7137_v54, 2  ;;  %v7151_v45 = vmax.f32 %v7149_v39, %v7150_v57 }
 0x2df   : > { %v7118_v15 = vmax.f32 %v7116_v38, %v7117_v0  ;;  %v7125_v2 = vmax.f32 %v7123_v63, %v7124_v23  ;;  %v7145_v34 = vrot.slane %v7144_v62, 2  ;;  %v7157_v49 = vrot.slane %v7156_v31, 4 }
 0x2e0   : > { %v7112_v35 = vrot.slane %v7111_v52, 1  ;;  %v7132_v13 = vmax.f32 %v7130_v20, %v7131_v59  ;;  %v7139_v5 = vmax.f32 %v7137_v54, %v7138_v3  ;;  %v7152_v46 = vrot.slane %v7151_v45, 2 }
 0x2e1   : > { %v7119_v7 = vrot.slane %v7118_v15, 1  ;;  %v7126_v60 = vrot.slane %v7125_v2, 1  ;;  %v7146_v16 = vmax.f32 %v7144_v62, %v7145_v34  ;;  %v7158_v30 = vmax.f32 %v7156_v31, %v7157_v49  ;;  %v15833_v31 = vld [vmem:[%s21049_s3 + $0x28] sm:$0xff]  }
 0x2e2   : > { %v7113_v8 = vmax.f32 %v7111_v52, %v7112_v35  ;;  %v7133_v24 = vrot.slane %v7132_v13, 1  ;;  %v7140_v43 = vrot.slane %v7139_v5, 1  ;;  %v7153_v26 = vmax.f32 %v7151_v45, %v7152_v46  ;;  %8452 = vmatpush1.bf16.msra.mxu0 %v15833_v31 }
 0x2e3   : > { %v7120_v9 = vmax.f32 %v7118_v15, %v7119_v7  ;;  %v7127_v11 = vmax.f32 %v7125_v2, %v7126_v60  ;;  %v7147_v10 = vrot.slane %v7146_v16, 1  ;;  %v7159_v42 = vrot.slane %v7158_v30, 2  ;;  %8453 = vmatprep.subr.bf16.mxu0 %v21093_v56 }
 0x2e4   : > { %v7134_v12 = vmax.f32 %v7132_v13, %v7133_v24  ;;  %v7141_v55 = vmax.f32 %v7139_v5, %v7140_v43  ;;  %v7154_v37 = vrot.slane %v7153_v26, 1  ;;  %v5884_v4 = vcombine.high %v5655_v19, %v5656_v58  ;;  %v18702_v58 = vld [vmem:[#allocation2] sm:$0xff] }
 0x2e5   : > { %v7148_v51 = vmax.f32 %v7146_v16, %v7147_v10  ;;  %v7160_v36 = vmax.f32 %v7158_v30, %v7159_v42  ;;  %v7435_v40 = vsel %vm5920_vm5, %v7127_v11, %v7113_v8  ;;  %v5891_v53 = vrot.slane %v5883_v41, %v18115_v29 }
 0x2e6   : > { %v7155_v25 = vmax.f32 %v7153_v26, %v7154_v37  ;;  %v7436_v17 = vsel %vm7372_vm6, %v7141_v55, %v7435_v40  ;;  %v7441_v21 = vsel %vm5920_vm5, %v7134_v12, %v7120_v9  ;;  %v5898_v61 = vrot.slane %v5884_v4, %v18115_v29 }
 0x2e7   : > { %v7161_v38 = vrot.slane %v7160_v36, 1  ;;  %v7442_v44 = vsel %vm7372_vm6, %v7148_v51, %v7441_v21  ;;  %v5899_v48 = vcombine.high %v5891_v53, %v5891_v53  ;;  %v6051_v19 = vrot.slane %v5891_v53, 7 }
 0x2e8   : > { %v18705_v63 = vsel %vm5922_vm7, %v7155_v25, %v7436_v17  ;;  %v5900_v41 = vcombine.high %v5898_v61, %v5898_v61  ;;  %v6057_v33 = vrot.slane %v5898_v61, 7  ;;  %v15653_v39 = vpack.i.bf16 %v18696_v32, %v18702_v58 }
 0x2e9   : > { %v7162_v28 = vmax.f32 %v7160_v36, %v7161_v38  ;;  %v6052_v20 = vsel %vm18130_vm15, %v6050_v27, %v6051_v19  ;;  %v6053_v54 = vrot.slane %v6051_v19, 2  ;;  %v6054_v57 = vrot.slane %v5899_v48, 7 }
 0x2ea   : > { %v6059_v0 = vrot.slane %v6057_v33, 2  ;;  %v18713_v23 = vrot.slane %v5900_v41, 7  ;;  %v6447_v62 = vrot.slane %v6052_v20, %v18115_v29  ;;  %15654 = vrot.lane.b32.xlu0 %v15653_v39, %s16225_s24 }
 0x2eb   : > { %v18721_v52 = vsel %vm5922_vm7, %v7162_v28, %v7442_v44  ;;  %v6055_v1 = vsel %vm18130_vm15, %v6053_v54, %v6054_v57  ;;  %v6056_v27 = vrot.slane %v6054_v57, 2 }
 0x2ec   : > { %v6061_v59 = vsel %vm18130_vm15, %v6059_v0, %v18713_v23  ;;  %v6448_v3 = vcombine.high %v6447_v62, %v6447_v62  ;;  %v6455_v45 = vrot.slane %v6055_v1, %v18115_v29  ;;  %v7163_v34 = vsel %vm6601_vm13, %v6447_v62, -inf }
 0x2ed   : > { %v6058_v15 = vsel %vm18130_vm15, %v6056_v27, %v6057_v33  ;;  %v6471_v2 = vrot.slane %v6061_v59, %v18115_v29  ;;  %v7164_v13 = vrot.slane %v7163_v34, 4 }
 0x2ee   : > { %v6456_v49 = vcombine.high %v6455_v45, %v6455_v45  ;;  %v6463_v35 = vrot.slane %v6058_v15, %v18115_v29  ;;  %v7170_v5 = vsel %vm6609_vm14, %v6448_v3, -inf  ;;  %v7177_v60 = vsel %vm6601_vm13, %v6455_v45, -inf }
 0x2ef   : > { %v6472_v46 = vcombine.high %v6471_v2, %v6471_v2  ;;  %v7171_v7 = vrot.slane %v7170_v5, 4  ;;  %v7205_v16 = vsel %vm6601_vm13, %v6471_v2, -inf  ;;  %v7165_v8 = vmax.f32 %v7163_v34, %v7164_v13 }
 0x2f0   : > { %v6464_v30 = vcombine.high %v6463_v35, %v6463_v35  ;;  %v7178_v24 = vrot.slane %v7177_v60, 4  ;;  %v7184_v43 = vsel %vm6609_vm14, %v6456_v49, -inf  ;;  %v7191_v11 = vsel %vm6601_vm13, %v6463_v35, -inf }
 0x2f1   : > { %v7172_v26 = vmax.f32 %v7170_v5, %v7171_v7  ;;  %v7185_v9 = vrot.slane %v7184_v43, 4  ;;  %v7206_v10 = vrot.slane %v7205_v16, 4  ;;  %v7166_v42 = vrot.slane %v7165_v8, 2  ;;  %v18747_v5 = vld [vmem:[#allocation2 + $0x18] sm:$0x3f] }
 0x2f2   : > { %v7179_v12 = vmax.f32 %v7177_v60, %v7178_v24  ;;  %v7192_v55 = vrot.slane %v7191_v11, 4  ;;  %v7198_v37 = vsel %vm6609_vm14, %v6464_v30, -inf  ;;  %v7212_v17 = vsel %vm6609_vm14, %v6472_v46, -inf }
 0x2f3   : > { %v7173_v4 = vrot.slane %v7172_v26, 2  ;;  %v7186_v51 = vmax.f32 %v7184_v43, %v7185_v9  ;;  %v7199_v36 = vrot.slane %v7198_v37, 4  ;;  %v7167_v40 = vmax.f32 %v7165_v8, %v7166_v42  ;;  %v18752_v8 = vld [vmem:[#allocation2 + $0x10] sm:$0x3f]  ;;  %v18762_v42 = vld [vmem:[#allocation2 + $0x38] sm:$0x3f] }
 0x2f4   : > { %v7180_v53 = vrot.slane %v7179_v12, 2  ;;  %v7193_v25 = vmax.f32 %v7191_v11, %v7192_v55  ;;  %v7207_v44 = vmax.f32 %v7205_v16, %v7206_v10  ;;  %v7213_v33 = vrot.slane %v7212_v17, 4  ;;  %v18760_v10 = vld [vmem:[#allocation2 + $0x20] sm:$0xff]  ;;  %v15834_v55 = vld [vmem:[%s21049_s3 + $0x30] sm:$0xff]  }
 0x2f5   : > { %v7174_v21 = vmax.f32 %v7172_v26, %v7173_v4  ;;  %v7187_v61 = vrot.slane %v7186_v51, 2  ;;  %v7200_v38 = vmax.f32 %v7198_v37, %v7199_v36  ;;  %v7168_v48 = vrot.slane %v7167_v40, 1  ;;  %v18776_v36 = vld [vmem:[#allocation2 + $0x30] sm:$0x3f]  ;;  %8454 = vmatpush1.bf16.msra.mxu0 %v15834_v55 }
 0x2f6   : > { %v7181_v19 = vmax.f32 %v7179_v12, %v7180_v53  ;;  %v7194_v41 = vrot.slane %v7193_v25, 2  ;;  %v7214_v62 = vmax.f32 %v7212_v17, %v7213_v33  ;;  %v7208_v59 = vrot.slane %v7207_v44, 2  ;;  %8455 = vmatprep.subr.bf16.mxu0 %v21093_v56 }
 0x2f7   : > { %v7175_v39 = vrot.slane %v7174_v21, 1  ;;  %v7188_v28 = vmax.f32 %v7186_v51, %v7187_v61  ;;  %v7201_v20 = vrot.slane %v7200_v38, 2  ;;  %v7169_v54 = vmax.f32 %v7167_v40, %v7168_v48  ;;  %v18778_v40 = vld [vmem:[#allocation2 + $0x40] sm:$0xff]  ;;  %v15835_v48 = vld [vmem:[%s21049_s3 + $0x38] sm:$0xff]  }
 0x2f8   : > { %v7182_v57 = vrot.slane %v7181_v19, 1  ;;  %v7195_v0 = vmax.f32 %v7193_v25, %v7194_v41  ;;  %v7215_v15 = vrot.slane %v7214_v62, 2  ;;  %v5657_v13 = vmax.f32 %v18430_v6, 0.0 }
 0x2f9   : > { %v7176_v31 = vmax.f32 %v7174_v21, %v7175_v39  ;;  %v7189_v1 = vrot.slane %v7188_v28, 1  ;;  %v7202_v27 = vmax.f32 %v7200_v38, %v7201_v20  ;;  %v7438_v2 = vsel %vm7375_vm10, %v7169_v54, %v18705_v63  ;;  %v18754_v63 = vld [vmem:[#allocation2 + $0x28] sm:$0xff]  ;;  %8456 = vmatpush1.bf16.msra.mxu0 %v15835_v48 }
 0x2fa   : > { %v7183_v3 = vmax.f32 %v7181_v19, %v7182_v57  ;;  %v7196_v45 = vrot.slane %v7195_v0, 1  ;;  %v5658_v30 = vmax.f32 %v18439_v22, 0.0  ;;  %v7209_v24 = vmax.f32 %v7207_v44, %v7208_v59  ;;  %v18764_v22 = vld [vmem:[#allocation2 + $0x48] sm:$0xff]  ;;  %8457 = vmatprep.subr.bf16.mxu0 %v21093_v56 }
 0x2fb   : > { %v7190_v34 = vmax.f32 %v7188_v28, %v7189_v1  ;;  %v7203_v49 = vrot.slane %v7202_v27, 1  ;;  %v7444_v35 = vsel %vm7375_vm10, %v7176_v31, %v18721_v52  ;;  %v7216_v43 = vmax.f32 %v7214_v62, %v7215_v15  ;;  %v15836_v1 = vld [vmem:[%s21049_s3 + $0x40] sm:$0xff]  }
 0x2fc   : > { %v7197_v46 = vmax.f32 %v7195_v0, %v7196_v45  ;;  %v7439_v7 = vsel %vm5924_vm9, %v7183_v3, %v7438_v2  ;;  %v15658_v6 = vpack.i.bf16 %v18747_v5, %v18752_v8  ;;  %v5901_v9 = vcombine.low %v5657_v13, %v5658_v30 }
 0x2fd   : > { %v7204_v60 = vmax.f32 %v7202_v27, %v7203_v49  ;;  %v7445_v16 = vsel %vm5924_vm9, %v7190_v34, %v7444_v35  ;;  %v5902_v11 = vcombine.high %v5657_v13, %v5658_v30  ;;  %v15663_v12 = vpack.i.bf16 %v18754_v63, %v18760_v10  ;;  %8458 = vmatpush1.bf16.msra.mxu0 %v15836_v1 }
 0x2fe   : > { %v7440_v52 = vsel %vm7378_vm11, %v7197_v46, %v7439_v7  ;;  %15659 = vrot.lane.b32.xlu0 %v15658_v6, %s16225_s24  ;;  %v6062_v37 = vrot.slane %v18713_v23, 2  ;;  %v5909_v4 = vrot.slane %v5901_v9, %v18115_v29  ;;  %v7210_v53 = vrot.slane %v7209_v24, 1  ;;  %8459 = vmatprep.subr.bf16.mxu0 %v21093_v56 }
 0x2ff   : > { %v7446_v26 = vsel %vm7378_vm11, %v7204_v60, %v7445_v16  ;;  %7485 = vst [vmem:[#allocation2 + $0x60] sm:$0xfe] %v7440_v52  ;;  %v5916_v51 = vrot.slane %v5902_v11, %v18115_v29  ;;  %v7217_v25 = vrot.slane %v7216_v43, 1  ;;  %15664 = vrot.lane.b32.xlu1 %v15663_v12, %s16225_s24  ;;  %v15668_v17 = vpack.i.bf16 %v18762_v42, %v18776_v36 }
 0x300   : > { %7486 = vst.msk [vmem:[#allocation2 + $0x68] sm:$0xfe] %vm7472_vm8, %v7446_v26  ;;  %v15673_v21 = vpack.i.bf16 %v18764_v22, %v18778_v40  ;;  %v5917_v61 = vcombine.high %v5909_v4, %v5909_v4  ;;  %v6063_v38 = vrot.slane %v5909_v4, 7  ;;  %v18795_v57 = vmax.f32 %v7209_v24, %v7210_v53 }
 0x301   : > { %v5918_v23 = vcombine.high %v5916_v51, %v5916_v51  ;;  %v6069_v44 = vrot.slane %v5916_v51, 7  ;;  %v18797_v0 = vmax.f32 %v7216_v43, %v7217_v25  ;;  %v15837_v43 = vld [vmem:[%s21049_s3 + $0x48] sm:$0xff]   ;;  %vm8817_vm8 = vcmask 654336  }
 0x302   : > { %15674 = vrot.lane.b32.xlu0 %v15673_v21, %s16225_s24  ;;  %v6064_v19 = vsel %vm18130_vm15, %v6062_v37, %v6063_v38  ;;  %v6065_v41 = vrot.slane %v6063_v38, 2  ;;  %v6066_v33 = vrot.slane %v5917_v61, 7  ;;  %8460 = vmatpush1.bf16.msra.mxu0 %v15837_v43  ;;  %vm8909_vm9 = vsmask.f32 7966 }
 0x303   : > { %v6071_v39 = vrot.slane %v6069_v44, 2  ;;  %v6072_v28 = vrot.slane %v5918_v23, 7  ;;  %v6479_v20 = vrot.slane %v6064_v19, %v18115_v29  ;;  %v7519_v54 = vrot.slane %v5918_v23, %v16370_v18  ;;  %15669 = vrot.lane.b32.xlu1 %v15668_v17, %s16225_s24  ;;  %v15838_v23 = vld [vmem:[%s21049_s3 + $0x50] sm:$0xff]   ;;  %8461 = vmatprep.subr.bf16.mxu0 %v21093_v56 }
 0x304   : > { %v6067_v62 = vsel %vm18130_vm15, %v6065_v41, %v6066_v33  ;;  %v6068_v31 = vrot.slane %v6066_v33, 2 }
 0x305   : > { %v6073_v27 = vsel %vm18130_vm15, %v6071_v39, %v6072_v28  ;;  %v6480_v59 = vcombine.high %v6479_v20, %v6479_v20  ;;  %v6487_v3 = vrot.slane %v6067_v62, %v18115_v29  ;;  %v7219_v45 = vsel %vm6601_vm13, %v6479_v20, -inf }
 0x306   : > { %v6070_v15 = vsel %vm18130_vm15, %v6068_v31, %v6069_v44  ;;  %v6503_v2 = vrot.slane %v6073_v27, %v18115_v29  ;;  %v7220_v34 = vrot.slane %v7219_v45, 4  ;;  %v7520_v49 = vcombine.high %v7519_v54, %v7519_v54  ;;  %8462 = vmatpush1.bf16.msra.mxu0 %v15838_v23  ;;  %v18856_v23 = vld [vmem:[#allocation2 + $0x60] sm:$0xff] }
 0x307   : > { %v6488_v35 = vcombine.high %v6487_v3, %v6487_v3  ;;  %v6495_v13 = vrot.slane %v6070_v15, %v18115_v29  ;;  %v7226_v46 = vsel %vm6609_vm14, %v6480_v59, -inf  ;;  %v7233_v7 = vsel %vm6601_vm13, %v6487_v3, -inf  ;;  %8463 = vmatprep.subr.bf16.mxu0 %v21093_v56 }
 0x308   : > { %v6504_v60 = vcombine.high %v6503_v2, %v6503_v2  ;;  %v7221_v16 = vmax.f32 %v7219_v45, %v7220_v34  ;;  %v7227_v30 = vrot.slane %v7226_v46, 4  ;;  %v7234_v24 = vrot.slane %v7233_v7, 4  ;;  %7535 = vst.msk [vmem:[#allocation2 + $0x75] ss:$8 sm:$0x3] %vm18123_vm12, %v7520_v49  ;;  %v15839_v45 = vld [vmem:[%s21049_s3 + $0x58] sm:$0xff]   ;;  %vm19146_vm12 = vmand %vm7378_vm11, %vm8909_vm9 }
 0x309   : > { %v6496_v52 = vcombine.high %v6495_v13, %v6495_v13  ;;  %v7240_v6 = vsel %vm6609_vm14, %v6488_v35, -inf  ;;  %v7247_v26 = vsel %vm6601_vm13, %v6495_v13, -inf  ;;  %v7261_v9 = vsel %vm6601_vm13, %v6503_v2, -inf }
 0x30a   : > { %v7222_v11 = vrot.slane %v7221_v16, 2  ;;  %v7228_v12 = vmax.f32 %v7226_v46, %v7227_v30  ;;  %v7235_v55 = vmax.f32 %v7233_v7, %v7234_v24  ;;  %v7241_v37 = vrot.slane %v7240_v6, 4  ;;  %8464 = vmatpush1.bf16.msra.mxu0 %v15839_v45 }
 0x30b   : > { %v7248_v14 = vrot.slane %v7247_v26, 4  ;;  %v7254_v4 = vsel %vm6609_vm14, %v6496_v52, -inf  ;;  %v7262_v51 = vrot.slane %v7261_v9, 4  ;;  %v7268_v53 = vsel %vm6609_vm14, %v6504_v60, -inf  ;;  %8465 = vmatprep.subr.bf16.mxu0 %v21093_v56 }
 0x30c   : > { %v7223_v25 = vmax.f32 %v7221_v16, %v7222_v11  ;;  %v7229_v17 = vrot.slane %v7228_v12, 2  ;;  %v7236_v21 = vrot.slane %v7235_v55, 2  ;;  %v7242_v61 = vmax.f32 %v7240_v6, %v7241_v37 }
 0x30d   : > { %v7249_v38 = vmax.f32 %v7247_v26, %v7248_v14  ;;  %v7255_v44 = vrot.slane %v7254_v4, 4  ;;  %v7263_v48 = vmax.f32 %v7261_v9, %v7262_v51  ;;  %v7269_v19 = vrot.slane %v7268_v53, 4  ;;  %v18842_v14 = vld [vmem:[#allocation2 + $0x58] sm:$0x3f] }
 0x30e   : > { %v7224_v41 = vrot.slane %v7223_v25, 1  ;;  %v7230_v33 = vmax.f32 %v7228_v12, %v7229_v17  ;;  %v7237_v39 = vmax.f32 %v7235_v55, %v7236_v21  ;;  %v7243_v28 = vrot.slane %v7242_v61, 2  ;;  %v18851_v17 = vld [vmem:[#allocation2 + $0x50] sm:$0x3f] }
 0x30f   : > { %v7250_v20 = vrot.slane %v7249_v38, 2  ;;  %v7256_v54 = vmax.f32 %v7254_v4, %v7255_v44  ;;  %v7264_v62 = vrot.slane %v7263_v48, 2  ;;  %v7270_v31 = vmax.f32 %v7268_v53, %v7269_v19  ;;  %v18845_v53 = vld [vmem:[#allocation2 + $0x68] sm:$0xff] }
 0x310   : > { %v7225_v1 = vmax.f32 %v7223_v25, %v7224_v41  ;;  %v7231_v27 = vrot.slane %v7230_v33, 1  ;;  %v7238_v59 = vrot.slane %v7237_v39, 1  ;;  %v7244_v3 = vmax.f32 %v7242_v61, %v7243_v28 }
 0x311   : > { %v7251_v15 = vmax.f32 %v7249_v38, %v7250_v20  ;;  %v7257_v2 = vrot.slane %v7256_v54, 2  ;;  %v7265_v34 = vmax.f32 %v7263_v48, %v7264_v62  ;;  %v7271_v49 = vrot.slane %v7270_v31, 2 }
 0x312   : > { %v7232_v35 = vmax.f32 %v7230_v33, %v7231_v27  ;;  %v7239_v13 = vmax.f32 %v7237_v39, %v7238_v59  ;;  %v7245_v46 = vrot.slane %v7244_v3, 1  ;;  %v7447_v7 = vsel %vm7386_vm4, %v7225_v1, %v18795_v57 }
 0x313   : > { %v7252_v60 = vrot.slane %v7251_v15, 1  ;;  %v7258_v16 = vmax.f32 %v7256_v54, %v7257_v2  ;;  %v7266_v30 = vrot.slane %v7265_v34, 1  ;;  %v7272_v24 = vmax.f32 %v7270_v31, %v7271_v49 }
 0x314   : > { %v7246_v43 = vmax.f32 %v7244_v3, %v7245_v46  ;;  %v7448_v52 = vsel %vm5920_vm5, %v7239_v13, %v7447_v7  ;;  %v7451_v6 = vsel %vm7386_vm4, %v7232_v35, %v18797_v0  ;;  %v15840_v0 = vld [vmem:[%s21049_s3 + $0x60] ss:$0 sps:$4 sm:$0xff]   ;;  %v15678_v61 = vpack.i.bf16 %v18842_v14, %v18851_v17 }
 0x315   : > { %v7253_v26 = vmax.f32 %v7251_v15, %v7252_v60  ;;  %v7259_v9 = vrot.slane %v7258_v16, 1  ;;  %v7273_v11 = vrot.slane %v7272_v24, 1  ;;  %v7267_v12 = vmax.f32 %v7265_v34, %v7266_v30 }
 0x316   : > { %v7452_v55 = vsel %vm5920_vm5, %v7246_v43, %v7451_v6  ;;  %v15683_v38 = vpack.i.bf16 %v18845_v53, %v18856_v23  ;;  %15679 = vrot.lane.b32.xlu1 %v15678_v61, %s16225_s24  ;;  %v8439_v44 = vsel %vm1663_vm0, %v15840_v0, 0  ;;  %vm8425_vm0 = vcmask 588800  }
 0x317   : > { %v7260_v57 = vmax.f32 %v7258_v16, %v7259_v9  ;;  %v7449_v37 = vsel %vm7372_vm6, %v7253_v26, %v7448_v52  ;;  %v7274_v4 = vmax.f32 %v7272_v24, %v7273_v11  ;;  %8466 = vmatpush1.bf16.msra.mxu0 %v8439_v44  ;;  %vm9225_vm11 = vcmask 1047552  }
 0x318   : > { %v7450_v51 = vsel %vm5922_vm7, %v7267_v12, %v7449_v37  ;;  %15684 = vrot.lane.b32.xlu0 %v15683_v38, %s16225_s24  ;;  %8830 = vmatprep.subr.bf16.mxu0 %v21093_v56  ;;  %vm9226_vm14 = vsmask.f32 7426  ;;  %vm9409_vm9 = vsmask.f32 7448 }
 0x319   : > { %v7453_v25 = vsel %vm7372_vm6, %v7260_v57, %v7452_v55  ;;  %7487 = vst [vmem:[#allocation2 + $0x70] sm:$0x1f] %v7450_v51 }
 0x31a   : > { %v7454_v21 = vsel %vm5922_vm7, %v7274_v4, %v7453_v25 }
 0x31b   : > { %7488 = vst.msk [vmem:[#allocation2 + $0x78] sm:$0x1f] %vm7475_vm3, %v7454_v21 }
 0x320   : > { %v18865_v48 = vld [vmem:[#allocation2 + $0x70] sm:$0x3f] }
 0x322   : > { %v18867_v19 = vld [vmem:[#allocation2 + $0x78] sm:$0x3f] }
 0x323   : > { %v15688_v41 = vpack.i.bf16 %v18867_v19, %v18865_v48 }
 0x325   : > { %15689 = vrot.lane.b32.xlu1 %v15688_v41, %s16225_s24  ;;  %s21006_s24 = scalar_lea.hbm %s21054_s8, %s15382_s20 }
 0x35c   : > { %v15655_v33 = vpop.permute.xlu0 %15654 }
 0x35d   : > { %v15657_v39 = vunpack.i.h.bf16 %v15655_v33  ;;  %v15656_v28 = vunpack.i.l.bf16 %v15655_v33 }
 0x35f   : > { %v7601_v20 = vsel %vm1641_vm2, %v15656_v28, %v15657_v39  ;;  %v7626_v54 = vmax.f32 %v18696_v32, %v15657_v39 }
 0x360   : > { %v7625_v62 = vmax.f32 %v18702_v58, %v7601_v20 }
 0x362   : > { %v14723_v31 = vpack.c.bf16 %v7626_v54, %v7625_v62 }
 0x364   : > { %v7903_v1 = vrot.slane %v14723_v31, %v16370_v18 }
 0x366   : > { %v7911_v27 = vcombine.high %v7903_v1, %v7903_v1  ;;  %v7919_v46 = vrot.slane %v7903_v1, %v16370_v18 }
 0x368   : > { %v7933_v15 = vrot.slane %v7911_v27, %v16370_v18 }
 0x36a   : > { %v8116_v52 = vcombine.low %v7919_v46, %v7933_v15  ;;  %v14731_v6 = vcombine.high %v7919_v46, %v7933_v15 }
 0x36c   : > { %v8126_v39 = vrot.slane %v8116_v52, %v16370_v18  ;;  %v8133_v28 = vrot.slane %v14731_v6, %v16370_v18 }
 0x370   : > { %v15660_v59 = vpop.permute.xlu0 %15659 }
 0x371   : > { %v15662_v3 = vunpack.i.h.bf16 %v15660_v59  ;;  %v15661_v45 = vunpack.i.l.bf16 %v15660_v59  ;;  %v15665_v2 = vpop.permute.xlu1 %15664 }
 0x372   : > { %v15667_v35 = vunpack.i.h.bf16 %v15665_v2  ;;  %v15666_v13 = vunpack.i.l.bf16 %v15665_v2 }
 0x373   : > { %v7628_v34 = vmax.f32 %v18747_v5, %v15662_v3  ;;  %v7602_v49 = vsel %vm1641_vm2, %v15661_v45, %v15662_v3 }
 0x374   : > { %v7627_v7 = vmax.f32 %v18752_v8, %v7602_v49  ;;  %v15675_v60 = vpop.permute.xlu0 %15674  ;;  %v7630_v16 = vmax.f32 %v18754_v63, %v15667_v35  ;;  %v7603_v30 = vsel %vm1641_vm2, %v15666_v13, %v15667_v35  ;;  %v8148_v49 = vcombine.low %v8126_v39, %v8133_v28 }
 0x375   : > { %v15677_v24 = vunpack.i.h.bf16 %v15675_v60  ;;  %v15676_v43 = vunpack.i.l.bf16 %v15675_v60  ;;  %v7629_v9 = vmax.f32 %v18760_v10, %v7603_v30  ;;  %v15670_v11 = vpop.permute.xlu1 %15669  ;;  %v8149_v35 = vcombine.high %v8126_v39, %v8133_v28 }
 0x376   : > { %v14724_v26 = vpack.c.bf16 %v7628_v34, %v7627_v7  ;;  %v15672_v12 = vunpack.i.h.bf16 %v15670_v11  ;;  %v15671_v55 = vunpack.i.l.bf16 %v15670_v11 }
 0x377   : > { %v7634_v57 = vmax.f32 %v18764_v22, %v15677_v24  ;;  %v7605_v37 = vsel %vm1641_vm2, %v15676_v43, %v15677_v24  ;;  %v14725_v51 = vpack.c.bf16 %v7630_v16, %v7629_v9 }
 0x378   : > { %v7910_v4 = vrot.slane %v14724_v26, %v16370_v18  ;;  %v7633_v0 = vmax.f32 %v18778_v40, %v7605_v37  ;;  %v7632_v25 = vmax.f32 %v18762_v42, %v15672_v12  ;;  %v7604_v21 = vsel %vm1641_vm2, %v15671_v55, %v15672_v12 }
 0x379   : > { %v7952_v44 = vrot.slane %v14725_v51, %v16370_v18  ;;  %v7631_v41 = vmax.f32 %v18776_v36, %v7604_v21  ;;  %v8165_v55 = vrot.slane %v8149_v35, %v16370_v18  ;;  %v8158_v37 = vrot.slane %v8148_v49, %v16370_v18 }
 0x37a   : > { %v7912_v61 = vcombine.high %v7910_v4, %v7910_v4  ;;  %v7926_v38 = vrot.slane %v7910_v4, %v16370_v18  ;;  %v14727_v33 = vpack.c.bf16 %v7634_v57, %v7633_v0  ;;  %v14717_v35 = vpack.c.bf16 %v18754_v63, %v18760_v10 }
 0x37b   : > { %v7960_v62 = vcombine.high %v7952_v44, %v7952_v44  ;;  %v7968_v31 = vrot.slane %v7952_v44, %v16370_v18  ;;  %v14726_v1 = vpack.c.bf16 %v7632_v25, %v7631_v41  ;;  %v15841_v41 = vld [vmem:[%s21048_s2] sm:$0xff]  }
 0x37c   : > { %v7940_v20 = vrot.slane %v7912_v61, %v16370_v18  ;;  %v7942_v54 = vcombine.high %v7926_v38, %v7926_v38  ;;  %v8001_v27 = vrot.slane %v14727_v33, %v16370_v18  ;;  %v14715_v61 = vpack.c.bf16 %v18696_v32, %v18702_v58  ;;  %v15842_v32 = vld [vmem:[%s21048_s2 + $0x8] sm:$0xff]  }
 0x37d   : > { %v7982_v3 = vrot.slane %v7960_v62, %v16370_v18  ;;  %v7990_v45 = vcombine.high %v7968_v31, %v7968_v31  ;;  %v7959_v2 = vrot.slane %v14726_v1, %v16370_v18 }
 0x37e   : > { %v8118_v59 = vcombine.low %v7926_v38, %v7940_v20  ;;  %v8119_v15 = vcombine.low %v7942_v54, %v7968_v31  ;;  %v8009_v34 = vcombine.high %v8001_v27, %v8001_v27  ;;  %v18901_v46 = vrot.slane %v8001_v27, %v16370_v18 }
 0x37f   : > { %v7992_v13 = vcombine.high %v7982_v3, %v7982_v3  ;;  %v8182_v16 = vcombine.low %v7982_v3, %v7990_v45  ;;  %v7961_v30 = vcombine.high %v7959_v2, %v7959_v2  ;;  %v7975_v24 = vrot.slane %v7959_v2, %v16370_v18 }
 0x380   : > { %v8140_v7 = vrot.slane %v8118_v59, %v16370_v18  ;;  %v8147_v60 = vrot.slane %v8119_v15, %v16370_v18  ;;  %v18907_v43 = vrot.slane %v8009_v34, %v16370_v18  ;;  %v7665_v62 = vrot.slane %v14715_v61, %v16370_v18  ;;  %v15843_v15 = vld [vmem:[%s21048_s2 + $0x10] sm:$0xff]  }
 0x381   : > { %v7989_v26 = vrot.slane %v7961_v30, %v16370_v18  ;;  %v7991_v9 = vcombine.high %v7975_v24, %v7975_v24  ;;  %v8183_v11 = vcombine.low %v7992_v13, %v7975_v24  ;;  %v8192_v0 = vrot.slane %v8182_v16, %v16370_v18  ;;  %v15844_v24 = vld [vmem:[%s21048_s2 + $0x18] sm:$0xff]  }
 0x382   : > { %v8150_v52 = vcombine.low %v8140_v7, %v8147_v60  ;;  %v8151_v6 = vcombine.high %v8140_v7, %v8147_v60  ;;  %v8185_v12 = vcombine.low %v18901_v46, %v18907_v43  ;;  %v14716_v59 = vpack.c.bf16 %v18747_v5, %v18752_v8 }
 0x383   : > { %v8184_v51 = vcombine.low %v7989_v26, %v7991_v9  ;;  %v8199_v25 = vrot.slane %v8183_v11, %v16370_v18  ;;  %v7673_v2 = vcombine.high %v7665_v62, %v7665_v62  ;;  %v7714_v9 = vrot.slane %v14717_v35, %v16370_v18 }
 0x384   : > { %v8179_v57 = vrot.slane %v8151_v6, %v16370_v18  ;;  %v8172_v4 = vrot.slane %v8150_v52, %v16370_v18  ;;  %v8213_v21 = vrot.slane %v8185_v12, %v16370_v18  ;;  %v7672_v49 = vrot.slane %v14716_v59, %v16370_v18 }
 0x385   : > { %v8206_v33 = vrot.slane %v8184_v51, %v16370_v18  ;;  %v8215_v39 = vcombine.high %v8192_v0, %v8199_v25  ;;  %v8214_v28 = vcombine.low %v8192_v0, %v8199_v25  ;;  %v18951_v52 = vrot.slane %v7673_v2, %v16370_v18 }
 0x386   : > { %v8181_v38 = vcombine.low %v8165_v55, %v8179_v57  ;;  %v8180_v44 = vcombine.low %v8158_v37, %v8172_v4  ;;  %v7674_v26 = vcombine.high %v7672_v49, %v7672_v49  ;;  %v18960_v12 = vrot.slane %v7665_v62, %v16370_v18  ;;  %v15845_v37 = vld [vmem:[%s21048_s2 + $0x20] sm:$0xff]  }
 0x387   : > { %v8217_v20 = vcombine.high %v8206_v33, %v8213_v21  ;;  %v8216_v54 = vcombine.low %v8206_v33, %v8213_v21  ;;  %v8231_v58 = vrot.slane %v8215_v39, %v16370_v18  ;;  %v8224_v1 = vrot.slane %v8214_v28, %v16370_v18 }
 0x388   : > { %14746 = vmatprep.mubr.msk.bf16.mxu0 %vm8425_vm0, %v8181_v38  ;;  %v15680_v34 = vpop.permute.xlu1 %15679  ;;  %v8505_v4 = vcombine.low %v18960_v12, %v18951_v52  ;;  %v14718_v51 = vpack.c.bf16 %v18762_v42, %v18776_v36  ;;  %v14719_v0 = vpack.c.bf16 %v18764_v22, %v18778_v40  ;;  %v18974_v21 = vrot.slane %v7672_v49, %v16370_v18 }
 0x389   : > { %8474 = vmatmul.mubr.bf16.vlgmr.msra.gmra.mrb[28].mxu0 %v8180_v44  ;;  %v8245_v31 = vrot.slane %v8217_v20, %v16370_v18  ;;  %v8238_v27 = vrot.slane %v8216_v54, %v16370_v18  ;;  %v15682_v13 = vunpack.i.h.bf16 %v15680_v34  ;;  %v15681_v5 = vunpack.i.l.bf16 %v15680_v34  ;;  %v15846_v54 = vld [vmem:[%s21048_s2 + $0x28] sm:$0xff]  }
 0x38a   : > { %8831 = vmatpush1.bf16.msra.mxu0 %v15841_v41  ;;  %v15685_v8 = vpop.permute.xlu0 %15684  ;;  %v18977_v61 = vrot.slane %v7674_v26, %v16370_v18  ;;  %v7722_v38 = vcombine.high %v7714_v9, %v7714_v9  ;;  %v18982_v22 = vrot.slane %v7714_v9, %v16370_v18  ;;  %v14732_v40 = vcombine.high %v18901_v46, %v18907_v43 }
 0x38b   : > { %8832 = vmatprep.subr.bf16.mxu0 %v21093_v56  ;;  %v8247_v3 = vcombine.low %v8231_v58, %v8245_v31  ;;  %v8246_v45 = vcombine.low %v8224_v1, %v8238_v27  ;;  %v15687_v7 = vunpack.i.h.bf16 %v15685_v8  ;;  %v15686_v60 = vunpack.i.l.bf16 %v15685_v8 }
 0x38c   : > { %v7636_v16 = vmax.f32 %v18842_v14, %v15682_v13  ;;  %v7606_v30 = vsel %vm1641_vm2, %v15681_v5, %v15682_v13  ;;  %v14750_v46 = vcombine.high %v18960_v12, %v18951_v52  ;;  %v7704_v59 = vcombine.high %v18974_v21, %v18974_v21  ;;  %v15847_v13 = vld [vmem:[%s21048_s2 + $0x30] sm:$0xff]  }
 0x38d   : > { %14747 = vmatprep.mubr.msk.bf16.mxu0 %vm8425_vm0, %v8247_v3  ;;  %v7635_v63 = vmax.f32 %v18851_v17, %v7606_v30  ;;  %v7638_v10 = vmax.f32 %v18845_v53, %v15687_v7  ;;  %v7607_v6 = vsel %vm1641_vm2, %v15686_v60, %v15687_v7  ;;  %v7721_v3 = vrot.slane %v14718_v51, %v16370_v18  ;;  %v15848_v51 = vld [vmem:[%s21048_s2 + $0x38] sm:$0xff]  }
 0x38e   : > { %8833 = vmatpush1.bf16.msra.mxu0 %v15842_v32  ;;  %v7637_v11 = vmax.f32 %v18856_v23, %v7607_v6  ;;  %v8507_v2 = vcombine.low %v18974_v21, %v18977_v61  ;;  %v19004_v34 = vrot.slane %v7722_v38, %v16370_v18  ;;  %v8508_v5 = vcombine.low %v7704_v59, %v18982_v22  ;;  %v15850_v59 = vld [vmem:[%s21048_s2 + $0x48] sm:$0xff]  }
 0x38f   : > { %8834 = vmatprep.subr.bf16.mxu0 %v21093_v56  ;;  %v14728_v55 = vpack.c.bf16 %v7636_v16, %v7635_v63  ;;  %v7763_v8 = vrot.slane %v14719_v0, %v16370_v18  ;;  %v8258_v7 = vrot.slane %v14732_v40, %v16370_v18  ;;  %v7737_v6 = vrot.slane %v7721_v3, %v16370_v18 }
 0x390   : > { %v14729_v57 = vpack.c.bf16 %v7638_v10, %v7637_v11  ;;  %v7723_v10 = vcombine.high %v7721_v3, %v7721_v3  ;;  %v19027_v61 = vrot.slane %v8508_v5, %v16370_v18 }
 0x391   : > { %8482 = vmatmul.mubr.bf16.gmra.mrb[32].mxu0 %v8246_v45  ;;  %v8008_v25 = vrot.slane %v14728_v55, %v16370_v18  ;;  %v7771_v0 = vcombine.high %v7763_v8, %v7763_v8 }
 0x392   : > { %8835 = vmatpush1.bf16.msra.mxu0 %v15843_v15  ;;  %v8050_v44 = vrot.slane %v14729_v57, %v16370_v18 }
 0x393   : > { %8836 = vmatprep.subr.bf16.mxu0 %v21093_v56  ;;  %v8010_v33 = vcombine.high %v8008_v25, %v8008_v25  ;;  %v8024_v42 = vrot.slane %v8008_v25, %v16370_v18  ;;  %v14721_v25 = vpack.c.bf16 %v18845_v53, %v18856_v23  ;;  %v19039_v23 = vrot.slane %v8505_v4, %v16370_v18 }
 0x394   : > { %v8058_v28 = vcombine.high %v8050_v44, %v8050_v44  ;;  %v8066_v20 = vrot.slane %v8050_v44, %v16370_v18  ;;  %v19053_v52 = vrot.slane %v7771_v0, %v16370_v18 }
 0x395   : > { %v8038_v62 = vrot.slane %v8010_v33, %v16370_v18  ;;  %v8040_v32 = vcombine.high %v8024_v42, %v8024_v42 }
 0x396   : > { %8837 = vmatpush1.bf16.msra.mxu0 %v15844_v24  ;;  %v8080_v43 = vrot.slane %v8058_v28, %v16370_v18  ;;  %v8088_v1 = vcombine.high %v8066_v20, %v8066_v20  ;;  %v15849_v28 = vld [vmem:[%s21048_s2 + $0x40] sm:$0xff]  }
 0x397   : > { %8838 = vmatprep.subr.bf16.mxu0 %v21093_v56  ;;  %v15690_v41 = vpop.permute.xlu1 %15689  ;;  %v8249_v45 = vcombine.low %v8024_v42, %v8038_v62  ;;  %v8250_v15 = vcombine.low %v8040_v32, %v8066_v20  ;;  %v14720_v42 = vpack.c.bf16 %v18842_v14, %v18851_v17  ;;  %v19045_v20 = vrot.slane %v14750_v46, %v16370_v18 }
 0x398   : > { %v15692_v36 = vunpack.i.h.bf16 %v15690_v41  ;;  %v15691_v39 = vunpack.i.l.bf16 %v15690_v41  ;;  %v8251_v49 = vcombine.low %v8080_v43, %v8088_v1  ;;  %v8090_v16 = vcombine.high %v8080_v43, %v8080_v43 }
 0x399   : > { %v8265_v60 = vrot.slane %v8249_v45, %v16370_v18  ;;  %v8272_v24 = vrot.slane %v8250_v15, %v16370_v18  ;;  %v19048_v14 = vrot.slane %v8507_v2, %v16370_v18  ;;  %v7812_v17 = vrot.slane %v14721_v25, %v16370_v18 }
 0x39a   : > { %8839 = vmatpush1.bf16.msra.mxu0 %v15845_v37  ;;  %v7640_v58 = vmax.f32 %v18867_v19, %v15692_v36  ;;  %v7608_v31 = vsel %vm1641_vm2, %v15691_v39, %v15692_v36  ;;  %v8279_v63 = vrot.slane %v8251_v49, %v16370_v18  ;;  %v7752_v32 = vcombine.high %v18982_v22, %v18982_v22 }
 0x39b   : > { %8840 = vmatprep.subr.bf16.mxu0 %v21093_v56  ;;  %v7639_v27 = vmax.f32 %v18865_v48, %v7608_v31  ;;  %v8281_v26 = vcombine.high %v8258_v7, %v8265_v60  ;;  %v8280_v9 = vcombine.low %v8258_v7, %v8265_v60  ;;  %v8540_v62 = vcombine.high %v19048_v14, %v19027_v61  ;;  %v15851_v60 = vld [vmem:[%s21048_s2 + $0x50] sm:$0xff]  }
 0x39c   : > { %v8283_v57 = vcombine.high %v8272_v24, %v8279_v63  ;;  %v8282_v37 = vcombine.low %v8272_v24, %v8279_v63  ;;  %v7751_v31 = vrot.slane %v7723_v10, %v16370_v18  ;;  %v7753_v46 = vcombine.high %v7737_v6, %v7737_v6 }
 0x39d   : > { %v14730_v35 = vpack.c.bf16 %v7640_v58, %v7639_v27  ;;  %v8297_v21 = vrot.slane %v8281_v26, %v16370_v18  ;;  %v8290_v36 = vrot.slane %v8280_v9, %v16370_v18  ;;  %v7754_v58 = vcombine.high %v19004_v34, %v19004_v34 }
 0x39e   : > { %8841 = vmatpush1.bf16.msra.mxu0 %v15846_v54  ;;  %v8311_v33 = vrot.slane %v8283_v57, %v16370_v18  ;;  %v8304_v53 = vrot.slane %v8282_v37, %v16370_v18  ;;  %v19066_v43 = vrot.slane %v7763_v8, %v16370_v18  ;;  %v7770_v1 = vrot.slane %v14720_v42, %v16370_v18 }
 0x39f   : > { %8842 = vmatprep.subr.bf16.mxu0 %v21093_v56  ;;  %v8057_v30 = vrot.slane %v14730_v35, %v16370_v18  ;;  %v8538_v22 = vcombine.high %v19039_v23, %v19045_v20  ;;  %v7820_v3 = vcombine.high %v7812_v17, %v7812_v17  ;;  %v7828_v2 = vrot.slane %v7812_v17, %v16370_v18 }
 0x3a0   : > { %v8313_v39 = vcombine.low %v8297_v21, %v8311_v33  ;;  %v8312_v54 = vcombine.low %v8290_v36, %v8304_v53  ;;  %v8574_v15 = vcombine.low %v19066_v43, %v19053_v52  ;;  %v8568_v35 = vrot.slane %v8540_v62, %v16370_v18 }
 0x3a1   : > { %v8059_v11 = vcombine.high %v8057_v30, %v8057_v30  ;;  %v8073_v55 = vrot.slane %v8057_v30, %v16370_v18  ;;  %v8572_v5 = vcombine.low %v7754_v58, %v7737_v6  ;;  %v7772_v8 = vcombine.high %v7770_v1, %v7770_v1 }
 0x3a2   : > { %8843 = vmatpush1.bf16.msra.mxu0 %v15847_v13  ;;  %14748 = vmatprep.mubr.msk.bf16.mxu0 %vm8425_vm0, %v8313_v39  ;;  %v8571_v13 = vcombine.low %v19004_v34, %v7752_v32  ;;  %v8554_v7 = vrot.slane %v8538_v22, %v16370_v18  ;;  %v7786_v30 = vrot.slane %v7770_v1, %v16370_v18  ;;  %vm21227_vm2 = vcmask 1040384  }
 0x3a3   : > { %8844 = vmatprep.subr.bf16.mxu0 %v21093_v56  ;;  %v8087_v38 = vrot.slane %v8059_v11, %v16370_v18  ;;  %v8089_v44 = vcombine.high %v8073_v55, %v8073_v55  ;;  %v8314_v41 = vcombine.low %v8090_v16, %v8073_v55  ;;  %8490 = vmatmul.mubr.bf16.gmra.mrb[36].mxu0 %v8312_v54  ;;  %v15852_v11 = vld [vmem:[%s21048_s2 + $0x58] sm:$0xff]   ;;  %vm19139_vm3 = vmand %vm21227_vm2, %vm797_vm1  ;;  %vm9405_vm2 = vsmask.f32 3336 }
 0x3a4   : > { %v8573_v16 = vcombine.low %v7751_v31, %v7753_v46  ;;  %v7842_v24 = vrot.slane %v7820_v3, %v16370_v18  ;;  %v7850_v34 = vcombine.high %v7828_v2, %v7828_v2  ;;  %v14722_v10 = vpack.c.bf16 %v18867_v19, %v18865_v48 }
 0x3a5   : > { %v8315_v40 = vcombine.low %v8087_v38, %v8089_v44  ;;  %v8322_v12 = vrot.slane %v8314_v41, %v16370_v18  ;;  %v8570_v6 = vcombine.low %v8554_v7, %v8568_v35  ;;  %v8602_v26 = vrot.slane %v8574_v15, %v16370_v18  ;;  %v15853_v41 = vld [vmem:[%s21048_s2 + $0x60] sm:$0xff]  }
 0x3a6   : > { %8845 = vmatpush1.bf16.msra.mxu0 %v15848_v51  ;;  %v7800_v9 = vrot.slane %v7772_v8, %v16370_v18  ;;  %v8588_v55 = vrot.slane %v8572_v5, %v16370_v18  ;;  %v8595_v57 = vrot.slane %v8573_v16, %v16370_v18  ;;  %v7802_v37 = vcombine.high %v7786_v30, %v7786_v30 }
 0x3a7   : > { %8846 = vmatprep.subr.bf16.mxu0 %v21093_v56  ;;  %v8329_v4 = vrot.slane %v8315_v40, %v16370_v18  ;;  %v8539_v48 = vcombine.low %v19048_v14, %v19027_v61  ;;  %v7819_v19 = vrot.slane %v14722_v10, %v16370_v18  ;;  %v8581_v51 = vrot.slane %v8571_v13, %v16370_v18  ;;  %v8911_v10 = vld [vmem:[#allocation3] sm:$0x80] }
 0x3a8   : > { %v8606_v0 = vcombine.high %v8595_v57, %v8602_v26  ;;  %v8640_v25 = vcombine.low %v7842_v24, %v7850_v34  ;;  %v8537_v21 = vcombine.low %v19039_v23, %v19045_v20  ;;  %v8638_v38 = vcombine.low %v7786_v30, %v7800_v9  ;;  %v8896_v34 = vld [vmem:[#allocation3] sm:$0x1] }
 0x3a9   : > { %v8331_v27 = vcombine.high %v8322_v12, %v8329_v4  ;;  %v8330_v45 = vcombine.low %v8322_v12, %v8329_v4  ;;  %v8639_v44 = vcombine.low %v7802_v37, %v7828_v2  ;;  %v8604_v33 = vcombine.high %v8581_v51, %v8588_v55 }
 0x3aa   : > { %8847 = vmatpush1.bf16.msra.mxu0 %v15849_v28  ;;  %v14751_v61 = vcombine.high %v19066_v43, %v19053_v52  ;;  %v8561_v42 = vrot.slane %v8539_v48, %v16370_v18  ;;  %v7821_v36 = vcombine.high %v7819_v19, %v7819_v19  ;;  %v7835_v53 = vrot.slane %v7819_v19, %v16370_v18  ;;  %v15854_v48 = vld [vmem:[%s21050_s4 + $0x4] ss:$8 sps:$4 sm:$0xff]   ;;  %v15856_v19 = vld [vmem:[%s21050_s4] ss:$8 sps:$4 sm:$0xff]  }
 0x3ab   : > { %8848 = vmatprep.subr.bf16.mxu0 %v21093_v56  ;;  %v8345_v49 = vrot.slane %v8331_v27, %v16370_v18  ;;  %v8338_v63 = vrot.slane %v8330_v45, %v16370_v18  ;;  %v8634_v23 = vrot.slane %v8606_v0, %v16370_v18  ;;  %v8668_v39 = vrot.slane %v8640_v25, %v16370_v18  ;;  %v8902_v0 = vld [vmem:[#allocation3 + $0x10] sm:$0x1]  ;;  %v8917_v25 = vld [vmem:[#allocation3 + $0x10] sm:$0x80] }
 0x3ac   : > { %v8547_v40 = vrot.slane %v8537_v21, %v16370_v18  ;;  %v8620_v28 = vrot.slane %v8604_v33, %v16370_v18  ;;  %v8654_v20 = vrot.slane %v8638_v38, %v16370_v18  ;;  %v8661_v14 = vrot.slane %v8639_v44, %v16370_v18  ;;  %9895 = vmatprep.subr.bf16.mxu1 %v15854_v48  ;;  %v15859_v44 = vld [vmem:[%s21050_s4 + $0x10] ss:$8 sps:$4 sm:$0xff]   ;;  %v15863_v33 = vld [vmem:[%s21050_s4 + $0x80] ss:$8 sps:$4 sm:$0xff]  }
 0x3ad   : > { %14749 = vmatprep.mubr.msk.bf16.mxu0 %vm8425_vm0, %v8345_v49  ;;  %v8605_v54 = vcombine.low %v8595_v57, %v8602_v26  ;;  %v8647_v52 = vrot.slane %v14751_v61, %v16370_v18  ;;  %v7849_v12 = vrot.slane %v7821_v36, %v16370_v18  ;;  %v7851_v4 = vcombine.high %v7835_v53, %v7835_v53  ;;  %v15865_v61 = vld [vmem:[%s21050_s4 + $0x84] ss:$8 sps:$4 sm:$0xff]   ;;  %v15862_v36 = vld [vmem:[%s21050_s4 + $0x20] ss:$8 sps:$4 sm:$0xff]   ;;  %vm19282_vm0 = vmand %vm9225_vm11, %vm9226_vm14 }
 0x3ae   : > { %8849 = vmatpush1.bf16.msra.mxu0 %v15850_v59  ;;  %v8569_v17 = vcombine.low %v8547_v40, %v8561_v42  ;;  %v8636_v62 = vcombine.low %v8620_v28, %v8634_v23  ;;  %v8672_v32 = vcombine.high %v8661_v14, %v8668_v39  ;;  %v8603_v58 = vcombine.low %v8581_v51, %v8588_v55  ;;  %v8914_v55 = vld [vmem:[#allocation3 + $0x8] sm:$0x80]  ;;  %v15857_v51 = vld [vmem:[%s21050_s4 + $0x14] ss:$8 sps:$4 sm:$0xff]   ;;  %v8905_v42 = vld [vmem:[#allocation3 + $0x18] sm:$0x1] }
 0x3af   : > { %8850 = vmatprep.subr.bf16.mxu0 %v21093_v56  ;;  %8498 = vmatmul.mubr.bf16.gmra.mrb[40].mxu0 %v8338_v63  ;;  %v8670_v31 = vcombine.high %v8647_v52, %v8654_v20  ;;  %v7852_v46 = vcombine.high %v7842_v24, %v7842_v24  ;;  %v8627_v43 = vrot.slane %v8605_v54, %v16370_v18  ;;  %v8912_v9 = vsel %vm19146_vm12, 0, %v8911_v10  ;;  %v8920_v23 = vld [vmem:[#allocation3 + $0x18] sm:$0x80]  ;;  %v15868_v28 = vld [vmem:[%s21050_s4 + $0x30] ss:$8 sps:$4 sm:$0xff]  }
 0x3b0   : > { %14765 = vmatprep.mubr.msk.bf16.mxu0 %vm8817_vm8, %v8570_v6  ;;  %v8700_v1 = vrot.slane %v8672_v32, %v16370_v18  ;;  %v8704_v27 = vcombine.low %v7849_v12, %v7851_v4  ;;  %v8613_v59 = vrot.slane %v8603_v58, %v16370_v18  ;;  %v8671_v15 = vcombine.low %v8661_v14, %v8668_v39  ;;  %v15866_v40 = vld [vmem:[%s21050_s4 + $0x34] ss:$8 sps:$4 sm:$0xff]   ;;  %v15877_v54 = vld [vmem:[%s21050_s4 + $0xa4] ss:$8 sps:$4 sm:$0xff]   ;;  %v15875_v12 = vld [vmem:[%s21050_s4 + $0xa0] ss:$8 sps:$4 sm:$0xff]  }
 0x3b1   : > { %v8686_v22 = vrot.slane %v8670_v31, %v16370_v18  ;;  %v8703_v3 = vcombine.low %v7852_v46, %v7835_v53  ;;  %v8669_v35 = vcombine.low %v8647_v52, %v8654_v20  ;;  %v8897_v6 = vsel %vm19139_vm3, 0, %v8896_v34  ;;  %8913 = vst [vmem:[#allocation3] sm:$0x80] %v8912_v9  ;;  %9896 = vmatpush1.bf16.msra.mxu1 %v15856_v19  ;;  %v15869_v20 = vld [vmem:[%s21050_s4 + $0x90] ss:$8 sps:$4 sm:$0xff]  }
 0x3b2   : > { %8851 = vmatpush1.bf16.msra.mxu0 %v15851_v60  ;;  %v8635_v45 = vcombine.low %v8613_v59, %v8627_v43  ;;  %v8718_v49 = vrot.slane %v8704_v27, %v16370_v18  ;;  %v8693_v5 = vrot.slane %v8671_v15, %v16370_v18  ;;  %8898 = vst [vmem:[#allocation3] sm:$0x1] %v8897_v6  ;;  %v8915_v37 = vsel %vm19146_vm12, 0, %v8914_v55  ;;  %v15871_v14 = vld [vmem:[%s21050_s4 + $0x94] ss:$8 sps:$4 sm:$0xff]  }
 0x3b3   : > { %8852 = vmatprep.subr.bf16.mxu0 %v21093_v56  ;;  %v8702_v2 = vcombine.low %v8686_v22, %v8700_v1  ;;  %v8711_v13 = vrot.slane %v8703_v3, %v16370_v18  ;;  %v8679_v7 = vrot.slane %v8669_v35, %v16370_v18  ;;  %8916 = vst [vmem:[#allocation3 + $0x8] sm:$0x80] %v8915_v37  ;;  %v8903_v21 = vsel %vm19139_vm3, 0, %v8902_v0  ;;  %v15874_v52 = vld [vmem:[%s21050_s4 + $0x40] ss:$8 sps:$4 sm:$0xff]  }
 0x3b4   : > { %v8918_v38 = vsel %vm19146_vm12, 0, %v8917_v25  ;;  %8904 = vst [vmem:[#allocation3 + $0x10] sm:$0x1] %v8903_v21  ;;  %9897 = vmatprep.subr.bf16.mxu1 %v15857_v51  ;;  %v8906_v53 = vsel %vm19139_vm3, 0, %v8905_v42  ;;  %v8921_v39 = vsel %vm19146_vm12, 0, %v8920_v23 }
 0x3b5   : > { %v8720_v8 = vcombine.high %v8711_v13, %v8718_v49  ;;  %v8701_v60 = vcombine.low %v8679_v7, %v8693_v5  ;;  %v8719_v30 = vcombine.low %v8711_v13, %v8718_v49  ;;  %8919 = vst [vmem:[#allocation3 + $0x10] sm:$0x80] %v8918_v38  ;;  %9898 = vmatpush1.bf16.msra.mxu1 %v15859_v44  ;;  %8907 = vst [vmem:[#allocation3 + $0x18] sm:$0x1] %v8906_v53  ;;  %v15878_v4 = vld [vmem:[%s21050_s4 + $0x54] ss:$8 sps:$4 sm:$0xff]  }
 0x3b6   : > { %8853 = vmatpush1.bf16.msra.mxu0 %v15852_v11  ;;  %v8899_v11 = vld [vmem:[#allocation3 + $0x8] sm:$0x1]  ;;  %8922 = vst [vmem:[#allocation3 + $0x18] sm:$0x80] %v8921_v39  ;;  %v15880_v32 = vld [vmem:[%s21050_s4 + $0x50] ss:$8 sps:$4 sm:$0xff]  }
 0x3b7   : > { %8854 = vmatprep.subr.bf16.mxu0 %v21093_v56  ;;  %v8734_v16 = vrot.slane %v8720_v8, %v16370_v18  ;;  %v8727_v24 = vrot.slane %v8719_v30, %v16370_v18  ;;  %v8900_v57 = vsel %vm19139_vm3, 0, %v8899_v11  ;;  %v15881_v58 = vld [vmem:[%s21050_s4 + $0xb0] ss:$8 sps:$4 sm:$0xff]   ;;  %v15884_v31 = vld [vmem:[%s21050_s4 + $0x64] ss:$8 sps:$4 sm:$0xff]  }
 0x3b8   : > { %8901 = vst [vmem:[#allocation3 + $0x8] sm:$0x1] %v8900_v57  ;;  %v15889_v46 = vld [vmem:[%s21050_s4 + $0xc4] ss:$8 sps:$4 sm:$0xff]   ;;  %v15886_v43 = vld [vmem:[%s21050_s4 + $0x60] ss:$8 sps:$4 sm:$0xff]  }
 0x3b9   : > { %v15887_v1 = vld [vmem:[%s21050_s4 + $0xc0] ss:$8 sps:$4 sm:$0xff]   ;;  %v15890_v27 = vld [vmem:[%s21050_s4 + $0x74] ss:$8 sps:$4 sm:$0xff]   ;;  %v15892_v22 = vld [vmem:[%s21050_s4 + $0x70] ss:$8 sps:$4 sm:$0xff]  }
 0x3ba   : > { %8855 = vmatpush1.bf16.msra.mxu0 %v15853_v41  ;;  %v15860_v41 = vld [vmem:[%s21050_s4 + $0x24] ss:$8 sps:$4 sm:$0xff]   ;;  %v15895_v59 = vld [vmem:[%s21050_s4 + $0xd4] ss:$8 sps:$4 sm:$0xff]   ;;  %v15893_v3 = vld [vmem:[%s21050_s4 + $0xd0] ss:$8 sps:$4 sm:$0xff]  }
 0x3bb   : > { %9899 = vmatprep.subr.bf16.mxu1 %v15860_v41  ;;  %9698 = vmatprep.subr.bf16.mxu0 %v15865_v61  ;;  %v15902_v15 = vld [vmem:[%s21050_s4 + $0xe4] ss:$8 sps:$4 sm:$0xff]   ;;  %v15908_v49 = vld [vmem:[%s21050_s4 + $0xf4] ss:$8 sps:$4 sm:$0xff]   ;;  %v15906_v35 = vld [vmem:[%s21050_s4 + $0xf0] ss:$8 sps:$4 sm:$0xff]  }
 0x3bc   : > { %9900 = vmatpush1.bf16.msra.mxu1 %v15862_v36  ;;  %vm9407_vm3 = vsmask.f32 5392 }
 0x3bd   : > { %8863 = vmatmul.mubr.bf16.vlgmr.msra.gmra.mrb[28].mxu0 %v8569_v17  ;;  %v15872_v17 = vld [vmem:[%s21050_s4 + $0x44] ss:$8 sps:$4 sm:$0xff]   ;;  %9901 = vmatprep.subr.bf16.mxu1 %v15866_v40 }
 0x3be   : > { %14766 = vmatprep.mubr.msk.bf16.mxu0 %vm8817_vm8, %v8636_v62  ;;  %9699 = vmatpush1.bf16.msra.mxu0 %v15863_v33  ;;  %v15883_v62 = vld [vmem:[%s21050_s4 + $0xb4] ss:$8 sps:$4 sm:$0xff]  }
 0x3bf   : > { %9700 = vmatprep.subr.bf16.mxu0 %v15871_v14 }
 0x3c0   : > { %9902 = vmatpush1.bf16.msra.mxu1 %v15868_v28 }
 0x3c1   : > { %9903 = vmatprep.subr.bf16.mxu1 %v15872_v17 }
 0x3c2   : > { %9701 = vmatpush1.bf16.msra.mxu0 %v15869_v20 }
 0x3c3   : > { %9702 = vmatprep.subr.bf16.mxu0 %v15877_v54 }
 0x3c4   : > { %9904 = vmatpush1.bf16.msra.mxu1 %v15874_v52 }
 0x3c5   : > { %8871 = vmatmul.mubr.bf16.gmra.mrb[32].mxu0 %v8635_v45  ;;  %9905 = vmatprep.subr.bf16.mxu1 %v15878_v4  ;;  %v15898_v45 = vld [vmem:[%s21050_s4 + $0x104] ss:$8 sps:$4 sm:$0xff]  }
 0x3c6   : > { %14767 = vmatprep.mubr.msk.bf16.mxu0 %vm8817_vm8, %v8702_v2  ;;  %9703 = vmatpush1.bf16.msra.mxu0 %v15875_v12  ;;  %v15900_v2 = vld [vmem:[%s21050_s4 + $0xe0] ss:$8 sps:$4 sm:$0xff]  }
 0x3c7   : > { %9704 = vmatprep.subr.bf16.mxu0 %v15883_v62 }
 0x3c8   : > { %9906 = vmatpush1.bf16.msra.mxu1 %v15880_v32 }
 0x3c9   : > { %9907 = vmatprep.subr.bf16.mxu1 %v15884_v31 }
 0x3ca   : > { %9705 = vmatpush1.bf16.msra.mxu0 %v15881_v58 }
 0x3cb   : > { %9706 = vmatprep.subr.bf16.mxu0 %v15889_v46 }
 0x3cc   : > { %9908 = vmatpush1.bf16.msra.mxu1 %v15886_v43 }
 0x3cd   : > { %8879 = vmatmul.mubr.bf16.gmra.mrb[36].mxu0 %v8701_v60  ;;  %9909 = vmatprep.subr.bf16.mxu1 %v15890_v27 }
 0x3ce   : > { %14768 = vmatprep.mubr.msk.bf16.mxu0 %vm8817_vm8, %v8734_v16  ;;  %9707 = vmatpush1.bf16.msra.mxu0 %v15887_v1  ;;  %vm9404_vm8 = vsmask.f32 1280 }
 0x3cf   : > { %9708 = vmatprep.subr.bf16.mxu0 %v15895_v59  ;;  %vm9406_vm12 = vmor %vm9404_vm8, %vm9405_vm2 }
 0x3d0   : > { %9910 = vmatpush1.bf16.msra.mxu1 %v15892_v22  ;;  %vm19316_vm11 = vmor %vm9406_vm12, %vm9407_vm3  ;;  %vm21244_vm3 = vsmask.f32 6424  ;;  %vm19729_vm12 = vcmp.lt.s32.totalorder %v21222_v47, 192 }
 0x3d1   : > { %10231 = vmatprep.subr.bf16.mxu1 %v15898_v45  ;;  %vm19331_vm14 = vmor %vm19316_vm11, %vm9409_vm9  ;;  %vm11513_vm11 = vcmask 517120  }
 0x3d2   : > { %9709 = vmatpush1.bf16.msra.mxu0 %v15893_v3  ;;  %v9228_v3 = vld [vmem:[#allocation3] sm:$0xff] }
 0x3d3   : > { %9710 = vmatprep.subr.bf16.mxu0 %v15902_v15 }
 0x3d5   : > { %8887 = vmatmul.mubr.bf16.gmra.mrb[40].mxu0 %v8727_v24 }
 0x3d6   : > { %9730 = vmatprep.mubr.bf16.mxu0 %v21093_v56  ;;  %9711 = vmatpush1.bf16.msra.mxu0 %v15900_v2 }
 0x3d7   : > { %9712 = vmatprep.subr.bf16.mxu0 %v15908_v49 }
 0x3da   : > { %9713 = vmatpush1.bf16.msra.mxu0 %v15906_v35 }
 0x3db   : > { %12319 = vmatprep.subr.bf16.mxu0 %v21093_v56 }
 0x490   : > { %v8864_v13 = vpop.f32.mrb[28].mxu0 }
 0x491   : > { %v8930_v5 = vcombine.high %v8864_v13, %v8864_v13  ;;  %v8937_v8 = vrot.slane %v8864_v13, %v18115_v29  ;;  %v8866_v7 = vpop.f32.mrb[29].mxu0 }
 0x492   : > { %v8867_v60 = vpop.f32.mrb[30].mxu0 }
 0x493   : > { %v8944_v16 = vrot.slane %v8930_v5, %v18115_v29  ;;  %v8945_v30 = vcombine.high %v8937_v8, %v8937_v8  ;;  %v8947_v24 = vcombine.high %v8867_v60, %v8867_v60  ;;  %v8954_v63 = vrot.slane %v8867_v60, %v18115_v29  ;;  %v8869_v34 = vpop.f32.mrb[31].mxu0 }
 0x495   : > { %v8946_v10 = vcombine.high %v8944_v16, %v8944_v16  ;;  %v9049_v6 = vcombine.low %v8937_v8, %v8945_v30  ;;  %v8961_v26 = vrot.slane %v8947_v24, %v18115_v29  ;;  %v8962_v9 = vcombine.high %v8954_v63, %v8954_v63 }
 0x497   : > { %v9050_v11 = vcombine.low %v8944_v16, %v8946_v10  ;;  %v9066_v55 = vcombine.low %v8954_v63, %v8962_v9  ;;  %v9057_v57 = vrot.slane %v9049_v6, %v18115_v29  ;;  %v9080_v37 = vrot.slane %v8961_v26, %v18115_v29 }
 0x498   : > { %v8872_v48 = vpop.f32.mrb[32].mxu0  ;;  %v8963_v38 = vcombine.high %v8961_v26, %v8961_v26 }
 0x499   : > { %v9064_v19 = vrot.slane %v9050_v11, %v18115_v29  ;;  %v9073_v51 = vrot.slane %v9066_v55, %v18115_v29  ;;  %v8964_v0 = vcombine.high %v8872_v48, %v8872_v48  ;;  %v8971_v25 = vrot.slane %v8872_v48, %v18115_v29  ;;  %v8874_v21 = vpop.f32.mrb[33].mxu0 }
 0x49a   : > { %v8875_v44 = vpop.f32.mrb[34].mxu0 }
 0x49b   : > { %v9065_v41 = vcombine.low %v9057_v57, %v9064_v19  ;;  %v9081_v33 = vcombine.low %v9073_v51, %v9080_v37  ;;  %v8978_v61 = vrot.slane %v8964_v0, %v18115_v29  ;;  %v8979_v42 = vcombine.high %v8971_v25, %v8971_v25  ;;  %v8877_v36 = vpop.f32.mrb[35].mxu0 }
 0x49c   : > { %v9082_v53 = vcombine.low %v8963_v38, %v8971_v25  ;;  %v8981_v23 = vcombine.high %v8875_v44, %v8875_v44  ;;  %v8988_v39 = vrot.slane %v8875_v44, %v18115_v29  ;;  %v9231_v38 = vld [vmem:[#allocation3 + $0x8] sm:$0xff] }
 0x49d   : > { %v9189_v40 = vpack.c.bf16 %v9081_v33, %v9065_v41  ;;  %v9083_v28 = vcombine.low %v8979_v42, %v8978_v61  ;;  %v8980_v20 = vcombine.high %v8978_v61, %v8978_v61 }
 0x49e   : > { %v8995_v14 = vrot.slane %v8981_v23, %v18115_v29  ;;  %v8996_v17 = vcombine.high %v8988_v39, %v8988_v39  ;;  %v9090_v52 = vrot.slane %v9082_v53, %v18115_v29 }
 0x49f   : > { %v9194_v54 = vshrl.u32 %v9189_v40, 16  ;;  %v9097_v12 = vrot.slane %v9083_v28, %v18115_v29  ;;  %v9099_v4 = vcombine.low %v8980_v20, %v8988_v39  ;;  %v9197_v62 = vshll.u32 %v9189_v40, 16 }
 0x4a0   : > { %v8997_v32 = vcombine.high %v8995_v14, %v8995_v14  ;;  %v9113_v58 = vrot.slane %v8996_v17, %v18115_v29  ;;  %v8880_v31 = vpop.f32.mrb[36].mxu0 }
 0x4a1   : > { %v9196_v46 = vrot.slane %v9194_v54, 7  ;;  %v9098_v43 = vcombine.low %v9090_v52, %v9097_v12  ;;  %v9106_v1 = vrot.slane %v9099_v4, %v18115_v29  ;;  %v8998_v27 = vcombine.high %v8880_v31, %v8880_v31  ;;  %v8882_v59 = vpop.f32.mrb[37].mxu0 }
 0x4a2   : > { %v9115_v45 = vcombine.low %v8995_v14, %v8997_v32  ;;  %v9005_v15 = vrot.slane %v8880_v31, %v18115_v29  ;;  %v8883_v2 = vpop.f32.mrb[38].mxu0 }
 0x4a3   : > { %v9199_v49 = vor.u32 %v9197_v62, %v9196_v46  ;;  %v9114_v35 = vcombine.low %v9106_v1, %v9113_v58  ;;  %v9012_v13 = vrot.slane %v8998_v27, %v18115_v29  ;;  %v9015_v5 = vcombine.high %v8883_v2, %v8883_v2  ;;  %v8885_v8 = vpop.f32.mrb[39].mxu0 }
 0x4a4   : > { %v9013_v7 = vcombine.high %v9005_v15, %v9005_v15  ;;  %v9022_v60 = vrot.slane %v8883_v2, %v18115_v29  ;;  %v9123_v6 = vrot.slane %v9115_v45, %v18115_v29 }
 0x4a5   : > { %v9229_v16 = vsel %vm19282_vm0, %v9199_v49, %v9228_v3  ;;  %v9190_v30 = vpack.c.bf16 %v9114_v35, %v9098_v43  ;;  %v9014_v24 = vcombine.high %v9012_v13, %v9012_v13  ;;  %v9029_v63 = vrot.slane %v9015_v5, %v18115_v29 }
 0x4a6   : > { %9230 = vst [vmem:[#allocation3] sm:$0xff] %v9229_v16  ;;  %v9116_v34 = vcombine.low %v9005_v15, %v9013_v7  ;;  %v9030_v10 = vcombine.high %v9022_v60, %v9022_v60  ;;  %v9146_v57 = vrot.slane %v9022_v60, %v18115_v29 }
 0x4a7   : > { %v9201_v26 = vshrl.u32 %v9190_v30, 16  ;;  %v9132_v9 = vcombine.low %v9012_v13, %v9014_v24  ;;  %v9204_v11 = vshll.u32 %v9190_v30, 16  ;;  %v9031_v41 = vcombine.high %v9029_v63, %v9029_v63  ;;  %v9234_v13 = vld [vmem:[#allocation3 + $0x10] sm:$0xff] }
 0x4a8   : > { %v9130_v55 = vrot.slane %v9116_v34, %v18115_v29  ;;  %v9148_v37 = vcombine.low %v9030_v10, %v9029_v63  ;;  %v8888_v48 = vpop.f32.mrb[40].mxu0  ;;  %v15911_v10 = vld [vmem:[%s21050_s4 + $0x124] ss:$8 sps:$4 sm:$0xff]  }
 0x4a9   : > { %v9203_v19 = vrot.slane %v9201_v26, 7  ;;  %v9139_v51 = vrot.slane %v9132_v9, %v18115_v29  ;;  %v9032_v0 = vcombine.high %v8888_v48, %v8888_v48  ;;  %v9039_v25 = vrot.slane %v8888_v48, %v18115_v29  ;;  %v8890_v21 = vpop.f32.mrb[41].mxu0 }
 0x4aa   : > { %v9131_v44 = vcombine.low %v9123_v6, %v9130_v55  ;;  %v8891_v33 = vpop.f32.mrb[42].mxu0  ;;  %v9156_v39 = vrot.slane %v9148_v37, %v18115_v29 }
 0x4ab   : > { %v9206_v61 = vor.u32 %v9204_v11, %v9203_v19  ;;  %v9147_v42 = vcombine.low %v9139_v51, %v9146_v57  ;;  %v9046_v36 = vrot.slane %v9032_v0, %v18115_v29  ;;  %v9047_v53 = vcombine.high %v9039_v25, %v9039_v25  ;;  %v8892_v23 = vpop.f32.mrb[43].mxu0 }
 0x4ac   : > { %v9149_v40 = vcombine.low %v9031_v41, %v9039_v25 }
 0x4ad   : > { %v9232_v28 = vsel %vm19282_vm0, %v9206_v61, %v9231_v38  ;;  %v9191_v20 = vpack.c.bf16 %v9147_v42, %v9131_v44  ;;  %v9048_v14 = vcombine.high %v9046_v36, %v9046_v36  ;;  %v9165_v17 = vcombine.low %v9047_v53, %v9046_v36  ;;  %v9240_v54 = vld [vmem:[#allocation3] sm:$0x3f]  ;;  %v9237_v42 = vld [vmem:[#allocation3 + $0x18] sm:$0xff] }
 0x4ae   : > { %v9328_v52 = vld [vmem:[#allocation3] sm:$0x7f]  ;;  %9233 = vst [vmem:[#allocation3 + $0x8] sm:$0xff] %v9232_v28  ;;  %v9163_v12 = vrot.slane %v9149_v40, %v18115_v29  ;;  %v9248_v4 = vcombine.high %v9240_v54, %v9240_v54  ;;  %v9255_v62 = vrot.slane %v9240_v54, %v18115_v29 }
 0x4af   : > { %v9336_v32 = vcombine.high %v9328_v52, %v9328_v52  ;;  %v19303_v58 = vld [vmem:[#allocation3] sm:$0x7e]  ;;  %v9208_v31 = vshrl.u32 %v9191_v20, 16  ;;  %v9211_v46 = vshll.u32 %v9191_v20, 16  ;;  %v9172_v43 = vrot.slane %v9165_v17, %v18115_v29 }
 0x4b0   : > { %v9179_v1 = vrot.slane %v9048_v14, %v18115_v29  ;;  %v9164_v27 = vcombine.low %v9156_v39, %v9163_v12  ;;  %v9262_v59 = vrot.slane %v9248_v4, %v18115_v29  ;;  %v9263_v3 = vcombine.high %v9255_v62, %v9255_v62 }
 0x4b1   : > { %v9343_v45 = vrot.slane %v9328_v52, %v18115_v29  ;;  %v9210_v15 = vrot.slane %v9208_v31, 7  ;;  %v9350_v49 = vrot.slane %v9336_v32, %v18115_v29  ;;  %v9966_v35 = vcombine.high %v19303_v58, %v19303_v58 }
 0x4b2   : > { %v9180_v2 = vcombine.low %v9172_v43, %v9179_v1  ;;  %v9761_v5 = vcombine.low %v9255_v62, %v9263_v3  ;;  %v19324_v19 = vrot.slane %v19303_v58, %v18115_v29  ;;  %v15896_v62 = vld [vmem:[%s21050_s4 + $0x100] ss:$8 sps:$4 sm:$0xff]   ;;  %v15905_v1 = vld [vmem:[%s21050_s4 + $0x114] ss:$8 sps:$4 sm:$0xff]   ;;  %v15937_v58 = vld [vmem:[%s21050_s4 + $0x184] ss:$8 sps:$4 sm:$0xff]  }
 0x4b3   : > { %v9351_v8 = vcombine.high %v9343_v45, %v9343_v45  ;;  %v9412_v7 = vshrl.u32 %v9343_v45, 16  ;;  %v9415_v60 = vshll.u32 %v9343_v45, 16  ;;  %v9213_v16 = vor.u32 %v9211_v46, %v9210_v15 }
 0x4b4   : > { %v9192_v30 = vpack.c.bf16 %v9180_v2, %v9164_v27  ;;  %v9352_v24 = vcombine.high %v9350_v49, %v9350_v49  ;;  %v9431_v63 = vshll.u32 %v9350_v49, 16  ;;  %v9769_v34 = vrot.slane %v9761_v5, %v18115_v29 }
 0x4b5   : > { %v9414_v6 = vrot.slane %v9412_v7, 6  ;;  %v9417_v26 = vrot.slane %v9415_v60, 7  ;;  %v9421_v9 = vshll.u32 %v9351_v8, 16  ;;  %v9235_v11 = vsel %vm19282_vm0, %v9213_v16, %v9234_v13  ;;  %v9241_v37 = vld [vmem:[#allocation3 + $0x8] sm:$0x3f] }
 0x4b6   : > { %v9215_v55 = vshrl.u32 %v9192_v30, 16  ;;  %v9218_v57 = vshll.u32 %v9192_v30, 16  ;;  %v9329_v48 = vld [vmem:[#allocation3 + $0x8] sm:$0x7f]  ;;  %9236 = vst [vmem:[#allocation3 + $0x10] sm:$0xff] %v9235_v11  ;;  %v9271_v51 = vrot.slane %v9241_v37, %v18115_v29  ;;  %v9425_v41 = vshrl.u32 %v9351_v8, 16 }
 0x4b7   : > { %v9360_v0 = vrot.slane %v9329_v48, %v18115_v29  ;;  %v9418_v25 = vor.u32 %v9417_v26, %v9414_v6  ;;  %v9423_v21 = vrot.slane %v9421_v9, 7  ;;  %v9433_v33 = vrot.slane %v9431_v63, 7  ;;  %v15903_v16 = vld [vmem:[%s21050_s4 + $0x110] ss:$8 sps:$4 sm:$0xff]  }
 0x4b8   : > { %v9217_v38 = vrot.slane %v9215_v55, 7  ;;  %v9435_v61 = vshrl.u32 %v9350_v49, 16  ;;  %v9762_v36 = vcombine.low %v9262_v59, %v9271_v51  ;;  %v9441_v39 = vshll.u32 %v9352_v24, 16 }
 0x4b9   : > { %v19335_v53 = vcombine.high %v9360_v0, %v9360_v0  ;;  %v9419_v23 = vrot.slane %v9418_v25, 2  ;;  %v9427_v28 = vrot.slane %v9425_v41, 6  ;;  %v9446_v14 = vshrl.u32 %v9360_v0, 16 }
 0x4ba   : > { %v9220_v40 = vor.u32 %v9218_v57, %v9217_v38  ;;  %v9437_v20 = vrot.slane %v9435_v61, 6  ;;  %v9776_v17 = vrot.slane %v9762_v36, %v18115_v29  ;;  %v9443_v52 = vrot.slane %v9441_v39, 7  ;;  %v15909_v38 = vld [vmem:[%s21050_s4 + $0x120] ss:$8 sps:$4 sm:$0xff]  }
 0x4bb   : > { %v9424_v54 = vsel %vm19331_vm14, %v9419_v23, %v9423_v21  ;;  %v9449_v12 = vshll.u32 %v9360_v0, 16  ;;  %v9428_v32 = vor.u32 %v9427_v28, %v9423_v21  ;;  %v9448_v46 = vrot.slane %v9446_v14, 6  ;;  %v15916_v23 = vld [vmem:[%s21050_s4 + $0x134] ss:$8 sps:$4 sm:$0xff]  }
 0x4bc   : > { %v9238_v4 = vsel %vm19282_vm0, %v9220_v40, %v9237_v42  ;;  %v9438_v31 = vor.u32 %v9437_v20, %v9433_v33  ;;  %v9777_v43 = vcombine.low %v9769_v34, %v9776_v17  ;;  %v9455_v59 = vshll.u32 %v19335_v53, 16 }
 0x4bd   : > { %9239 = vst [vmem:[#allocation3 + $0x18] sm:$0xff] %v9238_v4  ;;  %v9451_v27 = vrot.slane %v9449_v12, 7  ;;  %v9264_v3 = vcombine.high %v9241_v37, %v9241_v37  ;;  %v9429_v45 = vrot.slane %v9428_v32, 2  ;;  %v9242_v15 = vld [vmem:[#allocation3 + $0x10] sm:$0x3f]  ;;  %v9279_v2 = vcombine.high %v9271_v51, %v9271_v51 }
 0x4be   : > { %v9439_v22 = vrot.slane %v9438_v31, 2  ;;  %v9353_v49 = vcombine.high %v9329_v48, %v9329_v48  ;;  %9928 = vmatmul.mubr.bf16.vlgmr.msra.gmra.mrb[0].mxu1 %v9777_v43  ;;  %v9457_v5 = vrot.slane %v9455_v59, 7  ;;  %v9287_v7 = vrot.slane %v9242_v15, %v18115_v29  ;;  %v9330_v60 = vld [vmem:[#allocation3 + $0x10] sm:$0x7f] }
 0x4bf   : > { %v9452_v13 = vor.u32 %v9451_v27, %v9448_v46  ;;  %v9278_v8 = vrot.slane %v9264_v3, %v18115_v29  ;;  %10232 = vmatpush1.bf16.msra.mxu1 %v15896_v62  ;;  %v9434_v30 = vsel %vm19331_vm14, %v9429_v45, %v9433_v33  ;;  %9937 = vmatprep.mubr.bf16.mxu1 %v21093_v56  ;;  %v9459_v34 = vshrl.u32 %v19335_v53, 16  ;;  %v15914_v31 = vld [vmem:[%s21050_s4 + $0x130] ss:$8 sps:$4 sm:$0xff]   ;;  %v15919_v27 = vld [vmem:[%s21050_s4 + $0x144] ss:$8 sps:$4 sm:$0xff]  }
 0x4c0   : > { %v9444_v24 = vsel %vm19331_vm14, %v9439_v22, %v9443_v52  ;;  %v9280_v63 = vcombine.high %v9242_v15, %v9242_v15  ;;  %10233 = vmatprep.subr.bf16.mxu1 %v15905_v1  ;;  %v9564_v26 = vcombine.low %v9424_v54, %v9434_v30  ;;  %v9295_v9 = vcombine.high %v9287_v7, %v9287_v7  ;;  %v15917_v30 = vld [vmem:[%s21050_s4 + $0x140] ss:$8 sps:$4 sm:$0xff]  }
 0x4c1   : > { %v9453_v6 = vrot.slane %v9452_v13, 2  ;;  %v9778_v11 = vcombine.low %v9279_v2, %v9278_v8  ;;  %v9367_v57 = vrot.slane %v9353_v49, %v18115_v29  ;;  %v9370_v37 = vcombine.high %v9330_v60, %v9330_v60 }
 0x4c2   : > { %v9294_v55 = vrot.slane %v9280_v63, %v18115_v29  ;;  %v9377_v48 = vrot.slane %v9330_v60, %v18115_v29  ;;  %v9572_v0 = vrot.slane %v9564_v26, %v18115_v29  ;;  %v9779_v25 = vcombine.low %v9287_v7, %v9295_v9 }
 0x4c3   : > { %v9458_v51 = vsel %vm19331_vm14, %v9453_v6, %v9457_v5  ;;  %v9786_v21 = vrot.slane %v9778_v11, %v18115_v29  ;;  %10234 = vmatpush1.bf16.msra.mxu1 %v15903_v16  ;;  %v9369_v61 = vcombine.high %v9367_v57, %v9367_v57  ;;  %v19374_v42 = vrot.slane %v9370_v37, %v18115_v29  ;;  %v15926_v11 = vld [vmem:[%s21050_s4 + $0x154] ss:$8 sps:$4 sm:$0xff]  }
 0x4c4   : > { %v9565_v41 = vcombine.low %v9444_v24, %v9458_v51  ;;  %v9243_v33 = vld [vmem:[#allocation3 + $0x18] sm:$0x3f]  ;;  %v9385_v36 = vcombine.high %v9377_v48, %v9377_v48  ;;  %10235 = vmatprep.subr.bf16.mxu1 %v15911_v10  ;;  %v9793_v53 = vrot.slane %v9779_v25, %v18115_v29  ;;  %v9461_v28 = vrot.slane %v9459_v34, 6 }
 0x4c5   : > { %v9296_v39 = vcombine.high %v9243_v33, %v9243_v33  ;;  %v9303_v40 = vrot.slane %v9243_v33, %v18115_v29  ;;  %v9465_v14 = vshll.u32 %v9367_v57, 16  ;;  %v9469_v17 = vshrl.u32 %v9367_v57, 16  ;;  %v9331_v16 = vld [vmem:[#allocation3 + $0x18] sm:$0x7f] }
 0x4c6   : > { %v9579_v20 = vrot.slane %v9565_v41, %v18115_v29  ;;  %v9475_v54 = vshll.u32 %v9369_v61, 16  ;;  %v9794_v52 = vcombine.low %v9786_v21, %v9793_v53  ;;  %v9462_v46 = vor.u32 %v9461_v28, %v9457_v5  ;;  %v15924_v33 = vld [vmem:[%s21050_s4 + $0x150] ss:$8 sps:$4 sm:$0xff]  }
 0x4c7   : > { %v9310_v12 = vrot.slane %v9296_v39, %v18115_v29  ;;  %v9311_v4 = vcombine.high %v9303_v40, %v9303_v40  ;;  %v9795_v62 = vcombine.low %v9294_v55, %v9303_v40  ;;  %10236 = vmatpush1.bf16.msra.mxu1 %v15909_v38  ;;  %v9467_v43 = vrot.slane %v9465_v14, 7 }
 0x4c8   : > { %v9580_v32 = vcombine.low %v9572_v0, %v9579_v20  ;;  %v9471_v1 = vrot.slane %v9469_v17, 6  ;;  %9938 = vmatmul.mubr.bf16.gmra.mrb[4].mxu1 %v9794_v52  ;;  %10237 = vmatprep.subr.bf16.mxu1 %v15916_v23  ;;  %v9477_v45 = vrot.slane %v9475_v54, 7  ;;  %v9480_v22 = vshrl.u32 %v9377_v48, 16 }
 0x4c9   : > { %v9796_v59 = vcombine.low %v9311_v4, %v9310_v12  ;;  %v9803_v3 = vrot.slane %v9795_v62, %v18115_v29  ;;  %9947 = vmatprep.mubr.bf16.mxu1 %v21093_v56  ;;  %v9463_v15 = vrot.slane %v9462_v46, 2  ;;  %v9483_v49 = vshll.u32 %v9377_v48, 16 }
 0x4ca   : > { %9731 = vmatmul.mubr.bf16.vlgmr.msra.gmra.mrb[44].mxu0 %v9580_v32  ;;  %v9472_v2 = vor.u32 %v9471_v1, %v9467_v43  ;;  %v9489_v13 = vshll.u32 %v9385_v36, 16  ;;  %v9482_v8 = vrot.slane %v9480_v22, 6  ;;  %v9493_v7 = vshrl.u32 %v9385_v36, 16  ;;  %v15933_v22 = vld [vmem:[%s21050_s4 + $0x174] ss:$8 sps:$4 sm:$0xff]  }
 0x4cb   : > { %9740 = vmatprep.mubr.bf16.mxu0 %v21093_v56  ;;  %v9810_v5 = vrot.slane %v9796_v59, %v18115_v29  ;;  %v9499_v60 = vshll.u32 %v19374_v42, 16  ;;  %10238 = vmatpush1.bf16.msra.mxu1 %v15914_v31  ;;  %v9468_v24 = vsel %vm19331_vm14, %v9463_v15, %v9467_v43  ;;  %v9485_v34 = vrot.slane %v9483_v49, 7  ;;  %v15927_v31 = vld [vmem:[%s21050_s4 + $0x160] ss:$8 sps:$4 sm:$0xff]  }
 0x4cc   : > { %v9473_v63 = vrot.slane %v9472_v2, 2  ;;  %v9491_v10 = vrot.slane %v9489_v13, 7  ;;  %10239 = vmatprep.subr.bf16.mxu1 %v15919_v27  ;;  %v9495_v26 = vrot.slane %v9493_v7, 6  ;;  %v9386_v55 = vcombine.high %v19374_v42, %v19374_v42 }
 0x4cd   : > { %v9811_v6 = vcombine.low %v9803_v3, %v9810_v5  ;;  %v9501_v9 = vrot.slane %v9499_v60, 7  ;;  %v9486_v37 = vor.u32 %v9485_v34, %v9482_v8  ;;  %v9387_v48 = vcombine.high %v9331_v16, %v9331_v16  ;;  %v9959_v5 = vld [vmem:[#allocation3 + $0x8] sm:$0x7e]  ;;  %v15931_v34 = vld [vmem:[%s21050_s4 + $0x170] ss:$8 sps:$4 sm:$0xff]  }
 0x4ce   : > { %v9478_v57 = vsel %vm19331_vm14, %v9473_v63, %v9477_v45  ;;  %v9394_v51 = vrot.slane %v9331_v16, %v18115_v29  ;;  %v9496_v0 = vor.u32 %v9495_v26, %v9491_v10  ;;  %v9503_v21 = vshrl.u32 %v19374_v42, 16  ;;  %v15929_v42 = vld [vmem:[%s21050_s4 + $0x164] ss:$8 sps:$4 sm:$0xff]  }
 0x4cf   : > { %v9581_v25 = vcombine.low %v9468_v24, %v9478_v57  ;;  %v9509_v38 = vshll.u32 %v9386_v55, 16  ;;  %10240 = vmatpush1.bf16.msra.mxu1 %v15917_v30  ;;  %v9487_v41 = vrot.slane %v9486_v37, 2  ;;  %v9401_v61 = vrot.slane %v9387_v48, %v18115_v29 }
 0x4d0   : > { %v9402_v36 = vcombine.high %v9394_v51, %v9394_v51  ;;  %v9514_v53 = vshrl.u32 %v9394_v51, 16  ;;  %9948 = vmatmul.mubr.bf16.gmra.mrb[8].mxu1 %v9811_v6  ;;  %v9497_v23 = vrot.slane %v9496_v0, 2  ;;  %10241 = vmatprep.subr.bf16.mxu1 %v15926_v11  ;;  %v9505_v40 = vrot.slane %v9503_v21, 6 }
 0x4d1   : > { %v9589_v39 = vrot.slane %v9581_v25, %v18115_v29  ;;  %v9511_v28 = vrot.slane %v9509_v38, 7  ;;  %v9492_v20 = vsel %vm19331_vm14, %v9487_v41, %v9491_v10  ;;  %v9403_v14 = vcombine.high %v9401_v61, %v9401_v61  ;;  %10263 = vmatprep.mubr.bf16.mxu1 %v21093_v56 }
 0x4d2   : > { %v9516_v17 = vrot.slane %v9514_v53, 6  ;;  %v9517_v54 = vshll.u32 %v9394_v51, 16  ;;  %v9502_v52 = vsel %vm19331_vm14, %v9497_v23, %v9501_v9  ;;  %v9506_v12 = vor.u32 %v9505_v40, %v9501_v9 }
 0x4d3   : > { %v9523_v4 = vshll.u32 %v9402_v36, 16  ;;  %v9527_v62 = vshrl.u32 %v9402_v36, 16  ;;  %v9582_v32 = vcombine.low %v9492_v20, %v9502_v52  ;;  %10242 = vmatpush1.bf16.msra.mxu1 %v15924_v33  ;;  %v9533_v43 = vshll.u32 %v9401_v61, 16 }
 0x4d4   : > { %v9519_v46 = vrot.slane %v9517_v54, 7  ;;  %v9537_v1 = vshrl.u32 %v9401_v61, 16  ;;  %10243 = vmatprep.subr.bf16.mxu1 %v15929_v42  ;;  %v9507_v27 = vrot.slane %v9506_v12, 2  ;;  %v9543_v45 = vshll.u32 %v9403_v14, 16 }
 0x4d5   : > { %v9525_v59 = vrot.slane %v9523_v4, 7  ;;  %v9529_v3 = vrot.slane %v9527_v62, 6  ;;  %v9596_v15 = vrot.slane %v9582_v32, %v18115_v29  ;;  %v9535_v49 = vrot.slane %v9533_v43, 7  ;;  %v9961_v62 = vld [vmem:[#allocation3 + $0x18] sm:$0x7e] }
 0x4d6   : > { %v9520_v2 = vor.u32 %v9519_v46, %v9516_v17  ;;  %v9539_v13 = vrot.slane %v9537_v1, 6  ;;  %v9512_v8 = vsel %vm19331_vm14, %v9507_v27, %v9511_v28  ;;  %v9545_v60 = vrot.slane %v9543_v45, 7  ;;  %v15935_v45 = vld [vmem:[%s21050_s4 + $0x180] ss:$8 sps:$4 sm:$0xff]  }
 0x4d7   : > { %v9530_v7 = vor.u32 %v9529_v3, %v9525_v59  ;;  %v9980_v16 = vrot.slane %v9966_v35, %v18115_v29  ;;  %v9597_v30 = vcombine.low %v9589_v39, %v9596_v15  ;;  %10244 = vmatpush1.bf16.msra.mxu1 %v15927_v31  ;;  %v9981_v10 = vcombine.high %v19324_v19, %v19324_v19 }
 0x4d8   : > { %v9521_v24 = vrot.slane %v9520_v2, 2  ;;  %v9540_v63 = vor.u32 %v9539_v13, %v9535_v49  ;;  %10245 = vmatprep.subr.bf16.mxu1 %v15933_v22  ;;  %v9990_v9 = vrot.slane %v9959_v5, %v18115_v29  ;;  %v14817_v11 = vrot.slane %v19324_v19, 9  ;;  %v9960_v19 = vld [vmem:[#allocation3 + $0x10] sm:$0x7e] }
 0x4d9   : > { %v9531_v6 = vrot.slane %v9530_v7, 2  ;;  %v9982_v26 = vcombine.high %v9980_v16, %v9980_v16  ;;  %9741 = vmatmul.mubr.bf16.gmra.mrb[48].mxu0 %v9597_v30  ;;  %v10042_v57 = vrot.slane %v9981_v10, 7  ;;  %v10045_v37 = vrot.slane %v9980_v16, 7 }
 0x4da   : > { %v9526_v35 = vsel %vm19331_vm14, %v9521_v24, %v9525_v59  ;;  %v9541_v55 = vrot.slane %v9540_v63, 2  ;;  %9750 = vmatprep.mubr.bf16.mxu0 %v21093_v56  ;;  %v9998_v0 = vcombine.high %v9990_v9, %v9990_v9  ;;  %v14818_v53 = vrot.slane %v9990_v9, 9  ;;  %v10306_v63 = vld [vmem:[#allocation3] sm:$0xfe] }
 0x4db   : > { %v9536_v48 = vsel %vm19331_vm14, %v9531_v6, %v9535_v49  ;;  %v9598_v51 = vcombine.low %v9512_v8, %v9526_v35  ;;  %v10048_v25 = vrot.slane %v9982_v26, 7  ;;  %10246 = vmatpush1.bf16.msra.mxu1 %v15931_v34  ;;  %v10043_v38 = vsel %vm18130_vm15, %v14817_v11, %v10042_v57  ;;  %v15938_v26 = vld [vmem:[%s21050_s4 + $0x190] ss:$8 sps:$4 sm:$0xff]  }
 0x4dc   : > { %v9546_v21 = vsel %vm19331_vm14, %v9541_v55, %v9545_v60  ;;  %v10044_v41 = vrot.slane %v10042_v57, 2  ;;  %v10047_v33 = vrot.slane %v10045_v37, 2  ;;  %v10052_v23 = vrot.slane %v9998_v0, 7  ;;  %10660 = vmatprep.subr.bf16.mxu1 %v15937_v58  ;;  %v15945_v57 = vld [vmem:[%s21050_s4 + $0x1a4] ss:$8 sps:$4 sm:$0xff]  }
 0x4dd   : > { %v9599_v61 = vcombine.low %v9536_v48, %v9546_v21  ;;  %v9606_v36 = vrot.slane %v9598_v51, %v18115_v29  ;;  %v9983_v44 = vcombine.high %v9959_v5, %v9959_v5  ;;  %v10000_v40 = vcombine.high %v9960_v19, %v9960_v19  ;;  %v15940_v5 = vld [vmem:[%s21050_s4 + $0x194] ss:$8 sps:$4 sm:$0xff]   ;;  %v10307_v51 = vld [vmem:[#allocation3 + $0x8] sm:$0xfe] }
 0x4de   : > { %v10046_v39 = vsel %vm18130_vm15, %v10044_v41, %v10045_v37  ;;  %v10049_v42 = vsel %vm18130_vm15, %v10047_v33, %v10048_v25  ;;  %v10053_v20 = vsel %vm18130_vm15, %v14818_v53, %v10052_v23  ;;  %v10007_v17 = vrot.slane %v9960_v19, %v18115_v29 }
 0x4df   : > { %v9613_v28 = vrot.slane %v9599_v61, %v18115_v29  ;;  %v10097_v14 = vcombine.low %v10043_v38, %v10046_v39  ;;  %v10098_v54 = vcombine.low %v10049_v42, %v10053_v20  ;;  %v9997_v52 = vrot.slane %v9983_v44, %v18115_v29 }
 0x4e0   : > { %v10014_v12 = vrot.slane %v10000_v40, %v18115_v29  ;;  %v10054_v4 = vrot.slane %v10052_v23, 2  ;;  %v10015_v46 = vcombine.high %v10007_v17, %v10007_v17  ;;  %v14819_v43 = vrot.slane %v10007_v17, 9  ;;  %v15948_v40 = vld [vmem:[%s21050_s4 + $0x1b4] ss:$8 sps:$4 sm:$0xff]  }
 0x4e1   : > { %v9614_v32 = vcombine.low %v9606_v36, %v9613_v28  ;;  %v10105_v31 = vrot.slane %v10097_v14, %v18115_v29  ;;  %v10112_v1 = vrot.slane %v10098_v54, %v18115_v29  ;;  %v9999_v27 = vcombine.high %v9997_v52, %v9997_v52  ;;  %v15943_v36 = vld [vmem:[%s21050_s4 + $0x1a0] ss:$8 sps:$4 sm:$0xff]  }
 0x4e2   : > { %v10055_v59 = vrot.slane %v9997_v52, 7  ;;  %v10065_v3 = vrot.slane %v10014_v12, 7  ;;  %v10062_v22 = vrot.slane %v10015_v46, 7  ;;  %v10016_v15 = vcombine.high %v10014_v12, %v10014_v12  ;;  %v15946_v46 = vld [vmem:[%s21050_s4 + $0x1b0] ss:$8 sps:$4 sm:$0xff]  }
 0x4e3   : > { %9751 = vmatmul.mubr.bf16.gmra.mrb[52].mxu0 %v9614_v32  ;;  %v10017_v2 = vcombine.high %v9961_v62, %v9961_v62  ;;  %v10024_v49 = vrot.slane %v9961_v62, %v18115_v29  ;;  %v10113_v13 = vcombine.low %v10105_v31, %v10112_v1  ;;  %v10058_v60 = vrot.slane %v9999_v27, 7  ;;  %v15961_v62 = vld [vmem:[%s21050_s4 + $0x1f4] ss:$8 sps:$4 sm:$0xff]  }
 0x4e4   : > { %v10056_v8 = vsel %vm18130_vm15, %v10054_v4, %v10055_v59  ;;  %v10057_v7 = vrot.slane %v10055_v59, 2  ;;  %v10064_v16 = vrot.slane %v10062_v22, 2  ;;  %v10063_v10 = vsel %vm18130_vm15, %v14819_v43, %v10062_v22 }
 0x4e5   : > { %v10031_v30 = vrot.slane %v10017_v2, %v18115_v29  ;;  %v10032_v24 = vcombine.high %v10024_v49, %v10024_v49  ;;  %10264 = vmatmul.mubr.bf16.vlgmr.msra.gmra.mrb[0].mxu1 %v10113_v13  ;;  %v10067_v6 = vrot.slane %v10065_v3, 2  ;;  %v10068_v37 = vrot.slane %v10016_v15, 7 }
 0x4e6   : > { %v10059_v34 = vsel %vm18130_vm15, %v10057_v7, %v10058_v60  ;;  %10661 = vmatpush1.bf16.msra.mxu1 %v15935_v45  ;;  %10273 = vmatprep.mubr.bf16.mxu1 %v21093_v56  ;;  %v10066_v9 = vsel %vm18130_vm15, %v10064_v16, %v10065_v3  ;;  %v10314_v0 = vcombine.high %v10306_v63, %v10306_v63  ;;  %v14820_v25 = vrot.slane %v10024_v49, 9  ;;  %v15952_v3 = vld [vmem:[%s21050_s4 + $0x1c4] ss:$8 sps:$4 sm:$0xff]  }
 0x4e7   : > { %v10114_v11 = vcombine.low %v10056_v8, %v10059_v34  ;;  %v10033_v58 = vcombine.high %v10031_v30, %v10031_v30  ;;  %v10072_v35 = vrot.slane %v10032_v24, 7  ;;  %10662 = vmatprep.subr.bf16.mxu1 %v15940_v5  ;;  %v10115_v55 = vcombine.low %v10063_v10, %v10066_v9  ;;  %v10308_v8 = vld [vmem:[#allocation3 + $0x10] sm:$0xfe] }
 0x4e8   : > { %v10075_v48 = vrot.slane %v10031_v30, 7  ;;  %v10321_v61 = vrot.slane %v10306_v63, %v18115_v29  ;;  %v10328_v39 = vrot.slane %v10314_v0, %v18115_v29  ;;  %v10338_v42 = vrot.slane %v10307_v51, %v18115_v29  ;;  %v15950_v63 = vld [vmem:[%s21050_s4 + $0x1c0] ss:$8 sps:$4 sm:$0xff]  }
 0x4e9   : > { %v10074_v19 = vrot.slane %v10072_v35, 2  ;;  %v10078_v21 = vrot.slane %v10033_v58, 7  ;;  %v10122_v38 = vrot.slane %v10114_v11, %v18115_v29  ;;  %v10129_v41 = vrot.slane %v10115_v55, %v18115_v29  ;;  %v15955_v11 = vld [vmem:[%s21050_s4 + $0x1d4] ss:$8 sps:$4 sm:$0xff]   ;;  %v15978_v58 = vld [vmem:[%s21050_s4 + $0x240] ss:$8 sps:$4 sm:$0xff]  }
 0x4ea   : > { %v10077_v33 = vrot.slane %v10075_v48, 2  ;;  %10663 = vmatpush1.bf16.msra.mxu1 %v15938_v26  ;;  %v10073_v53 = vsel %vm18130_vm15, %v14820_v25, %v10072_v35  ;;  %v10069_v28 = vsel %vm18130_vm15, %v10067_v6, %v10068_v37  ;;  %v10329_v14 = vcombine.high %v10321_v61, %v10321_v61 }
 0x4eb   : > { %v10076_v23 = vsel %vm18130_vm15, %v10074_v19, %v10075_v48  ;;  %v10130_v44 = vcombine.low %v10122_v38, %v10129_v41  ;;  %10664 = vmatprep.subr.bf16.mxu1 %v15945_v57  ;;  %v10330_v54 = vcombine.high %v10328_v39, %v10328_v39  ;;  %v10346_v52 = vcombine.high %v10338_v42, %v10338_v42 }
 0x4ec   : > { %v10079_v20 = vsel %vm18130_vm15, %v10077_v33, %v10078_v21  ;;  %v10331_v12 = vcombine.high %v10307_v51, %v10307_v51  ;;  %v10131_v4 = vcombine.low %v10069_v28, %v10073_v53  ;;  %vm21238_vm0 = vsmask.f32 2312  ;;  %v15953_v21 = vld [vmem:[%s21050_s4 + $0x1d0] ss:$8 sps:$4 sm:$0xff]  }
 0x4ed   : > { %v10132_v17 = vcombine.low %v10076_v23, %v10079_v20  ;;  %10274 = vmatmul.mubr.bf16.gmra.mrb[4].mxu1 %v10130_v44  ;;  %vm19510_vm8 = vmor %vm797_vm1, %vm21238_vm0  ;;  %v10391_v32 = vshrl.u32 %v10329_v14, 16  ;;  %v10400_v31 = vshrl.u32 %v10328_v39, 16  ;;  %v10386_v43 = vshrl.u32 %v10321_v61, 16  ;;  %v10309_v44 = vld [vmem:[#allocation3 + $0x18] sm:$0xfe] }
 0x4ee   : > { %10665 = vmatpush1.bf16.msra.mxu1 %v15943_v36  ;;  %10283 = vmatprep.mubr.bf16.mxu1 %v21093_v56  ;;  %v10394_v1 = vshll.u32 %v10329_v14, 16  ;;  %v10409_v27 = vshrl.u32 %v10330_v54, 16  ;;  %v10422_v15 = vshrl.u32 %v10346_v52, 16  ;;  %vm21241_vm1 = vsmask.f32 4368 }
 0x4ef   : > { %10666 = vmatprep.subr.bf16.mxu1 %v15948_v40  ;;  %v10146_v59 = vrot.slane %v10132_v17, %v18115_v29  ;;  %v10393_v45 = vrot.slane %v10391_v32, 7  ;;  %v10402_v22 = vrot.slane %v10400_v31, 7  ;;  %vm19525_vm2 = vmor %vm19510_vm8, %vm21241_vm1  ;;  %v10403_v49 = vshll.u32 %v10328_v39, 16  ;;  %v15958_v36 = vld [vmem:[%s21050_s4 + $0x1e4] ss:$8 sps:$4 sm:$0xff]  }
 0x4f0   : > { %v10411_v13 = vrot.slane %v10409_v27, 7  ;;  %v10417_v5 = vshrl.u32 %v10338_v42, 16  ;;  %v19530_v7 = vrot.slane %v10331_v12, %v18115_v29  ;;  %v10139_v60 = vrot.slane %v10131_v4, %v18115_v29  ;;  %vm19546_vm9 = vmor %vm19525_vm2, %vm21244_vm3  ;;  %v15956_v17 = vld [vmem:[%s21050_s4 + $0x1e0] ss:$8 sps:$4 sm:$0xff]  }
 0x4f1   : > { %v10396_v16 = vor.u32 %v10394_v1, %v10393_v45  ;;  %v10412_v30 = vshll.u32 %v10330_v54, 16  ;;  %v10425_v24 = vshll.u32 %v10346_v52, 16  ;;  %v10398_v34 = vrot.slane %v10393_v45, 2 }
 0x4f2   : > { %10667 = vmatpush1.bf16.msra.mxu1 %v15946_v46  ;;  %v10405_v10 = vor.u32 %v10403_v49, %v10402_v22  ;;  %v19536_v6 = vrot.slane %v10422_v15, 7  ;;  %v10347_v26 = vcombine.high %v19530_v7, %v19530_v7  ;;  %v10147_v9 = vcombine.low %v10139_v60, %v10146_v59  ;;  %v15959_v49 = vld [vmem:[%s21050_s4 + $0x1f0] ss:$8 sps:$4 sm:$0xff]  }
 0x4f3   : > { %10668 = vmatprep.subr.bf16.mxu1 %v15952_v3  ;;  %v10348_v35 = vcombine.high %v10308_v8, %v10308_v8  ;;  %v10355_v55 = vrot.slane %v10308_v8, %v18115_v29  ;;  %v14853_v57 = vrot.slane %v10386_v43, 9  ;;  %v10414_v37 = vor.u32 %v10412_v30, %v10411_v13 }
 0x4f4   : > { %v14854_v48 = vrot.slane %v10417_v5, 9  ;;  %v10427_v51 = vor.u32 %v10425_v24, %v19536_v6  ;;  %v10407_v0 = vrot.slane %v10402_v22, 2  ;;  %v10406_v41 = vsel %vm19546_vm9, %v10398_v34, %v10405_v10 }
 0x4f5   : > { %10284 = vmatmul.mubr.bf16.gmra.mrb[8].mxu1 %v10147_v9  ;;  %v10362_v25 = vrot.slane %v10348_v35, %v18115_v29  ;;  %v10363_v19 = vcombine.high %v10355_v55, %v10355_v55  ;;  %v10397_v38 = vsel %vm19546_vm9, %v14853_v57, %v10396_v16  ;;  %v10440_v61 = vshrl.u32 %v10347_v26, 16  ;;  %v15963_v35 = vld [vmem:[%s21050_s4 + $0x200] ss:$8 sps:$4 sm:$0xff]  }
 0x4f6   : > { %10669 = vmatpush1.bf16.msra.mxu1 %v15950_v63  ;;  %10692 = vmatprep.mubr.bf16.mxu1 %v21093_v56  ;;  %v10428_v33 = vsel %vm19546_vm9, %v14854_v48, %v10427_v51  ;;  %v10431_v53 = vshrl.u32 %v19530_v7, 16  ;;  %v10415_v39 = vsel %vm19546_vm9, %v10407_v0, %v10414_v37  ;;  %v10526_v40 = vcombine.low %v10397_v38, %v10406_v41  ;;  %v15968_v48 = vld [vmem:[%s21050_s4 + $0x214] ss:$8 sps:$4 sm:$0xff]  }
 0x4f7   : > { %10670 = vmatprep.subr.bf16.mxu1 %v15955_v11  ;;  %v10453_v23 = vshrl.u32 %v10363_v19, 16  ;;  %v10462_v42 = vshrl.u32 %v10362_v25, 16  ;;  %v10527_v28 = vcombine.low %v10415_v39, %v10428_v33  ;;  %v10442_v20 = vrot.slane %v10440_v61, 7 }
 0x4f8   : > { %v10448_v14 = vshrl.u32 %v10355_v55, 16  ;;  %v10456_v52 = vshll.u32 %v10363_v19, 16  ;;  %v10465_v4 = vshll.u32 %v10362_v25, 16  ;;  %v10433_v32 = vrot.slane %v10431_v53, 7 }
 0x4f9   : > { %v10455_v54 = vrot.slane %v10453_v23, 7  ;;  %v19572_v12 = vrot.slane %v10462_v42, 7  ;;  %v10443_v31 = vshll.u32 %v10347_v26, 16  ;;  %v10365_v46 = vcombine.high %v10309_v44, %v10309_v44  ;;  %v15966_v23 = vld [vmem:[%s21050_s4 + $0x210] ss:$8 sps:$4 sm:$0xff]  }
 0x4fa   : > { %10671 = vmatpush1.bf16.msra.mxu1 %v15953_v21  ;;  %v10372_v43 = vrot.slane %v10309_v44, %v18115_v29  ;;  %v10364_v3 = vcombine.high %v10362_v25, %v10362_v25  ;;  %v10434_v45 = vshll.u32 %v19530_v7, 16  ;;  %v14855_v22 = vrot.slane %v10448_v14, 9  ;;  %v15965_v7 = vld [vmem:[%s21050_s4 + $0x204] ss:$8 sps:$4 sm:$0xff]  }
 0x4fb   : > { %10672 = vmatprep.subr.bf16.mxu1 %v15958_v36  ;;  %v10458_v1 = vor.u32 %v10456_v52, %v10455_v54  ;;  %v10460_v27 = vrot.slane %v10455_v54, 2  ;;  %v10467_v59 = vor.u32 %v10465_v4, %v19572_v12  ;;  %v10379_v15 = vrot.slane %v10365_v46, %v18115_v29  ;;  %v15971_v4 = vld [vmem:[%s21050_s4 + $0x220] ss:$8 sps:$4 sm:$0xff]  }
 0x4fc   : > { %v10380_v2 = vcombine.high %v10372_v43, %v10372_v43  ;;  %v10534_v13 = vrot.slane %v10526_v40, %v18115_v29  ;;  %v10541_v5 = vrot.slane %v10527_v28, %v18115_v29  ;;  %v10429_v8 = vrot.slane %v19536_v6, 2 }
 0x4fd   : > { %v10445_v60 = vor.u32 %v10443_v31, %v10442_v20  ;;  %v10436_v16 = vor.u32 %v10434_v45, %v10433_v32  ;;  %v10438_v30 = vrot.slane %v10433_v32, 2  ;;  %v10459_v24 = vsel %vm19546_vm9, %v14855_v22, %v10458_v1  ;;  %v15973_v20 = vld [vmem:[%s21050_s4 + $0x224] ss:$8 sps:$4 sm:$0xff]  }
 0x4fe   : > { %10673 = vmatpush1.bf16.msra.mxu1 %v15956_v17  ;;  %v10381_v63 = vcombine.high %v10379_v15, %v10379_v15  ;;  %v10468_v34 = vsel %vm19546_vm9, %v10460_v27, %v10467_v59  ;;  %v10471_v10 = vshrl.u32 %v10364_v3, 16  ;;  %v10484_v26 = vshrl.u32 %v10380_v2, 16  ;;  %v15980_v45 = vld [vmem:[%s21050_s4 + $0x244] ss:$8 sps:$4 sm:$0xff]  }
 0x4ff   : > { %10674 = vmatprep.subr.bf16.mxu1 %v15961_v62  ;;  %v10493_v9 = vshrl.u32 %v10379_v15, 16  ;;  %v10542_v6 = vcombine.low %v10534_v13, %v10541_v5  ;;  %v10446_v55 = vsel %vm19546_vm9, %v10438_v30, %v10445_v60  ;;  %v10437_v51 = vsel %vm19546_vm9, %v10429_v8, %v10436_v16  ;;  %v10736_v13 = vld [vmem:[#allocation3 + $0x8] sm:$0xfc]  ;;  %v15981_v60 = vld [vmem:[%s21050_s4 + $0x250] ss:$8 sps:$4 sm:$0xff]  }
 0x500   : > { %v10502_v11 = vshrl.u32 %v10381_v63, 16  ;;  %v10486_v57 = vrot.slane %v10484_v26, 7  ;;  %v10544_v0 = vcombine.low %v10459_v24, %v10468_v34  ;;  %v10505_v19 = vshll.u32 %v10381_v63, 16  ;;  %v10737_v30 = vld [vmem:[#allocation3 + $0x10] sm:$0xfc] }
 0x501   : > { %v10495_v37 = vrot.slane %v10493_v9, 7  ;;  %v10473_v21 = vrot.slane %v10471_v10, 7  ;;  %v10479_v38 = vshrl.u32 %v10372_v43, 16  ;;  %v10487_v41 = vshll.u32 %v10380_v2, 16  ;;  %v15976_v43 = vld [vmem:[%s21050_s4 + $0x234] ss:$8 sps:$4 sm:$0xff]  }
 0x502   : > { %10675 = vmatpush1.bf16.msra.mxu1 %v15959_v49  ;;  %v10504_v25 = vrot.slane %v10502_v11, 7  ;;  %v10496_v33 = vshll.u32 %v10379_v15, 16  ;;  %v10543_v61 = vcombine.low %v10437_v51, %v10446_v55  ;;  %v10474_v36 = vshll.u32 %v10364_v3, 16  ;;  %v10735_v15 = vld [vmem:[#allocation3] sm:$0xfc] }
 0x503   : > { %10962 = vmatprep.subr.bf16.mxu1 %v15965_v7  ;;  %v10489_v39 = vor.u32 %v10487_v41, %v10486_v57  ;;  %v10491_v42 = vrot.slane %v10486_v57, 2  ;;  %v10500_v40 = vrot.slane %v10495_v37, 2  ;;  %v10558_v28 = vrot.slane %v10544_v0, %v18115_v29  ;;  %v15983_v49 = vld [vmem:[%s21050_s4 + $0x254] ss:$8 sps:$4 sm:$0xff]   ;;  %v15986_v7 = vld [vmem:[%s21050_s4 + $0x264] ss:$8 sps:$4 sm:$0xff]  }
 0x504   : > { %v10507_v53 = vor.u32 %v10505_v19, %v10504_v25  ;;  %v10498_v44 = vor.u32 %v10496_v33, %v10495_v37  ;;  %v10476_v14 = vor.u32 %v10474_v36, %v10473_v21  ;;  %v14856_v17 = vrot.slane %v10479_v38, 9  ;;  %v15984_v10 = vld [vmem:[%s21050_s4 + $0x260] ss:$8 sps:$4 sm:$0xff]   ;;  %v15989_v26 = vld [vmem:[%s21050_s4 + $0x274] ss:$8 sps:$4 sm:$0xff]  }
 0x505   : > { %10693 = vmatmul.mubr.bf16.vlgmr.msra.gmra.mrb[0].mxu1 %v10542_v6  ;;  %v10551_v52 = vrot.slane %v10543_v61, %v18115_v29  ;;  %v10469_v62 = vrot.slane %v19572_v12, 2  ;;  %v15974_v12 = vld [vmem:[%s21050_s4 + $0x230] ss:$8 sps:$4 sm:$0xff]   ;;  %v10743_v5 = vcombine.high %v10735_v15, %v10735_v15  ;;  %v10750_v8 = vrot.slane %v10735_v15, %v18115_v29  ;;  %v15999_v15 = vld [vmem:[%s21051_s5 + $0x28] sm:$0xff]  }
 0x506   : > { %10963 = vmatpush1.bf16.msra.mxu1 %v15963_v35  ;;  %10702 = vmatprep.mubr.bf16.mxu1 %v21093_v56  ;;  %v10508_v54 = vsel %vm19546_vm9, %v10500_v40, %v10507_v53  ;;  %v10490_v32 = vsel %vm19546_vm9, %v14856_v17, %v10489_v39  ;;  %v10499_v31 = vsel %vm19546_vm9, %v10491_v42, %v10498_v44  ;;  %v10738_v35 = vld [vmem:[#allocation3 + $0x18] sm:$0xfc]  ;;  %vm11868_vm14 = vcmask 521217  }
 0x507   : > { %10964 = vmatprep.subr.bf16.mxu1 %v15968_v48  ;;  %v10559_v46 = vcombine.low %v10551_v52, %v10558_v28  ;;  %v10561_v1 = vcombine.low %v10499_v31, %v10508_v54  ;;  %v10477_v27 = vsel %vm19546_vm9, %v10469_v62, %v10476_v14  ;;  %v10767_v16 = vrot.slane %v10736_v13, %v18115_v29  ;;  %v15987_v37 = vld [vmem:[%s21050_s4 + $0x270] ss:$8 sps:$4 sm:$0xff]  }
 0x508   : > { %v10560_v59 = vcombine.low %v10477_v27, %v10490_v32  ;;  %v10757_v24 = vrot.slane %v10743_v5, %v18115_v29  ;;  %v10758_v63 = vcombine.high %v10750_v8, %v10750_v8  ;;  %v10760_v34 = vcombine.high %v10736_v13, %v10736_v13  ;;  %v16000_v5 = vld [vmem:[%s21051_s5 + $0x30] sm:$0xff]  }
 0x509   : > { %v10575_v3 = vrot.slane %v10561_v1, %v18115_v29  ;;  %v10777_v11 = vcombine.high %v10737_v30, %v10737_v30  ;;  %v10784_v6 = vrot.slane %v10737_v30, %v18115_v29  ;;  %v10794_v25 = vcombine.high %v10738_v35, %v10738_v35 }
 0x50a   : > { %10965 = vmatpush1.bf16.msra.mxu1 %v15966_v23  ;;  %v10568_v22 = vrot.slane %v10560_v59, %v18115_v29  ;;  %v14905_v9 = vcombine.high %v10757_v24, %v10767_v16  ;;  %v10828_v55 = vcombine.low %v10758_v63, %v10757_v24  ;;  %v10774_v57 = vrot.slane %v10760_v34, %v18115_v29 }
 0x50b   : > { %10966 = vmatprep.subr.bf16.mxu1 %v15973_v20  ;;  %v10791_v51 = vrot.slane %v10777_v11, %v18115_v29  ;;  %v10792_v0 = vcombine.high %v10784_v6, %v10784_v6  ;;  %v10808_v33 = vrot.slane %v10794_v25, %v18115_v29  ;;  %v10801_v39 = vrot.slane %v10738_v35, %v18115_v29  ;;  %v16002_v6 = vld [vmem:[%s21051_s5 + $0x40] sm:$0xff]  }
 0x50c   : > { %v10576_v2 = vcombine.low %v10568_v22, %v10575_v3  ;;  %v10843_v48 = vrot.slane %v14905_v9, %v18115_v29  ;;  %v10836_v19 = vrot.slane %v10828_v55, %v18115_v29  ;;  %v10776_v21 = vcombine.high %v10774_v57, %v10774_v57  ;;  %v15995_v3 = vld [vmem:[%s21051_s5 + $0x8] sm:$0xff]   ;;  %v15997_v22 = vld [vmem:[%s21051_s5 + $0x18] sm:$0xff]  }
 0x50d   : > { %10703 = vmatmul.mubr.bf16.gmra.mrb[4].mxu1 %v10559_v46  ;;  %v10846_v41 = vcombine.low %v10792_v0, %v10791_v51  ;;  %v10810_v53 = vcombine.high %v10808_v33, %v10808_v33  ;;  %v14906_v40 = vcombine.high %v10791_v51, %v10801_v39 }
 0x50e   : > { %10967 = vmatpush1.bf16.msra.mxu1 %v15971_v4  ;;  %10712 = vmatprep.mubr.bf16.mxu1 %v21093_v56  ;;  %v10844_v38 = vcombine.low %v10836_v19, %v10843_v48  ;;  %v10845_v61 = vcombine.low %v10774_v57, %v10776_v21 }
 0x50f   : > { %10968 = vmatprep.subr.bf16.mxu1 %v15976_v43  ;;  %v10860_v36 = vrot.slane %v10846_v41, %v18115_v29  ;;  %v10863_v44 = vcombine.low %v10808_v33, %v10810_v53  ;;  %v10870_v20 = vrot.slane %v14906_v40, %v18115_v29 }
 0x510   : > { %v10853_v23 = vrot.slane %v10845_v61, %v18115_v29 }
 0x511   : > { %v10877_v28 = vrot.slane %v10863_v44, %v18115_v29 }
 0x512   : > { %10969 = vmatpush1.bf16.msra.mxu1 %v15974_v12  ;;  %v10861_v42 = vcombine.low %v10853_v23, %v10860_v36  ;;  %v15994_v12 = vld [vmem:[%s21051_s5] sm:$0xff]  }
 0x513   : > { %10970 = vmatprep.subr.bf16.mxu1 %v15980_v45  ;;  %v10878_v14 = vcombine.low %v10870_v20, %v10877_v28  ;;  %12320 = vmatpush1.bf16.msra.mxu0 %v15994_v12  ;;  %v15996_v45 = vld [vmem:[%s21051_s5 + $0x10] sm:$0xff]  }
 0x514   : > { %12321 = vmatprep.subr.bf16.mxu0 %v21093_v56 }
 0x515   : > { %10713 = vmatmul.mubr.bf16.gmra.mrb[8].mxu1 %v10576_v2 }
 0x516   : > { %10971 = vmatpush1.bf16.msra.mxu1 %v15978_v58  ;;  %10994 = vmatprep.mubr.bf16.mxu1 %v21093_v56  ;;  %v15998_v58 = vld [vmem:[%s21051_s5 + $0x20] sm:$0xff]  }
 0x517   : > { %10972 = vmatprep.subr.bf16.mxu1 %v15983_v49  ;;  %12322 = vmatpush1.bf16.msra.mxu0 %v15995_v3 }
 0x518   : > { %12323 = vmatprep.subr.bf16.mxu0 %v21093_v56 }
 0x51a   : > { %10973 = vmatpush1.bf16.msra.mxu1 %v15981_v60 }
 0x51b   : > { %10974 = vmatprep.subr.bf16.mxu1 %v15986_v7  ;;  %12324 = vmatpush1.bf16.msra.mxu0 %v15996_v45 }
 0x51c   : > { %12325 = vmatprep.subr.bf16.mxu0 %v21093_v56 }
 0x51e   : > { %10975 = vmatpush1.bf16.msra.mxu1 %v15984_v10  ;;  %v16001_v10 = vld [vmem:[%s21051_s5 + $0x38] sm:$0xff]  }
 0x51f   : > { %10976 = vmatprep.subr.bf16.mxu1 %v15989_v26  ;;  %12326 = vmatpush1.bf16.msra.mxu0 %v15997_v22 }
 0x520   : > { %12327 = vmatprep.subr.bf16.mxu0 %v21093_v56 }
 0x522   : > { %10977 = vmatpush1.bf16.msra.mxu1 %v15987_v37 }
 0x523   : > { %12172 = vmatprep.subr.bf16.mxu1 %v21093_v56  ;;  %12328 = vmatpush1.bf16.msra.mxu0 %v15998_v58 }
 0x524   : > { %12329 = vmatprep.subr.bf16.mxu0 %v21093_v56 }
 0x525   : > { %10995 = vmatmul.mubr.bf16.vlgmr.msra.gmra.mrb[0].mxu1 %v10844_v38 }
 0x526   : > { %11004 = vmatprep.mubr.bf16.mxu1 %v21093_v56 }
 0x527   : > { %12330 = vmatpush1.bf16.msra.mxu0 %v15999_v15 }
 0x528   : > { %12331 = vmatprep.subr.bf16.mxu0 %v21093_v56 }
 0x52b   : > { %12332 = vmatpush1.bf16.msra.mxu0 %v16000_v5 }
 0x52c   : > { %12333 = vmatprep.subr.bf16.mxu0 %v21093_v56 }
 0x52d   : > { %11005 = vmatmul.mubr.bf16.gmra.mrb[4].mxu1 %v10861_v42  ;;  %v16003_v42 = vld [vmem:[%s21051_s5 + $0x48] sm:$0xff]  }
 0x52e   : > { %11014 = vmatprep.mubr.bf16.mxu1 %v21093_v56 }
 0x52f   : > { %12334 = vmatpush1.bf16.msra.mxu0 %v16001_v10 }
 0x530   : > { %12335 = vmatprep.subr.bf16.mxu0 %v21093_v56 }
 0x533   : > { %12336 = vmatpush1.bf16.msra.mxu0 %v16002_v6 }
 0x534   : > { %12337 = vmatprep.subr.bf16.mxu0 %v21093_v56 }
 0x535   : > { %11015 = vmatmul.mubr.bf16.gmra.mrb[8].mxu1 %v10878_v14 }
 0x537   : > { %12338 = vmatpush1.bf16.msra.mxu0 %v16003_v42 }
 0x538   : > { %12339 = vmatprep.subr.bf16.mxu0 %v21093_v56 }
 0x59d   : > { %v9732_v17 = vpop.f32.mrb[44].mxu0 }
 0x59e   : > { %v9734_v54 = vpop.f32.mrb[45].mxu0 }
 0x59f   : > { %v9736_v52 = vpop.f32.mrb[46].mxu0 }
 0x5a0   : > { %v9738_v4 = vpop.f32.mrb[47].mxu0 }
 0x5ac   : > { %v9742_v62 = vpop.f32.mrb[48].mxu0 }
 0x5ad   : > { %v19676_v32 = vpop.f32.mrb[49].mxu0 }
 0x5ae   : > { %v19678_v31 = vpop.f32.mrb[50].mxu0 }
 0x5af   : > { %v19680_v46 = vpop.f32.mrb[51].mxu0 }
 0x5b6   : > { %v19682_v43 = vpop.f32.mrb[52].mxu0 }
 0x5b7   : > { %v19684_v1 = vpop.f32.mrb[53].mxu0 }
 0x5b8   : > { %v19686_v27 = vpop.f32.mrb[54].mxu0 }
 0x5b9   : > { %v19688_v59 = vpop.f32.mrb[55].mxu0 }
 0x5f8   : > { %v10996_v2 = vpop.f32.mrb[0].mxu1 }
 0x5f9   : > { %v15397_v49 = vadd.f32 %v10996_v2, %v9732_v17  ;;  %v10998_v13 = vpop.f32.mrb[1].mxu1  ;;  %v16004_v2 = vld [vmem:[%s21051_s5 + $0x50] sm:$0xff]  }
 0x5fa   : > { %v15398_v8 = vadd.f32 %v10998_v13, %v9734_v54  ;;  %v11000_v60 = vpop.f32.mrb[2].mxu1  ;;  %12340 = vmatpush1.bf16.msra.mxu0 %v16004_v2 }
 0x5fb   : > { %v11037_v7 = vmax.f32 %v15397_v49, 0.0  ;;  %v15399_v16 = vadd.f32 %v11000_v60, %v9736_v52  ;;  %v11002_v30 = vpop.f32.mrb[3].mxu1  ;;  %12341 = vmatprep.subr.bf16.mxu0 %v21093_v56 }
 0x5fc   : > { %v11038_v24 = vmax.f32 %v15398_v8, 0.0  ;;  %v15400_v63 = vadd.f32 %v11002_v30, %v9738_v4 }
 0x5fd   : > { %v11039_v34 = vmax.f32 %v15399_v16, 0.0 }
 0x5fe   : > { %v11061_v26 = vcombine.low %v11037_v7, %v11038_v24  ;;  %v11062_v9 = vcombine.high %v11037_v7, %v11038_v24  ;;  %v11040_v11 = vmax.f32 %v15400_v63, 0.0 }
 0x600   : > { %v11079_v35 = vrot.slane %v11061_v26, %v18115_v29  ;;  %v11087_v55 = vrot.slane %v11062_v9, %v18115_v29  ;;  %v11239_v57 = vrot.slane %v11061_v26, %v16370_v18  ;;  %v11063_v37 = vcombine.low %v11039_v34, %v11040_v11  ;;  %v11006_v48 = vpop.f32.mrb[4].mxu1 }
 0x601   : > { %v11064_v0 = vcombine.high %v11039_v34, %v11040_v11  ;;  %v19733_v25 = vadd.f32 %v11006_v48, %v9742_v62  ;;  %v19735_v19 = vpop.f32.mrb[5].mxu1  ;;  %v16005_v48 = vld [vmem:[%s21051_s5 + $0x58] sm:$0xff]  }
 0x602   : > { %v11080_v21 = vcombine.high %v11079_v35, %v11079_v35  ;;  %v11088_v38 = vcombine.high %v11087_v55, %v11087_v55  ;;  %v14923_v41 = vrot.slane %v11079_v35, 9  ;;  %v11174_v33 = vrot.slane %v11087_v55, 7  ;;  %v19737_v61 = vpop.f32.mrb[6].mxu1  ;;  %12342 = vmatpush1.bf16.msra.mxu0 %v16005_v48 }
 0x603   : > { %v11246_v36 = vrot.slane %v11239_v57, %v16370_v18  ;;  %v11095_v53 = vrot.slane %v11063_v37, %v18115_v29  ;;  %v11103_v47 = vrot.slane %v11064_v0, %v18115_v29  ;;  %v11253_v23 = vrot.slane %v11064_v0, %v16370_v18  ;;  %v19743_v39 = vpop.f32.mrb[7].mxu1  ;;  %12474 = vmatprep.subr.bf16.mxu0 %v21093_v56 }
 0x604   : > { %v11171_v44 = vrot.slane %v11080_v21, 7  ;;  %v11176_v40 = vrot.slane %v11174_v33, 2  ;;  %v11177_v28 = vrot.slane %v11088_v38, 7  ;;  %v19749_v20 = vrot.slane %v11063_v37, %v16370_v18 }
 0x605   : > { %11295 = vst.msk [vmem:[#allocation4] ss:$8 sm:$0x3] %vm19729_vm12, %v11246_v36  ;;  %v11096_v14 = vcombine.high %v11095_v53, %v11095_v53  ;;  %v11104_v17 = vcombine.high %v11103_v47, %v11103_v47  ;;  %v11180_v54 = vrot.slane %v11095_v53, 7  ;;  %v14924_v52 = vrot.slane %v11103_v47, 9 }
 0x606   : > { %v11172_v4 = vsel %vm18130_vm15, %v14923_v41, %v11171_v44  ;;  %v11173_v62 = vrot.slane %v11171_v44, 2  ;;  %v11178_v12 = vsel %vm18130_vm15, %v11176_v40, %v11177_v28  ;;  %v11179_v3 = vrot.slane %v11177_v28, 2 }
 0x607   : > { %v11312_v45 = vrot.slane %v11172_v4, %v18115_v29  ;;  %v11328_v22 = vrot.slane %v11178_v12, %v18115_v29  ;;  %v11182_v58 = vrot.slane %v11180_v54, 2  ;;  %v11183_v15 = vrot.slane %v11096_v14, 7 }
 0x608   : > { %v11175_v49 = vsel %vm18130_vm15, %v11173_v62, %v11174_v33  ;;  %v11181_v13 = vsel %vm18130_vm15, %v11179_v3, %v11180_v54  ;;  %v19767_v5 = vrot.slane %v11104_v17, 7  ;;  %v11260_v8 = vrot.slane %v11253_v23, %v16370_v18  ;;  %v19770_v60 = vpop.f32.mrb[8].mxu1 }
 0x609   : > { %v11313_v7 = vcombine.high %v11312_v45, %v11312_v45  ;;  %v11320_v16 = vrot.slane %v11175_v49, %v18115_v29  ;;  %v11329_v30 = vcombine.high %v11328_v22, %v11328_v22  ;;  %v11506_v24 = vsel %vm6601_vm13, %v11312_v45, -inf  ;;  %v19775_v63 = vpop.f32.mrb[9].mxu1 }
 0x60a   : > { %v11507_v34 = vrot.slane %v11506_v24, 4  ;;  %v11535_v10 = vsel %vm6601_vm13, %v11328_v22, -inf  ;;  %v11184_v26 = vsel %vm18130_vm15, %v11182_v58, %v11183_v15  ;;  %v11188_v9 = vsel %vm18130_vm15, %v14924_v52, %v19767_v5  ;;  %11298 = vst.msk [vmem:[#allocation4 + $0x10] ss:$8 sm:$0x3] %vm19729_vm12, %v11260_v8  ;;  %v19785_v11 = vpop.f32.mrb[10].mxu1 }
 0x60b   : > { %v11321_v6 = vcombine.high %v11320_v16, %v11320_v16  ;;  %v11514_v35 = vsel %vm11513_vm11, %v11313_v7, -inf  ;;  %v11521_v55 = vsel %vm6601_vm13, %v11320_v16, -inf  ;;  %v11536_v57 = vrot.slane %v11535_v10, 4  ;;  %v19789_v37 = vpop.f32.mrb[11].mxu1 }
 0x60c   : > { %v11508_v0 = vmax.f32 %v11506_v24, %v11507_v34  ;;  %v11515_v21 = vrot.slane %v11514_v35, 4  ;;  %v11522_v38 = vrot.slane %v11521_v55, 4  ;;  %v11542_v41 = vsel %vm11513_vm11, %v11329_v30, -inf }
 0x60d   : > { %v11528_v33 = vsel %vm11513_vm11, %v11321_v6, -inf  ;;  %v11537_v36 = vmax.f32 %v11535_v10, %v11536_v57  ;;  %v11543_v53 = vrot.slane %v11542_v41, 4  ;;  %v11189_v47 = vrot.slane %v19767_v5, 2 }
 0x60e   : > { %v11509_v23 = vrot.slane %v11508_v0, 2  ;;  %v11516_v42 = vmax.f32 %v11514_v35, %v11515_v21  ;;  %v11523_v44 = vmax.f32 %v11521_v55, %v11522_v38  ;;  %v11529_v40 = vrot.slane %v11528_v33, 4 }
 0x60f   : > { %v11538_v28 = vrot.slane %v11537_v36, 2  ;;  %v11544_v14 = vmax.f32 %v11542_v41, %v11543_v53  ;;  %v11336_v17 = vrot.slane %v11181_v13, %v18115_v29  ;;  %v11344_v54 = vrot.slane %v11184_v26, %v18115_v29 }
 0x610   : > { %v11510_v52 = vmax.f32 %v11508_v0, %v11509_v23  ;;  %v11517_v4 = vrot.slane %v11516_v42, 2  ;;  %v11524_v62 = vrot.slane %v11523_v44, 2  ;;  %v11530_v12 = vmax.f32 %v11528_v33, %v11529_v40 }
 0x611   : > { %v11539_v3 = vmax.f32 %v11537_v36, %v11538_v28  ;;  %v11545_v45 = vrot.slane %v11544_v14, 2  ;;  %v11337_v22 = vcombine.high %v11336_v17, %v11336_v17  ;;  %v11345_v58 = vcombine.high %v11344_v54, %v11344_v54 }
 0x612   : > { %v11511_v15 = vrot.slane %v11510_v52, 1  ;;  %v11518_v2 = vmax.f32 %v11516_v42, %v11517_v4  ;;  %v11525_v49 = vmax.f32 %v11523_v44, %v11524_v62  ;;  %v11531_v8 = vrot.slane %v11530_v12, 2 }
 0x613   : > { %v11540_v7 = vrot.slane %v11539_v3, 1  ;;  %v11546_v16 = vmax.f32 %v11544_v14, %v11545_v45  ;;  %v11352_v13 = vrot.slane %v11188_v9, %v18115_v29  ;;  %v11549_v30 = vsel %vm6601_vm13, %v11336_v17, -inf }
 0x614   : > { %v11512_v24 = vmax.f32 %v11510_v52, %v11511_v15  ;;  %v11519_v34 = vrot.slane %v11518_v2, 1  ;;  %v11526_v10 = vrot.slane %v11525_v49, 1  ;;  %v11532_v26 = vmax.f32 %v11530_v12, %v11531_v8 }
 0x615   : > { %v11541_v6 = vmax.f32 %v11539_v3, %v11540_v7  ;;  %v11547_v35 = vrot.slane %v11546_v16, 1  ;;  %v11353_v55 = vcombine.high %v11352_v13, %v11352_v13  ;;  %v11550_v57 = vrot.slane %v11549_v30, 4 }
 0x616   : > { %v11520_v48 = vmax.f32 %v11518_v2, %v11519_v34  ;;  %v11527_v0 = vmax.f32 %v11525_v49, %v11526_v10  ;;  %v11533_v21 = vrot.slane %v11532_v26, 1  ;;  %v11556_v38 = vsel %vm11513_vm11, %v11337_v22, -inf }
 0x617   : > { %v11548_v41 = vmax.f32 %v11546_v16, %v11547_v35  ;;  %v11551_v33 = vmax.f32 %v11549_v30, %v11550_v57  ;;  %v11557_v36 = vrot.slane %v11556_v38, 4  ;;  %v11563_v9 = vsel %vm6601_vm13, %v11344_v54, -inf }
 0x618   : > { %v11534_v53 = vmax.f32 %v11532_v26, %v11533_v21  ;;  %v11827_v23 = vsel %vm5920_vm5, %v11527_v0, %v11512_v24  ;;  %v11564_v42 = vrot.slane %v11563_v9, 4  ;;  %v11570_v44 = vsel %vm11513_vm11, %v11345_v58, -inf }
 0x619   : > { %v11828_v40 = vsel %vm7372_vm6, %v11541_v6, %v11827_v23  ;;  %v11552_v28 = vrot.slane %v11551_v33, 2  ;;  %v11558_v14 = vmax.f32 %v11556_v38, %v11557_v36  ;;  %v11571_v17 = vrot.slane %v11570_v44, 4 }
 0x61a   : > { %v11831_v52 = vsel %vm5920_vm5, %v11534_v53, %v11520_v48  ;;  %v11565_v4 = vmax.f32 %v11563_v9, %v11564_v42  ;;  %v11577_v62 = vsel %vm6601_vm13, %v11352_v13, -inf  ;;  %v11584_v12 = vsel %vm11513_vm11, %v11353_v55, -inf }
 0x61b   : > { %v11832_v54 = vsel %vm7372_vm6, %v11548_v41, %v11831_v52  ;;  %v11553_v3 = vmax.f32 %v11551_v33, %v11552_v28  ;;  %v11559_v45 = vrot.slane %v11558_v14, 2  ;;  %v11572_v22 = vmax.f32 %v11570_v44, %v11571_v17 }
 0x61c   : > { %v11566_v15 = vrot.slane %v11565_v4, 2  ;;  %v11578_v58 = vrot.slane %v11577_v62, 4  ;;  %v11585_v2 = vrot.slane %v11584_v12, 4  ;;  %v11883_v49 = vcombine.high %v19749_v20, %v19749_v20 }
 0x61d   : > { %v11554_v8 = vrot.slane %v11553_v3, 1  ;;  %v11560_v7 = vmax.f32 %v11558_v14, %v11559_v45  ;;  %v11573_v16 = vrot.slane %v11572_v22, 2  ;;  %v11041_v30 = vmax.f32 %v19733_v25, 0.0 }
 0x61e   : > { %v11567_v13 = vmax.f32 %v11565_v4, %v11566_v15  ;;  %v11579_v24 = vmax.f32 %v11577_v62, %v11578_v58  ;;  %v11586_v34 = vmax.f32 %v11584_v12, %v11585_v2  ;;  %v11890_v10 = vrot.slane %v11883_v49, %v16370_v18 }
 0x61f   : > { %v11555_v26 = vmax.f32 %v11553_v3, %v11554_v8  ;;  %v11561_v6 = vrot.slane %v11560_v7, 1  ;;  %v11574_v35 = vmax.f32 %v11572_v22, %v11573_v16  ;;  %v15402_v55 = vadd.f32 %v19735_v19, %v19676_v32 }
 0x620   : > { %v11568_v57 = vrot.slane %v11567_v13, 1  ;;  %v11580_v48 = vrot.slane %v11579_v24, 2  ;;  %v11587_v0 = vrot.slane %v11586_v34, 2  ;;  %v11891_v20 = vcombine.high %v11890_v10, %v11890_v10 }
 0x621   : > { %v11562_v21 = vmax.f32 %v11560_v7, %v11561_v6  ;;  %v11575_v38 = vrot.slane %v11574_v35, 1  ;;  %v11829_v41 = vsel %vm5922_vm7, %v11555_v26, %v11828_v40  ;;  %v11042_v25 = vmax.f32 %v15402_v55, 0.0 }
 0x622   : > { %v11569_v33 = vmax.f32 %v11567_v13, %v11568_v57  ;;  %v11581_v36 = vmax.f32 %v11579_v24, %v11580_v48  ;;  %v11588_v9 = vmax.f32 %v11586_v34, %v11587_v0  ;;  %11945 = vst.msk [vmem:[#allocation4 + $0x6] ss:$8 sm:$0x3] %vm19729_vm12, %v11891_v20  ;;  %v15403_v53 = vadd.f32 %v19737_v61, %v19678_v31 }
 0x623   : > { %v11576_v23 = vmax.f32 %v11574_v35, %v11575_v38  ;;  %v11833_v32 = vsel %vm5922_vm7, %v11562_v21, %v11832_v54  ;;  %v11065_v19 = vcombine.low %v11041_v30, %v11042_v25  ;;  %v11066_v42 = vcombine.high %v11041_v30, %v11042_v25 }
 0x624   : > { %v11582_v44 = vrot.slane %v11581_v36, 1  ;;  %v11589_v28 = vrot.slane %v11588_v9, 1  ;;  %v11830_v14 = vsel %vm7375_vm10, %v11569_v33, %v11829_v41  ;;  %v11043_v40 = vmax.f32 %v15403_v53, 0.0 }
 0x625   : > { %v11834_v17 = vsel %vm7375_vm10, %v11576_v23, %v11833_v32  ;;  %11867 = vst [vmem:[#allocation4] sm:$0x3e] %v11830_v14  ;;  %v11111_v52 = vrot.slane %v11065_v19, %v18115_v29  ;;  %v11119_v4 = vrot.slane %v11066_v42, %v18115_v29  ;;  %v11898_v62 = vrot.slane %v11066_v42, %v16370_v18 }
 0x626   : > { %v19829_v31 = vmax.f32 %v11581_v36, %v11582_v44  ;;  %v19831_v61 = vmax.f32 %v11588_v9, %v11589_v28  ;;  %11869 = vst.msk [vmem:[#allocation4 + $0x8] sm:$0x3e] %vm11868_vm14, %v11834_v17  ;;  %v15404_v12 = vadd.f32 %v19743_v39, %v19680_v46  ;;  %v19838_v54 = vadd.f32 %v19770_v60, %v19682_v43 }
 0x627   : > { %v11112_v3 = vcombine.high %v11111_v52, %v11111_v52  ;;  %v11120_v45 = vcombine.high %v11119_v4, %v11119_v4  ;;  %v11190_v22 = vrot.slane %v11111_v52, 7  ;;  %v11196_v15 = vrot.slane %v11119_v4, 7 }
 0x628   : > { %v11899_v58 = vcombine.high %v11898_v62, %v11898_v62  ;;  %v11044_v2 = vmax.f32 %v15404_v12, 0.0  ;;  %v11045_v49 = vmax.f32 %v19838_v54, 0.0  ;;  %v19843_v8 = vadd.f32 %v19775_v63, %v19684_v1 }
 0x629   : > { %v11191_v46 = vsel %vm18130_vm15, %v11189_v47, %v11190_v22  ;;  %v11192_v39 = vrot.slane %v11190_v22, 2  ;;  %v11193_v43 = vrot.slane %v11112_v3, 7  ;;  %v11198_v60 = vrot.slane %v11196_v15, 2 }
 0x62a   : > { %v11199_v7 = vrot.slane %v11120_v45, 7  ;;  %v11360_v16 = vrot.slane %v11191_v46, %v18115_v29  ;;  %v11906_v30 = vrot.slane %v11899_v58, %v16370_v18  ;;  %v19851_v13 = vcombine.low %v11043_v40, %v11044_v2 }
 0x62b   : > { %v11194_v24 = vsel %vm18130_vm15, %v11192_v39, %v11193_v43  ;;  %v11195_v1 = vrot.slane %v11193_v43, 2  ;;  %v19855_v63 = vcombine.high %v11043_v40, %v11044_v2  ;;  %v11046_v5 = vmax.f32 %v19843_v8, 0.0 }
 0x62c   : > { %v11200_v47 = vsel %vm18130_vm15, %v11198_v60, %v11199_v7  ;;  %v11361_v34 = vcombine.high %v11360_v16, %v11360_v16  ;;  %v11368_v10 = vrot.slane %v11194_v24, %v18115_v29  ;;  %v11591_v26 = vsel %vm6601_vm13, %v11360_v16, -inf }
 0x62d   : > { %v11197_v6 = vsel %vm18130_vm15, %v11195_v1, %v11196_v15  ;;  %v11384_v35 = vrot.slane %v11200_v47, %v18115_v29  ;;  %v11592_v55 = vrot.slane %v11591_v26, 4  ;;  %v11907_v57 = vcombine.high %v11906_v30, %v11906_v30 }
 0x62e   : > { %v11369_v48 = vcombine.high %v11368_v10, %v11368_v10  ;;  %v11376_v0 = vrot.slane %v11197_v6, %v18115_v29  ;;  %v11598_v20 = vsel %vm11513_vm11, %v11361_v34, -inf  ;;  %v11605_v21 = vsel %vm6601_vm13, %v11368_v10, -inf }
 0x62f   : > { %v11385_v38 = vcombine.high %v11384_v35, %v11384_v35  ;;  %v11593_v41 = vmax.f32 %v11591_v26, %v11592_v55  ;;  %v11599_v25 = vrot.slane %v11598_v20, 4  ;;  %v11606_v33 = vrot.slane %v11605_v21, 4  ;;  %11948 = vst.msk [vmem:[#allocation4 + $0x16] ss:$8 sm:$0x3] %vm19729_vm12, %v11907_v57 }
 0x630   : > { %v11377_v36 = vcombine.high %v11376_v0, %v11376_v0  ;;  %v11612_v9 = vsel %vm11513_vm11, %v11369_v48, -inf  ;;  %v11619_v53 = vsel %vm6601_vm13, %v11376_v0, -inf  ;;  %v11633_v23 = vsel %vm6601_vm13, %v11384_v35, -inf }
 0x631   : > { %v11594_v32 = vrot.slane %v11593_v41, 2  ;;  %v11600_v19 = vmax.f32 %v11598_v20, %v11599_v25  ;;  %v11607_v42 = vmax.f32 %v11605_v21, %v11606_v33  ;;  %v11613_v44 = vrot.slane %v11612_v9, 4 }
 0x632   : > { %v11620_v28 = vrot.slane %v11619_v53, 4  ;;  %v11626_v14 = vsel %vm11513_vm11, %v11377_v36, -inf  ;;  %v11634_v40 = vrot.slane %v11633_v23, 4  ;;  %v11640_v17 = vsel %vm11513_vm11, %v11385_v38, -inf }
 0x633   : > { %v11595_v52 = vmax.f32 %v11593_v41, %v11594_v32  ;;  %v11601_v4 = vrot.slane %v11600_v19, 2  ;;  %v11608_v62 = vrot.slane %v11607_v42, 2  ;;  %v11614_v12 = vmax.f32 %v11612_v9, %v11613_v44 }
 0x634   : > { %v11621_v3 = vmax.f32 %v11619_v53, %v11620_v28  ;;  %v11627_v45 = vrot.slane %v11626_v14, 4  ;;  %v11635_v22 = vmax.f32 %v11633_v23, %v11634_v40  ;;  %v11641_v15 = vrot.slane %v11640_v17, 4 }
 0x635   : > { %v11596_v58 = vrot.slane %v11595_v52, 1  ;;  %v11602_v2 = vmax.f32 %v11600_v19, %v11601_v4  ;;  %v11609_v46 = vmax.f32 %v11607_v42, %v11608_v62  ;;  %v11615_v39 = vrot.slane %v11614_v12, 2 }
 0x636   : > { %v11622_v43 = vrot.slane %v11621_v3, 2  ;;  %v11628_v60 = vmax.f32 %v11626_v14, %v11627_v45  ;;  %v11636_v7 = vrot.slane %v11635_v22, 2  ;;  %v11642_v16 = vmax.f32 %v11640_v17, %v11641_v15 }
 0x637   : > { %v11597_v30 = vmax.f32 %v11595_v52, %v11596_v58  ;;  %v11603_v24 = vrot.slane %v11602_v2, 1  ;;  %v11610_v1 = vrot.slane %v11609_v46, 1  ;;  %v11616_v47 = vmax.f32 %v11614_v12, %v11615_v39 }
 0x638   : > { %v11623_v34 = vmax.f32 %v11621_v3, %v11622_v43  ;;  %v11629_v10 = vrot.slane %v11628_v60, 2  ;;  %v11637_v26 = vmax.f32 %v11635_v22, %v11636_v7  ;;  %v11643_v6 = vrot.slane %v11642_v16, 2 }
 0x639   : > { %v11604_v35 = vmax.f32 %v11602_v2, %v11603_v24  ;;  %v11611_v55 = vmax.f32 %v11609_v46, %v11610_v1  ;;  %v11617_v57 = vrot.slane %v11616_v47, 1  ;;  %v11835_v48 = vsel %vm5920_vm5, %v11597_v30, %v19829_v31 }
 0x63a   : > { %v11624_v0 = vrot.slane %v11623_v34, 1  ;;  %v11630_v20 = vmax.f32 %v11628_v60, %v11629_v10  ;;  %v11638_v21 = vrot.slane %v11637_v26, 1  ;;  %v11644_v38 = vmax.f32 %v11642_v16, %v11643_v6 }
 0x63b   : > { %v11618_v41 = vmax.f32 %v11616_v47, %v11617_v57  ;;  %v11836_v25 = vsel %vm7372_vm6, %v11611_v55, %v11835_v48  ;;  %v11839_v33 = vsel %vm5920_vm5, %v11604_v35, %v19831_v61  ;;  %v11127_v36 = vrot.slane %v19851_v13, %v18115_v29 }
 0x63c   : > { %v11625_v9 = vmax.f32 %v11623_v34, %v11624_v0  ;;  %v11631_v53 = vrot.slane %v11630_v20, 1  ;;  %v11639_v23 = vmax.f32 %v11637_v26, %v11638_v21  ;;  %v11645_v32 = vrot.slane %v11644_v38, 1 }
 0x63d   : > { %v11840_v19 = vsel %vm7372_vm6, %v11618_v41, %v11839_v33  ;;  %v11128_v31 = vcombine.high %v11127_v36, %v11127_v36  ;;  %v11135_v42 = vrot.slane %v19855_v63, %v18115_v29  ;;  %v14925_v44 = vrot.slane %v11127_v36, 9 }
 0x63e   : > { %v11632_v28 = vmax.f32 %v11630_v20, %v11631_v53  ;;  %v11646_v14 = vmax.f32 %v11644_v38, %v11645_v32  ;;  %v11837_v40 = vsel %vm5922_vm7, %v11625_v9, %v11836_v25  ;;  %v11267_v61 = vrot.slane %v19851_v13, %v16370_v18 }
 0x63f   : > { %v11838_v17 = vsel %vm7375_vm10, %v11639_v23, %v11837_v40  ;;  %v11136_v52 = vcombine.high %v11135_v42, %v11135_v42  ;;  %v11203_v4 = vrot.slane %v11128_v31, 7  ;;  %v11206_v62 = vrot.slane %v11135_v42, 7 }
 0x640   : > { %v11841_v12 = vsel %vm5922_vm7, %v11632_v28, %v11840_v19  ;;  %11870 = vst [vmem:[#allocation4 + $0x10] sm:$0x3e] %v11838_v17  ;;  %v11274_v3 = vrot.slane %v11267_v61, %v16370_v18  ;;  %v11069_v63 = vcombine.low %v11045_v49, %v11046_v5  ;;  %v19899_v13 = vcombine.high %v11045_v49, %v11046_v5 }
 0x641   : > { %v11842_v45 = vsel %vm7375_vm10, %v11646_v14, %v11841_v12  ;;  %v11204_v22 = vsel %vm18130_vm15, %v14925_v44, %v11203_v4  ;;  %v11205_v15 = vrot.slane %v11203_v4, 2  ;;  %v11208_v58 = vrot.slane %v11206_v62, 2 }
 0x642   : > { %11871 = vst.msk [vmem:[#allocation4 + $0x18] sm:$0x3e] %vm11868_vm14, %v11842_v45  ;;  %v11209_v2 = vrot.slane %v11136_v52, 7  ;;  %v11392_v46 = vrot.slane %v11204_v22, %v18115_v29  ;;  %v11143_v8 = vrot.slane %v11069_v63, %v18115_v29  ;;  %v11151_v54 = vrot.slane %v19899_v13, %v18115_v29 }
 0x643   : > { %11301 = vst.msk [vmem:[#allocation4 + $0x20] ss:$8 sm:$0x3] %vm19729_vm12, %v11274_v3  ;;  %v11207_v49 = vsel %vm18130_vm15, %v11205_v15, %v11206_v62  ;;  %v11281_v5 = vrot.slane %v19899_v13, %v16370_v18  ;;  %v19917_v39 = vadd.f32 %v19785_v11, %v19686_v27  ;;  %v11914_v52 = vrot.slane %v11069_v63, %v16370_v18 }
 0x644   : > { %v11210_v43 = vsel %vm18130_vm15, %v11208_v58, %v11209_v2  ;;  %v11211_v60 = vrot.slane %v11209_v2, 2  ;;  %v11393_v7 = vcombine.high %v11392_v46, %v11392_v46  ;;  %v11400_v16 = vrot.slane %v11207_v49, %v18115_v29 }
 0x645   : > { %v11408_v30 = vrot.slane %v11210_v43, %v18115_v29  ;;  %v11647_v24 = vsel %vm6601_vm13, %v11392_v46, -inf  ;;  %v11144_v1 = vcombine.high %v11143_v8, %v11143_v8  ;;  %v11152_v47 = vcombine.high %v11151_v54, %v11151_v54 }
 0x646   : > { %v11401_v34 = vcombine.high %v11400_v16, %v11400_v16  ;;  %v11648_v10 = vrot.slane %v11647_v24, 4  ;;  %v11654_v26 = vsel %vm11513_vm11, %v11393_v7, -inf  ;;  %v11661_v27 = vsel %vm6601_vm13, %v11400_v16, -inf }
 0x647   : > { %v11409_v11 = vcombine.high %v11408_v30, %v11408_v30  ;;  %v11655_v6 = vrot.slane %v11654_v26, 4  ;;  %v11662_v35 = vrot.slane %v11661_v27, 4  ;;  %v11675_v55 = vsel %vm6601_vm13, %v11408_v30, -inf }
 0x648   : > { %v11649_v57 = vmax.f32 %v11647_v24, %v11648_v10  ;;  %v11668_v48 = vsel %vm11513_vm11, %v11401_v34, -inf  ;;  %v11676_v0 = vrot.slane %v11675_v55, 4  ;;  %v11212_v20 = vrot.slane %v11143_v8, 7 }
 0x649   : > { %v11656_v21 = vmax.f32 %v11654_v26, %v11655_v6  ;;  %v11663_v38 = vmax.f32 %v11661_v27, %v11662_v35  ;;  %v11669_v41 = vrot.slane %v11668_v48, 4  ;;  %v11682_v25 = vsel %vm11513_vm11, %v11409_v11, -inf }
 0x64a   : > { %v11650_v33 = vrot.slane %v11649_v57, 2  ;;  %v11677_v36 = vmax.f32 %v11675_v55, %v11676_v0  ;;  %v11683_v9 = vrot.slane %v11682_v25, 4  ;;  %v11213_v53 = vsel %vm18130_vm15, %v11211_v60, %v11212_v20 }
 0x64b   : > { %v11657_v23 = vrot.slane %v11656_v21, 2  ;;  %v11664_v32 = vrot.slane %v11663_v38, 2  ;;  %v11670_v19 = vmax.f32 %v11668_v48, %v11669_v41  ;;  %v11214_v31 = vrot.slane %v11212_v20, 2 }
 0x64c   : > { %v11651_v42 = vmax.f32 %v11649_v57, %v11650_v33  ;;  %v11678_v44 = vrot.slane %v11677_v36, 2  ;;  %v11684_v28 = vmax.f32 %v11682_v25, %v11683_v9  ;;  %v11215_v14 = vrot.slane %v11144_v1, 7 }
 0x64d   : > { %v11658_v40 = vmax.f32 %v11656_v21, %v11657_v23  ;;  %v11665_v61 = vmax.f32 %v11663_v38, %v11664_v32  ;;  %v11671_v17 = vrot.slane %v11670_v19, 2  ;;  %v14926_v3 = vrot.slane %v11151_v54, 9 }
 0x64e   : > { %v11652_v4 = vrot.slane %v11651_v42, 1  ;;  %v11679_v62 = vmax.f32 %v11677_v36, %v11678_v44  ;;  %v11685_v12 = vrot.slane %v11684_v28, 2  ;;  %v19932_v15 = vrot.slane %v11152_v47, 7 }
 0x64f   : > { %v11659_v13 = vrot.slane %v11658_v40, 1  ;;  %v11666_v45 = vrot.slane %v11665_v61, 1  ;;  %v11672_v22 = vmax.f32 %v11670_v19, %v11671_v17  ;;  %v11216_v46 = vsel %vm18130_vm15, %v11214_v31, %v11215_v14 }
 0x650   : > { %v11680_v58 = vrot.slane %v11679_v62, 1  ;;  %v11686_v2 = vmax.f32 %v11684_v28, %v11685_v12  ;;  %v11288_v8 = vrot.slane %v11281_v5, %v16370_v18  ;;  %v11653_v49 = vmax.f32 %v11651_v42, %v11652_v4 }
 0x651   : > { %v11667_v43 = vmax.f32 %v11665_v61, %v11666_v45  ;;  %v11673_v60 = vrot.slane %v11672_v22, 1  ;;  %v11220_v63 = vsel %vm18130_vm15, %v14926_v3, %v19932_v15  ;;  %v11660_v54 = vmax.f32 %v11658_v40, %v11659_v13 }
 0x652   : > { %v11681_v7 = vmax.f32 %v11679_v62, %v11680_v58  ;;  %v11687_v16 = vrot.slane %v11686_v2, 1  ;;  %11304 = vst.msk [vmem:[#allocation4 + $0x30] ss:$8 sm:$0x3] %vm19729_vm12, %v11288_v8  ;;  %v11416_v30 = vrot.slane %v11213_v53, %v18115_v29  ;;  %v11424_v5 = vrot.slane %v11216_v46, %v18115_v29  ;;  %v16026_v8 = vld [vmem:[%s21052_s6] sm:$0xff]  }
 0x653   : > { %v11674_v24 = vmax.f32 %v11672_v22, %v11673_v60  ;;  %v11843_v1 = vsel %vm5920_vm5, %v11667_v43, %v11653_v49  ;;  %v11432_v47 = vrot.slane %v11220_v63, %v18115_v29  ;;  %v11915_v53 = vcombine.high %v11914_v52, %v11914_v52  ;;  %12173 = vmatpush1.bf16.msra.mxu1 %v16026_v8 }
 0x654   : > { %v11688_v34 = vmax.f32 %v11686_v2, %v11687_v16  ;;  %v11844_v10 = vsel %vm7372_vm6, %v11681_v7, %v11843_v1  ;;  %v11417_v26 = vcombine.high %v11416_v30, %v11416_v30  ;;  %v11689_v27 = vsel %vm6601_vm13, %v11416_v30, -inf  ;;  %12174 = vmatprep.subr.bf16.mxu1 %v21093_v56 }
 0x655   : > { %v11847_v11 = vsel %vm5920_vm5, %v11674_v24, %v11660_v54  ;;  %v11425_v6 = vcombine.high %v11424_v5, %v11424_v5  ;;  %v11433_v35 = vcombine.high %v11432_v47, %v11432_v47  ;;  %v11690_v55 = vrot.slane %v11689_v27, 4 }
 0x656   : > { %v11848_v57 = vsel %vm7372_vm6, %v11688_v34, %v11847_v11  ;;  %v11696_v48 = vsel %vm11513_vm11, %v11417_v26, -inf  ;;  %v11703_v0 = vsel %vm6601_vm13, %v11424_v5, -inf  ;;  %v11717_v20 = vsel %vm6601_vm13, %v11432_v47, -inf  ;;  %v19969_v26 = vld [vmem:[#allocation4 + $0x18] sm:$0x7f] }
 0x657   : > { %v11691_v21 = vmax.f32 %v11689_v27, %v11690_v55  ;;  %v11697_v38 = vrot.slane %v11696_v48, 4  ;;  %v11704_v41 = vrot.slane %v11703_v0, 4  ;;  %v11710_v25 = vsel %vm11513_vm11, %v11425_v6, -inf  ;;  %v16028_v27 = vld [vmem:[%s21052_s6 + $0x8] sm:$0xff]  }
 0x658   : > { %v11711_v33 = vrot.slane %v11710_v25, 4  ;;  %v11718_v36 = vrot.slane %v11717_v20, 4  ;;  %v11724_v9 = vsel %vm11513_vm11, %v11433_v35, -inf  ;;  %v11922_v28 = vrot.slane %v11915_v53, %v16370_v18  ;;  %12175 = vmatpush1.bf16.msra.mxu1 %v16028_v27  ;;  %v16030_v53 = vld [vmem:[%s21052_s6 + $0x10] sm:$0xff]  }
 0x659   : > { %v11692_v23 = vrot.slane %v11691_v21, 2  ;;  %v11698_v32 = vmax.f32 %v11696_v48, %v11697_v38  ;;  %v11705_v19 = vmax.f32 %v11703_v0, %v11704_v41  ;;  %v11725_v31 = vrot.slane %v11724_v9, 4  ;;  %12176 = vmatprep.subr.bf16.mxu1 %v21093_v56 }
 0x65a   : > { %v11712_v42 = vmax.f32 %v11710_v25, %v11711_v33  ;;  %v11719_v44 = vmax.f32 %v11717_v20, %v11718_v36  ;;  %v11047_v14 = vmax.f32 %v19917_v39, 0.0  ;;  %v11923_v3 = vcombine.high %v11922_v28, %v11922_v28  ;;  %v19978_v20 = vld [vmem:[#allocation4 + $0x10] sm:$0x7f]  ;;  %v19983_v25 = vld [vmem:[#allocation4 + $0x8] sm:$0x7f] }
 0x65b   : > { %v11693_v40 = vmax.f32 %v11691_v21, %v11692_v23  ;;  %v11699_v61 = vrot.slane %v11698_v32, 2  ;;  %v11706_v17 = vrot.slane %v11705_v19, 2  ;;  %v11726_v4 = vmax.f32 %v11724_v9, %v11725_v31 }
 0x65c   : > { %v11713_v62 = vrot.slane %v11712_v42, 2  ;;  %v11720_v12 = vrot.slane %v11719_v44, 2  ;;  %v15408_v52 = vadd.f32 %v19789_v37, %v19688_v59  ;;  %11951 = vst.msk [vmem:[#allocation4 + $0x26] ss:$8 sm:$0x3] %vm19729_vm12, %v11923_v3  ;;  %v11221_v7 = vrot.slane %v19932_v15, 2  ;;  %12177 = vmatpush1.bf16.msra.mxu1 %v16030_v53 }
 0x65d   : > { %v11694_v13 = vrot.slane %v11693_v40, 1  ;;  %v11700_v45 = vmax.f32 %v11698_v32, %v11699_v61  ;;  %v11707_v22 = vmax.f32 %v11705_v19, %v11706_v17  ;;  %v11727_v58 = vrot.slane %v11726_v4, 2  ;;  %12178 = vmatprep.subr.bf16.mxu1 %v21093_v56 }
 0x65e   : > { %v11714_v2 = vmax.f32 %v11712_v42, %v11713_v62  ;;  %v11721_v46 = vmax.f32 %v11719_v44, %v11720_v12  ;;  %v11048_v39 = vmax.f32 %v15408_v52, 0.0  ;;  %v15693_v41 = vpack.i.bf16 %v19969_v26, %v19978_v20  ;;  %v19996_v42 = vld [vmem:[#allocation4] sm:$0x7f] }
 0x65f   : > { %v11695_v49 = vmax.f32 %v11693_v40, %v11694_v13  ;;  %v11701_v43 = vrot.slane %v11700_v45, 1  ;;  %v11708_v60 = vrot.slane %v11707_v22, 1  ;;  %v11728_v63 = vmax.f32 %v11726_v4, %v11727_v58  ;;  %v16032_v13 = vld [vmem:[%s21052_s6 + $0x18] sm:$0xff]  }
 0x660   : > { %v11715_v54 = vrot.slane %v11714_v2, 1  ;;  %v11071_v59 = vcombine.low %v11047_v14, %v11048_v39  ;;  %v11072_v37 = vcombine.high %v11047_v14, %v11048_v39  ;;  %v11722_v5 = vrot.slane %v11721_v46, 1  ;;  %15694 = vrot.lane.b32.xlu0 %v15693_v41, %s16226_s23  ;;  %12179 = vmatpush1.bf16.msra.mxu1 %v16032_v13 }
 0x661   : > { %v11702_v16 = vmax.f32 %v11700_v45, %v11701_v43  ;;  %v11709_v30 = vmax.f32 %v11707_v22, %v11708_v60  ;;  %v11845_v24 = vsel %vm5922_vm7, %v11695_v49, %v11844_v10  ;;  %v11729_v11 = vrot.slane %v11728_v63, 1  ;;  %12180 = vmatprep.subr.bf16.mxu1 %v21093_v56 }
 0x662   : > { %v11716_v1 = vmax.f32 %v11714_v2, %v11715_v54  ;;  %v11159_v47 = vrot.slane %v11071_v59, %v18115_v29  ;;  %v11167_v34 = vrot.slane %v11072_v37, %v18115_v29  ;;  %v11930_v10 = vrot.slane %v11072_v37, %v16370_v18 }
 0x663   : > { %v11846_v15 = vsel %vm7375_vm10, %v11709_v30, %v11845_v24  ;;  %v11849_v6 = vsel %vm5922_vm7, %v11702_v16, %v11848_v57  ;;  %v19991_v23 = vmax.f32 %v11721_v46, %v11722_v5  ;;  %v19998_v44 = vmax.f32 %v11728_v63, %v11729_v11 }
 0x664   : > { %v11850_v35 = vsel %vm7375_vm10, %v11716_v1, %v11849_v6  ;;  %11872 = vst [vmem:[#allocation4 + $0x20] sm:$0x3e] %v11846_v15  ;;  %v11160_v55 = vcombine.high %v11159_v47, %v11159_v47  ;;  %v11168_v48 = vcombine.high %v11167_v34, %v11167_v34  ;;  %v11222_v0 = vrot.slane %v11159_v47, 7 }
 0x665   : > { %11873 = vst.msk [vmem:[#allocation4 + $0x28] sm:$0x3e] %vm11868_vm14, %v11850_v35  ;;  %v11228_v21 = vrot.slane %v11167_v34, 7  ;;  %v11931_v38 = vcombine.high %v11930_v10, %v11930_v10  ;;  %v15703_v40 = vpack.i.bf16 %v19983_v25, %v19996_v42 }
 0x666   : > { %v11223_v57 = vsel %vm18130_vm15, %v11221_v7, %v11222_v0  ;;  %v11224_v33 = vrot.slane %v11222_v0, 2  ;;  %v11225_v36 = vrot.slane %v11160_v55, 7  ;;  %v11231_v9 = vrot.slane %v11168_v48, 7  ;;  %v16034_v7 = vld [vmem:[%s21052_s6 + $0x20] sm:$0xff]   ;;  %v16036_v0 = vld [vmem:[%s21052_s6 + $0x28] sm:$0xff]  }
 0x667   : > { %v11230_v32 = vrot.slane %v11228_v21, 2  ;;  %v11440_v19 = vrot.slane %v11223_v57, %v18115_v29  ;;  %v11938_v31 = vrot.slane %v11931_v38, %v16370_v18  ;;  %15704 = vrot.lane.b32.xlu0 %v15703_v40, %s16226_s23  ;;  %12181 = vmatpush1.bf16.msra.mxu1 %v16034_v7 }
 0x668   : > { %v11226_v28 = vsel %vm18130_vm15, %v11224_v33, %v11225_v36  ;;  %v11227_v14 = vrot.slane %v11225_v36, 2  ;;  %12182 = vmatprep.subr.bf16.mxu1 %v21093_v56 }
 0x669   : > { %v11232_v61 = vsel %vm18130_vm15, %v11230_v32, %v11231_v9  ;;  %v11441_v17 = vcombine.high %v11440_v19, %v11440_v19  ;;  %v11448_v18 = vrot.slane %v11226_v28, %v18115_v29  ;;  %v11731_v4 = vsel %vm6601_vm13, %v11440_v19, -inf }
 0x66a   : > { %v11229_v62 = vsel %vm18130_vm15, %v11227_v14, %v11228_v21  ;;  %v11464_v12 = vrot.slane %v11232_v61, %v18115_v29  ;;  %v11732_v3 = vrot.slane %v11731_v4, 4  ;;  %v11939_v52 = vcombine.high %v11938_v31, %v11938_v31 }
 0x66b   : > { %v11449_v45 = vcombine.high %v11448_v18, %v11448_v18  ;;  %v11456_v22 = vrot.slane %v11229_v62, %v18115_v29  ;;  %v11738_v58 = vsel %vm11513_vm11, %v11441_v17, -inf  ;;  %v11745_v2 = vsel %vm6601_vm13, %v11448_v18, -inf  ;;  %12183 = vmatpush1.bf16.msra.mxu1 %v16036_v0  ;;  %v16038_v18 = vld [vmem:[%s21052_s6 + $0x30] sm:$0xff]  }
 0x66c   : > { %v11465_v46 = vcombine.high %v11464_v12, %v11464_v12  ;;  %v11733_v50 = vmax.f32 %v11731_v4, %v11732_v3  ;;  %v11739_v39 = vrot.slane %v11738_v58, 4  ;;  %v11746_v8 = vrot.slane %v11745_v2, 4  ;;  %11954 = vst.msk [vmem:[#allocation4 + $0x36] ss:$8 sm:$0x3] %vm19729_vm12, %v11939_v52  ;;  %12184 = vmatprep.subr.bf16.mxu1 %v21093_v56 }
 0x66d   : > { %v11457_v49 = vcombine.high %v11456_v22, %v11456_v22  ;;  %v11752_v43 = vsel %vm11513_vm11, %v11449_v45, -inf  ;;  %v11759_v60 = vsel %vm6601_vm13, %v11456_v22, -inf  ;;  %v11773_v29 = vsel %vm6601_vm13, %v11464_v12, -inf }
 0x66e   : > { %v11734_v63 = vrot.slane %v11733_v50, 2  ;;  %v11740_v54 = vmax.f32 %v11738_v58, %v11739_v39  ;;  %v11747_v59 = vmax.f32 %v11745_v2, %v11746_v8  ;;  %v11753_v37 = vrot.slane %v11752_v43, 4  ;;  %v20045_v58 = vld [vmem:[#allocation4 + $0x20] sm:$0x7f] }
 0x66f   : > { %v11760_v51 = vrot.slane %v11759_v60, 4  ;;  %v11766_v16 = vsel %vm11513_vm11, %v11457_v49, -inf  ;;  %v11774_v30 = vrot.slane %v11773_v29, 4  ;;  %v11780_v24 = vsel %vm11513_vm11, %v11465_v46, -inf  ;;  %12185 = vmatpush1.bf16.msra.mxu1 %v16038_v18 }
 0x670   : > { %v11735_v1 = vmax.f32 %v11733_v50, %v11734_v63  ;;  %v11741_v5 = vrot.slane %v11740_v54, 2  ;;  %v11748_v47 = vrot.slane %v11747_v59, 2  ;;  %v11754_v34 = vmax.f32 %v11752_v43, %v11753_v37  ;;  %12186 = vmatprep.subr.bf16.mxu1 %v21093_v56 }
 0x671   : > { %v11761_v27 = vmax.f32 %v11759_v60, %v11760_v51  ;;  %v11767_v11 = vrot.slane %v11766_v16, 4  ;;  %v11775_v15 = vmax.f32 %v11773_v29, %v11774_v30  ;;  %v11781_v6 = vrot.slane %v11780_v24, 4  ;;  %v16040_v60 = vld [vmem:[%s21052_s6 + $0x38] sm:$0xff]  }
 0x672   : > { %v11736_v10 = vrot.slane %v11735_v1, 1  ;;  %v11742_v35 = vmax.f32 %v11740_v54, %v11741_v5  ;;  %v11749_v55 = vmax.f32 %v11747_v59, %v11748_v47  ;;  %v11755_v48 = vrot.slane %v11754_v34, 2 }
 0x673   : > { %v11762_v21 = vrot.slane %v11761_v27, 2  ;;  %v11768_v38 = vmax.f32 %v11766_v16, %v11767_v11  ;;  %v11776_v41 = vrot.slane %v11775_v15, 2  ;;  %v11782_v57 = vmax.f32 %v11780_v24, %v11781_v6  ;;  %12187 = vmatpush1.bf16.msra.mxu1 %v16040_v60 }
 0x674   : > { %v11737_v33 = vmax.f32 %v11735_v1, %v11736_v10  ;;  %v11743_v36 = vrot.slane %v11742_v35, 1  ;;  %v11750_v9 = vrot.slane %v11749_v55, 1  ;;  %v11756_v53 = vmax.f32 %v11754_v34, %v11755_v48  ;;  %12188 = vmatprep.subr.bf16.mxu1 %v21093_v56 }
 0x675   : > { %v11763_v32 = vmax.f32 %v11761_v27, %v11762_v21  ;;  %v11769_v19 = vrot.slane %v11768_v38, 2  ;;  %v11777_v31 = vmax.f32 %v11775_v15, %v11776_v41  ;;  %v11783_v28 = vrot.slane %v11782_v57, 2  ;;  %v16042_v21 = vld [vmem:[%s21052_s6 + $0x40] sm:$0xff]  }
 0x676   : > { %v11744_v14 = vmax.f32 %v11742_v35, %v11743_v36  ;;  %v11751_v40 = vmax.f32 %v11749_v55, %v11750_v9  ;;  %v11757_v61 = vrot.slane %v11756_v53, 1  ;;  %v11851_v17 = vsel %vm5920_vm5, %v11737_v33, %v19991_v23  ;;  %v20047_v23 = vld [vmem:[#allocation4 + $0x28] sm:$0x7f] }
 0x677   : > { %v11764_v4 = vrot.slane %v11763_v32, 1  ;;  %v11770_v62 = vmax.f32 %v11768_v38, %v11769_v19  ;;  %v11778_v12 = vrot.slane %v11777_v31, 1  ;;  %v11784_v3 = vmax.f32 %v11782_v57, %v11783_v28  ;;  %12189 = vmatpush1.bf16.msra.mxu1 %v16042_v21  ;;  %v16044_v19 = vld [vmem:[%s21052_s6 + $0x48] sm:$0xff]  }
 0x678   : > { %v11758_v52 = vmax.f32 %v11756_v53, %v11757_v61  ;;  %v11852_v13 = vsel %vm7372_vm6, %v11751_v40, %v11851_v17  ;;  %v11855_v45 = vsel %vm5920_vm5, %v11744_v14, %v19998_v44  ;;  %v12012_v22 = vpack.c.bf16 %v19969_v26, %v19969_v26  ;;  %12190 = vmatprep.subr.bf16.mxu1 %v21093_v56 }
 0x679   : > { %v11765_v2 = vmax.f32 %v11763_v32, %v11764_v4  ;;  %v11771_v46 = vrot.slane %v11770_v62, 1  ;;  %v11785_v50 = vrot.slane %v11784_v3, 1  ;;  %v12011_v39 = vpack.c.bf16 %v19978_v20, %v19978_v20 }
 0x67a   : > { %v11779_v8 = vmax.f32 %v11777_v31, %v11778_v12  ;;  %v11856_v49 = vsel %vm7372_vm6, %v11758_v52, %v11855_v45  ;;  %v12009_v44 = vpack.c.bf16 %v19996_v42, %v19996_v42  ;;  %v12010_v43 = vpack.c.bf16 %v19983_v25, %v19983_v25 }
 0x67b   : > { %v11772_v29 = vmax.f32 %v11770_v62, %v11771_v46  ;;  %v11853_v63 = vsel %vm5922_vm7, %v11765_v2, %v11852_v13  ;;  %v12013_v54 = vpack.c.bf16 %v20045_v58, %v20045_v58  ;;  %v15698_v59 = vpack.i.bf16 %v20047_v23, %v20045_v58  ;;  %12191 = vmatpush1.bf16.msra.mxu1 %v16044_v19  ;;  %v16007_v19 = vld [vmem:[%s21051_s5 + $0x68] sm:$0xff]  }
 0x67c   : > { %v11786_v37 = vmax.f32 %v11784_v3, %v11785_v50  ;;  %v11854_v7 = vsel %vm7375_vm10, %v11779_v8, %v11853_v63  ;;  %v20066_v51 = vunpack.c.l.b16 %v12012_v22  ;;  %v12014_v16 = vpack.c.bf16 %v20047_v23, %v20047_v23  ;;  %12192 = vmatprep.subr.bf16.mxu1 %v21093_v56 }
 0x67d   : > { %v11857_v30 = vsel %vm5922_vm7, %v11772_v29, %v11856_v49  ;;  %11874 = vst [vmem:[#allocation4 + $0x30] sm:$0x3e] %v11854_v7  ;;  %15699 = vrot.lane.b32.xlu1 %v15698_v59, %s16226_s23  ;;  %v20074_v1 = vunpack.c.l.b16 %v12011_v39  ;;  %v20076_v5 = vunpack.c.l.b16 %v12009_v44  ;;  %v20079_v47 = vunpack.c.l.b16 %v12010_v43  ;;  %v16046_v39 = vld [vmem:[%s21052_s6 + $0x50] sm:$0xff]  }
 0x67e   : > { %v11858_v24 = vsel %vm7375_vm10, %v11786_v37, %v11857_v30  ;;  %v20081_v34 = vunpack.c.l.b16 %v12013_v54  ;;  %v20083_v27 = vunpack.c.l.b16 %v12014_v16  ;;  %v12234_v11 = vrot.slane %v20066_v51, 7 }
 0x67f   : > { %11875 = vst.msk [vmem:[#allocation4 + $0x38] sm:$0x3e] %vm11868_vm14, %v11858_v24  ;;  %v12228_v15 = vrot.slane %v20074_v1, 7  ;;  %v12688_v6 = vrot.slane %v20076_v5, 2  ;;  %v12689_v10 = vrot.slane %v20074_v1, 1  ;;  %v12390_v55 = vrot.slane %v20079_v47, 1  ;;  %12193 = vmatpush1.bf16.msra.mxu1 %v16046_v39 }
 0x680   : > { %v12230_v35 = vrot.slane %v20081_v34, 6  ;;  %v12998_v48 = vrot.slane %v20079_v47, 3  ;;  %v12999_v0 = vrot.slane %v20066_v51, 2  ;;  %v12235_v41 = vsel %vm7386_vm4, %v12234_v11, %v20079_v47  ;;  %12622 = vmatprep.subr.bf16.mxu1 %v21093_v56 }
 0x681   : > { %v12690_v57 = vsel %vm7386_vm4, %v12689_v10, %v12688_v6  ;;  %v13001_v33 = vrot.slane %v20083_v27, 1  ;;  %v12992_v36 = vrot.slane %v20076_v5, 3  ;;  %vm12315_vm7 = vcmask 523264   ;;  %v16006_v10 = vld [vmem:[%s21051_s5 + $0x60] sm:$0xff]  }
 0x682   : > { %v12691_v53 = vsel %vm5920_vm5, %v20081_v34, %v12690_v57  ;;  %v13000_v32 = vsel %vm7386_vm4, %v12999_v0, %v12998_v48  ;;  %v12993_v31 = vrot.slane %v20074_v1, 2  ;;  %v12995_v40 = vrot.slane %v20081_v34, 1 }
 0x683   : > { %v13002_v14 = vsel %vm5920_vm5, %v13001_v33, %v13000_v32  ;;  %v13303_v61 = vrot.slane %v20079_v47, 4  ;;  %v13304_v17 = vrot.slane %v20066_v51, 3  ;;  %v12236_v12 = vrot.slane %v20083_v27, 6 }
 0x684   : > { %v20096_v38 = vld [vmem:[#allocation4 + $0x30] sm:$0x7f]  ;;  %v12392_v3 = vrot.slane %v20083_v27, 7  ;;  %v12994_v52 = vsel %vm7386_vm4, %v12993_v31, %v12992_v36  ;;  %v13306_v45 = vrot.slane %v20083_v27, 2  ;;  %v12229_v2 = vsel %vm7386_vm4, %v12228_v15, %v20076_v5 }
 0x685   : > { %v12015_v9 = vpack.c.bf16 %v20096_v38, %v20096_v38  ;;  %v13305_v13 = vsel %vm7386_vm4, %v13304_v17, %v13303_v61  ;;  %v12231_v8 = vsel %vm5920_vm5, %v12230_v35, %v12229_v2  ;;  %v12391_v49 = vsel %vm7386_vm4, %v20066_v51, %v12390_v55 }
 0x686   : > { %v20112_v28 = vld [vmem:[#allocation4 + $0x38] sm:$0x7f]  ;;  %v12996_v44 = vsel %vm5920_vm5, %v12995_v40, %v12994_v52  ;;  %v13307_v43 = vsel %vm5920_vm5, %v13306_v45, %v13305_v13  ;;  %v12237_v60 = vsel %vm5920_vm5, %v12236_v12, %v12235_v41  ;;  %v13297_v54 = vrot.slane %v20074_v1, 3 }
 0x687   : > { %v20119_v18 = vunpack.c.l.b16 %v12015_v9  ;;  %v15708_v4 = vpack.i.bf16 %v20112_v28, %v20096_v38  ;;  %v12016_v62 = vpack.c.bf16 %v20112_v28, %v20112_v28  ;;  %v12393_v37 = vsel %vm5920_vm5, %v12392_v3, %v12391_v49 }
 0x688   : > { %v13299_v16 = vrot.slane %v20081_v34, 2  ;;  %v13296_v15 = vrot.slane %v20076_v5, 4  ;;  %v13611_v33 = vrot.slane %v20079_v47, 5  ;;  %v13612_v9 = vrot.slane %v20066_v51, 4 }
 0x689   : > { %15709 = vrot.lane.b32.xlu1 %v15708_v4, %s16226_s23  ;;  %v20131_v22 = vunpack.c.l.b16 %v12016_v62  ;;  %v12232_v46 = vrot.slane %v20119_v18, 5  ;;  %v12692_v50 = vrot.slane %v20119_v18, 7  ;;  %v20169_v55 = vsel %vm7372_vm6, %v20119_v18, %v12996_v44 }
 0x68a   : > { %v13298_v0 = vsel %vm7386_vm4, %v13297_v54, %v13296_v15  ;;  %v13301_v57 = vrot.slane %v20119_v18, 1  ;;  %v13605_v40 = vrot.slane %v20074_v1, 4  ;;  %v13613_v61 = vsel %vm7386_vm4, %v13612_v9, %v13611_v33  ;;  %v16012_v15 = vld [vmem:[%s21051_s5 + $0x90] sm:$0xff]  }
 0x68b   : > { %v12238_v29 = vrot.slane %v20131_v22, 5  ;;  %v12394_v63 = vrot.slane %v20131_v22, 6  ;;  %v12233_v59 = vsel %vm7372_vm6, %v12232_v46, %v12231_v8  ;;  %v20153_v7 = vsel %vm7372_vm6, %v12692_v50, %v12691_v53  ;;  %v16008_v50 = vld [vmem:[%s21051_s5 + $0x70] sm:$0xff]  }
 0x68c   : > { %v20160_v11 = vsel %vm7372_vm6, %v20131_v22, %v13002_v14  ;;  %v12240_v35 = vpack.c.b16 %v12233_v59, %v12233_v59  ;;  %v13308_v48 = vrot.slane %v20131_v22, 1  ;;  %v13300_v41 = vsel %vm5920_vm5, %v13299_v16, %v13298_v0  ;;  %v16009_v59 = vld [vmem:[%s21051_s5 + $0x78] sm:$0xff]  }
 0x68d   : > { %v12239_v30 = vsel %vm7372_vm6, %v12238_v29, %v12237_v60  ;;  %v12395_v24 = vsel %vm7372_vm6, %v12394_v63, %v12393_v37  ;;  %v13614_v53 = vrot.slane %v20083_v27, 3  ;;  %v13616_v32 = vrot.slane %v20131_v22, 2 }
 0x68e   : > { %v12241_v6 = vpack.c.b16 %v12239_v30, %v12239_v30  ;;  %v12397_v21 = vpack.c.b16 %v12395_v24, %v12395_v24  ;;  %v20178_v36 = vsel %vm7372_vm6, %v13308_v48, %v13307_v43  ;;  %v20188_v31 = vsel %vm7372_vm6, %v13301_v57, %v13300_v41  ;;  %v16010_v30 = vld [vmem:[%s21051_s5 + $0x80] sm:$0xff]   ;;  %v16011_v24 = vld [vmem:[%s21051_s5 + $0x88] sm:$0xff]   ;;  %v16016_v48 = vld [vmem:[%s21051_s5 + $0xb0] sm:$0xff]  }
 0x68f   : > { %v13604_v14 = vrot.slane %v20076_v5, 5  ;;  %v13607_v17 = vrot.slane %v20081_v34, 3  ;;  %v13609_v4 = vrot.slane %v20119_v18, 2  ;;  %v13615_v62 = vsel %vm5920_vm5, %v13614_v53, %v13613_v61  ;;  %v16017_v53 = vld [vmem:[%s21051_s5 + $0xb8] sm:$0xff]   ;;  %v16022_v61 = vld [vmem:[%s21051_s5 + $0xe0] sm:$0xff]  }
 0x690   : > { %14951 = vmatprep.mubr.msk.bf16.mxu0 %vm12315_vm7, %v12241_v6  ;;  %v13919_v3 = vrot.slane %v20079_v47, 6  ;;  %v13920_v52 = vrot.slane %v20066_v51, 5  ;;  %v20201_v13 = vsel %vm7372_vm6, %v13616_v32, %v13615_v62  ;;  %v13922_v2 = vrot.slane %v20083_v27, 4  ;;  %v16013_v6 = vld [vmem:[%s21051_s5 + $0x98] sm:$0xff]  }
 0x691   : > { %12352 = vmatmul.mubr.bf16.vlgmr.msra.gmra.mrb[56].mxu0 %v12240_v35  ;;  %v13606_v12 = vsel %vm7386_vm4, %v13605_v40, %v13604_v14  ;;  %v13924_v46 = vrot.slane %v20131_v22, 3  ;;  %v13912_v44 = vrot.slane %v20076_v5, 6  ;;  %v13913_v43 = vrot.slane %v20074_v1, 5  ;;  %v16015_v35 = vld [vmem:[%s21051_s5 + $0xa8] sm:$0xff]   ;;  %v16021_v40 = vld [vmem:[%s21051_s5 + $0xd8] sm:$0xff]  }
 0x692   : > { %12475 = vmatpush1.bf16.msra.mxu0 %v16006_v10  ;;  %14988 = vmatprep.mubr.msk.bf16.mxu0 %vm12315_vm7, %v12397_v21  ;;  %v13608_v45 = vsel %vm5920_vm5, %v13607_v17, %v13606_v12  ;;  %v13921_v8 = vsel %vm7386_vm4, %v13920_v52, %v13919_v3  ;;  %v13915_v60 = vrot.slane %v20081_v34, 4  ;;  %v13917_v63 = vrot.slane %v20119_v18, 3  ;;  %v16014_v10 = vld [vmem:[%s21051_s5 + $0xa0] sm:$0xff]   ;;  %v16019_v14 = vld [vmem:[%s21051_s5 + $0xc8] sm:$0xff]   ;;  %v16025_v12 = vld [vmem:[%s21051_s5 + $0xf8] sm:$0xff]  }
 0x693   : > { %12476 = vmatprep.subr.bf16.mxu0 %v21093_v56  ;;  %v20210_v39 = vsel %vm7372_vm6, %v13609_v4, %v13608_v45  ;;  %v13923_v49 = vsel %vm5920_vm5, %v13922_v2, %v13921_v8  ;;  %v13914_v54 = vsel %vm7386_vm4, %v13913_v43, %v13912_v44  ;;  %v12386_v0 = vrot.slane %v20081_v34, 7  ;;  %v16023_v17 = vld [vmem:[%s21051_s5 + $0xe8] sm:$0xff]   ;;  %v16024_v4 = vld [vmem:[%s21051_s5 + $0xf0] sm:$0xff]   ;;  %v16027_v8 = vld [vmem:[%s21051_s5 + $0x100] sm:$0xff]  }
 0x694   : > { %v20219_v29 = vsel %vm7372_vm6, %v13924_v46, %v13923_v49  ;;  %v13916_v37 = vsel %vm5920_vm5, %v13915_v60, %v13914_v54  ;;  %v12695_v21 = vrot.slane %v20066_v51, 1  ;;  %v12384_v41 = vrot.slane %v20076_v5, 1 }
 0x695   : > { %v20229_v16 = vsel %vm7372_vm6, %v13917_v63, %v13916_v37  ;;  %v12388_v57 = vrot.slane %v20119_v18, 6  ;;  %v12694_v33 = vrot.slane %v20079_v47, 2  ;;  %v12698_v9 = vrot.slane %v20131_v22, 7  ;;  %v16018_v22 = vld [vmem:[%s21051_s5 + $0xc0] sm:$0xff]  }
 0x696   : > { %12477 = vmatpush1.bf16.msra.mxu0 %v16007_v19  ;;  %v12385_v32 = vsel %vm7386_vm4, %v20074_v1, %v12384_v41  ;;  %vm11988_vm13 = vcmask 916480   ;;  %vm12168_vm15 = vcmask 392192  }
 0x697   : > { %12478 = vmatprep.subr.bf16.mxu0 %v21093_v56  ;;  %v12387_v51 = vsel %vm5920_vm5, %v12386_v0, %v12385_v32  ;;  %v12696_v5 = vsel %vm7386_vm4, %v12695_v21, %v12694_v33 }
 0x698   : > { %v12389_v34 = vsel %vm7372_vm6, %v12388_v57, %v12387_v51  ;;  %v12697_v47 = vsel %vm5920_vm5, %v20083_v27, %v12696_v5  ;;  %v16020_v27 = vld [vmem:[%s21051_s5 + $0xd0] sm:$0xff]  }
 0x699   : > { %v12699_v18 = vsel %vm7372_vm6, %v12698_v9, %v12697_v47  ;;  %v12396_v19 = vpack.c.b16 %v12389_v34, %v12389_v34 }
 0x69a   : > { %12479 = vmatpush1.bf16.msra.mxu0 %v16008_v50  ;;  %v12701_v1 = vpack.c.b16 %v12699_v18, %v12699_v18  ;;  %v16033_v18 = vld [vmem:[%s21051_s5 + $0x118] sm:$0xff]  }
 0x69b   : > { %12480 = vmatprep.subr.bf16.mxu0 %v21093_v56 }
 0x69e   : > { %12481 = vmatpush1.bf16.msra.mxu0 %v16009_v59 }
 0x69f   : > { %12482 = vmatprep.subr.bf16.mxu0 %v21093_v56 }
 0x6a2   : > { %12483 = vmatpush1.bf16.msra.mxu0 %v16010_v30 }
 0x6a3   : > { %12484 = vmatprep.subr.bf16.mxu0 %v21093_v56 }
 0x6a6   : > { %12485 = vmatpush1.bf16.msra.mxu0 %v16011_v24 }
 0x6a7   : > { %12486 = vmatprep.subr.bf16.mxu0 %v21093_v56 }
 0x6aa   : > { %12487 = vmatpush1.bf16.msra.mxu0 %v16012_v15 }
 0x6ab   : > { %12488 = vmatprep.subr.bf16.mxu0 %v21093_v56 }
 0x6ae   : > { %12489 = vmatpush1.bf16.msra.mxu0 %v16013_v6 }
 0x6af   : > { %12490 = vmatprep.subr.bf16.mxu0 %v21093_v56 }
 0x6b2   : > { %12491 = vmatpush1.bf16.msra.mxu0 %v16014_v10 }
 0x6b3   : > { %12492 = vmatprep.subr.bf16.mxu0 %v21093_v56 }
 0x6b6   : > { %12493 = vmatpush1.bf16.msra.mxu0 %v16015_v35 }
 0x6b7   : > { %12494 = vmatprep.subr.bf16.mxu0 %v21093_v56 }
 0x6ba   : > { %12495 = vmatpush1.bf16.msra.mxu0 %v16016_v48 }
 0x6bb   : > { %12496 = vmatprep.subr.bf16.mxu0 %v21093_v56 }
 0x6be   : > { %12497 = vmatpush1.bf16.msra.mxu0 %v16017_v53 }
 0x6bf   : > { %12778 = vmatprep.subr.bf16.mxu0 %v21093_v56 }
 0x6c1   : > { %12507 = vmatmul.mubr.bf16.vlgmr.msra.gmra.mrb[56].mxu0 %v12396_v19 }
 0x6c2   : > { %12779 = vmatpush1.bf16.msra.mxu0 %v16018_v22  ;;  %15059 = vmatprep.mubr.msk.bf16.mxu0 %vm12315_vm7, %v12701_v1 }
 0x6c3   : > { %12780 = vmatprep.subr.bf16.mxu0 %v21093_v56 }
 0x6c6   : > { %12781 = vmatpush1.bf16.msra.mxu0 %v16019_v14 }
 0x6c7   : > { %12782 = vmatprep.subr.bf16.mxu0 %v21093_v56 }
 0x6ca   : > { %12783 = vmatpush1.bf16.msra.mxu0 %v16020_v27 }
 0x6cb   : > { %12784 = vmatprep.subr.bf16.mxu0 %v21093_v56 }
 0x6ce   : > { %12785 = vmatpush1.bf16.msra.mxu0 %v16021_v40 }
 0x6cf   : > { %12786 = vmatprep.subr.bf16.mxu0 %v21093_v56 }
 0x6d2   : > { %12787 = vmatpush1.bf16.msra.mxu0 %v16022_v61  ;;  %v15695_v62 = vpop.permute.xlu0 %15694 }
 0x6d3   : > { %12788 = vmatprep.subr.bf16.mxu0 %v21093_v56  ;;  %v15697_v3 = vunpack.i.h.bf16 %v15695_v62  ;;  %v15696_v52 = vunpack.i.l.bf16 %v15695_v62 }
 0x6d5   : > { %v12004_v45 = vmax.f32 %v19969_v26, %v15697_v3  ;;  %v11990_v2 = vsel %vm11988_vm13, %v15696_v52, %v15697_v3  ;;  %v16035_v3 = vld [vmem:[%s21051_s5 + $0x120] sm:$0xff]   ;;  %v12700_v52 = vpack.c.b16 %v20153_v7, %v20153_v7 }
 0x6d6   : > { %12789 = vmatpush1.bf16.msra.mxu0 %v16023_v17  ;;  %v12003_v46 = vmax.f32 %v19978_v20, %v11990_v2  ;;  %v16029_v20 = vld [vmem:[%s21051_s5 + $0x108] sm:$0xff]   ;;  %v13005_v2 = vpack.c.b16 %v20160_v11, %v20160_v11 }
 0x6d7   : > { %12790 = vmatprep.subr.bf16.mxu0 %v21093_v56  ;;  %v12020_v49 = vpack.c.bf16 %v12004_v45, %v12004_v45 }
 0x6d8   : > { %v12019_v60 = vpack.c.bf16 %v12003_v46, %v12003_v46 }
 0x6d9   : > { %v15705_v50 = vpop.permute.xlu0 %15704  ;;  %v20323_v59 = vunpack.c.l.b16 %v12020_v49 }
 0x6da   : > { %12791 = vmatpush1.bf16.msra.mxu0 %v16024_v4  ;;  %v15707_v44 = vunpack.i.h.bf16 %v15705_v50  ;;  %v15706_v43 = vunpack.i.l.bf16 %v15705_v50  ;;  %v20325_v37 = vunpack.c.l.b16 %v12019_v60 }
 0x6db   : > { %12792 = vmatprep.subr.bf16.mxu0 %v21093_v56  ;;  %v13153_v35 = vrot.slane %v20323_v59, 2  ;;  %v13460_v41 = vrot.slane %v20323_v59, 3  ;;  %v13768_v53 = vrot.slane %v20323_v59, 4  ;;  %v14076_v47 = vrot.slane %v20323_v59, 5 }
 0x6dc   : > { %v12002_v63 = vmax.f32 %v19983_v25, %v15707_v44  ;;  %v11989_v26 = vsel %vm11988_vm13, %v15706_v43, %v15707_v44  ;;  %v12843_v6 = vrot.slane %v20325_v37, 1  ;;  %v13147_v48 = vrot.slane %v20325_v37, 2 }
 0x6dd   : > { %v12001_v54 = vmax.f32 %v19996_v42, %v11989_v26  ;;  %v16031_v42 = vld [vmem:[%s21051_s5 + $0x110] sm:$0xff]   ;;  %v13453_v57 = vrot.slane %v20325_v37, 3  ;;  %v13761_v32 = vrot.slane %v20325_v37, 4  ;;  %v14069_v61 = vrot.slane %v20325_v37, 5 }
 0x6de   : > { %12793 = vmatpush1.bf16.msra.mxu0 %v16025_v12  ;;  %v12018_v30 = vpack.c.bf16 %v12002_v63, %v12002_v63  ;;  %v16039_v63 = vld [vmem:[%s21051_s5 + $0x130] sm:$0xff]  }
 0x6df   : > { %12794 = vmatprep.subr.bf16.mxu0 %v21093_v56  ;;  %v12017_v24 = vpack.c.bf16 %v12001_v54, %v12001_v54 }
 0x6e0   : > { %v20328_v15 = vunpack.c.l.b16 %v12018_v30 }
 0x6e1   : > { %v20330_v25 = vunpack.c.l.b16 %v12017_v24 }
 0x6e2   : > { %12795 = vmatpush1.bf16.msra.mxu0 %v16027_v8  ;;  %v13152_v10 = vrot.slane %v20328_v15, 3  ;;  %v13459_v9 = vrot.slane %v20328_v15, 4  ;;  %v13767_v19 = vrot.slane %v20328_v15, 5  ;;  %v14075_v14 = vrot.slane %v20328_v15, 6  ;;  %v16037_v8 = vld [vmem:[%s21051_s5 + $0x128] sm:$0xff]  }
 0x6e3   : > { %12796 = vmatprep.subr.bf16.mxu0 %v21093_v56  ;;  %v12842_v0 = vrot.slane %v20330_v25, 2  ;;  %v13146_v21 = vrot.slane %v20330_v25, 3  ;;  %v13452_v34 = vrot.slane %v20330_v25, 4  ;;  %v13760_v1 = vrot.slane %v20330_v25, 5 }
 0x6e4   : > { %v13154_v33 = vsel %vm7386_vm4, %v13153_v35, %v13152_v10  ;;  %v13461_v22 = vsel %vm7386_vm4, %v13460_v41, %v13459_v9  ;;  %v14068_v40 = vrot.slane %v20330_v25, 6  ;;  %v13769_v17 = vsel %vm7386_vm4, %v13768_v53, %v13767_v19 }
 0x6e5   : > { %v12844_v51 = vsel %vm7386_vm4, %v12843_v6, %v12842_v0  ;;  %v13148_v5 = vsel %vm7386_vm4, %v13147_v48, %v13146_v21  ;;  %v13454_v27 = vsel %vm7386_vm4, %v13453_v57, %v13452_v34  ;;  %v13762_v4 = vsel %vm7386_vm4, %v13761_v32, %v13760_v1 }
 0x6e6   : > { %12797 = vmatpush1.bf16.msra.mxu0 %v16029_v20  ;;  %v14077_v62 = vsel %vm7386_vm4, %v14076_v47, %v14075_v14  ;;  %v14070_v12 = vsel %vm7386_vm4, %v14069_v61, %v14068_v40  ;;  %v16041_v20 = vld [vmem:[%s21051_s5 + $0x138] sm:$0xff]   ;;  %v12093_v14 = vrot.slane %v20323_v59, 7 }
 0x6e7   : > { %12798 = vmatprep.subr.bf16.mxu0 %v21093_v56 }
 0x6ea   : > { %12799 = vmatpush1.bf16.msra.mxu0 %v16031_v42 }
 0x6eb   : > { %12800 = vmatprep.subr.bf16.mxu0 %v21093_v56 }
 0x6ee   : > { %12801 = vmatpush1.bf16.msra.mxu0 %v16033_v18 }
 0x6ef   : > { %13082 = vmatprep.subr.bf16.mxu0 %v21093_v56  ;;  %v15700_v45 = vpop.permute.xlu1 %15699 }
 0x6f0   : > { %v15702_v46 = vunpack.i.h.bf16 %v15700_v45  ;;  %v15701_v50 = vunpack.i.l.bf16 %v15700_v45 }
 0x6f1   : > { %12811 = vmatmul.mubr.bf16.vlgmr.msra.gmra.mrb[60].mxu0 %v12700_v52 }
 0x6f2   : > { %13083 = vmatpush1.bf16.msra.mxu0 %v16035_v3  ;;  %15130 = vmatprep.mubr.msk.bf16.mxu0 %vm12315_vm7, %v13005_v2  ;;  %v12006_v49 = vmax.f32 %v20047_v23, %v15702_v46  ;;  %v11991_v7 = vsel %vm11988_vm13, %v15701_v50, %v15702_v46  ;;  %v12094_v3 = vsel %vm7386_vm4, %v12093_v14, %v20328_v15  ;;  %v16058_v14 = vld [vmem:[%s21052_s6 + $0x80] sm:$0xff]  }
 0x6f3   : > { %13084 = vmatprep.subr.bf16.mxu0 %v21093_v56  ;;  %v12005_v44 = vmax.f32 %v20045_v58, %v11991_v7 }
 0x6f4   : > { %v12022_v43 = vpack.c.bf16 %v12006_v49, %v12006_v49 }
 0x6f5   : > { %v12021_v11 = vpack.c.bf16 %v12005_v44, %v12005_v44 }
 0x6f6   : > { %13085 = vmatpush1.bf16.msra.mxu0 %v16037_v8  ;;  %v20383_v60 = vunpack.c.l.b16 %v12022_v43  ;;  %v16047_v43 = vld [vmem:[%s21051_s5 + $0x150] sm:$0xff]  }
 0x6f7   : > { %v20388_v26 = vunpack.c.l.b16 %v12021_v11  ;;  %13086 = vmatprep.subr.bf16.mxu0 %v21093_v56 }
 0x6f8   : > { %v13155_v23 = vrot.slane %v20383_v60, 1  ;;  %v13462_v24 = vrot.slane %v20383_v60, 2  ;;  %v13770_v21 = vrot.slane %v20383_v60, 3  ;;  %v12546_v40 = vrot.slane %v20383_v60, 7 }
 0x6f9   : > { %v20394_v54 = vsel %vm5920_vm5, %v20388_v26, %v12844_v51  ;;  %v13149_v58 = vrot.slane %v20388_v26, 1  ;;  %v13455_v10 = vrot.slane %v20388_v26, 2  ;;  %v13763_v57 = vrot.slane %v20388_v26, 3  ;;  %v16043_v51 = vld [vmem:[%s21051_s5 + $0x140] sm:$0xff]  }
 0x6fa   : > { %13087 = vmatpush1.bf16.msra.mxu0 %v16039_v63  ;;  %v13156_v30 = vsel %vm5920_vm5, %v13155_v23, %v13154_v33  ;;  %v20406_v0 = vsel %vm5920_vm5, %v13462_v24, %v13461_v22  ;;  %v14078_v33 = vrot.slane %v20383_v60, 4  ;;  %v14071_v9 = vrot.slane %v20388_v26, 4 }
 0x6fb   : > { %v15710_v42 = vpop.permute.xlu1 %15709  ;;  %13088 = vmatprep.subr.bf16.mxu0 %v21093_v56  ;;  %v13150_v6 = vsel %vm5920_vm5, %v13149_v58, %v13148_v5  ;;  %v20410_v41 = vsel %vm5920_vm5, %v13455_v10, %v13454_v27  ;;  %v12544_v5 = vrot.slane %v20328_v15, 1  ;;  %v13771_v34 = vsel %vm5920_vm5, %v13770_v21, %v13769_v17 }
 0x6fc   : > { %v15712_v35 = vunpack.i.h.bf16 %v15710_v42  ;;  %v15711_v48 = vunpack.i.l.bf16 %v15710_v42  ;;  %v13764_v18 = vsel %vm5920_vm5, %v13763_v57, %v13762_v4  ;;  %v14079_v22 = vsel %vm5920_vm5, %v14078_v33, %v14077_v62 }
 0x6fd   : > { %v12095_v27 = vrot.slane %v20383_v60, 6  ;;  %v12087_v17 = vrot.slane %v20325_v37, 7  ;;  %v12089_v4 = vrot.slane %v20388_v26, 6  ;;  %v12545_v62 = vsel %vm7386_vm4, %v20323_v59, %v12544_v5 }
 0x6fe   : > { %v12008_v53 = vmax.f32 %v20112_v28, %v15712_v35  ;;  %v11992_v32 = vsel %vm11988_vm13, %v15711_v48, %v15712_v35  ;;  %13089 = vmatpush1.bf16.msra.mxu0 %v16041_v20  ;;  %v14072_v28 = vsel %vm5920_vm5, %v14071_v9, %v14070_v12  ;;  %v12547_v49 = vsel %vm5920_vm5, %v12546_v40, %v12545_v62  ;;  %v16049_v48 = vld [vmem:[%s21051_s5 + $0x158] sm:$0xff]   ;;  %v16050_v9 = vld [vmem:[%s21052_s6 + $0x60] sm:$0xff]   ;;  %v16059_v40 = vld [vmem:[%s21052_s6 + $0x88] sm:$0xff]  }
 0x6ff   : > { %v12007_v47 = vmax.f32 %v20096_v38, %v11992_v32  ;;  %13090 = vmatprep.subr.bf16.mxu0 %v21093_v56  ;;  %v16045_v38 = vld [vmem:[%s21051_s5 + $0x148] sm:$0xff]   ;;  %v12088_v45 = vsel %vm7386_vm4, %v12087_v17, %v20330_v25  ;;  %v12096_v50 = vsel %vm5920_vm5, %v12095_v27, %v12094_v3  ;;  %v13004_v27 = vpack.c.b16 %v20169_v55, %v20169_v55  ;;  %v16061_v17 = vld [vmem:[%s21052_s6 + $0x98] sm:$0xff]   ;;  %v16062_v62 = vld [vmem:[%s21052_s6 + $0xa0] sm:$0xff]  }
 0x700   : > { %v12024_v19 = vpack.c.bf16 %v12008_v53, %v12008_v53  ;;  %v12090_v11 = vsel %vm5920_vm5, %v12089_v4, %v12088_v45  ;;  %v12538_v55 = vrot.slane %v20330_v25, 1  ;;  %v12848_v4 = vrot.slane %v20328_v15, 2 }
 0x701   : > { %v12023_v1 = vpack.c.bf16 %v12007_v47, %v12007_v47  ;;  %v12540_v3 = vrot.slane %v20388_v26, 7 }
 0x702   : > { %v20430_v61 = vunpack.c.l.b16 %v12024_v19  ;;  %13091 = vmatpush1.bf16.msra.mxu0 %v16043_v51  ;;  %v16056_v19 = vld [vmem:[%s21052_s6 + $0x78] sm:$0xff]   ;;  %v12539_v45 = vsel %vm7386_vm4, %v20325_v37, %v12538_v55  ;;  %v16092_v55 = vld [vmem:[%s21051_s5 + $0x1b0] sm:$0xff]  }
 0x703   : > { %v20439_v12 = vunpack.c.l.b16 %v12023_v1  ;;  %13092 = vmatprep.subr.bf16.mxu0 %v21093_v56  ;;  %v16057_v1 = vld [vmem:[%s21051_s5 + $0x178] sm:$0xff]   ;;  %v12541_v26 = vsel %vm5920_vm5, %v12540_v3, %v12539_v45  ;;  %v16095_v3 = vld [vmem:[%s21051_s5 + $0x1c8] sm:$0xff]  }
 0x704   : > { %v12097_v52 = vrot.slane %v20430_v61, 5  ;;  %v12548_v2 = vrot.slane %v20430_v61, 6  ;;  %v20450_v46 = vsel %vm7372_vm6, %v20430_v61, %v13156_v30  ;;  %v16048_v30 = vld [vmem:[%s21052_s6 + $0x58] sm:$0xff]   ;;  %v13772_v21 = vrot.slane %v20430_v61, 2 }
 0x705   : > { %v12091_v8 = vrot.slane %v20439_v12, 5  ;;  %v12846_v7 = vrot.slane %v20439_v12, 7  ;;  %v20464_v23 = vsel %vm7372_vm6, %v20439_v12, %v13150_v6  ;;  %v13464_v6 = vrot.slane %v20430_v61, 1  ;;  %v16097_v45 = vld [vmem:[%s21051_s5 + $0x1d8] sm:$0xff]  }
 0x706   : > { %13093 = vmatpush1.bf16.msra.mxu0 %v16045_v38  ;;  %v12098_v44 = vsel %vm7372_vm6, %v12097_v52, %v12096_v50  ;;  %v12549_v63 = vsel %vm7372_vm6, %v12548_v2, %v12547_v49  ;;  %v13457_v35 = vrot.slane %v20439_v12, 1  ;;  %v13765_v57 = vrot.slane %v20439_v12, 2  ;;  %v16060_v38 = vld [vmem:[%s21052_s6 + $0x90] sm:$0xff]   ;;  %v16063_v50 = vld [vmem:[%s21052_s6 + $0xa8] sm:$0xff]  }
 0x707   : > { %13094 = vmatprep.subr.bf16.mxu0 %v21093_v56  ;;  %v12100_v58 = vpack.c.b16 %v12098_v44, %v12098_v44  ;;  %v12092_v20 = vsel %vm7372_vm6, %v12091_v8, %v12090_v11  ;;  %v20473_v42 = vsel %vm7372_vm6, %v12846_v7, %v20394_v54  ;;  %v12551_v10 = vpack.c.b16 %v12549_v63, %v12549_v63  ;;  %v16065_v7 = vld [vmem:[%s21052_s6 + $0xb8] sm:$0xff]   ;;  %v16067_v44 = vld [vmem:[%s21052_s6 + $0xc8] sm:$0xff]   ;;  %v16070_v63 = vld [vmem:[%s21052_s6 + $0xe0] sm:$0xff]  }
 0x708   : > { %v12099_v24 = vpack.c.b16 %v12092_v20, %v12092_v20  ;;  %v14080_v54 = vrot.slane %v20430_v61, 3  ;;  %v14073_v33 = vrot.slane %v20439_v12, 3  ;;  %v20491_v53 = vsel %vm7372_vm6, %v13464_v6, %v20406_v0  ;;  %v16069_v11 = vld [vmem:[%s21052_s6 + $0xd8] sm:$0xff]   ;;  %v16072_v20 = vld [vmem:[%s21052_s6 + $0xf0] sm:$0xff]  }
 0x709   : > { %14938 = vmatprep.mubr.msk.bf16.mxu1 %vm12168_vm15, %v12100_v58  ;;  %v20495_v32 = vsel %vm7372_vm6, %v13457_v35, %v20410_v41  ;;  %v20500_v51 = vsel %vm7372_vm6, %v13772_v21, %v13771_v34  ;;  %v20503_v5 = vsel %vm7372_vm6, %v13765_v57, %v13764_v18  ;;  %v16051_v41 = vld [vmem:[%s21051_s5 + $0x160] sm:$0xff]   ;;  %v16052_v34 = vld [vmem:[%s21052_s6 + $0x68] sm:$0xff]   ;;  %v12849_v52 = vrot.slane %v20323_v59, 1  ;;  %v16080_v57 = vld [vmem:[%s21052_s6 + $0x130] sm:$0xff]  }
 0x70a   : > { %13095 = vmatpush1.bf16.msra.mxu0 %v16047_v43  ;;  %12205 = vmatmul.mubr.bf16.vlgmr.msra.gmra.mrb[12].mxu1 %v12099_v24  ;;  %v20506_v47 = vsel %vm7372_vm6, %v14080_v54, %v14079_v22  ;;  %v20509_v0 = vsel %vm7372_vm6, %v14073_v33, %v14072_v28  ;;  %v16053_v18 = vld [vmem:[%s21051_s5 + $0x168] sm:$0xff]   ;;  %v16054_v22 = vld [vmem:[%s21052_s6 + $0x70] sm:$0xff]   ;;  %v12542_v2 = vrot.slane %v20439_v12, 6  ;;  %v12852_v15 = vrot.slane %v20430_v61, 7  ;;  %v16074_v24 = vld [vmem:[%s21052_s6 + $0x100] sm:$0xff]  }
 0x70b   : > { %12623 = vmatpush1.bf16.msra.mxu1 %v16048_v30  ;;  %15022 = vmatprep.mubr.msk.bf16.mxu1 %vm12168_vm15, %v12551_v10  ;;  %v16055_v28 = vld [vmem:[%s21051_s5 + $0x170] sm:$0xff]   ;;  %v12850_v25 = vsel %vm7386_vm4, %v12849_v52, %v12848_v4  ;;  %v16071_v58 = vld [vmem:[%s21052_s6 + $0xe8] sm:$0xff]   ;;  %v16073_v30 = vld [vmem:[%s21052_s6 + $0xf8] sm:$0xff]   ;;  %v12854_v6 = vpack.c.b16 %v20473_v42, %v20473_v42  ;;  %v13159_v35 = vpack.c.b16 %v20450_v46, %v20450_v46  ;;  %vm16228_vm4 = vmmov 0  }
 0x70c   : > { %13096 = vmatprep.subr.bf16.mxu0 %v21093_v56  ;;  %12624 = vmatprep.subr.bf16.mxu1 %v21093_v56  ;;  %v12543_v59 = vsel %vm7372_vm6, %v12542_v2, %v12541_v26  ;;  %v12851_v37 = vsel %vm5920_vm5, %v20383_v60, %v12850_v25  ;;  %v16064_v61 = vld [vmem:[%s21052_s6 + $0xb0] sm:$0xff]   ;;  %v16066_v60 = vld [vmem:[%s21052_s6 + $0xc0] sm:$0xff]   ;;  %v16075_v10 = vld [vmem:[%s21052_s6 + $0x108] sm:$0xff]   ;;  %v13310_v25 = vpack.c.b16 %v20188_v31, %v20188_v31  ;;  %vm14213_vm5 = vcmask 261120  }
 0x70d   : > { %v12853_v12 = vsel %vm7372_vm6, %v12852_v15, %v12851_v37  ;;  %v12550_v8 = vpack.c.b16 %v12543_v59, %v12543_v59  ;;  %v16068_v43 = vld [vmem:[%s21052_s6 + $0xd0] sm:$0xff]   ;;  %v16077_v42 = vld [vmem:[%s21052_s6 + $0x118] sm:$0xff]   ;;  %v16078_v46 = vld [vmem:[%s21052_s6 + $0x120] sm:$0xff]   ;;  %v13467_v15 = vpack.c.b16 %v20491_v53, %v20491_v53 }
 0x70e   : > { %13097 = vmatpush1.bf16.msra.mxu0 %v16049_v48  ;;  %v12855_v49 = vpack.c.b16 %v12853_v12, %v12853_v12  ;;  %v16076_v48 = vld [vmem:[%s21052_s6 + $0x110] sm:$0xff]   ;;  %v16079_v21 = vld [vmem:[%s21052_s6 + $0x128] sm:$0xff]   ;;  %v16081_v54 = vld [vmem:[%s21052_s6 + $0x138] sm:$0xff]  }
 0x70f   : > { %12625 = vmatpush1.bf16.msra.mxu1 %v16050_v9  ;;  %13098 = vmatprep.subr.bf16.mxu0 %v21093_v56  ;;  %v16082_v33 = vld [vmem:[%s21052_s6 + $0x140] sm:$0xff]   ;;  %v16083_v9 = vld [vmem:[%s21052_s6 + $0x148] sm:$0xff]   ;;  %v16093_v4 = vld [vmem:[%s21051_s5 + $0x1b8] sm:$0xff]  }
 0x710   : > { %12626 = vmatprep.subr.bf16.mxu1 %v21093_v56  ;;  %v16096_v52 = vld [vmem:[%s21051_s5 + $0x1d0] sm:$0xff]   ;;  %v16098_v2 = vld [vmem:[%s21052_s6 + $0x160] sm:$0xff]   ;;  %v16101_v12 = vld [vmem:[%s21052_s6 + $0x178] sm:$0xff]  }
 0x711   : > { %v16100_v31 = vld [vmem:[%s21052_s6 + $0x170] sm:$0xff]  }
 0x712   : > { %13099 = vmatpush1.bf16.msra.mxu0 %v16051_v41  ;;  %v16084_v41 = vld [vmem:[%s21052_s6 + $0x150] sm:$0xff]  }
 0x713   : > { %12627 = vmatpush1.bf16.msra.mxu1 %v16052_v34  ;;  %13100 = vmatprep.subr.bf16.mxu0 %v21093_v56  ;;  %v16085_v34 = vld [vmem:[%s21052_s6 + $0x158] sm:$0xff]  }
 0x714   : > { %12628 = vmatprep.subr.bf16.mxu1 %v21093_v56 }
 0x716   : > { %13101 = vmatpush1.bf16.msra.mxu0 %v16053_v18  ;;  %v16086_v18 = vld [vmem:[%s21051_s5 + $0x180] sm:$0xff]  }
 0x717   : > { %12629 = vmatpush1.bf16.msra.mxu1 %v16054_v22  ;;  %13102 = vmatprep.subr.bf16.mxu0 %v21093_v56  ;;  %v13158_v22 = vpack.c.b16 %v20464_v23, %v20464_v23  ;;  %v16088_v23 = vld [vmem:[%s21051_s5 + $0x190] sm:$0xff]  }
 0x718   : > { %12630 = vmatprep.subr.bf16.mxu1 %v21093_v56 }
 0x71a   : > { %13103 = vmatpush1.bf16.msra.mxu0 %v16055_v28  ;;  %v13311_v28 = vpack.c.b16 %v20178_v36, %v20178_v36 }
 0x71b   : > { %12631 = vmatpush1.bf16.msra.mxu1 %v16056_v19  ;;  %13104 = vmatprep.subr.bf16.mxu0 %v21093_v56  ;;  %v16087_v19 = vld [vmem:[%s21051_s5 + $0x188] sm:$0xff]  }
 0x71c   : > { %12632 = vmatprep.subr.bf16.mxu1 %v21093_v56 }
 0x71e   : > { %13105 = vmatpush1.bf16.msra.mxu0 %v16057_v1 }
 0x71f   : > { %12633 = vmatpush1.bf16.msra.mxu1 %v16058_v14 }
 0x720   : > { %12634 = vmatprep.subr.bf16.mxu1 %v21093_v56 }
 0x721   : > { %13115 = vmatmul.mubr.bf16.vlgmr.msra.gmra.mrb[64].mxu0 %v13004_v27 }
 0x723   : > { %12635 = vmatpush1.bf16.msra.mxu1 %v16059_v40  ;;  %v16089_v40 = vld [vmem:[%s21051_s5 + $0x198] sm:$0xff]  }
 0x724   : > { %12636 = vmatprep.subr.bf16.mxu1 %v21093_v56 }
 0x727   : > { %12637 = vmatpush1.bf16.msra.mxu1 %v16060_v38  ;;  %v16090_v38 = vld [vmem:[%s21051_s5 + $0x1a0] sm:$0xff]  }
 0x728   : > { %12638 = vmatprep.subr.bf16.mxu1 %v21093_v56 }
 0x72b   : > { %12639 = vmatpush1.bf16.msra.mxu1 %v16061_v17  ;;  %v16091_v17 = vld [vmem:[%s21051_s5 + $0x1a8] sm:$0xff]  }
 0x72c   : > { %12640 = vmatprep.subr.bf16.mxu1 %v21093_v56 }
 0x72f   : > { %12641 = vmatpush1.bf16.msra.mxu1 %v16062_v62  ;;  %v16094_v62 = vld [vmem:[%s21051_s5 + $0x1c0] sm:$0xff]  }
 0x730   : > { %12642 = vmatprep.subr.bf16.mxu1 %v21093_v56 }
 0x733   : > { %12643 = vmatpush1.bf16.msra.mxu1 %v16063_v50  ;;  %v16099_v50 = vld [vmem:[%s21052_s6 + $0x168] sm:$0xff]  }
 0x734   : > { %12926 = vmatprep.subr.bf16.mxu1 %v21093_v56 }
 0x736   : > { %12655 = vmatmul.mubr.bf16.vlgmr.msra.gmra.mrb[16].mxu1 %v12550_v8  ;;  %v16103_v8 = vld [vmem:[%s21052_s6 + $0x188] sm:$0xff]  }
 0x737   : > { %12927 = vmatpush1.bf16.msra.mxu1 %v16064_v61  ;;  %15093 = vmatprep.mubr.msk.bf16.mxu1 %vm12168_vm15, %v12855_v49  ;;  %v16102_v61 = vld [vmem:[%s21052_s6 + $0x180] sm:$0xff]   ;;  %v16104_v49 = vld [vmem:[%s21052_s6 + $0x190] sm:$0xff]  }
 0x738   : > { %12928 = vmatprep.subr.bf16.mxu1 %v21093_v56 }
 0x73b   : > { %12929 = vmatpush1.bf16.msra.mxu1 %v16065_v7  ;;  %v16105_v7 = vld [vmem:[%s21052_s6 + $0x198] sm:$0xff]  }
 0x73c   : > { %12930 = vmatprep.subr.bf16.mxu1 %v21093_v56 }
 0x73f   : > { %12931 = vmatpush1.bf16.msra.mxu1 %v16066_v60  ;;  %v16106_v60 = vld [vmem:[%s21052_s6 + $0x1a0] sm:$0xff]  }
 0x740   : > { %12932 = vmatprep.subr.bf16.mxu1 %v21093_v56 }
 0x743   : > { %12933 = vmatpush1.bf16.msra.mxu1 %v16067_v44 }
 0x744   : > { %12934 = vmatprep.subr.bf16.mxu1 %v21093_v56 }
 0x747   : > { %12935 = vmatpush1.bf16.msra.mxu1 %v16068_v43 }
 0x748   : > { %12936 = vmatprep.subr.bf16.mxu1 %v21093_v56 }
 0x74b   : > { %12937 = vmatpush1.bf16.msra.mxu1 %v16069_v11 }
 0x74c   : > { %12938 = vmatprep.subr.bf16.mxu1 %v21093_v56 }
 0x74f   : > { %12939 = vmatpush1.bf16.msra.mxu1 %v16070_v63 }
 0x750   : > { %12940 = vmatprep.subr.bf16.mxu1 %v21093_v56 }
 0x753   : > { %12941 = vmatpush1.bf16.msra.mxu1 %v16071_v58  ;;  %v16107_v58 = vld [vmem:[%s21052_s6 + $0x1a8] sm:$0xff]  }
 0x754   : > { %12942 = vmatprep.subr.bf16.mxu1 %v21093_v56 }
 0x757   : > { %12943 = vmatpush1.bf16.msra.mxu1 %v16072_v20 }
 0x758   : > { %12944 = vmatprep.subr.bf16.mxu1 %v21093_v56 }
 0x75b   : > { %12945 = vmatpush1.bf16.msra.mxu1 %v16073_v30  ;;  %v16108_v30 = vld [vmem:[%s21052_s6 + $0x1b0] sm:$0xff]  }
 0x75c   : > { %12946 = vmatprep.subr.bf16.mxu1 %v21093_v56 }
 0x75f   : > { %12947 = vmatpush1.bf16.msra.mxu1 %v16074_v24  ;;  %v16109_v24 = vld [vmem:[%s21051_s5 + $0x1e0] sm:$0xff]  }
 0x760   : > { %13230 = vmatprep.subr.bf16.mxu1 %v21093_v56 }
 0x762   : > { %12959 = vmatmul.mubr.bf16.vlgmr.msra.gmra.mrb[20].mxu1 %v12854_v6  ;;  %v13619_v6 = vpack.c.b16 %v20201_v13, %v20201_v13  ;;  %v16112_v13 = vld [vmem:[%s21051_s5 + $0x1f8] sm:$0xff]  }
 0x763   : > { %13231 = vmatpush1.bf16.msra.mxu1 %v16075_v10  ;;  %15164 = vmatprep.mubr.msk.bf16.mxu1 %vm12168_vm15, %v13159_v35  ;;  %v13466_v10 = vpack.c.b16 %v20495_v32, %v20495_v32  ;;  %v16110_v35 = vld [vmem:[%s21051_s5 + $0x1e8] sm:$0xff]   ;;  %v16111_v32 = vld [vmem:[%s21051_s5 + $0x1f0] sm:$0xff]  }
 0x764   : > { %13232 = vmatprep.subr.bf16.mxu1 %v21093_v56 }
 0x767   : > { %13233 = vmatpush1.bf16.msra.mxu1 %v16076_v48 }
 0x768   : > { %13234 = vmatprep.subr.bf16.mxu1 %v21093_v56 }
 0x76b   : > { %13235 = vmatpush1.bf16.msra.mxu1 %v16077_v42 }
 0x76c   : > { %13236 = vmatprep.subr.bf16.mxu1 %v21093_v56 }
 0x76f   : > { %13237 = vmatpush1.bf16.msra.mxu1 %v16078_v46 }
 0x770   : > { %13238 = vmatprep.subr.bf16.mxu1 %v21093_v56 }
 0x773   : > { %13239 = vmatpush1.bf16.msra.mxu1 %v16079_v21 }
 0x774   : > { %13240 = vmatprep.subr.bf16.mxu1 %v21093_v56 }
 0x777   : > { %13241 = vmatpush1.bf16.msra.mxu1 %v16080_v57  ;;  %v16113_v57 = vld [vmem:[%s21051_s5 + $0x200] sm:$0xff]  }
 0x778   : > { %13242 = vmatprep.subr.bf16.mxu1 %v21093_v56 }
 0x77b   : > { %13243 = vmatpush1.bf16.msra.mxu1 %v16081_v54  ;;  %v16114_v54 = vld [vmem:[%s21051_s5 + $0x208] sm:$0xff]  }
 0x77c   : > { %13244 = vmatprep.subr.bf16.mxu1 %v21093_v56 }
 0x77f   : > { %13245 = vmatpush1.bf16.msra.mxu1 %v16082_v33  ;;  %v16115_v33 = vld [vmem:[%s21051_s5 + $0x210] sm:$0xff]  }
 0x780   : > { %13246 = vmatprep.subr.bf16.mxu1 %v21093_v56 }
 0x783   : > { %13247 = vmatpush1.bf16.msra.mxu1 %v16083_v9  ;;  %v16116_v9 = vld [vmem:[%s21051_s5 + $0x218] sm:$0xff]  }
 0x784   : > { %13248 = vmatprep.subr.bf16.mxu1 %v21093_v56 }
 0x787   : > { %13249 = vmatpush1.bf16.msra.mxu1 %v16084_v41  ;;  %v16117_v41 = vld [vmem:[%s21051_s5 + $0x220] sm:$0xff]  }
 0x788   : > { %13250 = vmatprep.subr.bf16.mxu1 %v21093_v56 }
 0x78b   : > { %13251 = vmatpush1.bf16.msra.mxu1 %v16085_v34 }
 0x78c   : > { %13388 = vmatprep.subr.bf16.mxu1 %v21093_v56 }
 0x78e   : > { %13263 = vmatmul.mubr.bf16.vlgmr.msra.gmra.mrb[24].mxu1 %v13158_v22 }
 0x78f   : > { %13389 = vmatpush1.bf16.msra.mxu1 %v16086_v18  ;;  %15201 = vmatprep.mubr.msk.bf16.mxu1 %vm12315_vm7, %v13311_v28 }
 0x790   : > { %13390 = vmatprep.subr.bf16.mxu1 %v21093_v56 }
 0x793   : > { %13391 = vmatpush1.bf16.msra.mxu1 %v16087_v19  ;;  %v16118_v19 = vld [vmem:[%s21051_s5 + $0x228] sm:$0xff]  }
 0x794   : > { %v20689_v1 = vpop.f32.mrb[56].mxu0  ;;  %13392 = vmatprep.subr.bf16.mxu1 %v21093_v56 }
 0x795   : > { %v12510_v36 = vpop.f32.mrb[57].mxu0 }
 0x796   : > { %v12511_v14 = vpop.f32.mrb[58].mxu0  ;;  %v16119_v36 = vld [vmem:[%s21051_s5 + $0x230] sm:$0xff]  }
 0x797   : > { %v12512_v27 = vpop.f32.mrb[59].mxu0  ;;  %13393 = vmatpush1.bf16.msra.mxu1 %v16088_v23  ;;  %v16120_v14 = vld [vmem:[%s21051_s5 + $0x238] sm:$0xff]  }
 0x798   : > { %13394 = vmatprep.subr.bf16.mxu1 %v21093_v56  ;;  %v16121_v27 = vld [vmem:[%s21052_s6 + $0x1b8] sm:$0xff]  }
 0x79b   : > { %13395 = vmatpush1.bf16.msra.mxu1 %v16089_v40  ;;  %v13618_v40 = vpack.c.b16 %v20210_v39, %v20210_v39  ;;  %v16123_v39 = vld [vmem:[%s21052_s6 + $0x1c8] sm:$0xff]  }
 0x79c   : > { %13396 = vmatprep.subr.bf16.mxu1 %v21093_v56 }
 0x79f   : > { %13397 = vmatpush1.bf16.msra.mxu1 %v16090_v38  ;;  %v13775_v38 = vpack.c.b16 %v20500_v51, %v20500_v51  ;;  %v16124_v51 = vld [vmem:[%s21052_s6 + $0x1d0] sm:$0xff]  }
 0x7a0   : > { %13398 = vmatprep.subr.bf16.mxu1 %v21093_v56 }
 0x7a3   : > { %13399 = vmatpush1.bf16.msra.mxu1 %v16091_v17  ;;  %v16122_v17 = vld [vmem:[%s21052_s6 + $0x1c0] sm:$0xff]  }
 0x7a4   : > { %13400 = vmatprep.subr.bf16.mxu1 %v21093_v56 }
 0x7a7   : > { %13401 = vmatpush1.bf16.msra.mxu1 %v16092_v55  ;;  %v16125_v55 = vld [vmem:[%s21052_s6 + $0x1d8] sm:$0xff]  }
 0x7a8   : > { %13402 = vmatprep.subr.bf16.mxu1 %v21093_v56 }
 0x7ab   : > { %13403 = vmatpush1.bf16.msra.mxu1 %v16093_v4  ;;  %v16126_v4 = vld [vmem:[%s21052_s6 + $0x1e0] sm:$0xff]  }
 0x7ac   : > { %13404 = vmatprep.subr.bf16.mxu1 %v21093_v56 }
 0x7af   : > { %13405 = vmatpush1.bf16.msra.mxu1 %v16094_v62  ;;  %v16127_v62 = vld [vmem:[%s21052_s6 + $0x1e8] sm:$0xff]  }
 0x7b0   : > { %13406 = vmatprep.subr.bf16.mxu1 %v21093_v56 }
 0x7b3   : > { %13407 = vmatpush1.bf16.msra.mxu1 %v16095_v3  ;;  %v16128_v3 = vld [vmem:[%s21052_s6 + $0x1f0] sm:$0xff]  }
 0x7b4   : > { %13408 = vmatprep.subr.bf16.mxu1 %v21093_v56 }
 0x7b7   : > { %13409 = vmatpush1.bf16.msra.mxu1 %v16096_v52 }
 0x7b8   : > { %13410 = vmatprep.subr.bf16.mxu1 %v21093_v56 }
 0x7bb   : > { %13411 = vmatpush1.bf16.msra.mxu1 %v16097_v45 }
 0x7bc   : > { %13538 = vmatprep.subr.bf16.mxu1 %v21093_v56 }
 0x7be   : > { %13421 = vmatmul.mubr.bf16.vlgmr.msra.gmra.mrb[24].mxu1 %v13310_v25 }
 0x7bf   : > { %13539 = vmatpush1.bf16.msra.mxu1 %v16098_v2  ;;  %15235 = vmatprep.mubr.msk.bf16.mxu1 %vm12168_vm15, %v13467_v15  ;;  %v16129_v15 = vld [vmem:[%s21052_s6 + $0x1f8] sm:$0xff]  }
 0x7c0   : > { %13540 = vmatprep.subr.bf16.mxu1 %v21093_v56 }
 0x7c3   : > { %13541 = vmatpush1.bf16.msra.mxu1 %v16099_v50 }
 0x7c4   : > { %v20744_v26 = vpop.f32.mrb[60].mxu0  ;;  %13542 = vmatprep.subr.bf16.mxu1 %v21093_v56 }
 0x7c5   : > { %v12814_v53 = vpop.f32.mrb[61].mxu0 }
 0x7c6   : > { %v12815_v59 = vpop.f32.mrb[62].mxu0  ;;  %v16131_v53 = vld [vmem:[%s21052_s6 + $0x208] sm:$0xff]  }
 0x7c7   : > { %v12816_v37 = vpop.f32.mrb[63].mxu0  ;;  %13543 = vmatpush1.bf16.msra.mxu1 %v16100_v31  ;;  %v16132_v59 = vld [vmem:[%s21051_s5 + $0x240] sm:$0xff]  }
 0x7c8   : > { %13544 = vmatprep.subr.bf16.mxu1 %v21093_v56  ;;  %v13774_v37 = vpack.c.b16 %v20503_v5, %v20503_v5  ;;  %v16134_v5 = vld [vmem:[%s21051_s5 + $0x250] sm:$0xff]  }
 0x7cb   : > { %13545 = vmatpush1.bf16.msra.mxu1 %v16101_v12  ;;  %v13927_v12 = vpack.c.b16 %v20219_v29, %v20219_v29  ;;  %v16135_v29 = vld [vmem:[%s21051_s5 + $0x258] sm:$0xff]  }
 0x7cc   : > { %13546 = vmatprep.subr.bf16.mxu1 %v21093_v56 }
 0x7cf   : > { %13547 = vmatpush1.bf16.msra.mxu1 %v16102_v61  ;;  %v16133_v61 = vld [vmem:[%s21051_s5 + $0x248] sm:$0xff]  }
 0x7d0   : > { %13548 = vmatprep.subr.bf16.mxu1 %v21093_v56 }
 0x7d3   : > { %13549 = vmatpush1.bf16.msra.mxu1 %v16103_v8  ;;  %v16136_v8 = vld [vmem:[%s21051_s5 + $0x260] sm:$0xff]  }
 0x7d4   : > { %13550 = vmatprep.subr.bf16.mxu1 %v21093_v56 }
 0x7d7   : > { %13551 = vmatpush1.bf16.msra.mxu1 %v16104_v49  ;;  %v16137_v49 = vld [vmem:[%s21051_s5 + $0x268] sm:$0xff]  }
 0x7d8   : > { %13552 = vmatprep.subr.bf16.mxu1 %v21093_v56 }
 0x7db   : > { %13553 = vmatpush1.bf16.msra.mxu1 %v16105_v7  ;;  %v16138_v7 = vld [vmem:[%s21051_s5 + $0x270] sm:$0xff]  }
 0x7dc   : > { %13554 = vmatprep.subr.bf16.mxu1 %v21093_v56 }
 0x7dd   : > { %v12206_v44 = vpop.f32.mrb[12].mxu1 }
 0x7de   : > { %v15409_v43 = vadd.f32 %v20689_v1, %v12206_v44  ;;  %v12208_v11 = vpop.f32.mrb[13].mxu1  ;;  %v16140_v44 = vld [vmem:[%s21051_s5 + $0x280] sm:$0xff]  }
 0x7df   : > { %13555 = vmatpush1.bf16.msra.mxu1 %v16106_v60  ;;  %v12209_v63 = vpop.f32.mrb[14].mxu1  ;;  %v16139_v60 = vld [vmem:[%s21051_s5 + $0x278] sm:$0xff]   ;;  %v16142_v11 = vld [vmem:[%s21051_s5 + $0x290] sm:$0xff]  }
 0x7e0   : > { %v12210_v20 = vpop.f32.mrb[15].mxu1  ;;  %13556 = vmatprep.subr.bf16.mxu1 %v21093_v56  ;;  %v16143_v63 = vld [vmem:[%s21051_s5 + $0x298] sm:$0xff]  }
 0x7e1   : > { %v13926_v20 = vpack.c.b16 %v20229_v16, %v20229_v16  ;;  %v16146_v16 = vld [vmem:[%s21052_s6 + $0x220] sm:$0xff]  }
 0x7e3   : > { %13557 = vmatpush1.bf16.msra.mxu1 %v16107_v58  ;;  %v16144_v58 = vld [vmem:[%s21052_s6 + $0x210] sm:$0xff]  }
 0x7e4   : > { %13558 = vmatprep.subr.bf16.mxu1 %v21093_v56 }
 0x7e7   : > { %13559 = vmatpush1.bf16.msra.mxu1 %v16108_v30  ;;  %v14083_v30 = vpack.c.b16 %v20506_v47, %v20506_v47  ;;  %v16147_v47 = vld [vmem:[%s21052_s6 + $0x228] sm:$0xff]  }
 0x7e8   : > { %13696 = vmatprep.subr.bf16.mxu1 %v21093_v56 }
 0x7ea   : > { %13571 = vmatmul.mubr.bf16.vlgmr.msra.gmra.mrb[24].mxu1 %v13466_v10  ;;  %v16148_v10 = vld [vmem:[%s21052_s6 + $0x230] sm:$0xff]  }
 0x7eb   : > { %13697 = vmatpush1.bf16.msra.mxu1 %v16109_v24  ;;  %15272 = vmatprep.mubr.msk.bf16.mxu1 %vm12315_vm7, %v13619_v6  ;;  %v16145_v24 = vld [vmem:[%s21052_s6 + $0x218] sm:$0xff]  }
 0x7ec   : > { %13698 = vmatprep.subr.bf16.mxu1 %v21093_v56  ;;  %v16149_v6 = vld [vmem:[%s21052_s6 + $0x238] sm:$0xff]  }
 0x7ef   : > { %13699 = vmatpush1.bf16.msra.mxu1 %v16110_v35  ;;  %v16150_v35 = vld [vmem:[%s21052_s6 + $0x240] sm:$0xff]  }
 0x7f0   : > { %13700 = vmatprep.subr.bf16.mxu1 %v21093_v56 }
 0x7f3   : > { %13701 = vmatpush1.bf16.msra.mxu1 %v16111_v32  ;;  %v16151_v32 = vld [vmem:[%s21052_s6 + $0x248] sm:$0xff]  }
 0x7f4   : > { %v20800_v48 = vpop.f32.mrb[64].mxu0  ;;  %13702 = vmatprep.subr.bf16.mxu1 %v21093_v56 }
 0x7f5   : > { %v13118_v42 = vpop.f32.mrb[65].mxu0 }
 0x7f6   : > { %v13119_v46 = vpop.f32.mrb[66].mxu0  ;;  %v16154_v42 = vld [vmem:[%s21052_s6 + $0x260] sm:$0xff]  }
 0x7f7   : > { %v13120_v21 = vpop.f32.mrb[67].mxu0  ;;  %13703 = vmatpush1.bf16.msra.mxu1 %v16112_v13  ;;  %v16152_v13 = vld [vmem:[%s21052_s6 + $0x250] sm:$0xff]   ;;  %v14082_v46 = vpack.c.b16 %v20509_v0, %v20509_v0 }
 0x7f8   : > { %13704 = vmatprep.subr.bf16.mxu1 %v21093_v56  ;;  %v16227_v21 = vmov 0.0  }
 0x7fb   : > { %13705 = vmatpush1.bf16.msra.mxu1 %v16113_v57  ;;  %v16155_v57 = vld [vmem:[%s21053_s7] sm:$0xff]  }
 0x7fc   : > { %13706 = vmatprep.subr.bf16.mxu1 %v21093_v56 }
 0x7ff   : > { %13707 = vmatpush1.bf16.msra.mxu1 %v16114_v54  ;;  %v16156_v54 = vld [vmem:[%s21053_s7 + $0x8] sm:$0xff]  }
 0x800   : > { %13708 = vmatprep.subr.bf16.mxu1 %v21093_v56 }
 0x803   : > { %13709 = vmatpush1.bf16.msra.mxu1 %v16115_v33 }
 0x804   : > { %13710 = vmatprep.subr.bf16.mxu1 %v21093_v56 }
 0x807   : > { %13711 = vmatpush1.bf16.msra.mxu1 %v16116_v9 }
 0x808   : > { %13712 = vmatprep.subr.bf16.mxu1 %v21093_v56 }
 0x809   : > { %v12656_v34 = vpop.f32.mrb[16].mxu1 }
 0x80a   : > { %v15410_v18 = vadd.f32 %v15409_v43, %v12656_v34  ;;  %v12658_v22 = vpop.f32.mrb[17].mxu1  ;;  %v16141_v43 = vld [vmem:[%s21051_s5 + $0x288] sm:$0xff]  }
 0x80b   : > { %v12659_v28 = vpop.f32.mrb[18].mxu1  ;;  %13713 = vmatpush1.bf16.msra.mxu1 %v16117_v41 }
 0x80c   : > { %v12660_v23 = vpop.f32.mrb[19].mxu1  ;;  %13714 = vmatprep.subr.bf16.mxu1 %v21093_v56  ;;  %v15411_v1 = vadd.f32 %v15410_v18, %v20744_v26  ;;  %v16130_v26 = vld [vmem:[%s21052_s6 + $0x200] sm:$0xff]  }
 0x80f   : > { %13715 = vmatpush1.bf16.msra.mxu1 %v16118_v19 }
 0x810   : > { %13716 = vmatprep.subr.bf16.mxu1 %v21093_v56 }
 0x813   : > { %13717 = vmatpush1.bf16.msra.mxu1 %v16119_v36 }
 0x814   : > { %13718 = vmatprep.subr.bf16.mxu1 %v21093_v56 }
 0x817   : > { %13719 = vmatpush1.bf16.msra.mxu1 %v16120_v14 }
 0x818   : > { %13846 = vmatprep.subr.bf16.mxu1 %v21093_v56 }
 0x81a   : > { %13729 = vmatmul.mubr.bf16.vlgmr.msra.gmra.mrb[24].mxu1 %v13618_v40 }
 0x81b   : > { %13847 = vmatpush1.bf16.msra.mxu1 %v16121_v27  ;;  %15306 = vmatprep.mubr.msk.bf16.mxu1 %vm12168_vm15, %v13775_v38 }
 0x81c   : > { %13848 = vmatprep.subr.bf16.mxu1 %v21093_v56 }
 0x81f   : > { %13849 = vmatpush1.bf16.msra.mxu1 %v16122_v17 }
 0x820   : > { %13850 = vmatprep.subr.bf16.mxu1 %v21093_v56 }
 0x823   : > { %13851 = vmatpush1.bf16.msra.mxu1 %v16123_v39 }
 0x824   : > { %13852 = vmatprep.subr.bf16.mxu1 %v21093_v56 }
 0x827   : > { %13853 = vmatpush1.bf16.msra.mxu1 %v16124_v51 }
 0x828   : > { %13854 = vmatprep.subr.bf16.mxu1 %v21093_v56 }
 0x82b   : > { %13855 = vmatpush1.bf16.msra.mxu1 %v16125_v55 }
 0x82c   : > { %13856 = vmatprep.subr.bf16.mxu1 %v21093_v56 }
 0x82f   : > { %13857 = vmatpush1.bf16.msra.mxu1 %v16126_v4 }
 0x830   : > { %13858 = vmatprep.subr.bf16.mxu1 %v21093_v56 }
 0x833   : > { %13859 = vmatpush1.bf16.msra.mxu1 %v16127_v62 }
 0x834   : > { %13860 = vmatprep.subr.bf16.mxu1 %v21093_v56 }
 0x835   : > { %v12960_v52 = vpop.f32.mrb[20].mxu1 }
 0x836   : > { %v15412_v45 = vadd.f32 %v15411_v1, %v12960_v52  ;;  %v12962_v2 = vpop.f32.mrb[21].mxu1 }
 0x837   : > { %v12963_v25 = vpop.f32.mrb[22].mxu1  ;;  %13861 = vmatpush1.bf16.msra.mxu1 %v16128_v3 }
 0x838   : > { %v12964_v50 = vpop.f32.mrb[23].mxu1  ;;  %13862 = vmatprep.subr.bf16.mxu1 %v21093_v56  ;;  %v20878_v31 = vadd.f32 %v15412_v45, %v20800_v48  ;;  %v16153_v48 = vld [vmem:[%s21052_s6 + $0x258] sm:$0xff]  }
 0x83b   : > { %13863 = vmatpush1.bf16.msra.mxu1 %v16129_v15 }
 0x83c   : > { %13864 = vmatprep.subr.bf16.mxu1 %v21093_v56 }
 0x83f   : > { %13865 = vmatpush1.bf16.msra.mxu1 %v16130_v26 }
 0x840   : > { %13866 = vmatprep.subr.bf16.mxu1 %v21093_v56 }
 0x843   : > { %13867 = vmatpush1.bf16.msra.mxu1 %v16131_v53 }
 0x844   : > { %14004 = vmatprep.subr.bf16.mxu1 %v21093_v56 }
 0x846   : > { %13879 = vmatmul.mubr.bf16.vlgmr.msra.gmra.mrb[24].mxu1 %v13774_v37 }
 0x847   : > { %14005 = vmatpush1.bf16.msra.mxu1 %v16132_v59  ;;  %15343 = vmatprep.mubr.msk.bf16.mxu1 %vm12315_vm7, %v13927_v12 }
 0x848   : > { %14006 = vmatprep.subr.bf16.mxu1 %v21093_v56 }
 0x84b   : > { %14007 = vmatpush1.bf16.msra.mxu1 %v16133_v61 }
 0x84c   : > { %14008 = vmatprep.subr.bf16.mxu1 %v21093_v56 }
 0x84f   : > { %14009 = vmatpush1.bf16.msra.mxu1 %v16134_v5 }
 0x850   : > { %14010 = vmatprep.subr.bf16.mxu1 %v21093_v56 }
 0x853   : > { %14011 = vmatpush1.bf16.msra.mxu1 %v16135_v29 }
 0x854   : > { %14012 = vmatprep.subr.bf16.mxu1 %v21093_v56 }
 0x857   : > { %14013 = vmatpush1.bf16.msra.mxu1 %v16136_v8 }
 0x858   : > { %14014 = vmatprep.subr.bf16.mxu1 %v21093_v56 }
 0x85b   : > { %14015 = vmatpush1.bf16.msra.mxu1 %v16137_v49 }
 0x85c   : > { %14016 = vmatprep.subr.bf16.mxu1 %v21093_v56 }
 0x85f   : > { %14017 = vmatpush1.bf16.msra.mxu1 %v16138_v7 }
 0x860   : > { %14018 = vmatprep.subr.bf16.mxu1 %v21093_v56 }
 0x863   : > { %14019 = vmatpush1.bf16.msra.mxu1 %v16139_v60 }
 0x864   : > { %14020 = vmatprep.subr.bf16.mxu1 %v21093_v56 }
 0x867   : > { %14021 = vmatpush1.bf16.msra.mxu1 %v16140_v44 }
 0x868   : > { %14022 = vmatprep.subr.bf16.mxu1 %v21093_v56 }
 0x86b   : > { %14023 = vmatpush1.bf16.msra.mxu1 %v16141_v43 }
 0x86c   : > { %14024 = vmatprep.subr.bf16.mxu1 %v21093_v56 }
 0x86f   : > { %14025 = vmatpush1.bf16.msra.mxu1 %v16142_v11 }
 0x870   : > { %14026 = vmatprep.subr.bf16.mxu1 %v21093_v56 }
 0x873   : > { %14027 = vmatpush1.bf16.msra.mxu1 %v16143_v63 }
 0x874   : > { %14154 = vmatprep.subr.bf16.mxu1 %v21093_v56 }
 0x876   : > { %14037 = vmatmul.mubr.bf16.vlgmr.msra.gmra.mrb[24].mxu1 %v13926_v20 }
 0x877   : > { %14155 = vmatpush1.bf16.msra.mxu1 %v16144_v58  ;;  %15377 = vmatprep.mubr.msk.bf16.mxu1 %vm12168_vm15, %v14083_v30 }
 0x878   : > { %14156 = vmatprep.subr.bf16.mxu1 %v21093_v56 }
 0x87b   : > { %14157 = vmatpush1.bf16.msra.mxu1 %v16145_v24 }
 0x87c   : > { %14158 = vmatprep.subr.bf16.mxu1 %v21093_v56 }
 0x87f   : > { %14159 = vmatpush1.bf16.msra.mxu1 %v16146_v16 }
 0x880   : > { %14160 = vmatprep.subr.bf16.mxu1 %v21093_v56 }
 0x883   : > { %14161 = vmatpush1.bf16.msra.mxu1 %v16147_v47 }
 0x884   : > { %14162 = vmatprep.subr.bf16.mxu1 %v21093_v56 }
 0x887   : > { %14163 = vmatpush1.bf16.msra.mxu1 %v16148_v10 }
 0x888   : > { %14164 = vmatprep.subr.bf16.mxu1 %v21093_v56 }
 0x88b   : > { %14165 = vmatpush1.bf16.msra.mxu1 %v16149_v6 }
 0x88c   : > { %14166 = vmatprep.subr.bf16.mxu1 %v21093_v56 }
 0x88f   : > { %14167 = vmatpush1.bf16.msra.mxu1 %v16150_v35 }
 0x890   : > { %14168 = vmatprep.subr.bf16.mxu1 %v21093_v56 }
 0x893   : > { %14169 = vmatpush1.bf16.msra.mxu1 %v16151_v32 }
 0x894   : > { %14170 = vmatprep.subr.bf16.mxu1 %v21093_v56 }
 0x897   : > { %14171 = vmatpush1.bf16.msra.mxu1 %v16152_v13 }
 0x898   : > { %14172 = vmatprep.subr.bf16.mxu1 %v21093_v56 }
 0x89b   : > { %14173 = vmatpush1.bf16.msra.mxu1 %v16153_v48 }
 0x89c   : > { %14174 = vmatprep.subr.bf16.mxu1 %v21093_v56 }
 0x89f   : > { %14175 = vmatpush1.bf16.msra.mxu1 %v16154_v42 }
 0x8a0   : > { %15389 = vmatprep.subr.bf16.mxu1 %v16227_v21 }
 0x8a2   : > { %14187 = vmatmul.mubr.bf16.vlgmr.msra.gmra.mrb[24].mxu1 %v14082_v46 }
 0x8a3   : > { %15393 = vmatprep.mubr.msk.bf16.mxu1 %vm16228_vm4, %v16227_v21  ;;  %15390 = vmatpush3.bf16.msra.mxu1 %v16155_v57 }
 0x8a4   : > { %15391 = vmatprep.subr.bf16.mxu1 %v16227_v21 }
 0x8a7   : > { %15392 = vmatpush3.bf16.msra.mxu1 %v16156_v54 }
 0x975   : > { %v14188_v56 = vpop.f32.mrb[24].mxu1 }
 0x976   : > { %v15414_v0 = vadd.f32 %v20878_v31, %v14188_v56  ;;  %v14190_v33 = vpop.f32.mrb[25].mxu1 }
 0x977   : > { %v14191_v9 = vpop.f32.mrb[26].mxu1 }
 0x978   : > { %v14195_v41 = vmax.f32 %v15414_v0, 0.0  ;;  %v14192_v34 = vpop.f32.mrb[27].mxu1 }
 0x97a   : > { %v14196_v18 = vpack.c.bf16 %v14195_v41, %v14195_v41 }
 0x97c   : > { %15394 = vmatmul.mubr.msk.bf16.vlgmr.msra.gmra.mrb[28].mxu1 %vm14213_vm5, %v14196_v18 }
 0xa4f   : > { %v14251_v22 = vpop.f32.mrb[28].mxu1 }
 0xa50   : > { %14257 = vst [vmem:[%s301_s25] sm:$0xf] %v14251_v22  ;;  %v15395_v28 = vpop.f32.mrb[29].mxu1 }
 0xa51   : > { %v14254_v19 = vpop.f32.mrb[30].mxu1 }
 0xa52   : > { %16171 = shalt.err (!%p16168_p3)
}
 0xa53   : > { %s16172_s19 = scalar_lea.hbm %s21006_s24, 64  ;;  %s16176_s25 = scalar_lea.hbm %s21054_s8, 128 }
 0xa54   : > { %p16173_p4 = scmp.ne.s32.totalorder %s21006_s24, %s16172_s19  ;;  %p16177_p9 = scmp.lt.u32.totalorder %s21006_s24, %s21054_s8 }
 0xa55   : > { %p16178_p10 = scmp.lt.u32.totalorder %s16176_s25, %s16172_s19  ;;  %p16180_p12 = scmp.lt.u32.totalorder %s16172_s19, %s21006_s24 }
 0xa56   : > { %p16174_p7 = pnand %p16173_p4, %p16313_p5 }
 0xa57   : > { %p16179_p11 = por %p16178_p10, %p16177_p9 }
 0xa58   : > { %p16175_p8 = pneg %p16174_p7 }
 0xa59   : > { %p16181_p13 = por %p16180_p12, %p16179_p11 }
 0xa5b   : > { %p16182_p0 = pnand %p16181_p13, %p16175_p8 }
 0xa5d   : > { %16185 = shalt.err (!%p16182_p0)
}
 0xa5e   : > { %15607 = dma.vmem_to_hbm [thread:$0]  (%p16313_p5), %s21001_s26, 64, %s21006_s24, %s14259_s12   ;;  %v15396_v23 = vpop.f32.mrb[31].mxu1 }
 0xa5f PF: > { %p15613_p1 = scmp.ge.s32.totalorder %s16220_s30, 2  ;;  %s14284_s23 = sand.u32 1, %s16208_s27  }
 0xa60   : > { %s14285_s13 = scalar_lea.sflag [#allocation6], %s14284_s23 }
 0xa61   : > { %p15610_p2 = pnand %p15613_p1, %p16317_p6 }
 0xa63   : > { %16203 = dma.done.wait (!%p15610_p2), %s14285_s13, 64  }
 0xa64   : > { %16205 = vsyncadd (!%p15610_p2), %s14285_s13, 4294967232  ;;  %p18_p3 = scmp.ge.s32.totalorder %s16300_s11, 4   ;;  %s21249_s27 = smov %s16212_s28 }
 0xa65   : > { %s21250_s28 = smov %s16216_s29  ;;  %s21251_s29 = smov %s16311_s14 }
 0xa66   : > { %s21252_s30 = smov %s16300_s11  ;;  %20 = sbr.rel (!%p18_p3) target bundleno = 3 (0x3), region = 121 }
 0xa6d   :  { %14290 = vsyncpa [#allocation6], 1 }
 0xa6e   :  { %14292 = vsyncpa [#allocation6 + $0x1], 1 }

</bundles_post_ra>
